<compile_context>
chip_gen: v7x
topology: tpu7x:2x2x1
jax: 0.10.0
libtpu: 0.0.40
codegen_flags: <defaults>
</compile_context>

<pallas_src>
import math

import numpy as np
import jax
import jax.numpy as jnp
from jax import lax
from jax.experimental import pallas as pl
from jax.experimental.pallas import tpu as pltpu

# ----- static configuration (derived from Transformer.__init__ with input_size=32)
INPUT_SIZE = 32
B = 2                    # batch
N = INPUT_SIZE           # sequence length (== input_size)
E = 128                  # embed_dim
H = 4                    # n_heads
HD = E // H              # head_dim = 32
L = 2                    # n_layers
FF = 4 * E               # dim_feedforward = 512
H1 = 128                 # output head hidden_dim
H2 = 64                  # hidden_dim // 2
OUT_PAD = 128            # final (H2 -> 1) linear padded to 128 lanes; col 0 is real
OUT_ROWS = 8             # output rows per batch element (sublane-aligned block)
LN_EPS = 1e-5

# ----- row indices of the packed (NV, 128) per-feature-vector slab
(O_LN1W, O_LN1B, O_QB, O_KB, O_VB, O_OB, O_LN2W, O_LN2B, O_F2B) = range(9)
V_EMB_W, V_EMB_B, V_EMB_G, V_EMB_BETA = 0, 1, 2, 3
V_LAYER0 = 4
V_FLNW = V_LAYER0 + L * 9                      # 22
(V_FLNB, V_H1B, V_HL1G, V_HL1B,
 V_H2B, V_HL2G, V_HL2B, V_H3B) = range(V_FLNW + 1, V_FLNW + 9)
NV = 32                                        # padded to a multiple of 8 sublanes


def _layernorm(x, gamma, beta):
    mu = jnp.mean(x, axis=-1, keepdims=True)
    xc = x - mu
    var = jnp.mean(xc * xc, axis=-1, keepdims=True)
    return xc * lax.rsqrt(var + LN_EPS) * gamma + beta


def _gelu(x):
    # exact (erf-based) GELU, matching torch F.gelu / nn.GELU() defaults
    return 0.5 * x * (1.0 + lax.erf(x * (1.0 / math.sqrt(2.0))))


def _softmax_last(x):
    m = jnp.max(x, axis=-1, keepdims=True)
    e = jnp.exp(x - m)
    return e * pl.reciprocal(jnp.sum(e, axis=-1, keepdims=True), approx=True)


def _make_kernel(bc):
    """Kernel processing `bc` batch elements per grid step."""
    bcn = bc * N

    def kernel(x_ref, gate_ref, pe_ref, vecs_ref, ffb_ref,
               wqkv_ref, wo_ref, f1w_ref, f2w_ref,
               h1w_ref, h2w_ref, h3w_ref, o_ref):

        def vrow(i):                                    # packed parameter row
            return vecs_ref[i:i + 1, :]                 # (1, 128) f32

        # ---- embedding: (x * sigmoid(measurement_attn)) -> Linear(1,E) -> LN -> +PE
        scaled = x_ref[...] * gate_ref[...]             # (bcn, 1)
        h = scaled * vrow(V_EMB_W) + vrow(V_EMB_B)      # (bcn, E)
        h = _layernorm(h, vrow(V_EMB_G), vrow(V_EMB_BETA))
        h = h + pe_ref[...]

        inv_sqrt_hd = 1.0 / math.sqrt(HD)
        score_dims = (((2,), (2,)), ((0,), (0,)))       # q @ k^T, batched over (h,b)
        pv_dims = (((2,), (1,)), ((0,), (0,)))          # p @ v,   batched over (h,b)

        def split_heads(t):                             # (bcn, E) -> (H*bc, N, HD), h-major
            parts = [t[:, hd * HD:(hd + 1) * HD].reshape(bc, N, HD)
                     for hd in range(H)]
            return jnp.concatenate(parts, axis=0)

        # ---- transformer encoder layers (norm_first=True, GELU FFN)
        for l in range(L):
            base = V_LAYER0 + l * 9

            # -- self-attention block: h = h + out_proj(MHA(LN1(h)))
            hn = _layernorm(h, vrow(base + O_LN1W), vrow(base + O_LN1B))
            qkv = jnp.dot(hn.astype(jnp.bfloat16), wqkv_ref[l],
                          preferred_element_type=jnp.float32)           # (bcn, 3E)
            q = (qkv[:, 0:E] + vrow(base + O_QB)) * inv_sqrt_hd
            k = qkv[:, E:2 * E] + vrow(base + O_KB)
            v = qkv[:, 2 * E:3 * E] + vrow(base + O_VB)

            qh, kh, vh = split_heads(q), split_heads(k), split_heads(v)  # (H*bc,N,HD)
            s = lax.dot_general(qh, kh, score_dims,
                                preferred_element_type=jnp.float32)     # (H*bc,N,N)
            p = _softmax_last(s)
            pv = lax.dot_general(p, vh, pv_dims,
                                 preferred_element_type=jnp.float32)    # (H*bc,N,HD)

            # merge heads back to lanes (== PyTorch head concat), one K=128 matmul
            pv4 = pv.reshape(H, bc, N, HD)
            ctx = jnp.concatenate([pv4[hd] for hd in range(H)],
                                  axis=-1).reshape(bcn, E)               # (bcn, E)
            attn = jnp.dot(ctx.astype(jnp.bfloat16), wo_ref[l],
                           preferred_element_type=jnp.float32) + vrow(base + O_OB)
            h = h + attn

            # -- feed-forward block: h = h + W2 @ gelu(W1 @ LN2(h))
            hn = _layernorm(h, vrow(base + O_LN2W), vrow(base + O_LN2B))
            f = jnp.dot(hn.astype(jnp.bfloat16), f1w_ref[l],
                        preferred_element_type=jnp.float32) + ffb_ref[l:l + 1, :]
            f = _gelu(f)
            h = h + jnp.dot(f.astype(jnp.bfloat16), f2w_ref[l],
                            preferred_element_type=jnp.float32) + vrow(base + O_F2B)

        # ---- final encoder LayerNorm
        h = _layernorm(h, vrow(V_FLNW), vrow(V_FLNB))                    # (bcn, E)

        # ---- attention pooling over the sequence (per batch element)
        h3 = h.reshape(bc, N, E)
        logits = jnp.sum(h3, axis=-1, keepdims=True) * (1.0 / math.sqrt(E))  # (bc,N,1)
        mx = jnp.max(logits, axis=1, keepdims=True)
        e = jnp.exp(logits - mx)
        w = e * pl.reciprocal(jnp.sum(e, axis=1, keepdims=True), approx=True)
        pooled = jnp.sum(h3 * w, axis=1)                                  # (bc, E)

        # ---- output head: Linear-LN-GELU, Linear-LN-GELU, Linear, ReLU
        z = jnp.dot(pooled, h1w_ref[...],
                    preferred_element_type=jnp.float32) + vrow(V_H1B)     # (bc, H1)
        z = _gelu(_layernorm(z, vrow(V_HL1G), vrow(V_HL1B)))
        z = jnp.dot(z, h2w_ref[...],
                    preferred_element_type=jnp.float32) + vrow(V_H2B)[:, :H2]
        z = _gelu(_layernorm(z, vrow(V_HL2G)[:, :H2], vrow(V_HL2B)[:, :H2]))
        z = jnp.dot(z, h3w_ref[...],
                    preferred_element_type=jnp.float32) + vrow(V_H3B)     # (bc, OUT_PAD)
        z = jnp.maximum(z, 0.0)                                           # col 0 is real
        o_ref[...] = jnp.broadcast_to(z.reshape(bc, 1, OUT_PAD),
                                      (bc, OUT_ROWS, OUT_PAD))

    return kernel


def _default_batch_chunk():
    """v7x (2 TensorCores): one batch element per core.  v5e/v6e (1 TC): fold batch."""
    try:
        kind = jax.devices()[0].device_kind.lower()
    except Exception:
        kind = ""
    return 1 if "7" in kind else B


def transformer_forward(x, params, batch_chunk=None):
    """x: (B, N) float32 -> (B, 1) float32."""
    bc = _default_batch_chunk() if batch_chunk is None else batch_chunk
    assert B % bc == 0
    grid = (B // bc,)

    xb = x.reshape(B * N, 1).astype(jnp.float32)     # row index = b*N + n

    const_inputs = [
        params["vecs"], params["ffb"],
        params["wqkv"], params["wo"], params["f1w"], params["f2w"],
        params["h1w"], params["h2w"], params["h3w"],
    ]

    def _const_spec(a):
        nd = a.ndim
        return pl.BlockSpec(a.shape, lambda i, _n=nd: (0,) * _n)

    in_specs = (
        [pl.BlockSpec((bc * N, 1), lambda i: (i, 0)),     # this chunk's x rows
         pl.BlockSpec((bc * N, 1), lambda i: (i, 0)),     # sigmoid gate (host-tiled)
         pl.BlockSpec((bc * N, E), lambda i: (i, 0))]     # positional encoding (host-tiled)
        + [_const_spec(a) for a in const_inputs]
    )

    out = pl.pallas_call(
        _make_kernel(bc),
        out_shape=jax.ShapeDtypeStruct((B, OUT_ROWS, OUT_PAD), jnp.float32),
        grid=grid,
        in_specs=in_specs,
        out_specs=pl.BlockSpec((bc, OUT_ROWS, OUT_PAD), lambda i: (i, 0, 0)),
        compiler_params=pltpu.CompilerParams(
            dimension_semantics=("parallel",),            # both TCs on v7x; serial elsewhere
            vmem_limit_bytes=16 * 1024 * 1024,
        ),
    )(xb, params["gate"], params["pe"], *const_inputs)
    return out[:, 0, :1]                                  # (B, 1)


def init_params(key):
    keys = iter(jax.random.split(key, 12))

    def xavier(k, shape, gain=1.0):
        fan_in, fan_out = shape[-2], shape[-1]
        a = gain * math.sqrt(6.0 / (fan_in + fan_out))
        return jax.random.uniform(k, shape, jnp.float32, -a, a)

    # fixed sinusoidal positional encoding (first N positions), host-tiled over batch
    pos = np.arange(N, dtype=np.float32)[:, None]
    div = np.exp(np.arange(0, E, 2, dtype=np.float32) * (-math.log(10000.0) / E))
    pe = np.zeros((N, E), dtype=np.float32)
    pe[:, 0::2] = np.sin(pos * div)
    pe[:, 1::2] = np.cos(pos * div)

    p = {}
    p["pe"] = jnp.tile(jnp.asarray(pe), (B, 1))                      # (B*N, E)

    # measurement_attn = 1 + 0.01*randn; sigmoid precomputed host-side (parameter)
    mattn = 1.0 + 0.01 * jax.random.normal(next(keys), (N, 1), jnp.float32)
    p["gate"] = jnp.tile(jax.nn.sigmoid(mattn), (B, 1))              # (B*N, 1)

    emb_w = xavier(next(keys), (1, E), gain=2.0 / math.sqrt(INPUT_SIZE))

    # fused QKV (L, E, 3E), out-proj (L, E, E), FFN — stored bf16 for MXU
    p["wqkv"] = xavier(next(keys), (L, E, 3 * E)).astype(jnp.bfloat16)
    p["wo"] = xavier(next(keys), (L, E, E)).astype(jnp.bfloat16)
    p["f1w"] = xavier(next(keys), (L, E, FF)).astype(jnp.bfloat16)
    p["f2w"] = xavier(next(keys), (L, FF, E)).astype(jnp.bfloat16)
    p["ffb"] = jnp.zeros((L, FF), jnp.float32)                       # linear1 biases

    # output head (xavier gain 0.01 per _init_weights); kept in f32
    p["h1w"] = xavier(next(keys), (E, H1), gain=0.01)
    p["h2w"] = xavier(next(keys), (H1, H2), gain=0.01)
    w3 = xavier(next(keys), (H2, 1), gain=0.01)
    p["h3w"] = jnp.zeros((H2, OUT_PAD), jnp.float32).at[:, 0:1].set(w3)

    # packed per-feature-vector slab: biases (zeros, per module init) + LN gammas/betas
    vecs = np.zeros((NV, 128), dtype=np.float32)
    vecs[V_EMB_W] = np.asarray(emb_w[0])
    vecs[V_EMB_G] = 1.0
    for l in range(L):
        base = V_LAYER0 + l * 9
        vecs[base + O_LN1W] = 1.0
        vecs[base + O_LN2W] = 1.0
        # q/k/v/out-proj biases and f2 bias stay zero (zero-init in the module)
    vecs[V_FLNW] = 1.0
    vecs[V_HL1G] = 1.0
    vecs[V_HL2G, :H2] = 1.0
    p["vecs"] = jnp.asarray(vecs)
    return p


if __name__ == "__main__":
    key = jax.random.PRNGKey(0)
    kx, kp = jax.random.split(key)
    params = init_params(kp)
    x = jax.random.normal(kx, (B, N), jnp.float32)

    out = transformer_forward(x, params)
    out = jax.block_until_ready(out)
    assert out.shape == (B, 1), out.shape
    assert bool(jnp.all(jnp.isfinite(out)))
    assert bool(jnp.all(out >= 0.0))     # final ReLU
    print("KERNEL_OK")
</pallas_src>

<mosaic_0001>
module attributes {stable_mosaic.version = 11 : i64} {
  func.func @kernel(%arg0: i32, %arg1: memref<64x1xf32, #tpu.memory_space<vmem>>, %arg2: memref<64x1xf32, #tpu.memory_space<vmem>>, %arg3: memref<64x128xf32, #tpu.memory_space<vmem>>, %arg4: memref<32x128xf32, #tpu.memory_space<vmem>>, %arg5: memref<2x512xf32, #tpu.memory_space<vmem>>, %arg6: memref<2x128x384xbf16, #tpu.memory_space<vmem>>, %arg7: memref<2x128x128xbf16, #tpu.memory_space<vmem>>, %arg8: memref<2x128x512xbf16, #tpu.memory_space<vmem>>, %arg9: memref<2x512x128xbf16, #tpu.memory_space<vmem>>, %arg10: memref<128x128xf32, #tpu.memory_space<vmem>>, %arg11: memref<128x64xf32, #tpu.memory_space<vmem>>, %arg12: memref<64x128xf32, #tpu.memory_space<vmem>>, %arg13: memref<2x8x128xf32, #tpu.memory_space<vmem>>) attributes {dimension_semantics = [#tpu.dimension_semantics<parallel>], iteration_bounds = array<i64: 1>, scalar_prefetch = 0 : i64, scratch_operands = 0 : i64, tpu.core_type = #tpu.core_type<tc>, window_params = [{transform_indices = @transform_0, window_bounds = array<i64: 64, 1>}, {transform_indices = @transform_1, window_bounds = array<i64: 64, 1>}, {transform_indices = @transform_2, window_bounds = array<i64: 64, 128>}, {pipeline_mode = #tpu.pipeline_mode<synchronous>, transform_indices = @transform_3, window_bounds = array<i64: 32, 128>}, {pipeline_mode = #tpu.pipeline_mode<synchronous>, transform_indices = @transform_4, window_bounds = array<i64: 2, 512>}, {pipeline_mode = #tpu.pipeline_mode<synchronous>, transform_indices = @transform_5, window_bounds = array<i64: 2, 128, 384>}, {pipeline_mode = #tpu.pipeline_mode<synchronous>, transform_indices = @transform_6, window_bounds = array<i64: 2, 128, 128>}, {pipeline_mode = #tpu.pipeline_mode<synchronous>, transform_indices = @transform_7, window_bounds = array<i64: 2, 128, 512>}, {pipeline_mode = #tpu.pipeline_mode<synchronous>, transform_indices = @transform_8, window_bounds = array<i64: 2, 512, 128>}, {pipeline_mode = #tpu.pipeline_mode<synchronous>, transform_indices = @transform_9, window_bounds = array<i64: 128, 128>}, {pipeline_mode = #tpu.pipeline_mode<synchronous>, transform_indices = @transform_10, window_bounds = array<i64: 128, 64>}, {pipeline_mode = #tpu.pipeline_mode<synchronous>, transform_indices = @transform_11, window_bounds = array<i64: 64, 128>}, {transform_indices = @transform_12, window_bounds = array<i64: 2, 8, 128>}]} {
    %c0 = arith.constant 0 : index
    %c0_0 = arith.constant 0 : index
    %0 = vector.load %arg1[%c0, %c0_0] : memref<64x1xf32, #tpu.memory_space<vmem>>, vector<64x1xf32>
    %c0_1 = arith.constant 0 : index
    %c0_2 = arith.constant 0 : index
    %1 = vector.load %arg2[%c0_1, %c0_2] : memref<64x1xf32, #tpu.memory_space<vmem>>, vector<64x1xf32>
    %2 = arith.mulf %0, %1 : vector<64x1xf32>
    %c0_3 = arith.constant 0 : index
    %c0_4 = arith.constant 0 : index
    %3 = vector.load %arg4[%c0_3, %c0_4] : memref<32x128xf32, #tpu.memory_space<vmem>>, vector<1x128xf32>
    %4 = vector.broadcast %2 : vector<64x1xf32> to vector<64x128xf32>
    %5 = vector.broadcast %3 : vector<1x128xf32> to vector<64x128xf32>
    %6 = arith.mulf %4, %5 : vector<64x128xf32>
    %c1 = arith.constant 1 : index
    %c0_5 = arith.constant 0 : index
    %7 = vector.load %arg4[%c1, %c0_5] : memref<32x128xf32, #tpu.memory_space<vmem>>, vector<1x128xf32>
    %8 = vector.broadcast %7 : vector<1x128xf32> to vector<64x128xf32>
    %9 = arith.addf %6, %8 : vector<64x128xf32>
    %c2 = arith.constant 2 : index
    %c0_6 = arith.constant 0 : index
    %10 = vector.load %arg4[%c2, %c0_6] : memref<32x128xf32, #tpu.memory_space<vmem>>, vector<1x128xf32>
    %c3 = arith.constant 3 : index
    %c0_7 = arith.constant 0 : index
    %11 = vector.load %arg4[%c3, %c0_7] : memref<32x128xf32, #tpu.memory_space<vmem>>, vector<1x128xf32>
    %cst = arith.constant dense<0.000000e+00> : vector<64xf32>
    %12 = vector.multi_reduction <add>, %9, %cst [1] : vector<64x128xf32> to vector<64xf32>
    %13 = vector.shape_cast %12 : vector<64xf32> to vector<64x1xf32>
    %cst_8 = arith.constant 1.280000e+02 : f32
    %14 = vector.broadcast %cst_8 : f32 to vector<64x1xf32>
    %15 = arith.divf %13, %14 : vector<64x1xf32>
    %16 = vector.broadcast %15 : vector<64x1xf32> to vector<64x128xf32>
    %17 = arith.subf %9, %16 : vector<64x128xf32>
    %18 = arith.mulf %17, %17 : vector<64x128xf32>
    %cst_9 = arith.constant dense<0.000000e+00> : vector<64xf32>
    %19 = vector.multi_reduction <add>, %18, %cst_9 [1] : vector<64x128xf32> to vector<64xf32>
    %20 = vector.shape_cast %19 : vector<64xf32> to vector<64x1xf32>
    %cst_10 = arith.constant 1.280000e+02 : f32
    %21 = vector.broadcast %cst_10 : f32 to vector<64x1xf32>
    %22 = arith.divf %20, %21 : vector<64x1xf32>
    %cst_11 = arith.constant 9.99999974E-6 : f32
    %23 = vector.broadcast %cst_11 : f32 to vector<64x1xf32>
    %24 = arith.addf %22, %23 : vector<64x1xf32>
    %25 = math.rsqrt %24 : vector<64x1xf32>
    %26 = vector.broadcast %25 : vector<64x1xf32> to vector<64x128xf32>
    %27 = arith.mulf %17, %26 : vector<64x128xf32>
    %28 = vector.broadcast %10 : vector<1x128xf32> to vector<64x128xf32>
    %29 = arith.mulf %27, %28 : vector<64x128xf32>
    %30 = vector.broadcast %11 : vector<1x128xf32> to vector<64x128xf32>
    %31 = arith.addf %29, %30 : vector<64x128xf32>
    %c0_12 = arith.constant 0 : index
    %c0_13 = arith.constant 0 : index
    %32 = vector.load %arg3[%c0_12, %c0_13] : memref<64x128xf32, #tpu.memory_space<vmem>>, vector<64x128xf32>
    %33 = arith.addf %31, %32 : vector<64x128xf32>
    %c4 = arith.constant 4 : index
    %c0_14 = arith.constant 0 : index
    %34 = vector.load %arg4[%c4, %c0_14] : memref<32x128xf32, #tpu.memory_space<vmem>>, vector<1x128xf32>
    %c5 = arith.constant 5 : index
    %c0_15 = arith.constant 0 : index
    %35 = vector.load %arg4[%c5, %c0_15] : memref<32x128xf32, #tpu.memory_space<vmem>>, vector<1x128xf32>
    %cst_16 = arith.constant dense<0.000000e+00> : vector<64xf32>
    %36 = vector.multi_reduction <add>, %33, %cst_16 [1] : vector<64x128xf32> to vector<64xf32>
    %37 = vector.shape_cast %36 : vector<64xf32> to vector<64x1xf32>
    %cst_17 = arith.constant 1.280000e+02 : f32
    %38 = vector.broadcast %cst_17 : f32 to vector<64x1xf32>
    %39 = arith.divf %37, %38 : vector<64x1xf32>
    %40 = vector.broadcast %39 : vector<64x1xf32> to vector<64x128xf32>
    %41 = arith.subf %33, %40 : vector<64x128xf32>
    %42 = arith.mulf %41, %41 : vector<64x128xf32>
    %cst_18 = arith.constant dense<0.000000e+00> : vector<64xf32>
    %43 = vector.multi_reduction <add>, %42, %cst_18 [1] : vector<64x128xf32> to vector<64xf32>
    %44 = vector.shape_cast %43 : vector<64xf32> to vector<64x1xf32>
    %cst_19 = arith.constant 1.280000e+02 : f32
    %45 = vector.broadcast %cst_19 : f32 to vector<64x1xf32>
    %46 = arith.divf %44, %45 : vector<64x1xf32>
    %cst_20 = arith.constant 9.99999974E-6 : f32
    %47 = vector.broadcast %cst_20 : f32 to vector<64x1xf32>
    %48 = arith.addf %46, %47 : vector<64x1xf32>
    %49 = math.rsqrt %48 : vector<64x1xf32>
    %50 = vector.broadcast %49 : vector<64x1xf32> to vector<64x128xf32>
    %51 = arith.mulf %41, %50 : vector<64x128xf32>
    %52 = vector.broadcast %34 : vector<1x128xf32> to vector<64x128xf32>
    %53 = arith.mulf %51, %52 : vector<64x128xf32>
    %54 = vector.broadcast %35 : vector<1x128xf32> to vector<64x128xf32>
    %55 = arith.addf %53, %54 : vector<64x128xf32>
    %56 = arith.truncf %55 : vector<64x128xf32> to vector<64x128xbf16>
    %c0_21 = arith.constant 0 : index
    %c0_22 = arith.constant 0 : index
    %c0_23 = arith.constant 0 : index
    %57 = vector.load %arg6[%c0_21, %c0_22, %c0_23] : memref<2x128x384xbf16, #tpu.memory_space<vmem>>, vector<1x128x384xbf16>
    %58 = vector.shape_cast %57 : vector<1x128x384xbf16> to vector<128x384xbf16>
    %cst_24 = arith.constant dense<0.000000e+00> : vector<64x384xf32>
    %59 = tpu.matmul %56, %58, %cst_24 {dimension_numbers = #tpu.dot_dimension_numbers<[1], [0], [0], [1], [0, 0, 1, 1], [], []>} : vector<64x128xbf16>, vector<128x384xbf16>, vector<64x384xf32> -> vector<64x384xf32>
    %60 = vector.extract_strided_slice %59 {offsets = [0, 0], sizes = [64, 128], strides = [1, 1]} : vector<64x384xf32> to vector<64x128xf32>
    %c6 = arith.constant 6 : index
    %c0_25 = arith.constant 0 : index
    %61 = vector.load %arg4[%c6, %c0_25] : memref<32x128xf32, #tpu.memory_space<vmem>>, vector<1x128xf32>
    %62 = vector.broadcast %61 : vector<1x128xf32> to vector<64x128xf32>
    %63 = arith.addf %60, %62 : vector<64x128xf32>
    %cst_26 = arith.constant 0.176776692 : f32
    %64 = vector.broadcast %cst_26 : f32 to vector<64x128xf32>
    %65 = arith.mulf %63, %64 : vector<64x128xf32>
    %66 = vector.extract_strided_slice %59 {offsets = [0, 128], sizes = [64, 128], strides = [1, 1]} : vector<64x384xf32> to vector<64x128xf32>
    %c7 = arith.constant 7 : index
    %c0_27 = arith.constant 0 : index
    %67 = vector.load %arg4[%c7, %c0_27] : memref<32x128xf32, #tpu.memory_space<vmem>>, vector<1x128xf32>
    %68 = vector.broadcast %67 : vector<1x128xf32> to vector<64x128xf32>
    %69 = arith.addf %66, %68 : vector<64x128xf32>
    %70 = vector.extract_strided_slice %59 {offsets = [0, 256], sizes = [64, 128], strides = [1, 1]} : vector<64x384xf32> to vector<64x128xf32>
    %c8 = arith.constant 8 : index
    %c0_28 = arith.constant 0 : index
    %71 = vector.load %arg4[%c8, %c0_28] : memref<32x128xf32, #tpu.memory_space<vmem>>, vector<1x128xf32>
    %72 = vector.broadcast %71 : vector<1x128xf32> to vector<64x128xf32>
    %73 = arith.addf %70, %72 : vector<64x128xf32>
    %74 = vector.extract_strided_slice %65 {offsets = [0, 0], sizes = [64, 32], strides = [1, 1]} : vector<64x128xf32> to vector<64x32xf32>
    %75 = vector.shape_cast %74 : vector<64x32xf32> to vector<2x32x32xf32>
    %76 = vector.extract_strided_slice %65 {offsets = [0, 32], sizes = [64, 32], strides = [1, 1]} : vector<64x128xf32> to vector<64x32xf32>
    %77 = vector.shape_cast %76 : vector<64x32xf32> to vector<2x32x32xf32>
    %78 = vector.extract_strided_slice %65 {offsets = [0, 64], sizes = [64, 32], strides = [1, 1]} : vector<64x128xf32> to vector<64x32xf32>
    %79 = vector.shape_cast %78 : vector<64x32xf32> to vector<2x32x32xf32>
    %80 = vector.extract_strided_slice %65 {offsets = [0, 96], sizes = [64, 32], strides = [1, 1]} : vector<64x128xf32> to vector<64x32xf32>
    %81 = vector.shape_cast %80 : vector<64x32xf32> to vector<2x32x32xf32>
    %82 = tpu.concatenate %75, %77, %79, %81 in 0 : vector<2x32x32xf32>, vector<2x32x32xf32>, vector<2x32x32xf32>, vector<2x32x32xf32> -> vector<8x32x32xf32>
    %83 = vector.extract_strided_slice %69 {offsets = [0, 0], sizes = [64, 32], strides = [1, 1]} : vector<64x128xf32> to vector<64x32xf32>
    %84 = vector.shape_cast %83 : vector<64x32xf32> to vector<2x32x32xf32>
    %85 = vector.extract_strided_slice %69 {offsets = [0, 32], sizes = [64, 32], strides = [1, 1]} : vector<64x128xf32> to vector<64x32xf32>
    %86 = vector.shape_cast %85 : vector<64x32xf32> to vector<2x32x32xf32>
    %87 = vector.extract_strided_slice %69 {offsets = [0, 64], sizes = [64, 32], strides = [1, 1]} : vector<64x128xf32> to vector<64x32xf32>
    %88 = vector.shape_cast %87 : vector<64x32xf32> to vector<2x32x32xf32>
    %89 = vector.extract_strided_slice %69 {offsets = [0, 96], sizes = [64, 32], strides = [1, 1]} : vector<64x128xf32> to vector<64x32xf32>
    %90 = vector.shape_cast %89 : vector<64x32xf32> to vector<2x32x32xf32>
    %91 = tpu.concatenate %84, %86, %88, %90 in 0 : vector<2x32x32xf32>, vector<2x32x32xf32>, vector<2x32x32xf32>, vector<2x32x32xf32> -> vector<8x32x32xf32>
    %92 = vector.extract_strided_slice %73 {offsets = [0, 0], sizes = [64, 32], strides = [1, 1]} : vector<64x128xf32> to vector<64x32xf32>
    %93 = vector.shape_cast %92 : vector<64x32xf32> to vector<2x32x32xf32>
    %94 = vector.extract_strided_slice %73 {offsets = [0, 32], sizes = [64, 32], strides = [1, 1]} : vector<64x128xf32> to vector<64x32xf32>
    %95 = vector.shape_cast %94 : vector<64x32xf32> to vector<2x32x32xf32>
    %96 = vector.extract_strided_slice %73 {offsets = [0, 64], sizes = [64, 32], strides = [1, 1]} : vector<64x128xf32> to vector<64x32xf32>
    %97 = vector.shape_cast %96 : vector<64x32xf32> to vector<2x32x32xf32>
    %98 = vector.extract_strided_slice %73 {offsets = [0, 96], sizes = [64, 32], strides = [1, 1]} : vector<64x128xf32> to vector<64x32xf32>
    %99 = vector.shape_cast %98 : vector<64x32xf32> to vector<2x32x32xf32>
    %100 = tpu.concatenate %93, %95, %97, %99 in 0 : vector<2x32x32xf32>, vector<2x32x32xf32>, vector<2x32x32xf32>, vector<2x32x32xf32> -> vector<8x32x32xf32>
    %cst_29 = arith.constant dense<0.000000e+00> : vector<8x32x32xf32>
    %101 = tpu.matmul %82, %91, %cst_29 {dimension_numbers = #tpu.dot_dimension_numbers<[2], [2], [1], [1], [0, 0, 0, 1, 1, 1], [0], [0]>} : vector<8x32x32xf32>, vector<8x32x32xf32>, vector<8x32x32xf32> -> vector<8x32x32xf32>
    %cst_30 = arith.constant dense<0xFF800000> : vector<8x32xf32>
    %102 = vector.multi_reduction <maximumf>, %101, %cst_30 [2] : vector<8x32x32xf32> to vector<8x32xf32>
    %103 = vector.shape_cast %102 : vector<8x32xf32> to vector<8x32x1xf32>
    %104 = vector.broadcast %103 : vector<8x32x1xf32> to vector<8x32x32xf32>
    %105 = arith.subf %101, %104 : vector<8x32x32xf32>
    %106 = math.exp %105 : vector<8x32x32xf32>
    %cst_31 = arith.constant dense<0.000000e+00> : vector<8x32xf32>
    %107 = vector.multi_reduction <add>, %106, %cst_31 [2] : vector<8x32x32xf32> to vector<8x32xf32>
    %108 = vector.shape_cast %107 : vector<8x32xf32> to vector<8x32x1xf32>
    %109 = tpu.reciprocal %108 {approx = true} : vector<8x32x1xf32> -> vector<8x32x1xf32>
    %110 = vector.broadcast %109 : vector<8x32x1xf32> to vector<8x32x32xf32>
    %111 = arith.mulf %106, %110 : vector<8x32x32xf32>
    %cst_32 = arith.constant dense<0.000000e+00> : vector<8x32x32xf32>
    %112 = tpu.matmul %111, %100, %cst_32 {dimension_numbers = #tpu.dot_dimension_numbers<[2], [1], [1], [2], [0, 0, 0, 1, 1, 2], [0], [0]>} : vector<8x32x32xf32>, vector<8x32x32xf32>, vector<8x32x32xf32> -> vector<8x32x32xf32>
    %113 = vector.shape_cast %112 : vector<8x32x32xf32> to vector<4x2x32x32xf32>
    %114 = vector.extract_strided_slice %113 {offsets = [0, 0, 0, 0], sizes = [1, 2, 32, 32], strides = [1, 1, 1, 1]} : vector<4x2x32x32xf32> to vector<1x2x32x32xf32>
    %115 = vector.shape_cast %114 : vector<1x2x32x32xf32> to vector<2x32x32xf32>
    %116 = vector.extract_strided_slice %113 {offsets = [1, 0, 0, 0], sizes = [1, 2, 32, 32], strides = [1, 1, 1, 1]} : vector<4x2x32x32xf32> to vector<1x2x32x32xf32>
    %117 = vector.shape_cast %116 : vector<1x2x32x32xf32> to vector<2x32x32xf32>
    %118 = vector.extract_strided_slice %113 {offsets = [2, 0, 0, 0], sizes = [1, 2, 32, 32], strides = [1, 1, 1, 1]} : vector<4x2x32x32xf32> to vector<1x2x32x32xf32>
    %119 = vector.shape_cast %118 : vector<1x2x32x32xf32> to vector<2x32x32xf32>
    %120 = vector.extract_strided_slice %113 {offsets = [3, 0, 0, 0], sizes = [1, 2, 32, 32], strides = [1, 1, 1, 1]} : vector<4x2x32x32xf32> to vector<1x2x32x32xf32>
    %121 = vector.shape_cast %120 : vector<1x2x32x32xf32> to vector<2x32x32xf32>
    %122 = tpu.concatenate %115, %117, %119, %121 in 2 : vector<2x32x32xf32>, vector<2x32x32xf32>, vector<2x32x32xf32>, vector<2x32x32xf32> -> vector<2x32x128xf32>
    %123 = vector.shape_cast %122 : vector<2x32x128xf32> to vector<64x128xf32>
    %124 = arith.truncf %123 : vector<64x128xf32> to vector<64x128xbf16>
    %c0_33 = arith.constant 0 : index
    %c0_34 = arith.constant 0 : index
    %c0_35 = arith.constant 0 : index
    %125 = vector.load %arg7[%c0_33, %c0_34, %c0_35] : memref<2x128x128xbf16, #tpu.memory_space<vmem>>, vector<1x128x128xbf16>
    %126 = vector.shape_cast %125 : vector<1x128x128xbf16> to vector<128x128xbf16>
    %cst_36 = arith.constant dense<0.000000e+00> : vector<64x128xf32>
    %127 = tpu.matmul %124, %126, %cst_36 {dimension_numbers = #tpu.dot_dimension_numbers<[1], [0], [0], [1], [0, 0, 1, 1], [], []>} : vector<64x128xbf16>, vector<128x128xbf16>, vector<64x128xf32> -> vector<64x128xf32>
    %c9 = arith.constant 9 : index
    %c0_37 = arith.constant 0 : index
    %128 = vector.load %arg4[%c9, %c0_37] : memref<32x128xf32, #tpu.memory_space<vmem>>, vector<1x128xf32>
    %129 = vector.broadcast %128 : vector<1x128xf32> to vector<64x128xf32>
    %130 = arith.addf %127, %129 : vector<64x128xf32>
    %131 = arith.addf %33, %130 : vector<64x128xf32>
    %c10 = arith.constant 10 : index
    %c0_38 = arith.constant 0 : index
    %132 = vector.load %arg4[%c10, %c0_38] : memref<32x128xf32, #tpu.memory_space<vmem>>, vector<1x128xf32>
    %c11 = arith.constant 11 : index
    %c0_39 = arith.constant 0 : index
    %133 = vector.load %arg4[%c11, %c0_39] : memref<32x128xf32, #tpu.memory_space<vmem>>, vector<1x128xf32>
    %cst_40 = arith.constant dense<0.000000e+00> : vector<64xf32>
    %134 = vector.multi_reduction <add>, %131, %cst_40 [1] : vector<64x128xf32> to vector<64xf32>
    %135 = vector.shape_cast %134 : vector<64xf32> to vector<64x1xf32>
    %cst_41 = arith.constant 1.280000e+02 : f32
    %136 = vector.broadcast %cst_41 : f32 to vector<64x1xf32>
    %137 = arith.divf %135, %136 : vector<64x1xf32>
    %138 = vector.broadcast %137 : vector<64x1xf32> to vector<64x128xf32>
    %139 = arith.subf %131, %138 : vector<64x128xf32>
    %140 = arith.mulf %139, %139 : vector<64x128xf32>
    %cst_42 = arith.constant dense<0.000000e+00> : vector<64xf32>
    %141 = vector.multi_reduction <add>, %140, %cst_42 [1] : vector<64x128xf32> to vector<64xf32>
    %142 = vector.shape_cast %141 : vector<64xf32> to vector<64x1xf32>
    %cst_43 = arith.constant 1.280000e+02 : f32
    %143 = vector.broadcast %cst_43 : f32 to vector<64x1xf32>
    %144 = arith.divf %142, %143 : vector<64x1xf32>
    %cst_44 = arith.constant 9.99999974E-6 : f32
    %145 = vector.broadcast %cst_44 : f32 to vector<64x1xf32>
    %146 = arith.addf %144, %145 : vector<64x1xf32>
    %147 = math.rsqrt %146 : vector<64x1xf32>
    %148 = vector.broadcast %147 : vector<64x1xf32> to vector<64x128xf32>
    %149 = arith.mulf %139, %148 : vector<64x128xf32>
    %150 = vector.broadcast %132 : vector<1x128xf32> to vector<64x128xf32>
    %151 = arith.mulf %149, %150 : vector<64x128xf32>
    %152 = vector.broadcast %133 : vector<1x128xf32> to vector<64x128xf32>
    %153 = arith.addf %151, %152 : vector<64x128xf32>
    %154 = arith.truncf %153 : vector<64x128xf32> to vector<64x128xbf16>
    %c0_45 = arith.constant 0 : index
    %c0_46 = arith.constant 0 : index
    %c0_47 = arith.constant 0 : index
    %155 = vector.load %arg8[%c0_45, %c0_46, %c0_47] : memref<2x128x512xbf16, #tpu.memory_space<vmem>>, vector<1x128x512xbf16>
    %156 = vector.shape_cast %155 : vector<1x128x512xbf16> to vector<128x512xbf16>
    %cst_48 = arith.constant dense<0.000000e+00> : vector<64x512xf32>
    %157 = tpu.matmul %154, %156, %cst_48 {dimension_numbers = #tpu.dot_dimension_numbers<[1], [0], [0], [1], [0, 0, 1, 1], [], []>} : vector<64x128xbf16>, vector<128x512xbf16>, vector<64x512xf32> -> vector<64x512xf32>
    %c0_49 = arith.constant 0 : index
    %c0_50 = arith.constant 0 : index
    %158 = vector.load %arg5[%c0_49, %c0_50] : memref<2x512xf32, #tpu.memory_space<vmem>>, vector<1x512xf32>
    %159 = vector.broadcast %158 : vector<1x512xf32> to vector<64x512xf32>
    %160 = arith.addf %157, %159 : vector<64x512xf32>
    %cst_51 = arith.constant 5.000000e-01 : f32
    %161 = vector.broadcast %cst_51 : f32 to vector<64x512xf32>
    %162 = arith.mulf %161, %160 : vector<64x512xf32>
    %cst_52 = arith.constant 0.707106769 : f32
    %163 = vector.broadcast %cst_52 : f32 to vector<64x512xf32>
    %164 = arith.mulf %160, %163 : vector<64x512xf32>
    %165 = math.erf %164 : vector<64x512xf32>
    %cst_53 = arith.constant 1.000000e+00 : f32
    %166 = vector.broadcast %cst_53 : f32 to vector<64x512xf32>
    %167 = arith.addf %166, %165 : vector<64x512xf32>
    %168 = arith.mulf %162, %167 : vector<64x512xf32>
    %169 = arith.truncf %168 : vector<64x512xf32> to vector<64x512xbf16>
    %c0_54 = arith.constant 0 : index
    %c0_55 = arith.constant 0 : index
    %c0_56 = arith.constant 0 : index
    %170 = vector.load %arg9[%c0_54, %c0_55, %c0_56] : memref<2x512x128xbf16, #tpu.memory_space<vmem>>, vector<1x512x128xbf16>
    %171 = vector.shape_cast %170 : vector<1x512x128xbf16> to vector<512x128xbf16>
    %cst_57 = arith.constant dense<0.000000e+00> : vector<64x128xf32>
    %172 = tpu.matmul %169, %171, %cst_57 {dimension_numbers = #tpu.dot_dimension_numbers<[1], [0], [0], [1], [0, 0, 1, 1], [], []>} : vector<64x512xbf16>, vector<512x128xbf16>, vector<64x128xf32> -> vector<64x128xf32>
    %173 = arith.addf %131, %172 : vector<64x128xf32>
    %c12 = arith.constant 12 : index
    %c0_58 = arith.constant 0 : index
    %174 = vector.load %arg4[%c12, %c0_58] : memref<32x128xf32, #tpu.memory_space<vmem>>, vector<1x128xf32>
    %175 = vector.broadcast %174 : vector<1x128xf32> to vector<64x128xf32>
    %176 = arith.addf %173, %175 : vector<64x128xf32>
    %c13 = arith.constant 13 : index
    %c0_59 = arith.constant 0 : index
    %177 = vector.load %arg4[%c13, %c0_59] : memref<32x128xf32, #tpu.memory_space<vmem>>, vector<1x128xf32>
    %c14 = arith.constant 14 : index
    %c0_60 = arith.constant 0 : index
    %178 = vector.load %arg4[%c14, %c0_60] : memref<32x128xf32, #tpu.memory_space<vmem>>, vector<1x128xf32>
    %cst_61 = arith.constant dense<0.000000e+00> : vector<64xf32>
    %179 = vector.multi_reduction <add>, %176, %cst_61 [1] : vector<64x128xf32> to vector<64xf32>
    %180 = vector.shape_cast %179 : vector<64xf32> to vector<64x1xf32>
    %cst_62 = arith.constant 1.280000e+02 : f32
    %181 = vector.broadcast %cst_62 : f32 to vector<64x1xf32>
    %182 = arith.divf %180, %181 : vector<64x1xf32>
    %183 = vector.broadcast %182 : vector<64x1xf32> to vector<64x128xf32>
    %184 = arith.subf %176, %183 : vector<64x128xf32>
    %185 = arith.mulf %184, %184 : vector<64x128xf32>
    %cst_63 = arith.constant dense<0.000000e+00> : vector<64xf32>
    %186 = vector.multi_reduction <add>, %185, %cst_63 [1] : vector<64x128xf32> to vector<64xf32>
    %187 = vector.shape_cast %186 : vector<64xf32> to vector<64x1xf32>
    %cst_64 = arith.constant 1.280000e+02 : f32
    %188 = vector.broadcast %cst_64 : f32 to vector<64x1xf32>
    %189 = arith.divf %187, %188 : vector<64x1xf32>
    %cst_65 = arith.constant 9.99999974E-6 : f32
    %190 = vector.broadcast %cst_65 : f32 to vector<64x1xf32>
    %191 = arith.addf %189, %190 : vector<64x1xf32>
    %192 = math.rsqrt %191 : vector<64x1xf32>
    %193 = vector.broadcast %192 : vector<64x1xf32> to vector<64x128xf32>
    %194 = arith.mulf %184, %193 : vector<64x128xf32>
    %195 = vector.broadcast %177 : vector<1x128xf32> to vector<64x128xf32>
    %196 = arith.mulf %194, %195 : vector<64x128xf32>
    %197 = vector.broadcast %178 : vector<1x128xf32> to vector<64x128xf32>
    %198 = arith.addf %196, %197 : vector<64x128xf32>
    %199 = arith.truncf %198 : vector<64x128xf32> to vector<64x128xbf16>
    %c1_66 = arith.constant 1 : index
    %c0_67 = arith.constant 0 : index
    %c0_68 = arith.constant 0 : index
    %200 = vector.load %arg6[%c1_66, %c0_67, %c0_68] : memref<2x128x384xbf16, #tpu.memory_space<vmem>>, vector<1x128x384xbf16>
    %201 = vector.shape_cast %200 : vector<1x128x384xbf16> to vector<128x384xbf16>
    %cst_69 = arith.constant dense<0.000000e+00> : vector<64x384xf32>
    %202 = tpu.matmul %199, %201, %cst_69 {dimension_numbers = #tpu.dot_dimension_numbers<[1], [0], [0], [1], [0, 0, 1, 1], [], []>} : vector<64x128xbf16>, vector<128x384xbf16>, vector<64x384xf32> -> vector<64x384xf32>
    %203 = vector.extract_strided_slice %202 {offsets = [0, 0], sizes = [64, 128], strides = [1, 1]} : vector<64x384xf32> to vector<64x128xf32>
    %c15 = arith.constant 15 : index
    %c0_70 = arith.constant 0 : index
    %204 = vector.load %arg4[%c15, %c0_70] : memref<32x128xf32, #tpu.memory_space<vmem>>, vector<1x128xf32>
    %205 = vector.broadcast %204 : vector<1x128xf32> to vector<64x128xf32>
    %206 = arith.addf %203, %205 : vector<64x128xf32>
    %cst_71 = arith.constant 0.176776692 : f32
    %207 = vector.broadcast %cst_71 : f32 to vector<64x128xf32>
    %208 = arith.mulf %206, %207 : vector<64x128xf32>
    %209 = vector.extract_strided_slice %202 {offsets = [0, 128], sizes = [64, 128], strides = [1, 1]} : vector<64x384xf32> to vector<64x128xf32>
    %c16 = arith.constant 16 : index
    %c0_72 = arith.constant 0 : index
    %210 = vector.load %arg4[%c16, %c0_72] : memref<32x128xf32, #tpu.memory_space<vmem>>, vector<1x128xf32>
    %211 = vector.broadcast %210 : vector<1x128xf32> to vector<64x128xf32>
    %212 = arith.addf %209, %211 : vector<64x128xf32>
    %213 = vector.extract_strided_slice %202 {offsets = [0, 256], sizes = [64, 128], strides = [1, 1]} : vector<64x384xf32> to vector<64x128xf32>
    %c17 = arith.constant 17 : index
    %c0_73 = arith.constant 0 : index
    %214 = vector.load %arg4[%c17, %c0_73] : memref<32x128xf32, #tpu.memory_space<vmem>>, vector<1x128xf32>
    %215 = vector.broadcast %214 : vector<1x128xf32> to vector<64x128xf32>
    %216 = arith.addf %213, %215 : vector<64x128xf32>
    %217 = vector.extract_strided_slice %208 {offsets = [0, 0], sizes = [64, 32], strides = [1, 1]} : vector<64x128xf32> to vector<64x32xf32>
    %218 = vector.shape_cast %217 : vector<64x32xf32> to vector<2x32x32xf32>
    %219 = vector.extract_strided_slice %208 {offsets = [0, 32], sizes = [64, 32], strides = [1, 1]} : vector<64x128xf32> to vector<64x32xf32>
    %220 = vector.shape_cast %219 : vector<64x32xf32> to vector<2x32x32xf32>
    %221 = vector.extract_strided_slice %208 {offsets = [0, 64], sizes = [64, 32], strides = [1, 1]} : vector<64x128xf32> to vector<64x32xf32>
    %222 = vector.shape_cast %221 : vector<64x32xf32> to vector<2x32x32xf32>
    %223 = vector.extract_strided_slice %208 {offsets = [0, 96], sizes = [64, 32], strides = [1, 1]} : vector<64x128xf32> to vector<64x32xf32>
    %224 = vector.shape_cast %223 : vector<64x32xf32> to vector<2x32x32xf32>
    %225 = tpu.concatenate %218, %220, %222, %224 in 0 : vector<2x32x32xf32>, vector<2x32x32xf32>, vector<2x32x32xf32>, vector<2x32x32xf32> -> vector<8x32x32xf32>
    %226 = vector.extract_strided_slice %212 {offsets = [0, 0], sizes = [64, 32], strides = [1, 1]} : vector<64x128xf32> to vector<64x32xf32>
    %227 = vector.shape_cast %226 : vector<64x32xf32> to vector<2x32x32xf32>
    %228 = vector.extract_strided_slice %212 {offsets = [0, 32], sizes = [64, 32], strides = [1, 1]} : vector<64x128xf32> to vector<64x32xf32>
    %229 = vector.shape_cast %228 : vector<64x32xf32> to vector<2x32x32xf32>
    %230 = vector.extract_strided_slice %212 {offsets = [0, 64], sizes = [64, 32], strides = [1, 1]} : vector<64x128xf32> to vector<64x32xf32>
    %231 = vector.shape_cast %230 : vector<64x32xf32> to vector<2x32x32xf32>
    %232 = vector.extract_strided_slice %212 {offsets = [0, 96], sizes = [64, 32], strides = [1, 1]} : vector<64x128xf32> to vector<64x32xf32>
    %233 = vector.shape_cast %232 : vector<64x32xf32> to vector<2x32x32xf32>
    %234 = tpu.concatenate %227, %229, %231, %233 in 0 : vector<2x32x32xf32>, vector<2x32x32xf32>, vector<2x32x32xf32>, vector<2x32x32xf32> -> vector<8x32x32xf32>
    %235 = vector.extract_strided_slice %216 {offsets = [0, 0], sizes = [64, 32], strides = [1, 1]} : vector<64x128xf32> to vector<64x32xf32>
    %236 = vector.shape_cast %235 : vector<64x32xf32> to vector<2x32x32xf32>
    %237 = vector.extract_strided_slice %216 {offsets = [0, 32], sizes = [64, 32], strides = [1, 1]} : vector<64x128xf32> to vector<64x32xf32>
    %238 = vector.shape_cast %237 : vector<64x32xf32> to vector<2x32x32xf32>
    %239 = vector.extract_strided_slice %216 {offsets = [0, 64], sizes = [64, 32], strides = [1, 1]} : vector<64x128xf32> to vector<64x32xf32>
    %240 = vector.shape_cast %239 : vector<64x32xf32> to vector<2x32x32xf32>
    %241 = vector.extract_strided_slice %216 {offsets = [0, 96], sizes = [64, 32], strides = [1, 1]} : vector<64x128xf32> to vector<64x32xf32>
    %242 = vector.shape_cast %241 : vector<64x32xf32> to vector<2x32x32xf32>
    %243 = tpu.concatenate %236, %238, %240, %242 in 0 : vector<2x32x32xf32>, vector<2x32x32xf32>, vector<2x32x32xf32>, vector<2x32x32xf32> -> vector<8x32x32xf32>
    %cst_74 = arith.constant dense<0.000000e+00> : vector<8x32x32xf32>
    %244 = tpu.matmul %225, %234, %cst_74 {dimension_numbers = #tpu.dot_dimension_numbers<[2], [2], [1], [1], [0, 0, 0, 1, 1, 1], [0], [0]>} : vector<8x32x32xf32>, vector<8x32x32xf32>, vector<8x32x32xf32> -> vector<8x32x32xf32>
    %cst_75 = arith.constant dense<0xFF800000> : vector<8x32xf32>
    %245 = vector.multi_reduction <maximumf>, %244, %cst_75 [2] : vector<8x32x32xf32> to vector<8x32xf32>
    %246 = vector.shape_cast %245 : vector<8x32xf32> to vector<8x32x1xf32>
    %247 = vector.broadcast %246 : vector<8x32x1xf32> to vector<8x32x32xf32>
    %248 = arith.subf %244, %247 : vector<8x32x32xf32>
    %249 = math.exp %248 : vector<8x32x32xf32>
    %cst_76 = arith.constant dense<0.000000e+00> : vector<8x32xf32>
    %250 = vector.multi_reduction <add>, %249, %cst_76 [2] : vector<8x32x32xf32> to vector<8x32xf32>
    %251 = vector.shape_cast %250 : vector<8x32xf32> to vector<8x32x1xf32>
    %252 = tpu.reciprocal %251 {approx = true} : vector<8x32x1xf32> -> vector<8x32x1xf32>
    %253 = vector.broadcast %252 : vector<8x32x1xf32> to vector<8x32x32xf32>
    %254 = arith.mulf %249, %253 : vector<8x32x32xf32>
    %cst_77 = arith.constant dense<0.000000e+00> : vector<8x32x32xf32>
    %255 = tpu.matmul %254, %243, %cst_77 {dimension_numbers = #tpu.dot_dimension_numbers<[2], [1], [1], [2], [0, 0, 0, 1, 1, 2], [0], [0]>} : vector<8x32x32xf32>, vector<8x32x32xf32>, vector<8x32x32xf32> -> vector<8x32x32xf32>
    %256 = vector.shape_cast %255 : vector<8x32x32xf32> to vector<4x2x32x32xf32>
    %257 = vector.extract_strided_slice %256 {offsets = [0, 0, 0, 0], sizes = [1, 2, 32, 32], strides = [1, 1, 1, 1]} : vector<4x2x32x32xf32> to vector<1x2x32x32xf32>
    %258 = vector.shape_cast %257 : vector<1x2x32x32xf32> to vector<2x32x32xf32>
    %259 = vector.extract_strided_slice %256 {offsets = [1, 0, 0, 0], sizes = [1, 2, 32, 32], strides = [1, 1, 1, 1]} : vector<4x2x32x32xf32> to vector<1x2x32x32xf32>
    %260 = vector.shape_cast %259 : vector<1x2x32x32xf32> to vector<2x32x32xf32>
    %261 = vector.extract_strided_slice %256 {offsets = [2, 0, 0, 0], sizes = [1, 2, 32, 32], strides = [1, 1, 1, 1]} : vector<4x2x32x32xf32> to vector<1x2x32x32xf32>
    %262 = vector.shape_cast %261 : vector<1x2x32x32xf32> to vector<2x32x32xf32>
    %263 = vector.extract_strided_slice %256 {offsets = [3, 0, 0, 0], sizes = [1, 2, 32, 32], strides = [1, 1, 1, 1]} : vector<4x2x32x32xf32> to vector<1x2x32x32xf32>
    %264 = vector.shape_cast %263 : vector<1x2x32x32xf32> to vector<2x32x32xf32>
    %265 = tpu.concatenate %258, %260, %262, %264 in 2 : vector<2x32x32xf32>, vector<2x32x32xf32>, vector<2x32x32xf32>, vector<2x32x32xf32> -> vector<2x32x128xf32>
    %266 = vector.shape_cast %265 : vector<2x32x128xf32> to vector<64x128xf32>
    %267 = arith.truncf %266 : vector<64x128xf32> to vector<64x128xbf16>
    %c1_78 = arith.constant 1 : index
    %c0_79 = arith.constant 0 : index
    %c0_80 = arith.constant 0 : index
    %268 = vector.load %arg7[%c1_78, %c0_79, %c0_80] : memref<2x128x128xbf16, #tpu.memory_space<vmem>>, vector<1x128x128xbf16>
    %269 = vector.shape_cast %268 : vector<1x128x128xbf16> to vector<128x128xbf16>
    %cst_81 = arith.constant dense<0.000000e+00> : vector<64x128xf32>
    %270 = tpu.matmul %267, %269, %cst_81 {dimension_numbers = #tpu.dot_dimension_numbers<[1], [0], [0], [1], [0, 0, 1, 1], [], []>} : vector<64x128xbf16>, vector<128x128xbf16>, vector<64x128xf32> -> vector<64x128xf32>
    %c18 = arith.constant 18 : index
    %c0_82 = arith.constant 0 : index
    %271 = vector.load %arg4[%c18, %c0_82] : memref<32x128xf32, #tpu.memory_space<vmem>>, vector<1x128xf32>
    %272 = vector.broadcast %271 : vector<1x128xf32> to vector<64x128xf32>
    %273 = arith.addf %270, %272 : vector<64x128xf32>
    %274 = arith.addf %176, %273 : vector<64x128xf32>
    %c19 = arith.constant 19 : index
    %c0_83 = arith.constant 0 : index
    %275 = vector.load %arg4[%c19, %c0_83] : memref<32x128xf32, #tpu.memory_space<vmem>>, vector<1x128xf32>
    %c20 = arith.constant 20 : index
    %c0_84 = arith.constant 0 : index
    %276 = vector.load %arg4[%c20, %c0_84] : memref<32x128xf32, #tpu.memory_space<vmem>>, vector<1x128xf32>
    %cst_85 = arith.constant dense<0.000000e+00> : vector<64xf32>
    %277 = vector.multi_reduction <add>, %274, %cst_85 [1] : vector<64x128xf32> to vector<64xf32>
    %278 = vector.shape_cast %277 : vector<64xf32> to vector<64x1xf32>
    %cst_86 = arith.constant 1.280000e+02 : f32
    %279 = vector.broadcast %cst_86 : f32 to vector<64x1xf32>
    %280 = arith.divf %278, %279 : vector<64x1xf32>
    %281 = vector.broadcast %280 : vector<64x1xf32> to vector<64x128xf32>
    %282 = arith.subf %274, %281 : vector<64x128xf32>
    %283 = arith.mulf %282, %282 : vector<64x128xf32>
    %cst_87 = arith.constant dense<0.000000e+00> : vector<64xf32>
    %284 = vector.multi_reduction <add>, %283, %cst_87 [1] : vector<64x128xf32> to vector<64xf32>
    %285 = vector.shape_cast %284 : vector<64xf32> to vector<64x1xf32>
    %cst_88 = arith.constant 1.280000e+02 : f32
    %286 = vector.broadcast %cst_88 : f32 to vector<64x1xf32>
    %287 = arith.divf %285, %286 : vector<64x1xf32>
    %cst_89 = arith.constant 9.99999974E-6 : f32
    %288 = vector.broadcast %cst_89 : f32 to vector<64x1xf32>
    %289 = arith.addf %287, %288 : vector<64x1xf32>
    %290 = math.rsqrt %289 : vector<64x1xf32>
    %291 = vector.broadcast %290 : vector<64x1xf32> to vector<64x128xf32>
    %292 = arith.mulf %282, %291 : vector<64x128xf32>
    %293 = vector.broadcast %275 : vector<1x128xf32> to vector<64x128xf32>
    %294 = arith.mulf %292, %293 : vector<64x128xf32>
    %295 = vector.broadcast %276 : vector<1x128xf32> to vector<64x128xf32>
    %296 = arith.addf %294, %295 : vector<64x128xf32>
    %297 = arith.truncf %296 : vector<64x128xf32> to vector<64x128xbf16>
    %c1_90 = arith.constant 1 : index
    %c0_91 = arith.constant 0 : index
    %c0_92 = arith.constant 0 : index
    %298 = vector.load %arg8[%c1_90, %c0_91, %c0_92] : memref<2x128x512xbf16, #tpu.memory_space<vmem>>, vector<1x128x512xbf16>
    %299 = vector.shape_cast %298 : vector<1x128x512xbf16> to vector<128x512xbf16>
    %cst_93 = arith.constant dense<0.000000e+00> : vector<64x512xf32>
    %300 = tpu.matmul %297, %299, %cst_93 {dimension_numbers = #tpu.dot_dimension_numbers<[1], [0], [0], [1], [0, 0, 1, 1], [], []>} : vector<64x128xbf16>, vector<128x512xbf16>, vector<64x512xf32> -> vector<64x512xf32>
    %c1_94 = arith.constant 1 : index
    %c0_95 = arith.constant 0 : index
    %301 = vector.load %arg5[%c1_94, %c0_95] : memref<2x512xf32, #tpu.memory_space<vmem>>, vector<1x512xf32>
    %302 = vector.broadcast %301 : vector<1x512xf32> to vector<64x512xf32>
    %303 = arith.addf %300, %302 : vector<64x512xf32>
    %cst_96 = arith.constant 5.000000e-01 : f32
    %304 = vector.broadcast %cst_96 : f32 to vector<64x512xf32>
    %305 = arith.mulf %304, %303 : vector<64x512xf32>
    %cst_97 = arith.constant 0.707106769 : f32
    %306 = vector.broadcast %cst_97 : f32 to vector<64x512xf32>
    %307 = arith.mulf %303, %306 : vector<64x512xf32>
    %308 = math.erf %307 : vector<64x512xf32>
    %cst_98 = arith.constant 1.000000e+00 : f32
    %309 = vector.broadcast %cst_98 : f32 to vector<64x512xf32>
    %310 = arith.addf %309, %308 : vector<64x512xf32>
    %311 = arith.mulf %305, %310 : vector<64x512xf32>
    %312 = arith.truncf %311 : vector<64x512xf32> to vector<64x512xbf16>
    %c1_99 = arith.constant 1 : index
    %c0_100 = arith.constant 0 : index
    %c0_101 = arith.constant 0 : index
    %313 = vector.load %arg9[%c1_99, %c0_100, %c0_101] : memref<2x512x128xbf16, #tpu.memory_space<vmem>>, vector<1x512x128xbf16>
    %314 = vector.shape_cast %313 : vector<1x512x128xbf16> to vector<512x128xbf16>
    %cst_102 = arith.constant dense<0.000000e+00> : vector<64x128xf32>
    %315 = tpu.matmul %312, %314, %cst_102 {dimension_numbers = #tpu.dot_dimension_numbers<[1], [0], [0], [1], [0, 0, 1, 1], [], []>} : vector<64x512xbf16>, vector<512x128xbf16>, vector<64x128xf32> -> vector<64x128xf32>
    %316 = arith.addf %274, %315 : vector<64x128xf32>
    %c21 = arith.constant 21 : index
    %c0_103 = arith.constant 0 : index
    %317 = vector.load %arg4[%c21, %c0_103] : memref<32x128xf32, #tpu.memory_space<vmem>>, vector<1x128xf32>
    %318 = vector.broadcast %317 : vector<1x128xf32> to vector<64x128xf32>
    %319 = arith.addf %316, %318 : vector<64x128xf32>
    %c22 = arith.constant 22 : index
    %c0_104 = arith.constant 0 : index
    %320 = vector.load %arg4[%c22, %c0_104] : memref<32x128xf32, #tpu.memory_space<vmem>>, vector<1x128xf32>
    %c23 = arith.constant 23 : index
    %c0_105 = arith.constant 0 : index
    %321 = vector.load %arg4[%c23, %c0_105] : memref<32x128xf32, #tpu.memory_space<vmem>>, vector<1x128xf32>
    %cst_106 = arith.constant dense<0.000000e+00> : vector<64xf32>
    %322 = vector.multi_reduction <add>, %319, %cst_106 [1] : vector<64x128xf32> to vector<64xf32>
    %323 = vector.shape_cast %322 : vector<64xf32> to vector<64x1xf32>
    %cst_107 = arith.constant 1.280000e+02 : f32
    %324 = vector.broadcast %cst_107 : f32 to vector<64x1xf32>
    %325 = arith.divf %323, %324 : vector<64x1xf32>
    %326 = vector.broadcast %325 : vector<64x1xf32> to vector<64x128xf32>
    %327 = arith.subf %319, %326 : vector<64x128xf32>
    %328 = arith.mulf %327, %327 : vector<64x128xf32>
    %cst_108 = arith.constant dense<0.000000e+00> : vector<64xf32>
    %329 = vector.multi_reduction <add>, %328, %cst_108 [1] : vector<64x128xf32> to vector<64xf32>
    %330 = vector.shape_cast %329 : vector<64xf32> to vector<64x1xf32>
    %cst_109 = arith.constant 1.280000e+02 : f32
    %331 = vector.broadcast %cst_109 : f32 to vector<64x1xf32>
    %332 = arith.divf %330, %331 : vector<64x1xf32>
    %cst_110 = arith.constant 9.99999974E-6 : f32
    %333 = vector.broadcast %cst_110 : f32 to vector<64x1xf32>
    %334 = arith.addf %332, %333 : vector<64x1xf32>
    %335 = math.rsqrt %334 : vector<64x1xf32>
    %336 = vector.broadcast %335 : vector<64x1xf32> to vector<64x128xf32>
    %337 = arith.mulf %327, %336 : vector<64x128xf32>
    %338 = vector.broadcast %320 : vector<1x128xf32> to vector<64x128xf32>
    %339 = arith.mulf %337, %338 : vector<64x128xf32>
    %340 = vector.broadcast %321 : vector<1x128xf32> to vector<64x128xf32>
    %341 = arith.addf %339, %340 : vector<64x128xf32>
    %342 = vector.shape_cast %341 : vector<64x128xf32> to vector<2x32x128xf32>
    %cst_111 = arith.constant dense<0.000000e+00> : vector<2x32xf32>
    %343 = vector.multi_reduction <add>, %342, %cst_111 [2] : vector<2x32x128xf32> to vector<2x32xf32>
    %344 = vector.shape_cast %343 : vector<2x32xf32> to vector<2x32x1xf32>
    %cst_112 = arith.constant 0.0883883461 : f32
    %345 = vector.broadcast %cst_112 : f32 to vector<2x32x1xf32>
    %346 = arith.mulf %344, %345 : vector<2x32x1xf32>
    %cst_113 = arith.constant dense<0xFF800000> : vector<2x1xf32>
    %347 = vector.multi_reduction <maximumf>, %346, %cst_113 [1] : vector<2x32x1xf32> to vector<2x1xf32>
    %348 = vector.shape_cast %347 : vector<2x1xf32> to vector<2x1x1xf32>
    %349 = vector.broadcast %348 : vector<2x1x1xf32> to vector<2x32x1xf32>
    %350 = arith.subf %346, %349 : vector<2x32x1xf32>
    %351 = math.exp %350 : vector<2x32x1xf32>
    %cst_114 = arith.constant dense<0.000000e+00> : vector<2x1xf32>
    %352 = vector.multi_reduction <add>, %351, %cst_114 [1] : vector<2x32x1xf32> to vector<2x1xf32>
    %353 = vector.shape_cast %352 : vector<2x1xf32> to vector<2x1x1xf32>
    %354 = tpu.reciprocal %353 {approx = true} : vector<2x1x1xf32> -> vector<2x1x1xf32>
    %355 = vector.broadcast %354 : vector<2x1x1xf32> to vector<2x32x1xf32>
    %356 = arith.mulf %351, %355 : vector<2x32x1xf32>
    %357 = vector.broadcast %356 : vector<2x32x1xf32> to vector<2x32x128xf32>
    %358 = arith.mulf %342, %357 : vector<2x32x128xf32>
    %cst_115 = arith.constant dense<0.000000e+00> : vector<2x128xf32>
    %359 = vector.multi_reduction <add>, %358, %cst_115 [1] : vector<2x32x128xf32> to vector<2x128xf32>
    %c0_116 = arith.constant 0 : index
    %c0_117 = arith.constant 0 : index
    %360 = vector.load %arg10[%c0_116, %c0_117] : memref<128x128xf32, #tpu.memory_space<vmem>>, vector<128x128xf32>
    %cst_118 = arith.constant dense<0.000000e+00> : vector<2x128xf32>
    %361 = tpu.matmul %359, %360, %cst_118 {dimension_numbers = #tpu.dot_dimension_numbers<[1], [0], [0], [1], [0, 0, 1, 1], [], []>} : vector<2x128xf32>, vector<128x128xf32>, vector<2x128xf32> -> vector<2x128xf32>
    %c24 = arith.constant 24 : index
    %c0_119 = arith.constant 0 : index
    %362 = vector.load %arg4[%c24, %c0_119] : memref<32x128xf32, #tpu.memory_space<vmem>>, vector<1x128xf32>
    %363 = vector.broadcast %362 : vector<1x128xf32> to vector<2x128xf32>
    %364 = arith.addf %361, %363 : vector<2x128xf32>
    %c25 = arith.constant 25 : index
    %c0_120 = arith.constant 0 : index
    %365 = vector.load %arg4[%c25, %c0_120] : memref<32x128xf32, #tpu.memory_space<vmem>>, vector<1x128xf32>
    %c26 = arith.constant 26 : index
    %c0_121 = arith.constant 0 : index
    %366 = vector.load %arg4[%c26, %c0_121] : memref<32x128xf32, #tpu.memory_space<vmem>>, vector<1x128xf32>
    %cst_122 = arith.constant dense<0.000000e+00> : vector<2xf32>
    %367 = vector.multi_reduction <add>, %364, %cst_122 [1] : vector<2x128xf32> to vector<2xf32>
    %368 = vector.shape_cast %367 : vector<2xf32> to vector<2x1xf32>
    %cst_123 = arith.constant 1.280000e+02 : f32
    %369 = vector.broadcast %cst_123 : f32 to vector<2x1xf32>
    %370 = arith.divf %368, %369 : vector<2x1xf32>
    %371 = vector.broadcast %370 : vector<2x1xf32> to vector<2x128xf32>
    %372 = arith.subf %364, %371 : vector<2x128xf32>
    %373 = arith.mulf %372, %372 : vector<2x128xf32>
    %cst_124 = arith.constant dense<0.000000e+00> : vector<2xf32>
    %374 = vector.multi_reduction <add>, %373, %cst_124 [1] : vector<2x128xf32> to vector<2xf32>
    %375 = vector.shape_cast %374 : vector<2xf32> to vector<2x1xf32>
    %cst_125 = arith.constant 1.280000e+02 : f32
    %376 = vector.broadcast %cst_125 : f32 to vector<2x1xf32>
    %377 = arith.divf %375, %376 : vector<2x1xf32>
    %cst_126 = arith.constant 9.99999974E-6 : f32
    %378 = vector.broadcast %cst_126 : f32 to vector<2x1xf32>
    %379 = arith.addf %377, %378 : vector<2x1xf32>
    %380 = math.rsqrt %379 : vector<2x1xf32>
    %381 = vector.broadcast %380 : vector<2x1xf32> to vector<2x128xf32>
    %382 = arith.mulf %372, %381 : vector<2x128xf32>
    %383 = vector.broadcast %365 : vector<1x128xf32> to vector<2x128xf32>
    %384 = arith.mulf %382, %383 : vector<2x128xf32>
    %385 = vector.broadcast %366 : vector<1x128xf32> to vector<2x128xf32>
    %386 = arith.addf %384, %385 : vector<2x128xf32>
    %cst_127 = arith.constant 5.000000e-01 : f32
    %387 = vector.broadcast %cst_127 : f32 to vector<2x128xf32>
    %388 = arith.mulf %387, %386 : vector<2x128xf32>
    %cst_128 = arith.constant 0.707106769 : f32
    %389 = vector.broadcast %cst_128 : f32 to vector<2x128xf32>
    %390 = arith.mulf %386, %389 : vector<2x128xf32>
    %391 = math.erf %390 : vector<2x128xf32>
    %cst_129 = arith.constant 1.000000e+00 : f32
    %392 = vector.broadcast %cst_129 : f32 to vector<2x128xf32>
    %393 = arith.addf %392, %391 : vector<2x128xf32>
    %394 = arith.mulf %388, %393 : vector<2x128xf32>
    %c0_130 = arith.constant 0 : index
    %c0_131 = arith.constant 0 : index
    %395 = vector.load %arg11[%c0_130, %c0_131] : memref<128x64xf32, #tpu.memory_space<vmem>>, vector<128x64xf32>
    %cst_132 = arith.constant dense<0.000000e+00> : vector<2x64xf32>
    %396 = tpu.matmul %394, %395, %cst_132 {dimension_numbers = #tpu.dot_dimension_numbers<[1], [0], [0], [1], [0, 0, 1, 1], [], []>} : vector<2x128xf32>, vector<128x64xf32>, vector<2x64xf32> -> vector<2x64xf32>
    %c27 = arith.constant 27 : index
    %c0_133 = arith.constant 0 : index
    %397 = vector.load %arg4[%c27, %c0_133] : memref<32x128xf32, #tpu.memory_space<vmem>>, vector<1x128xf32>
    %398 = vector.extract_strided_slice %397 {offsets = [0, 0], sizes = [1, 64], strides = [1, 1]} : vector<1x128xf32> to vector<1x64xf32>
    %399 = vector.broadcast %398 : vector<1x64xf32> to vector<2x64xf32>
    %400 = arith.addf %396, %399 : vector<2x64xf32>
    %c28 = arith.constant 28 : index
    %c0_134 = arith.constant 0 : index
    %401 = vector.load %arg4[%c28, %c0_134] : memref<32x128xf32, #tpu.memory_space<vmem>>, vector<1x128xf32>
    %402 = vector.extract_strided_slice %401 {offsets = [0, 0], sizes = [1, 64], strides = [1, 1]} : vector<1x128xf32> to vector<1x64xf32>
    %c29 = arith.constant 29 : index
    %c0_135 = arith.constant 0 : index
    %403 = vector.load %arg4[%c29, %c0_135] : memref<32x128xf32, #tpu.memory_space<vmem>>, vector<1x128xf32>
    %404 = vector.extract_strided_slice %403 {offsets = [0, 0], sizes = [1, 64], strides = [1, 1]} : vector<1x128xf32> to vector<1x64xf32>
    %cst_136 = arith.constant dense<0.000000e+00> : vector<2xf32>
    %405 = vector.multi_reduction <add>, %400, %cst_136 [1] : vector<2x64xf32> to vector<2xf32>
    %406 = vector.shape_cast %405 : vector<2xf32> to vector<2x1xf32>
    %cst_137 = arith.constant 6.400000e+01 : f32
    %407 = vector.broadcast %cst_137 : f32 to vector<2x1xf32>
    %408 = arith.divf %406, %407 : vector<2x1xf32>
    %409 = vector.broadcast %408 : vector<2x1xf32> to vector<2x64xf32>
    %410 = arith.subf %400, %409 : vector<2x64xf32>
    %411 = arith.mulf %410, %410 : vector<2x64xf32>
    %cst_138 = arith.constant dense<0.000000e+00> : vector<2xf32>
    %412 = vector.multi_reduction <add>, %411, %cst_138 [1] : vector<2x64xf32> to vector<2xf32>
    %413 = vector.shape_cast %412 : vector<2xf32> to vector<2x1xf32>
    %cst_139 = arith.constant 6.400000e+01 : f32
    %414 = vector.broadcast %cst_139 : f32 to vector<2x1xf32>
    %415 = arith.divf %413, %414 : vector<2x1xf32>
    %cst_140 = arith.constant 9.99999974E-6 : f32
    %416 = vector.broadcast %cst_140 : f32 to vector<2x1xf32>
    %417 = arith.addf %415, %416 : vector<2x1xf32>
    %418 = math.rsqrt %417 : vector<2x1xf32>
    %419 = vector.broadcast %418 : vector<2x1xf32> to vector<2x64xf32>
    %420 = arith.mulf %410, %419 : vector<2x64xf32>
    %421 = vector.broadcast %402 : vector<1x64xf32> to vector<2x64xf32>
    %422 = arith.mulf %420, %421 : vector<2x64xf32>
    %423 = vector.broadcast %404 : vector<1x64xf32> to vector<2x64xf32>
    %424 = arith.addf %422, %423 : vector<2x64xf32>
    %cst_141 = arith.constant 5.000000e-01 : f32
    %425 = vector.broadcast %cst_141 : f32 to vector<2x64xf32>
    %426 = arith.mulf %425, %424 : vector<2x64xf32>
    %cst_142 = arith.constant 0.707106769 : f32
    %427 = vector.broadcast %cst_142 : f32 to vector<2x64xf32>
    %428 = arith.mulf %424, %427 : vector<2x64xf32>
    %429 = math.erf %428 : vector<2x64xf32>
    %cst_143 = arith.constant 1.000000e+00 : f32
    %430 = vector.broadcast %cst_143 : f32 to vector<2x64xf32>
    %431 = arith.addf %430, %429 : vector<2x64xf32>
    %432 = arith.mulf %426, %431 : vector<2x64xf32>
    %c0_144 = arith.constant 0 : index
    %c0_145 = arith.constant 0 : index
    %433 = vector.load %arg12[%c0_144, %c0_145] : memref<64x128xf32, #tpu.memory_space<vmem>>, vector<64x128xf32>
    %cst_146 = arith.constant dense<0.000000e+00> : vector<2x128xf32>
    %434 = tpu.matmul %432, %433, %cst_146 {dimension_numbers = #tpu.dot_dimension_numbers<[1], [0], [0], [1], [0, 0, 1, 1], [], []>} : vector<2x64xf32>, vector<64x128xf32>, vector<2x128xf32> -> vector<2x128xf32>
    %c30 = arith.constant 30 : index
    %c0_147 = arith.constant 0 : index
    %435 = vector.load %arg4[%c30, %c0_147] : memref<32x128xf32, #tpu.memory_space<vmem>>, vector<1x128xf32>
    %436 = vector.broadcast %435 : vector<1x128xf32> to vector<2x128xf32>
    %437 = arith.addf %434, %436 : vector<2x128xf32>
    %cst_148 = arith.constant 0.000000e+00 : f32
    %438 = vector.broadcast %cst_148 : f32 to vector<2x128xf32>
    %439 = arith.maximumf %437, %438 : vector<2x128xf32>
    %440 = vector.shape_cast %439 : vector<2x128xf32> to vector<2x1x128xf32>
    %441 = vector.shape_cast %440 : vector<2x1x128xf32> to vector<2x1x128xf32>
    %442 = vector.broadcast %441 : vector<2x1x128xf32> to vector<2x8x128xf32>
    %c0_149 = arith.constant 0 : index
    %c0_150 = arith.constant 0 : index
    %c0_151 = arith.constant 0 : index
    %443 = vector.load %arg13[%c0_149, %c0_150, %c0_151] : memref<2x8x128xf32, #tpu.memory_space<vmem>>, vector<2x8x128xf32>
    tpu.vector_store %arg13[%c0_149, %c0_150, %c0_151], %442 {strides = array<i32>} : memref<2x8x128xf32, #tpu.memory_space<vmem>>, vector<2x8x128xf32>,
    return
  }
  func.func @transform_0(%arg0: i32) -> (i32, i32) {
    %c0_i32 = arith.constant 0 : i32
    %c0_i32_0 = arith.constant 0 : i32
    return %arg0, %c0_i32 : i32, i32
  }
  func.func @transform_1(%arg0: i32) -> (i32, i32) {
    %c0_i32 = arith.constant 0 : i32
    %c0_i32_0 = arith.constant 0 : i32
    return %arg0, %c0_i32 : i32, i32
  }
  func.func @transform_2(%arg0: i32) -> (i32, i32) {
    %c0_i32 = arith.constant 0 : i32
    %c0_i32_0 = arith.constant 0 : i32
    return %arg0, %c0_i32 : i32, i32
  }
  func.func @transform_3(%arg0: i32) -> (i32, i32) {
    %c0_i32 = arith.constant 0 : i32
    %c0_i32_0 = arith.constant 0 : i32
    %c0_i32_1 = arith.constant 0 : i32
    return %c0_i32, %c0_i32_0 : i32, i32
  }
  func.func @transform_4(%arg0: i32) -> (i32, i32) {
    %c0_i32 = arith.constant 0 : i32
    %c0_i32_0 = arith.constant 0 : i32
    %c0_i32_1 = arith.constant 0 : i32
    return %c0_i32, %c0_i32_0 : i32, i32
  }
  func.func @transform_5(%arg0: i32) -> (i32, i32, i32) {
    %c0_i32 = arith.constant 0 : i32
    %c0_i32_0 = arith.constant 0 : i32
    %c0_i32_1 = arith.constant 0 : i32
    %c0_i32_2 = arith.constant 0 : i32
    return %c0_i32, %c0_i32_0, %c0_i32_1 : i32, i32, i32
  }
  func.func @transform_6(%arg0: i32) -> (i32, i32, i32) {
    %c0_i32 = arith.constant 0 : i32
    %c0_i32_0 = arith.constant 0 : i32
    %c0_i32_1 = arith.constant 0 : i32
    %c0_i32_2 = arith.constant 0 : i32
    return %c0_i32, %c0_i32_0, %c0_i32_1 : i32, i32, i32
  }
  func.func @transform_7(%arg0: i32) -> (i32, i32, i32) {
    %c0_i32 = arith.constant 0 : i32
    %c0_i32_0 = arith.constant 0 : i32
    %c0_i32_1 = arith.constant 0 : i32
    %c0_i32_2 = arith.constant 0 : i32
    return %c0_i32, %c0_i32_0, %c0_i32_1 : i32, i32, i32
  }
  func.func @transform_8(%arg0: i32) -> (i32, i32, i32) {
    %c0_i32 = arith.constant 0 : i32
    %c0_i32_0 = arith.constant 0 : i32
    %c0_i32_1 = arith.constant 0 : i32
    %c0_i32_2 = arith.constant 0 : i32
    return %c0_i32, %c0_i32_0, %c0_i32_1 : i32, i32, i32
  }
  func.func @transform_9(%arg0: i32) -> (i32, i32) {
    %c0_i32 = arith.constant 0 : i32
    %c0_i32_0 = arith.constant 0 : i32
    %c0_i32_1 = arith.constant 0 : i32
    return %c0_i32, %c0_i32_0 : i32, i32
  }
  func.func @transform_10(%arg0: i32) -> (i32, i32) {
    %c0_i32 = arith.constant 0 : i32
    %c0_i32_0 = arith.constant 0 : i32
    %c0_i32_1 = arith.constant 0 : i32
    return %c0_i32, %c0_i32_0 : i32, i32
  }
  func.func @transform_11(%arg0: i32) -> (i32, i32) {
    %c0_i32 = arith.constant 0 : i32
    %c0_i32_0 = arith.constant 0 : i32
    %c0_i32_1 = arith.constant 0 : i32
    return %c0_i32, %c0_i32_0 : i32, i32
  }
  func.func @transform_12(%arg0: i32) -> (i32, i32, i32) {
    %c0_i32 = arith.constant 0 : i32
    %c0_i32_0 = arith.constant 0 : i32
    %c0_i32_1 = arith.constant 0 : i32
    return %arg0, %c0_i32, %c0_i32_0 : i32, i32, i32
  }
}

</mosaic_0001>

<bundles_post_ra>
// kernel: tpu_custom_call.1
= control target key start
LH: loop header
LB: loop body
LE: loop exit
PB: predicated region body
PF: predicated region fallthrough
CT: control target
= control target key end

     0   :  { %17 = vsyncpa [#allocation3], 0  ;;  %s14630_s0 = inlined_call_operand.vmem [shape: f32[64,1], index: 0, kind: input, shape index: {}]   ;;  %s14631_s1 = inlined_call_operand.vmem [shape: f32[64,1], index: 1, kind: input, shape index: {}]   ;;  %s14632_s2 = inlined_call_operand.hbm [shape: f32[64,128], index: 2, kind: input, shape index: {}]   ;;  %s14633_s3 = inlined_call_operand.hbm [shape: f32[32,128], index: 3, kind: input, shape index: {}]   ;;  %s14634_s4 = inlined_call_operand.vmem [shape: f32[2,512], index: 4, kind: input, shape index: {}]   ;;  %s14635_s5 = inlined_call_operand.hbm [shape: bf16[2,128,384], index: 5, kind: input, shape index: {}]   ;;  %s14636_s6 = inlined_call_operand.vmem [shape: bf16[2,128,128], index: 6, kind: input, shape index: {}]   ;;  %s14637_s7 = inlined_call_operand.hbm [shape: bf16[2,128,512], index: 7, kind: input, shape index: {}]   ;;  %s14638_s8 = inlined_call_operand.hbm [shape: bf16[2,512,128], index: 8, kind: input, shape index: {}]   ;;  %s14639_s9 = inlined_call_operand.vmem [shape: f32[128,128], index: 9, kind: input, shape index: {}]   ;;  %s14640_s10 = inlined_call_operand.vmem [shape: f32[128,64], index: 10, kind: input, shape index: {}]   ;;  %s14641_s11 = inlined_call_operand.hbm [shape: f32[64,128], index: 11, kind: input, shape index: {}]   ;;  %s14642_s12 = inlined_call_operand.hbm [shape: f32[2,8,128], index: 12, kind: output, shape index: {}]  }
   0x1   :  { %18 = vsyncpa [#allocation6], 0 }
   0x2   :  { %19 = vsyncpa [#allocation9], 0 }
   0x3   :  { %20 = vsyncpa [#allocation12], 0 }
   0x4   :  { %21 = vsyncpa [#allocation4], 0  ;;  %s12065_s21 = smov [#allocation5]   ;;  %s12066_s23 = smov [#allocation8]  }
   0x5   :  { %s43_s22 = sshll.u32 %s12065_s21, 4  ;;  %s71_s24 = sshll.u32 %s12066_s23, 4  ;;  %s44_s22 = int_to_ptr.vmem [resolvable:$true] %s43_s22  ;;  %s12152_s24 = int_to_ptr.vmem [resolvable:$true] %s71_s24 }
   0x6   :  { %s11901_s27 = scalar_lea.hbm %s14633_s3, 512 }
   0x7   :  { %p11902_p0 = scmp.ne.s32.totalorder %s14633_s3, %s11901_s27  ;;  %p11905_p1 = scmp.lt.u32.totalorder %s11901_s27, %s14633_s3 }
   0x9   :  { %p11907_p2 = pnand %p11905_p1, %p11902_p0 }
   0xb   :  { %11910 = shalt.err (!%p11907_p2)
}
   0xc   :  { %s11911_s14 = scalar_lea.vmem %s44_s22, 512  ;;  %p11916_p4 = scmp.lt.s32.totalorder %s44_s22, %s44_s22 }
   0xd   :  { %p11912_p3 = scmp.ne.s32.totalorder %s44_s22, %s11911_s14  ;;  %p11917_p5 = scmp.lt.s32.totalorder %s11911_s14, %s11911_s14 }
   0xf   :  { %p11918_p6 = por %p11917_p5, %p11916_p4 }
  0x11   :  { %p11919_p7 = pnand %p11918_p6, %p11912_p3 }
  0x13   :  { %11922 = shalt.err (!%p11919_p7)
}
  0x14   :  { %s12067_s15 = smov 128   ;;  %s12068_s16 = smov 8  }
  0x15   :  { %49 = dma.hbm_to_vmem [thread:$0]  %s14633_s3, 512, %s44_s22, [#allocation6], %s12067_s15, %s12067_s15, %s12068_s16  }
  0x16   :  { %s11923_s21 = scalar_lea.hbm %s14637_s7, 8192 }
  0x17   :  { %p11924_p8 = scmp.ne.s32.totalorder %s14637_s7, %s11923_s21  ;;  %p11927_p9 = scmp.lt.u32.totalorder %s11923_s21, %s14637_s7 }
  0x19   :  { %p11929_p10 = pnand %p11927_p9, %p11924_p8 }
  0x1b   :  { %11932 = shalt.err (!%p11929_p10)
}
  0x1c   :  { %s11933_s28 = scalar_lea.vmem %s12152_s24, 8192  ;;  %p11938_p12 = scmp.lt.s32.totalorder %s12152_s24, %s12152_s24 }
  0x1d   :  { %p11934_p11 = scmp.ne.s32.totalorder %s12152_s24, %s11933_s28  ;;  %p11939_p13 = scmp.lt.s32.totalorder %s11933_s28, %s11933_s28 }
  0x1f   :  { %p11940_p0 = por %p11939_p13, %p11938_p12 }
  0x21   :  { %p11941_p1 = pnand %p11940_p0, %p11934_p11 }
  0x23   :  { %11944 = shalt.err (!%p11941_p1)
}
  0x24   :  { %s12069_s3 = smov 256   ;;  %s12070_s22 = smov 16  }
  0x25   :  { %77 = dma.hbm_to_vmem [thread:$0]  %s14637_s7, 8192, %s12152_s24, [#allocation9], %s12069_s3, %s12069_s3, %s12070_s22  }
  0x26   :  { %s12071_s13 = smov [#allocation2]   ;;  %s12072_s17 = smov [#allocation7]  }
  0x27   :  { %s31_s14 = sshll.u32 %s12071_s13, 4  ;;  %s57_s18 = sshll.u32 %s12072_s17, 4  ;;  %s32_s14 = int_to_ptr.vmem [resolvable:$true] %s31_s14  ;;  %s12186_s18 = int_to_ptr.vmem [resolvable:$true] %s57_s18 }
  0x28   :  { %s11945_s21 = scalar_lea.hbm %s14632_s2, 1024 }
  0x29   :  { %p11946_p2 = scmp.ne.s32.totalorder %s14632_s2, %s11945_s21  ;;  %p11949_p3 = scmp.lt.u32.totalorder %s11945_s21, %s14632_s2 }
  0x2b   :  { %p11951_p4 = pnand %p11949_p3, %p11946_p2 }
  0x2d   :  { %11954 = shalt.err (!%p11951_p4)
}
  0x2e   :  { %s11955_s7 = scalar_lea.vmem %s32_s14, 1024  ;;  %p11960_p6 = scmp.lt.s32.totalorder %s32_s14, %s32_s14 }
  0x2f   :  { %p11956_p5 = scmp.ne.s32.totalorder %s32_s14, %s11955_s7  ;;  %p11961_p7 = scmp.lt.s32.totalorder %s11955_s7, %s11955_s7 }
  0x31   :  { %p11962_p8 = por %p11961_p7, %p11960_p6 }
  0x33   :  { %p11963_p9 = pnand %p11962_p8, %p11956_p5 }
  0x35   :  { %11966 = shalt.err (!%p11963_p9)
}
  0x36   :  { %37 = dma.hbm_to_vmem [thread:$0]  %s14632_s2, 1024, %s32_s14, [#allocation3], %s12067_s15, %s12067_s15, %s12068_s16  }
  0x37   :  { %s11967_s29 = scalar_lea.hbm %s14635_s5, 6144 }
  0x38   :  { %p11968_p10 = scmp.ne.s32.totalorder %s14635_s5, %s11967_s29  ;;  %p11971_p11 = scmp.lt.u32.totalorder %s11967_s29, %s14635_s5 }
  0x3a   :  { %p11973_p12 = pnand %p11971_p11, %p11968_p10 }
  0x3c   :  { %11976 = shalt.err (!%p11973_p12)
}
  0x3d   :  { %s11977_s20 = scalar_lea.vmem %s12186_s18, 6144  ;;  %p11982_p0 = scmp.lt.s32.totalorder %s12186_s18, %s12186_s18 }
  0x3e   :  { %p11978_p13 = scmp.ne.s32.totalorder %s12186_s18, %s11977_s20  ;;  %p11983_p1 = scmp.lt.s32.totalorder %s11977_s20, %s11977_s20 }
  0x40   :  { %p11984_p2 = por %p11983_p1, %p11982_p0 }
  0x42   :  { %p11985_p3 = pnand %p11984_p2, %p11978_p13 }
  0x44   :  { %11988 = shalt.err (!%p11985_p3)
}
  0x45   :  { %s12073_s2 = smov 192   ;;  %s12074_s14 = smov 12  }
  0x46   :  { %63 = dma.hbm_to_vmem [thread:$0]  %s14635_s5, 6144, %s12186_s18, [#allocation6], %s12073_s2, %s12073_s2, %s12074_s14  }
  0x47   :  { %s12075_s25 = smov [#allocation10]   ;;  %s11989_s24 = scalar_lea.hbm %s14638_s8, 8192 }
  0x48   :  { %s83_s26 = sshll.u32 %s12075_s25, 4  ;;  %p11990_p4 = scmp.ne.s32.totalorder %s14638_s8, %s11989_s24  ;;  %s84_s26 = int_to_ptr.vmem [resolvable:$true] %s83_s26 }
  0x49   :  { %p11993_p5 = scmp.lt.u32.totalorder %s11989_s24, %s14638_s8 }
  0x4b   :  { %p11995_p6 = pnand %p11993_p5, %p11990_p4 }
  0x4d   :  { %11998 = shalt.err (!%p11995_p6)
}
  0x4e   :  { %s11999_s30 = scalar_lea.vmem %s84_s26, 8192  ;;  %p12004_p8 = scmp.lt.s32.totalorder %s84_s26, %s84_s26 }
  0x4f   :  { %p12000_p7 = scmp.ne.s32.totalorder %s84_s26, %s11999_s30  ;;  %p12005_p9 = scmp.lt.s32.totalorder %s11999_s30, %s11999_s30 }
  0x51   :  { %p12006_p10 = por %p12005_p9, %p12004_p8 }
  0x53   :  { %p12007_p11 = pnand %p12006_p10, %p12000_p7 }
  0x55   :  { %12010 = shalt.err (!%p12007_p11)
}
  0x56   :  { %s12076_s5 = smov 64   ;;  %s12077_s18 = smov 4  }
  0x57   :  { %89 = dma.hbm_to_vmem [thread:$0]  %s14638_s8, 8192, %s84_s26, [#allocation9], %s12076_s5, %s12076_s5, %s12077_s18  }
  0x58   :  { %s12078_s19 = smov [#allocation11]   ;;  %s12011_s21 = scalar_lea.hbm %s14641_s11, 1024 }
  0x59   :  { %s99_s20 = sshll.u32 %s12078_s19, 4  ;;  %p12012_p12 = scmp.ne.s32.totalorder %s14641_s11, %s12011_s21  ;;  %s100_s20 = int_to_ptr.vmem [resolvable:$true] %s99_s20 }
  0x5a   :  { %p12015_p13 = scmp.lt.u32.totalorder %s12011_s21, %s14641_s11 }
  0x5c   :  { %p12017_p0 = pnand %p12015_p13, %p12012_p12 }
  0x5e   :  { %12020 = shalt.err (!%p12017_p0)
}
  0x5f   :  { %s12021_s24 = scalar_lea.vmem %s100_s20, 1024  ;;  %p12026_p2 = scmp.lt.s32.totalorder %s100_s20, %s100_s20 }
  0x60   :  { %p12022_p1 = scmp.ne.s32.totalorder %s100_s20, %s12021_s24  ;;  %p12027_p3 = scmp.lt.s32.totalorder %s12021_s24, %s12021_s24 }
  0x62   :  { %p12028_p4 = por %p12027_p3, %p12026_p2 }
  0x64   :  { %p12029_p5 = pnand %p12028_p4, %p12022_p1 }
  0x66   :  { %12032 = shalt.err (!%p12029_p5)
}
  0x67   :  { %105 = dma.hbm_to_vmem [thread:$0]  %s14641_s11, 1024, %s100_s20, [#allocation12], %s12067_s15, %s12067_s15, %s12068_s16  }
  0x68   :  { %12055 = dma.done.wait [#allocation3], 1024  }
  0x69   :  { %12056 = vsyncadd [#allocation3], 4294966272 }
  0x6a   :  { %12057 = dma.done.wait [#allocation6], 6656  }
  0x6b   :  { %12058 = vsyncadd [#allocation6], 4294960640 }
  0x6c   :  { %12059 = dma.done.wait [#allocation9], 16384  }
  0x6d   :  { %12060 = vsyncadd [#allocation9], 4294950912 }
  0x6e   :  { %12061 = dma.done.wait [#allocation12], 1024  }
  0x6f   :  { %12062 = vsyncadd [#allocation12], 4294966272  ;;  %v14643_v0 = vmov 0   ;;  %v127_v1 = vld [vmem:[%s14630_s0 + $0x10] sm:$0xff]  ;;  %v125_v3 = vld [vmem:[%s14630_s0] sm:$0xff]  ;;  %vm1001_vm0 = vcmask 261120  }
  0x70   :  { %10792 = vset.pattern.permute.xlu1 %v14643_v0  ;;  %10791 = vset.pattern.permute.xlu0 %v14643_v0  ;;  %v135_v2 = vld [vmem:[%s14631_s1 + $0x10] sm:$0xff]  ;;  %v133_v5 = vld [vmem:[%s14631_s1] sm:$0xff]  ;;  %v128_v6 = vld [vmem:[%s14630_s0 + $0x18] sm:$0xff]  ;;  %vm3042_vm2 = vcmask 523264   ;;  %vm3051_vm3 = vcmask 785408   ;;  %vm12083_vm4 = vmmov 0  }
  0x71   :  { %656 = vmatprep.mubr.bf16.mxu0 %v14643_v0  ;;  %v143_v4 = vmul.f32 %v135_v2, %v127_v1  ;;  %v136_v7 = vld [vmem:[%s14631_s1 + $0x18] sm:$0xff]  ;;  %v141_v8 = vmul.f32 %v133_v5, %v125_v3  ;;  %v126_v9 = vld [vmem:[%s14630_s0 + $0x8] sm:$0xff]  ;;  %v129_v15 = vld [vmem:[%s14630_s0 + $0x20] sm:$0xff]  ;;  %vm8447_vm5 = vcmask 1041409   ;;  %vm8522_vm6 = vcmask 1041408  }
  0x72   :  { %v134_v10 = vld [vmem:[%s14631_s1 + $0x8] sm:$0xff]  ;;  %v144_v11 = vmul.f32 %v136_v7, %v128_v6  ;;  %v137_v16 = vld [vmem:[%s14631_s1 + $0x20] sm:$0xff]  ;;  %v132_v17 = vld [vmem:[%s14630_s0 + $0x38] sm:$0xff]  ;;  %vm8644_vm7 = vcmask 517120  }
  0x73   :  { %162 = vperm.xlu1 %10792, %v143_v4   ;;  %152 = vperm.xlu0 %10791, %v141_v8   ;;  %v142_v12 = vmul.f32 %v134_v10, %v126_v9  ;;  %v130_v13 = vld [vmem:[%s14630_s0 + $0x28] sm:$0xff]  ;;  %v140_v18 = vld [vmem:[%s14631_s1 + $0x38] sm:$0xff]  ;;  %v131_v20 = vld [vmem:[%s14630_s0 + $0x30] sm:$0xff]  ;;  %v145_v22 = vmul.f32 %v137_v16, %v129_v15  ;;  %s12080_s0 = smov 96  }
  0x74   :  { %v138_v14 = vld [vmem:[%s14631_s1 + $0x28] sm:$0xff]  ;;  %v139_v21 = vld [vmem:[%s14631_s1 + $0x30] sm:$0xff]  ;;  %v148_v23 = vmul.f32 %v140_v18, %v132_v17  ;;  %vm12430_vm1 = vmpackc.low %vm1001_vm0, %vm1001_vm0  ;;  %s12081_s1 = smov 32  }
  0x75   :  { %v146_v19 = vmul.f32 %v138_v14, %v130_v13  ;;  %v147_v24 = vmul.f32 %v139_v21, %v131_v20  ;;  %v8816_v25 = vld [vmem:[#allocation5] ss:$0 sm:$0xff]  ;;  %v8817_v28 = vld [vmem:[#allocation5 + $0x1] ss:$0 sm:$0xff] }
  0x77   :  { %167 = vperm.xlu1 %10792, %v144_v11   ;;  %157 = vperm.xlu0 %10791, %v142_v12  }
  0x7b   :  { %177 = vperm.xlu1 %10792, %v146_v19   ;;  %172 = vperm.xlu0 %10791, %v145_v22  }
  0x7f   :  { %187 = vperm.xlu1 %10792, %v148_v23   ;;  %182 = vperm.xlu0 %10791, %v147_v24  }
  0xf2   :  { %v163_v26 = vpop.permute.xlu1 %162  ;;  %v153_v27 = vpop.permute.xlu0 %152 }
  0xf3   :  { %v196_v29 = vmul.f32 %v8816_v25, %v163_v26  ;;  %v194_v30 = vmul.f32 %v8816_v25, %v153_v27 }
  0xf5   :  { %v207_v32 = vadd.f32 %v8817_v28, %v194_v30  ;;  %v209_v36 = vadd.f32 %v8817_v28, %v196_v29 }
  0xf6   :  { %v168_v31 = vpop.permute.xlu1 %167  ;;  %v158_v33 = vpop.permute.xlu0 %157 }
  0xf7   :  { %v197_v34 = vmul.f32 %v8816_v25, %v168_v31  ;;  %v195_v35 = vmul.f32 %v8816_v25, %v158_v33  ;;  %217 = vadd.xlane.f32.xlu0 %v207_v32 }
  0xf9   :  { %v208_v38 = vadd.f32 %v8817_v28, %v195_v35  ;;  %v210_v42 = vadd.f32 %v8817_v28, %v197_v34 }
  0xfa   :  { %v178_v37 = vpop.permute.xlu1 %177  ;;  %v173_v39 = vpop.permute.xlu0 %172 }
  0xfb   :  { %v199_v40 = vmul.f32 %v8816_v25, %v178_v37  ;;  %v198_v41 = vmul.f32 %v8816_v25, %v173_v39  ;;  %221 = vadd.xlane.f32.xlu0 %v209_v36  ;;  %219 = vadd.xlane.f32.xlu1 %v208_v38 }
  0xfd   :  { %v211_v43 = vadd.f32 %v8817_v28, %v198_v41  ;;  %v212_v47 = vadd.f32 %v8817_v28, %v199_v40 }
  0xfe   :  { %v188_v44 = vpop.permute.xlu1 %187  ;;  %v183_v45 = vpop.permute.xlu0 %182 }
  0xff   :  { %v200_v46 = vmul.f32 %v8816_v25, %v183_v45  ;;  %223 = vadd.xlane.f32.xlu0 %v210_v42  ;;  %225 = vadd.xlane.f32.xlu1 %v211_v43  ;;  %v201_v48 = vmul.f32 %v8816_v25, %v188_v44 }
 0x101   :  { %v213_v49 = vadd.f32 %v8817_v28, %v200_v46  ;;  %v214_v50 = vadd.f32 %v8817_v28, %v201_v48  ;;  %v8819_v46 = vld [vmem:[#allocation5 + $0x3] ss:$0 sm:$0xff] }
 0x103   :  { %227 = vadd.xlane.f32.xlu0 %v212_v47  ;;  %229 = vadd.xlane.f32.xlu1 %v213_v49 }
 0x107   :  { %231 = vadd.xlane.f32.xlu0 %v214_v50 }
 0x184   :  { %v218_v51 = vpop.xlane.xlu0 %217 }
 0x185   :  { %v234_v52 = vmul.f32 0.0078125, %v218_v51 }
 0x187   :  { %v12300_v53 = vsub.f32 %v207_v32, %v234_v52 }
 0x188   :  { %v220_v54 = vpop.xlane.xlu1 %219  ;;  %v222_v55 = vpop.xlane.xlu0 %221 }
 0x189   :  { %v235_v56 = vmul.f32 0.0078125, %v220_v54  ;;  %v236_v57 = vmul.f32 0.0078125, %v222_v55  ;;  %v250_v58 = vmul.f32 %v12300_v53, %v12300_v53 }
 0x18b   :  { %258 = vadd.xlane.f32.xlu1 %v250_v58  ;;  %v12304_v59 = vsub.f32 %v208_v38, %v235_v56  ;;  %v12306_v60 = vsub.f32 %v209_v36, %v236_v57 }
 0x18c   :  { %v226_v61 = vpop.xlane.xlu1 %225  ;;  %v224_v62 = vpop.xlane.xlu0 %223 }
 0x18d   :  { %v238_v63 = vmul.f32 0.0078125, %v226_v61  ;;  %v237_v1 = vmul.f32 0.0078125, %v224_v62  ;;  %v251_v2 = vmul.f32 %v12304_v59, %v12304_v59  ;;  %v252_v3 = vmul.f32 %v12306_v60, %v12306_v60 }
 0x18f   :  { %260 = vadd.xlane.f32.xlu0 %v251_v2  ;;  %262 = vadd.xlane.f32.xlu1 %v252_v3  ;;  %v12312_v4 = vsub.f32 %v211_v43, %v238_v63  ;;  %v12314_v5 = vsub.f32 %v210_v42, %v237_v1  ;;  %v8818_v42 = vld [vmem:[#allocation5 + $0x2] ss:$0 sm:$0xff]  ;;  %v331_v1 = vld [vmem:[#allocation2 + $0x8] sm:$0xff] }
 0x190   :  { %v230_v6 = vpop.xlane.xlu1 %229  ;;  %v228_v7 = vpop.xlane.xlu0 %227 }
 0x191   :  { %v240_v8 = vmul.f32 0.0078125, %v230_v6  ;;  %v239_v9 = vmul.f32 0.0078125, %v228_v7  ;;  %v254_v10 = vmul.f32 %v12312_v4, %v12312_v4  ;;  %v253_v11 = vmul.f32 %v12314_v5, %v12314_v5 }
 0x193   :  { %266 = vadd.xlane.f32.xlu1 %v254_v10  ;;  %264 = vadd.xlane.f32.xlu0 %v253_v11  ;;  %v12320_v12 = vsub.f32 %v213_v49, %v240_v8  ;;  %v12322_v13 = vsub.f32 %v212_v47, %v239_v9  ;;  %v334_v9 = vld [vmem:[#allocation2 + $0x20] sm:$0xff] }
 0x194   :  { %v232_v14 = vpop.xlane.xlu0 %231 }
 0x195   :  { %v241_v15 = vmul.f32 0.0078125, %v232_v14  ;;  %v256_v16 = vmul.f32 %v12320_v12, %v12320_v12  ;;  %v255_v17 = vmul.f32 %v12322_v13, %v12322_v13 }
 0x197   :  { %270 = vadd.xlane.f32.xlu1 %v256_v16  ;;  %268 = vadd.xlane.f32.xlu0 %v255_v17  ;;  %v12328_v18 = vsub.f32 %v214_v50, %v241_v15  ;;  %v330_v50 = vld [vmem:[#allocation2] sm:$0xff]  ;;  %v333_v15 = vld [vmem:[#allocation2 + $0x18] sm:$0xff] }
 0x199   :  { %v257_v19 = vmul.f32 %v12328_v18, %v12328_v18 }
 0x19b   :  { %272 = vadd.xlane.f32.xlu0 %v257_v19 }
 0x218   :  { %v259_v20 = vpop.xlane.xlu1 %258 }
 0x219   :  { %v274_v21 = vmul.f32 0.0078125, %v259_v20 }
 0x21b   :  { %v282_v22 = vadd.f32 1e-05, %v274_v21 }
 0x21c   :  { %v263_v23 = vpop.xlane.xlu1 %262  ;;  %v261_v24 = vpop.xlane.xlu0 %260 }
 0x21d   :  { %11393 = vrsqrt.f32 %v282_v22  ;;  %v276_v25 = vmul.f32 0.0078125, %v263_v23  ;;  %v275_v26 = vmul.f32 0.0078125, %v261_v24  ;;  %v336_v22 = vld [vmem:[#allocation2 + $0x30] sm:$0xff] }
 0x21f   :  { %v284_v27 = vadd.f32 1e-05, %v276_v25  ;;  %v283_v28 = vadd.f32 1e-05, %v275_v26  ;;  %v335_v25 = vld [vmem:[#allocation2 + $0x28] sm:$0xff] }
 0x220   :  { %v267_v29 = vpop.xlane.xlu1 %266  ;;  %v265_v30 = vpop.xlane.xlu0 %264 }
 0x221   :  { %11395 = vrsqrt.f32 %v284_v27  ;;  %v278_v31 = vmul.f32 0.0078125, %v267_v29  ;;  %v277_v32 = vmul.f32 0.0078125, %v265_v30  ;;  %v337_v29 = vld [vmem:[#allocation2 + $0x38] sm:$0xff] }
 0x222   :  { %11397 = vrsqrt.f32 %v283_v28 }
 0x223   :  { %v286_v33 = vadd.f32 1e-05, %v278_v31  ;;  %v285_v34 = vadd.f32 1e-05, %v277_v32  ;;  %v11153_v32 = vld [vmem:[#allocation7 + $0x4] ss:$12 sps:$4 sm:$0xff]  }
 0x224   :  { %v271_v35 = vpop.xlane.xlu1 %270  ;;  %v269_v36 = vpop.xlane.xlu0 %268  ;;  %624 = vmatprep.subr.bf16.mxu0 %v11153_v32  ;;  %v11184_v32 = vld [vmem:[#allocation7 + $0xb0] ss:$12 sps:$4 sm:$0xff]  }
 0x225   :  { %11399 = vrsqrt.f32 %v286_v33  ;;  %v280_v37 = vmul.f32 0.0078125, %v271_v35  ;;  %v279_v38 = vmul.f32 0.0078125, %v269_v36  ;;  %v11156_v33 = vld [vmem:[#allocation7 + $0x1c] ss:$12 sps:$4 sm:$0xff]  }
 0x226   :  { %11401 = vrsqrt.f32 %v285_v34  ;;  %v11158_v34 = vld [vmem:[#allocation7 + $0x8] ss:$12 sps:$4 sm:$0xff]  }
 0x227   :  { %v11394_v39 = vpop.eup %11393  ;;  %v288_v40 = vadd.f32 1e-05, %v280_v37  ;;  %v287_v41 = vadd.f32 1e-05, %v279_v38  ;;  %9756 = vmatprep.subr.bf16.mxu1 %v11158_v34 }
 0x228   :  { %v273_v43 = vpop.xlane.xlu0 %272  ;;  %v298_v44 = vmul.f32 %v11394_v39, %v12300_v53  ;;  %v332_v53 = vld [vmem:[#allocation2 + $0x10] sm:$0xff]  ;;  %9757 = vmatpush3.bf16.msra.mxu1 %v11158_v34 }
 0x229   :  { %11403 = vrsqrt.f32 %v288_v40  ;;  %v281_v45 = vmul.f32 0.0078125, %v273_v43 }
 0x22a   :  { %11405 = vrsqrt.f32 %v287_v41  ;;  %v310_v47 = vmul.f32 %v8818_v42, %v298_v44 }
 0x22b   :  { %v11396_v48 = vpop.eup %11395  ;;  %v289_v49 = vadd.f32 1e-05, %v281_v45 }
 0x22c   :  { %v11398_v51 = vpop.eup %11397  ;;  %v322_v52 = vadd.f32 %v8819_v46, %v310_v47  ;;  %v300_v54 = vmul.f32 %v11396_v48, %v12306_v60 }
 0x22d   :  { %11407 = vrsqrt.f32 %v289_v49  ;;  %v299_v55 = vmul.f32 %v11398_v51, %v12304_v59 }
 0x22e   :  { %v12335_v56 = vadd.f32 %v330_v50, %v322_v52  ;;  %v312_v57 = vmul.f32 %v8818_v42, %v300_v54 }
 0x22f   :  { %v11400_v58 = vpop.eup %11399  ;;  %v311_v61 = vmul.f32 %v8818_v42, %v299_v55 }
 0x230   :  { %v11402_v62 = vpop.eup %11401  ;;  %348 = vadd.xlane.f32.xlu1 %v12335_v56  ;;  %v324_v63 = vadd.f32 %v8819_v46, %v312_v57  ;;  %v302_v2 = vmul.f32 %v11400_v58, %v12312_v4 }
 0x231   :  { %v323_v3 = vadd.f32 %v8819_v46, %v311_v61  ;;  %v301_v6 = vmul.f32 %v11402_v62, %v12314_v5 }
 0x232   :  { %v12340_v60 = vadd.f32 %v332_v53, %v324_v63  ;;  %v314_v7 = vmul.f32 %v8818_v42, %v302_v2 }
 0x233   :  { %v11404_v59 = vpop.eup %11403  ;;  %v12342_v8 = vadd.f32 %v331_v1, %v323_v3  ;;  %v313_v10 = vmul.f32 %v8818_v42, %v301_v6 }
 0x234   :  { %v11406_v11 = vpop.eup %11405  ;;  %352 = vadd.xlane.f32.xlu1 %v12340_v60  ;;  %v326_v14 = vadd.f32 %v8819_v46, %v314_v7  ;;  %v304_v16 = vmul.f32 %v11404_v59, %v12320_v12  ;;  %v11159_v59 = vld [vmem:[#allocation7 + $0x18] ss:$12 sps:$4 sm:$0xff]  }
 0x235   :  { %350 = vadd.xlane.f32.xlu0 %v12342_v8  ;;  %v325_v4 = vadd.f32 %v8819_v46, %v313_v10  ;;  %v303_v5 = vmul.f32 %v11406_v11, %v12322_v13  ;;  %v11160_v10 = vld [vmem:[#allocation7 + $0x34] ss:$12 sps:$4 sm:$0xff]  }
 0x236   :  { %v12348_v17 = vadd.f32 %v334_v9, %v326_v14  ;;  %v316_v19 = vmul.f32 %v8818_v42, %v304_v16  ;;  %v11162_v11 = vld [vmem:[#allocation7 + $0x20] ss:$12 sps:$4 sm:$0xff]   ;;  %v11163_v14 = vld [vmem:[#allocation7 + $0x30] ss:$12 sps:$4 sm:$0xff]   ;;  %v11166_v16 = vld [vmem:[#allocation7 + $0x38] ss:$12 sps:$4 sm:$0xff]  }
 0x237   :  { %v11408_v20 = vpop.eup %11407  ;;  %v12350_v21 = vadd.f32 %v333_v15, %v325_v4  ;;  %v315_v23 = vmul.f32 %v8818_v42, %v303_v5  ;;  %9758 = vmatprep.subr.bf16.mxu1 %v11162_v11  ;;  %v11164_v15 = vld [vmem:[#allocation7 + $0x4c] ss:$12 sps:$4 sm:$0xff]   ;;  %v11167_v4 = vld [vmem:[#allocation7 + $0x48] ss:$12 sps:$4 sm:$0xff]   ;;  %v11168_v5 = vld [vmem:[#allocation7 + $0x64] ss:$12 sps:$4 sm:$0xff]  }
 0x238   :  { %356 = vadd.xlane.f32.xlu1 %v12348_v17  ;;  %v328_v24 = vadd.f32 %v8819_v46, %v316_v19  ;;  %v305_v26 = vmul.f32 %v11408_v20, %v12328_v18  ;;  %v11155_v18 = vld [vmem:[#allocation7] ss:$12 sps:$4 sm:$0xff]   ;;  %9759 = vmatpush3.bf16.msra.mxu1 %v11162_v11  ;;  %v11170_v19 = vld [vmem:[#allocation7 + $0x50] ss:$12 sps:$4 sm:$0xff]  }
 0x239   :  { %354 = vadd.xlane.f32.xlu0 %v12350_v21  ;;  %v327_v12 = vadd.f32 %v8819_v46, %v315_v23  ;;  %625 = vmatpush1.bf16.msra.mxu0 %v11155_v18  ;;  %v11171_v20 = vld [vmem:[#allocation7 + $0x60] ss:$12 sps:$4 sm:$0xff]   ;;  %v11174_v23 = vld [vmem:[#allocation7 + $0x68] ss:$12 sps:$4 sm:$0xff]  }
 0x23a   :  { %v12355_v27 = vadd.f32 %v336_v22, %v328_v24  ;;  %v317_v13 = vmul.f32 %v8818_v42, %v305_v26  ;;  %626 = vmatprep.subr.bf16.mxu0 %v11156_v33  ;;  %9760 = vmatprep.subr.bf16.mxu1 %v11166_v16  ;;  %v11172_v22 = vld [vmem:[#allocation7 + $0x7c] ss:$12 sps:$4 sm:$0xff]   ;;  %v11175_v24 = vld [vmem:[#allocation7 + $0x78] ss:$12 sps:$4 sm:$0xff]   ;;  %v11178_v26 = vld [vmem:[#allocation7 + $0x80] ss:$12 sps:$4 sm:$0xff]  }
 0x23b   :  { %v12357_v28 = vadd.f32 %v335_v25, %v327_v12  ;;  %v11176_v25 = vld [vmem:[#allocation7 + $0x94] ss:$12 sps:$4 sm:$0xff]   ;;  %v11179_v12 = vld [vmem:[#allocation7 + $0x90] ss:$12 sps:$4 sm:$0xff]  }
 0x23c   :  { %360 = vadd.xlane.f32.xlu1 %v12355_v27  ;;  %v329_v30 = vadd.f32 %v8819_v46, %v317_v13  ;;  %9761 = vmatpush3.bf16.msra.mxu1 %v11166_v16  ;;  %v11180_v13 = vld [vmem:[#allocation7 + $0xac] ss:$12 sps:$4 sm:$0xff]   ;;  %v8821_v16 = vld [vmem:[#allocation5 + $0x5] ss:$0 sm:$0xff] }
 0x23d   :  { %358 = vadd.xlane.f32.xlu0 %v12357_v28  ;;  %627 = vmatpush1.bf16.msra.mxu0 %v11159_v59 }
 0x23e   :  { %v12361_v31 = vadd.f32 %v337_v29, %v329_v30  ;;  %628 = vmatprep.subr.bf16.mxu0 %v11160_v10  ;;  %9762 = vmatprep.subr.bf16.mxu1 %v11170_v19  ;;  %v11182_v29 = vld [vmem:[#allocation7 + $0x98] ss:$12 sps:$4 sm:$0xff]   ;;  %v11183_v30 = vld [vmem:[#allocation7 + $0xa8] ss:$12 sps:$4 sm:$0xff]  }
 0x240   :  { %9763 = vmatpush3.bf16.msra.mxu1 %v11170_v19 }
 0x241   :  { %362 = vadd.xlane.f32.xlu0 %v12361_v31  ;;  %629 = vmatpush1.bf16.msra.mxu0 %v11163_v14 }
 0x242   :  { %630 = vmatprep.subr.bf16.mxu0 %v11164_v15  ;;  %9764 = vmatprep.subr.bf16.mxu1 %v11174_v23 }
 0x244   :  { %9765 = vmatpush3.bf16.msra.mxu1 %v11174_v23 }
 0x245   :  { %631 = vmatpush1.bf16.msra.mxu0 %v11167_v4  ;;  %9766 = vmatprep.subr.bf16.mxu1 %v11178_v26 }
 0x246   :  { %632 = vmatprep.subr.bf16.mxu0 %v11168_v5 }
 0x248   :  { %9767 = vmatpush3.bf16.msra.mxu1 %v11178_v26 }
 0x249   :  { %633 = vmatpush1.bf16.msra.mxu0 %v11171_v20  ;;  %9768 = vmatprep.subr.bf16.mxu1 %v11182_v29 }
 0x24a   :  { %634 = vmatprep.subr.bf16.mxu0 %v11172_v22 }
 0x24c   :  { %9769 = vmatpush3.bf16.msra.mxu1 %v11182_v29 }
 0x24d   :  { %635 = vmatpush1.bf16.msra.mxu0 %v11175_v24  ;;  %9770 = vmatprep.subr.bf16.mxu1 %v11184_v32 }
 0x24e   :  { %636 = vmatprep.subr.bf16.mxu0 %v11176_v25 }
 0x250   :  { %9771 = vmatpush3.bf16.msra.mxu1 %v11184_v32 }
 0x251   :  { %637 = vmatpush1.bf16.msra.mxu0 %v11179_v12 }
 0x252   :  { %638 = vmatprep.subr.bf16.mxu0 %v11180_v13 }
 0x255   :  { %639 = vmatpush1.bf16.msra.mxu0 %v11183_v30 }
 0x2bd   :  { %v349_v35 = vpop.xlane.xlu1 %348 }
 0x2be   :  { %v364_v36 = vmul.f32 0.0078125, %v349_v35 }
 0x2c0   :  { %v12365_v37 = vsub.f32 %v12335_v56, %v364_v36 }
 0x2c1   :  { %v353_v38 = vpop.xlane.xlu1 %352 }
 0x2c2   :  { %v366_v39 = vmul.f32 0.0078125, %v353_v38  ;;  %v351_v40 = vpop.xlane.xlu0 %350  ;;  %v380_v41 = vmul.f32 %v12365_v37, %v12365_v37 }
 0x2c3   :  { %v365_v42 = vmul.f32 0.0078125, %v351_v40 }
 0x2c4   :  { %388 = vadd.xlane.f32.xlu1 %v380_v41  ;;  %v12370_v43 = vsub.f32 %v12340_v60, %v366_v39 }
 0x2c5   :  { %v357_v44 = vpop.xlane.xlu1 %356  ;;  %v12373_v45 = vsub.f32 %v12342_v8, %v365_v42 }
 0x2c6   :  { %v368_v46 = vmul.f32 0.0078125, %v357_v44  ;;  %v355_v47 = vpop.xlane.xlu0 %354  ;;  %v382_v48 = vmul.f32 %v12370_v43, %v12370_v43 }
 0x2c7   :  { %v367_v49 = vmul.f32 0.0078125, %v355_v47  ;;  %v381_v50 = vmul.f32 %v12373_v45, %v12373_v45 }
 0x2c8   :  { %392 = vadd.xlane.f32.xlu1 %v382_v48  ;;  %v12380_v51 = vsub.f32 %v12348_v17, %v368_v46 }
 0x2c9   :  { %390 = vadd.xlane.f32.xlu0 %v381_v50  ;;  %v361_v52 = vpop.xlane.xlu1 %360  ;;  %v12383_v54 = vsub.f32 %v12350_v21, %v367_v49 }
 0x2ca   :  { %v370_v55 = vmul.f32 0.0078125, %v361_v52  ;;  %v359_v57 = vpop.xlane.xlu0 %358  ;;  %v384_v58 = vmul.f32 %v12380_v51, %v12380_v51 }
 0x2cb   :  { %v369_v53 = vmul.f32 0.0078125, %v359_v57  ;;  %v383_v61 = vmul.f32 %v12383_v54, %v12383_v54 }
 0x2cc   :  { %396 = vadd.xlane.f32.xlu1 %v384_v58  ;;  %v12390_v62 = vsub.f32 %v12355_v27, %v370_v55 }
 0x2cd   :  { %394 = vadd.xlane.f32.xlu0 %v383_v61  ;;  %v12393_v63 = vsub.f32 %v12357_v28, %v369_v53 }
 0x2ce   :  { %v363_v1 = vpop.xlane.xlu0 %362  ;;  %v386_v2 = vmul.f32 %v12390_v62, %v12390_v62 }
 0x2cf   :  { %v371_v3 = vmul.f32 0.0078125, %v363_v1  ;;  %v385_v6 = vmul.f32 %v12393_v63, %v12393_v63 }
 0x2d0   :  { %400 = vadd.xlane.f32.xlu1 %v386_v2 }
 0x2d1   :  { %398 = vadd.xlane.f32.xlu0 %v385_v6  ;;  %v12400_v7 = vsub.f32 %v12361_v31, %v371_v3  ;;  %v8820_v6 = vld [vmem:[#allocation5 + $0x4] ss:$0 sm:$0xff] }
 0x2d3   :  { %v387_v9 = vmul.f32 %v12400_v7, %v12400_v7 }
 0x2d5   :  { %402 = vadd.xlane.f32.xlu0 %v387_v9 }
 0x351   :  { %v389_v18 = vpop.xlane.xlu1 %388 }
 0x352   :  { %v404_v33 = vmul.f32 0.0078125, %v389_v18 }
 0x354   :  { %v412_v34 = vadd.f32 1e-05, %v404_v33 }
 0x355   :  { %v393_v35 = vpop.xlane.xlu1 %392 }
 0x356   :  { %11409 = vrsqrt.f32 %v412_v34  ;;  %v406_v36 = vmul.f32 0.0078125, %v393_v35  ;;  %v391_v38 = vpop.xlane.xlu0 %390 }
 0x357   :  { %v405_v39 = vmul.f32 0.0078125, %v391_v38 }
 0x358   :  { %v414_v40 = vadd.f32 1e-05, %v406_v36 }
 0x359   :  { %v413_v41 = vadd.f32 1e-05, %v405_v39  ;;  %v397_v42 = vpop.xlane.xlu1 %396 }
 0x35a   :  { %11411 = vrsqrt.f32 %v414_v40  ;;  %v408_v44 = vmul.f32 0.0078125, %v397_v42  ;;  %v395_v46 = vpop.xlane.xlu0 %394 }
 0x35b   :  { %11413 = vrsqrt.f32 %v413_v41  ;;  %v407_v47 = vmul.f32 0.0078125, %v395_v46  ;;  %v12418_v46 = vld [vmem:[#allocation5 + $0x7] ss:$0 sm:$0xff] }
 0x35c   :  { %v416_v48 = vadd.f32 1e-05, %v408_v44 }
 0x35d   :  { %v415_v49 = vadd.f32 1e-05, %v407_v47  ;;  %v401_v50 = vpop.xlane.xlu1 %400 }
 0x35e   :  { %11415 = vrsqrt.f32 %v416_v48  ;;  %v410_v52 = vmul.f32 0.0078125, %v401_v50  ;;  %v399_v55 = vpop.xlane.xlu0 %398 }
 0x35f   :  { %11417 = vrsqrt.f32 %v415_v49  ;;  %v409_v57 = vmul.f32 0.0078125, %v399_v55 }
 0x360   :  { %v11410_v58 = vpop.eup %11409  ;;  %v418_v53 = vadd.f32 1e-05, %v410_v52 }
 0x361   :  { %v417_v61 = vadd.f32 1e-05, %v409_v57  ;;  %v428_v2 = vmul.f32 %v11410_v58, %v12365_v37  ;;  %v8848_v57 = vld [vmem:[#allocation5 + $0x8] ss:$0 sm:$0xff] }
 0x362   :  { %11419 = vrsqrt.f32 %v418_v53  ;;  %v403_v1 = vpop.xlane.xlu0 %402  ;;  %v14657_v53 = vmov 0 }
 0x363   :  { %11421 = vrsqrt.f32 %v417_v61  ;;  %v411_v3 = vmul.f32 0.0078125, %v403_v1  ;;  %v440_v15 = vmul.f32 %v8820_v6, %v428_v2  ;;  %v14658_v53 = vsel %vm12430_vm1, 4294967295, %v14657_v53 }
 0x364   :  { %v11412_v59 = vpop.eup %11411  ;;  %14659 = vst [vmem:[#allocation19_spill] sm:$0xff] %v14658_v53 }
 0x365   :  { %v11414_v9 = vpop.eup %11413  ;;  %v419_v10 = vadd.f32 1e-05, %v411_v3  ;;  %v430_v11 = vmul.f32 %v11412_v59, %v12370_v43  ;;  %v452_v37 = vadd.f32 %v8821_v16, %v440_v15 }
 0x366   :  { %v429_v14 = vmul.f32 %v11414_v9, %v12373_v45 }
 0x367   :  { %11423 = vrsqrt.f32 %v419_v10  ;;  %v442_v20 = vmul.f32 %v8820_v6, %v430_v11 }
 0x368   :  { %v11416_v4 = vpop.eup %11415  ;;  %v441_v5 = vmul.f32 %v8820_v6, %v429_v14 }
 0x369   :  { %v11418_v19 = vpop.eup %11417  ;;  %v432_v22 = vmul.f32 %v11416_v4, %v12380_v51  ;;  %v454_v43 = vadd.f32 %v8821_v16, %v442_v20 }
 0x36a   :  { %v453_v23 = vadd.f32 %v8821_v16, %v441_v5  ;;  %v431_v24 = vmul.f32 %v11418_v19, %v12383_v54 }
 0x36b   :  { %v444_v29 = vmul.f32 %v8820_v6, %v432_v22 }
 0x36c   :  { %v11420_v25 = vpop.eup %11419  ;;  %v460_v26 = vpack.c.bf16 %v453_v23, %v452_v37  ;;  %v443_v12 = vmul.f32 %v8820_v6, %v431_v24 }
 0x36d   :  { %v11422_v13 = vpop.eup %11421  ;;  %v434_v32 = vmul.f32 %v11420_v25, %v12390_v62  ;;  %v456_v54 = vadd.f32 %v8821_v16, %v444_v29 }
 0x36e   :  { %657 = vmatmul.mubr.bf16.vlgmr.msra.gmra.mrb[0].mxu0 %v460_v26  ;;  %9772 = vmatprep.mubr.bf16.mxu1 %v460_v26  ;;  %v455_v45 = vadd.f32 %v8821_v16, %v443_v12  ;;  %v433_v30 = vmul.f32 %v11422_v13, %v12393_v63  ;;  %v12415_v63 = vld [vmem:[#allocation5 + $0x6] ss:$0 sm:$0xff] }
 0x36f   :  { %666 = vmatprep.mubr.bf16.mxu0 %v14643_v0  ;;  %v446_v36 = vmul.f32 %v8820_v6, %v434_v32 }
 0x370   :  { %v461_v51 = vpack.c.bf16 %v455_v45, %v454_v43  ;;  %v445_v18 = vmul.f32 %v8820_v6, %v433_v30 }
 0x371   :  { %v11424_v33 = vpop.eup %11423  ;;  %v458_v40 = vadd.f32 %v8821_v16, %v446_v36 }
 0x372   :  { %9773 = vmatmul.mubr.bf16.vlgmr.msra.gmra.mrb[0].mxu1 %v461_v51  ;;  %v457_v34 = vadd.f32 %v8821_v16, %v445_v18  ;;  %v435_v35 = vmul.f32 %v11424_v33, %v12400_v7 }
 0x374   :  { %v462_v38 = vpack.c.bf16 %v457_v34, %v456_v54  ;;  %v447_v39 = vmul.f32 %v8820_v6, %v435_v35 }
 0x376   :  { %667 = vmatmul.mubr.bf16.gmra.mrb[4].mxu0 %v461_v51  ;;  %9776 = vmatprep.mubr.bf16.mxu1 %v462_v38  ;;  %v459_v41 = vadd.f32 %v8821_v16, %v447_v39 }
 0x377   :  { %676 = vmatprep.mubr.bf16.mxu0 %v14643_v0 }
 0x378   :  { %v463_v62 = vpack.c.bf16 %v459_v41, %v458_v40 }
 0x37a   :  { %9777 = vmatmul.mubr.bf16.gmra.mrb[4].mxu1 %v463_v62 }
 0x37e   :  { %677 = vmatmul.mubr.bf16.gmra.mrb[8].mxu0 %v462_v38 }
 0x37f   :  { %686 = vmatprep.mubr.bf16.mxu0 %v14643_v0 }
 0x386   :  { %687 = vmatmul.mubr.bf16.gmra.mrb[12].mxu0 %v463_v62 }
 0x441   :  { %v658_v42 = vpop.f32.mrb[0].mxu0 }
 0x442   :  { %v767_v7 = vadd.f32 %v12415_v63, %v658_v42  ;;  %v660_v44 = vpop.f32.mrb[1].mxu0 }
 0x443   :  { %v662_v47 = vpop.f32.mrb[2].mxu0  ;;  %v788_v50 = vadd.f32 %v12418_v46, %v660_v44 }
 0x444   :  { %v12420_v48 = vmul.f32 0.17677669, %v767_v7  ;;  %v664_v49 = vpop.f32.mrb[3].mxu0  ;;  %v768_v14 = vadd.f32 %v12415_v63, %v662_v47 }
 0x445   :  { %v789_v52 = vadd.f32 %v12418_v46, %v664_v49  ;;  %v9774_v55 = vpop.f32.mrb[0].mxu1 }
 0x446   :  { %817 = vrot.lane.b32.xlu0 %v12420_v48, %s12080_s0  ;;  %v731_v58 = vpop.f32.mrb[1].mxu1  ;;  %9788 = vmatprep.mubr.msk.f32.mxu1 %vm1001_vm0, %v12420_v48  ;;  %v803_v3 = vadd.f32 %v9774_v55, %v8848_v57  ;;  %v12455_v25 = vmul.f32 0.17677669, %v768_v14 }
 0x447   :  { %v9775_v61 = vpop.f32.mrb[2].mxu1  ;;  %v12434_v1 = vpack.i.bf16 %v789_v52, %v788_v50  ;;  %v10389_v2 = vpack.c.bf16 %v789_v52, %v788_v50  ;;  %v801_v9 = vadd.f32 %v8848_v57, %v731_v58 }
 0x448   :  { %v804_v6 = vadd.f32 %v9775_v61, %v8848_v57  ;;  %v734_v59 = vpop.f32.mrb[3].mxu1 }
 0x449   :  { %v802_v10 = vadd.f32 %v8848_v57, %v734_v59  ;;  %10794 = vrot.lane.b32.xlu1 %v12434_v1, %s12080_s0  ;;  %v668_v11 = vpop.f32.mrb[4].mxu0  ;;  %10391 = vmatprep.subr.msk.bf16.mxu1 %vm12430_vm1, %v10389_v2 }
 0x44a   :  { %v670_v15 = vpop.f32.mrb[5].mxu0  ;;  %10394 = vmatpush3.bf16.xpose.msk.msra.mxu1 %vm12430_vm1, %v10389_v2  ;;  %v12443_v16 = vpack.i.bf16 %v804_v6, %v803_v3  ;;  %v12445_v4 = vpack.c.bf16 %v804_v6, %v803_v3  ;;  %v769_v12 = vadd.f32 %v12415_v63, %v668_v11 }
 0x44b   :  { %v672_v5 = vpop.f32.mrb[6].mxu0  ;;  %v12447_v19 = vpack.i.bf16 %v802_v10, %v801_v9  ;;  %v12449_v22 = vpack.c.bf16 %v802_v10, %v801_v9  ;;  %v790_v37 = vadd.f32 %v12418_v46, %v670_v15 }
 0x44c   :  { %v674_v20 = vpop.f32.mrb[7].mxu0  ;;  %v770_v51 = vadd.f32 %v12415_v63, %v672_v5  ;;  %v777_v39 = vmul.f32 0.17677669, %v769_v12 }
 0x44d   :  { %v791_v23 = vadd.f32 %v12418_v46, %v674_v20  ;;  %10799 = vrot.lane.b32.xlu1 %v12434_v1, %s12076_s5  ;;  %v9778_v24 = vpop.f32.mrb[4].mxu1 }
 0x44e   :  { %v747_v26 = vpop.f32.mrb[5].mxu1  ;;  %v807_v45 = vadd.f32 %v9778_v24, %v8848_v57  ;;  %v778_v49 = vmul.f32 0.17677669, %v770_v51 }
 0x44f   :  { %v9779_v13 = vpop.f32.mrb[6].mxu1  ;;  %v12458_v43 = vpack.i.bf16 %v791_v23, %v790_v37  ;;  %v10395_v29 = vpack.c.bf16 %v791_v23, %v790_v37  ;;  %v805_v18 = vadd.f32 %v8848_v57, %v747_v26 }
 0x450   :  { %v808_v30 = vadd.f32 %v9779_v13, %v8848_v57  ;;  %v750_v32 = vpop.f32.mrb[7].mxu1 }
 0x451   :  { %v806_v33 = vadd.f32 %v8848_v57, %v750_v32  ;;  %819 = vrot.lane.b32.xlu1 %v12455_v25, %s12080_s0  ;;  %10804 = vrot.lane.b32.xlu0 %v12458_v43, %s12080_s0  ;;  %v678_v54 = vpop.f32.mrb[8].mxu0 }
 0x452   :  { %v771_v34 = vadd.f32 %v12415_v63, %v678_v54  ;;  %10397 = vmatprep.subr.msk.bf16.mxu1 %vm12430_vm1, %v10395_v29  ;;  %v680_v35 = vpop.f32.mrb[9].mxu0  ;;  %v12468_v36 = vpack.i.bf16 %v808_v30, %v807_v45  ;;  %v12470_v38 = vpack.c.bf16 %v808_v30, %v807_v45 }
 0x453   :  { %10400 = vmatpush3.bf16.xpose.msk.msra.mxu1 %vm12430_vm1, %v10395_v29  ;;  %v682_v40 = vpop.f32.mrb[10].mxu0  ;;  %v12474_v41 = vpack.i.bf16 %v806_v33, %v805_v18  ;;  %v12476_v62 = vpack.c.bf16 %v806_v33, %v805_v18  ;;  %v792_v44 = vadd.f32 %v12418_v46, %v680_v35 }
 0x454   :  { %v779_v42 = vmul.f32 0.17677669, %v771_v34  ;;  %v684_v7 = vpop.f32.mrb[11].mxu0  ;;  %v772_v6 = vadd.f32 %v12415_v63, %v682_v40 }
 0x455   :  { %v793_v47 = vadd.f32 %v12418_v46, %v684_v7  ;;  %10809 = vrot.lane.b32.xlu1 %v12458_v43, %s12076_s5  ;;  %821 = vrot.lane.b32.xlu0 %v777_v39, %s12080_s0 }
 0x456   :  { %9802 = vmatprep.mubr.msk.f32.mxu0 %vm1001_vm0, %v779_v42 }
 0x457   :  { %v10401_v50 = vpack.c.bf16 %v793_v47, %v792_v44  ;;  %v10823_v52 = vpack.i.bf16 %v793_v47, %v792_v44 }
 0x459   :  { %823 = vrot.lane.b32.xlu1 %v778_v49, %s12080_s0  ;;  %825 = vrot.lane.b32.xlu0 %v779_v42, %s12080_s0  ;;  %v688_v55 = vpop.f32.mrb[12].mxu0 }
 0x45a   :  { %9789 = vmatmul.mubr.msk.f32.vlgmr.msra.gmra.mrb[8].mxu1 %vm1001_vm0, %v12455_v25  ;;  %10403 = vmatprep.subr.msk.bf16.mxu0 %vm12430_vm1, %v10401_v50  ;;  %v690_v57 = vpop.f32.mrb[13].mxu0  ;;  %v773_v10 = vadd.f32 %v12415_v63, %v688_v55 }
 0x45b   :  { %9791 = vmatprep.mubr.msk.f32.mxu1 %vm1001_vm0, %v777_v39  ;;  %10406 = vmatpush3.bf16.xpose.msk.msra.mxu0 %vm12430_vm1, %v10401_v50  ;;  %v692_v58 = vpop.f32.mrb[14].mxu0  ;;  %v794_v2 = vadd.f32 %v12418_v46, %v690_v57 }
 0x45c   :  { %v694_v61 = vpop.f32.mrb[15].mxu0  ;;  %v774_v11 = vadd.f32 %v12415_v63, %v692_v58  ;;  %v781_v14 = vmul.f32 0.17677669, %v773_v10 }
 0x45d   :  { %v795_v3 = vadd.f32 %v12418_v46, %v694_v61  ;;  %10824 = vrot.lane.b32.xlu0 %v10823_v52, %s12076_s5  ;;  %10814 = vrot.lane.b32.xlu1 %v10823_v52, %s12080_s0  ;;  %v780_v46 = vmul.f32 0.17677669, %v772_v6 }
 0x45e   :  { %9792 = vmatmul.mubr.msk.f32.gmra.mrb[10].mxu1 %vm1001_vm0, %v778_v49 }
 0x45f   :  { %v10828_v59 = vpack.i.bf16 %v795_v3, %v794_v2  ;;  %v10407_v9 = vpack.c.bf16 %v795_v3, %v794_v2 }
 0x461   :  { %10819 = vrot.lane.b32.xlu1 %v12434_v1, %s12081_s1  ;;  %10829 = vrot.lane.b32.xlu0 %v10828_v59, %s12080_s0  ;;  %v782_v1 = vmul.f32 0.17677669, %v774_v11 }
 0x462   :  { %10409 = vmatprep.subr.msk.bf16.mxu0 %vm12430_vm1, %v10407_v9 }
 0x463   :  { %10412 = vmatpush3.bf16.xpose.msk.msra.mxu0 %vm12430_vm1, %v10407_v9 }
 0x465   :  { %833 = vrot.lane.b32.xlu1 %v12420_v48, %s12076_s5  ;;  %827 = vrot.lane.b32.xlu0 %v780_v46, %s12080_s0 }
 0x469   :  { %835 = vrot.lane.b32.xlu1 %v12455_v25, %s12076_s5  ;;  %837 = vrot.lane.b32.xlu0 %v777_v39, %s12076_s5 }
 0x46a   :  { %9803 = vmatmul.mubr.msk.f32.vlgmr.msra.gmra.mrb[16].mxu0 %vm1001_vm0, %v780_v46 }
 0x46b   :  { %9805 = vmatprep.mubr.msk.f32.mxu0 %vm1001_vm0, %v781_v14 }
 0x46d   :  { %10834 = vrot.lane.b32.xlu1 %v12458_v43, %s12081_s1  ;;  %839 = vrot.lane.b32.xlu0 %v778_v49, %s12076_s5 }
 0x46e   :  { %9806 = vmatmul.mubr.msk.f32.gmra.mrb[18].mxu0 %vm1001_vm0, %v782_v1 }
 0x471   :  { %829 = vrot.lane.b32.xlu1 %v781_v14, %s12080_s0  ;;  %10839 = vrot.lane.b32.xlu0 %v10828_v59, %s12076_s5 }
 0x475   :  { %849 = vrot.lane.b32.xlu1 %v12420_v48, %s12081_s1  ;;  %10844 = vrot.lane.b32.xlu0 %v10823_v52, %s12081_s1 }
 0x479   :  { %831 = vrot.lane.b32.xlu1 %v782_v1, %s12080_s0  ;;  %841 = vrot.lane.b32.xlu0 %v779_v42, %s12076_s5 }
 0x47d   :  { %851 = vrot.lane.b32.xlu1 %v12455_v25, %s12081_s1  ;;  %843 = vrot.lane.b32.xlu0 %v780_v46, %s12076_s5 }
 0x481   :  { %853 = vrot.lane.b32.xlu1 %v777_v39, %s12081_s1  ;;  %855 = vrot.lane.b32.xlu0 %v778_v49, %s12081_s1 }
 0x485   :  { %10849 = vrot.lane.b32.xlu1 %v10828_v59, %s12081_s1  ;;  %845 = vrot.lane.b32.xlu0 %v781_v14, %s12076_s5 }
 0x489   :  { %847 = vrot.lane.b32.xlu1 %v782_v1, %s12076_s5  ;;  %857 = vrot.lane.b32.xlu0 %v779_v42, %s12081_s1 }
 0x48d   :  { %859 = vrot.lane.b32.xlu1 %v780_v46, %s12081_s1  ;;  %861 = vrot.lane.b32.xlu0 %v781_v14, %s12081_s1 }
 0x491   :  { %863 = vrot.lane.b32.xlu1 %v782_v1, %s12081_s1  ;;  %10859 = vrot.lane.b32.xlu0 %v12447_v19, %s12076_s5 }
 0x495   :  { %10854 = vrot.lane.b32.xlu1 %v12447_v19, %s12080_s0  ;;  %10869 = vrot.lane.b32.xlu0 %v12443_v16, %s12076_s5 }
 0x499   :  { %10864 = vrot.lane.b32.xlu1 %v12443_v16, %s12080_s0  ;;  %10879 = vrot.lane.b32.xlu0 %v12447_v19, %s12081_s1 }
 0x49d   :  { %10874 = vrot.lane.b32.xlu1 %v12474_v41, %s12080_s0 }
 0x4a1   :  { %10884 = vrot.lane.b32.xlu1 %v12468_v36, %s12080_s0 }
 0x4b8   :  { %v818_v63 = vpop.permute.xlu0 %817 }
 0x4b9   :  { %9816 = vmatprep.mubr.msk.f32.mxu1 %vm1001_vm0, %v818_v63 }
 0x4bb   :  { %v10795_v48 = vpop.permute.xlu1 %10794 }
 0x4bc   :  { %v10797_v15 = vunpack.i.h.bf16 %v10795_v48  ;;  %v10796_v5 = vunpack.i.l.bf16 %v10795_v48 }
 0x4be   :  { %v10413_v20 = vpack.c.bf16 %v10797_v15, %v10796_v5 }
 0x4bf   :  { %v10800_v37 = vpop.permute.xlu1 %10799 }
 0x4c0   :  { %10415 = vmatprep.subr.msk.bf16.mxu1 %vm12430_vm1, %v10413_v20  ;;  %v10802_v24 = vunpack.i.h.bf16 %v10800_v37  ;;  %v10801_v25 = vunpack.i.l.bf16 %v10800_v37 }
 0x4c1   :  { %10418 = vmatpush3.bf16.xpose.msk.msra.mxu1 %vm12430_vm1, %v10413_v20 }
 0x4c2   :  { %v10437_v45 = vpack.c.bf16 %v10802_v24, %v10801_v25 }
 0x4c3   :  { %v820_v19 = vpop.permute.xlu1 %819  ;;  %v10805_v23 = vpop.permute.xlu0 %10804 }
 0x4c4   :  { %v10807_v26 = vunpack.i.h.bf16 %v10805_v23  ;;  %v10806_v12 = vunpack.i.l.bf16 %v10805_v23 }
 0x4c6   :  { %v10419_v13 = vpack.c.bf16 %v10807_v26, %v10806_v12 }
 0x4c7   :  { %v10810_v43 = vpop.permute.xlu1 %10809  ;;  %v822_v29 = vpop.permute.xlu0 %821 }
 0x4c8   :  { %10421 = vmatprep.subr.msk.bf16.mxu1 %vm12430_vm1, %v10419_v13  ;;  %v10812_v51 = vunpack.i.h.bf16 %v10810_v43  ;;  %v10811_v18 = vunpack.i.l.bf16 %v10810_v43 }
 0x4c9   :  { %10424 = vmatpush3.bf16.xpose.msk.msra.mxu1 %vm12430_vm1, %v10419_v13 }
 0x4ca   :  { %10439 = vmatprep.subr.msk.bf16.mxu1 %vm12430_vm1, %v10437_v45  ;;  %v10443_v34 = vpack.c.bf16 %v10812_v51, %v10811_v18 }
 0x4cb   :  { %v824_v30 = vpop.permute.xlu1 %823  ;;  %v826_v32 = vpop.permute.xlu0 %825 }
 0x4cc   :  { %9830 = vmatprep.mubr.msk.f32.mxu0 %vm1001_vm0, %v826_v32 }
 0x4cf   :  { %v10815_v33 = vpop.permute.xlu1 %10814  ;;  %v10825_v54 = vpop.permute.xlu0 %10824 }
 0x4d0   :  { %v10817_v35 = vunpack.i.h.bf16 %v10815_v33  ;;  %v10816_v39 = vunpack.i.l.bf16 %v10815_v33  ;;  %9817 = vmatmul.mubr.msk.f32.vlgmr.msra.gmra.mrb[12].mxu1 %vm1001_vm0, %v820_v19  ;;  %v10827_v58 = vunpack.i.h.bf16 %v10825_v54  ;;  %v10826_v61 = vunpack.i.l.bf16 %v10825_v54 }
 0x4d1   :  { %9819 = vmatprep.mubr.msk.f32.mxu1 %vm1001_vm0, %v822_v29  ;;  %10442 = vmatpush3.bf16.xpose.msk.msra.mxu1 %vm12430_vm1, %v10437_v45 }
 0x4d2   :  { %v10425_v40 = vpack.c.bf16 %v10817_v35, %v10816_v39  ;;  %10445 = vmatprep.subr.msk.bf16.mxu1 %vm12430_vm1, %v10443_v34  ;;  %v10449_v59 = vpack.c.bf16 %v10827_v58, %v10826_v61 }
 0x4d3   :  { %v10820_v42 = vpop.permute.xlu1 %10819  ;;  %v10830_v7 = vpop.permute.xlu0 %10829 }
 0x4d4   :  { %v10822_v44 = vunpack.i.h.bf16 %v10820_v42  ;;  %v10821_v47 = vunpack.i.l.bf16 %v10820_v42  ;;  %v10832_v49 = vunpack.i.h.bf16 %v10830_v7  ;;  %v10831_v50 = vunpack.i.l.bf16 %v10830_v7  ;;  %9820 = vmatmul.mubr.msk.f32.gmra.mrb[14].mxu1 %vm1001_vm0, %v824_v30  ;;  %10427 = vmatprep.subr.msk.bf16.mxu0 %vm12430_vm1, %v10425_v40 }
 0x4d5   :  { %10430 = vmatpush3.bf16.xpose.msk.msra.mxu0 %vm12430_vm1, %v10425_v40 }
 0x4d6   :  { %v10431_v52 = vpack.c.bf16 %v10832_v49, %v10831_v50  ;;  %v10461_v2 = vpack.c.bf16 %v10822_v44, %v10821_v47 }
 0x4d7   :  { %v834_v55 = vpop.permute.xlu1 %833  ;;  %v828_v57 = vpop.permute.xlu0 %827 }
 0x4d8   :  { %10433 = vmatprep.subr.msk.bf16.mxu0 %vm12430_vm1, %v10431_v52  ;;  %9844 = vmatprep.mubr.msk.f32.mxu1 %vm1001_vm0, %v834_v55 }
 0x4d9   :  { %10448 = vmatpush3.bf16.xpose.msk.msra.mxu1 %vm12430_vm1, %v10443_v34 }
 0x4da   :  { %10463 = vmatprep.subr.msk.bf16.mxu1 %vm12430_vm1, %v10461_v2 }
 0x4db   :  { %v836_v3 = vpop.permute.xlu1 %835  ;;  %v838_v6 = vpop.permute.xlu0 %837 }
 0x4dd   :  { %10436 = vmatpush3.bf16.xpose.msk.msra.mxu0 %vm12430_vm1, %v10431_v52 }
 0x4de   :  { %10451 = vmatprep.subr.msk.bf16.mxu0 %vm12430_vm1, %v10449_v59 }
 0x4df   :  { %v10835_v9 = vpop.permute.xlu1 %10834  ;;  %v840_v46 = vpop.permute.xlu0 %839 }
 0x4e0   :  { %v10837_v10 = vunpack.i.h.bf16 %v10835_v9  ;;  %v10836_v11 = vunpack.i.l.bf16 %v10835_v9  ;;  %9845 = vmatmul.mubr.msk.f32.vlgmr.msra.gmra.mrb[16].mxu1 %vm1001_vm0, %v836_v3 }
 0x4e1   :  { %9847 = vmatprep.mubr.msk.f32.mxu1 %vm1001_vm0, %v838_v6  ;;  %10466 = vmatpush3.bf16.xpose.msk.msra.mxu1 %vm12430_vm1, %v10461_v2 }
 0x4e2   :  { %v10467_v14 = vpack.c.bf16 %v10837_v10, %v10836_v11 }
 0x4e3   :  { %v830_v1 = vpop.permute.xlu1 %829  ;;  %v10840_v63 = vpop.permute.xlu0 %10839 }
 0x4e4   :  { %v10842_v48 = vunpack.i.h.bf16 %v10840_v63  ;;  %v10841_v15 = vunpack.i.l.bf16 %v10840_v63  ;;  %9831 = vmatmul.mubr.msk.f32.vlgmr.msra.gmra.mrb[20].mxu0 %vm1001_vm0, %v828_v57  ;;  %9848 = vmatmul.mubr.msk.f32.gmra.mrb[18].mxu1 %vm1001_vm0, %v840_v46 }
 0x4e5   :  { %10469 = vmatprep.subr.msk.bf16.mxu1 %vm12430_vm1, %v10467_v14  ;;  %9833 = vmatprep.mubr.msk.f32.mxu0 %vm1001_vm0, %v830_v1 }
 0x4e6   :  { %v10455_v5 = vpack.c.bf16 %v10842_v48, %v10841_v15  ;;  %10454 = vmatpush3.bf16.xpose.msk.msra.mxu0 %vm12430_vm1, %v10449_v59 }
 0x4e7   :  { %v850_v20 = vpop.permute.xlu1 %849  ;;  %v10845_v37 = vpop.permute.xlu0 %10844 }
 0x4e8   :  { %10457 = vmatprep.subr.msk.bf16.mxu0 %vm12430_vm1, %v10455_v5  ;;  %9872 = vmatprep.mubr.msk.f32.mxu1 %vm1001_vm0, %v850_v20  ;;  %v10847_v19 = vunpack.i.h.bf16 %v10845_v37  ;;  %v10846_v23 = vunpack.i.l.bf16 %v10845_v37 }
 0x4e9   :  { %10472 = vmatpush3.bf16.xpose.msk.msra.mxu1 %vm12430_vm1, %v10467_v14 }
 0x4ea   :  { %10486 = vmatprep.subr.bf16.mxu1 %v12449_v22  ;;  %v10473_v26 = vpack.c.bf16 %v10847_v19, %v10846_v23 }
 0x4eb   :  { %v832_v24 = vpop.permute.xlu1 %831  ;;  %v842_v25 = vpop.permute.xlu0 %841 }
 0x4ec   :  { %9834 = vmatmul.mubr.msk.f32.gmra.mrb[22].mxu0 %vm1001_vm0, %v832_v24 }
 0x4ed   :  { %9858 = vmatprep.mubr.msk.f32.mxu0 %vm1001_vm0, %v842_v25 }
 0x4ee   :  { %10460 = vmatpush3.bf16.xpose.msk.msra.mxu0 %vm12430_vm1, %v10455_v5 }
 0x4ef   :  { %10475 = vmatprep.subr.msk.bf16.mxu0 %vm12430_vm1, %v10473_v26  ;;  %v852_v12 = vpop.permute.xlu1 %851  ;;  %v844_v13 = vpop.permute.xlu0 %843 }
 0x4f0   :  { %9873 = vmatmul.mubr.msk.f32.vlgmr.msra.gmra.mrb[20].mxu1 %vm1001_vm0, %v852_v12 }
 0x4f1   :  { %10488 = vmatpush3.bf16.msra.mxu1 %v12449_v22 }
 0x4f2   :  { %10490 = vmatprep.subr.bf16.mxu1 %v12445_v4 }
 0x4f3   :  { %v854_v43 = vpop.permute.xlu1 %853  ;;  %v856_v29 = vpop.permute.xlu0 %855 }
 0x4f4   :  { %9875 = vmatprep.mubr.msk.f32.mxu1 %vm1001_vm0, %v854_v43 }
 0x4f5   :  { %9859 = vmatmul.mubr.msk.f32.vlgmr.msra.gmra.mrb[24].mxu0 %vm1001_vm0, %v844_v13  ;;  %9876 = vmatmul.mubr.msk.f32.gmra.mrb[22].mxu1 %vm1001_vm0, %v856_v29 }
 0x4f6   :  { %10478 = vmatpush3.bf16.xpose.msk.msra.mxu0 %vm12430_vm1, %v10473_v26  ;;  %10492 = vmatpush3.bf16.msra.mxu1 %v12445_v4 }
 0x4f7   :  { %10494 = vmatprep.subr.bf16.mxu1 %v12476_v62  ;;  %v10850_v45 = vpop.permute.xlu1 %10849  ;;  %v846_v30 = vpop.permute.xlu0 %845 }
 0x4f8   :  { %v10852_v22 = vunpack.i.h.bf16 %v10850_v45  ;;  %v10851_v32 = vunpack.i.l.bf16 %v10850_v45  ;;  %9861 = vmatprep.mubr.msk.f32.mxu0 %vm1001_vm0, %v846_v30 }
 0x4fa   :  { %v10479_v51 = vpack.c.bf16 %v10852_v22, %v10851_v32 }
 0x4fb   :  { %v848_v18 = vpop.permute.xlu1 %847  ;;  %v858_v33 = vpop.permute.xlu0 %857 }
 0x4fc   :  { %9862 = vmatmul.mubr.msk.f32.gmra.mrb[26].mxu0 %vm1001_vm0, %v848_v18  ;;  %10481 = vmatprep.subr.msk.bf16.mxu0 %vm12430_vm1, %v10479_v51 }
 0x4fd   :  { %9886 = vmatprep.mubr.msk.f32.mxu0 %vm1001_vm0, %v858_v33 }
 0x4fe   :  { %10484 = vmatpush3.bf16.xpose.msk.msra.mxu0 %vm12430_vm1, %v10479_v51 }
 0x4ff   :  { %v862_v4 = vpop.permute.xlu0 %861  ;;  %v860_v54 = vpop.permute.xlu1 %859 }
 0x503   :  { %v10860_v34 = vpop.permute.xlu0 %10859  ;;  %v864_v7 = vpop.permute.xlu1 %863 }
 0x504   :  { %v10862_v35 = vunpack.i.h.bf16 %v10860_v34  ;;  %v10861_v39 = vunpack.i.l.bf16 %v10860_v34 }
 0x505   :  { %9887 = vmatmul.mubr.msk.f32.vlgmr.msra.gmra.mrb[28].mxu0 %vm1001_vm0, %v860_v54 }
 0x506   :  { %9889 = vmatprep.mubr.msk.f32.mxu0 %vm1001_vm0, %v862_v4  ;;  %v10517_v40 = vpack.c.bf16 %v10862_v35, %v10861_v39 }
 0x507   :  { %v10870_v42 = vpop.permute.xlu0 %10869  ;;  %v12679_v12 = vpop.permute.xlu1 %10854 }
 0x508   :  { %v10872_v44 = vunpack.i.h.bf16 %v10870_v42  ;;  %v10871_v47 = vunpack.i.l.bf16 %v10870_v42  ;;  %10518 = vmatprep.subr.bf16.mxu0 %v10517_v40 }
 0x509   :  { %9890 = vmatmul.mubr.msk.f32.gmra.mrb[30].mxu0 %vm1001_vm0, %v864_v7 }
 0x50a   :  { %10520 = vmatpush3.bf16.msra.mxu0 %v10517_v40  ;;  %v10521_v49 = vpack.c.bf16 %v10872_v44, %v10871_v47 }
 0x50b   :  { %v10880_v50 = vpop.permute.xlu0 %10879  ;;  %v12689_v30 = vpop.permute.xlu1 %10864 }
 0x50c   :  { %v10882_v52 = vunpack.i.h.bf16 %v10880_v50  ;;  %v10881_v55 = vunpack.i.l.bf16 %v10880_v50  ;;  %10522 = vmatprep.subr.bf16.mxu0 %v10521_v49 }
 0x50e   :  { %10524 = vmatpush3.bf16.msra.mxu0 %v10521_v49  ;;  %v12630_v57 = vpack.c.bf16 %v10882_v52, %v10881_v55 }
 0x50f   :  { %v12703_v54 = vpop.permute.xlu1 %10874 }
 0x510   :  { %10534 = vmatprep.subr.bf16.mxu0 %v12630_v57 }
 0x513   :  { %v12718_v49 = vpop.permute.xlu1 %10884 }
 0x52d   :  { %v12633_v58 = vpop.f32.mrb[8].mxu1 }
 0x52e   :  { %v12635_v61 = vpop.f32.mrb[9].mxu1  ;;  %v1813_v2 = vsel %vm1001_vm0, %v12633_v58, -inf }
 0x52f   :  { %1814 = vmax.xlane.f32.xlu1 %v1813_v2  ;;  %v1810_v3 = vsel %vm1001_vm0, %v12635_v61, -inf }
 0x530   :  { %1811 = vmax.xlane.f32.xlu0 %v1810_v3 }
 0x531   :  { %v12641_v6 = vpop.f32.mrb[10].mxu1 }
 0x532   :  { %v12643_v59 = vpop.f32.mrb[11].mxu1  ;;  %v1819_v9 = vsel %vm1001_vm0, %v12641_v6, -inf }
 0x533   :  { %v1816_v46 = vsel %vm1001_vm0, %v12643_v59, -inf }
 0x534   :  { %1820 = vmax.xlane.f32.xlu0 %v1819_v9 }
 0x538   :  { %1817 = vmax.xlane.f32.xlu0 %v1816_v46 }
 0x53d   :  { %v12649_v10 = vpop.f32.mrb[16].mxu0 }
 0x53e   :  { %v12651_v11 = vpop.f32.mrb[17].mxu0  ;;  %v1825_v14 = vsel %vm1001_vm0, %v12649_v10, -inf }
 0x53f   :  { %1826 = vmax.xlane.f32.xlu0 %v1825_v14  ;;  %v1822_v1 = vsel %vm1001_vm0, %v12651_v11, -inf }
 0x540   :  { %1823 = vmax.xlane.f32.xlu1 %v1822_v1 }
 0x541   :  { %v12657_v63 = vpop.f32.mrb[18].mxu0 }
 0x542   :  { %v12659_v48 = vpop.f32.mrb[19].mxu0  ;;  %v1831_v15 = vsel %vm1001_vm0, %v12657_v63, -inf }
 0x543   :  { %1832 = vmax.xlane.f32.xlu0 %v1831_v15  ;;  %v1828_v5 = vsel %vm1001_vm0, %v12659_v48, -inf }
 0x544   :  { %1829 = vmax.xlane.f32.xlu1 %v1828_v5 }
 0x5a3   :  { %v12665_v20 = vpop.f32.mrb[12].mxu1 }
 0x5a4   :  { %v12667_v37 = vpop.f32.mrb[13].mxu1  ;;  %v1837_v19 = vsel %vm1001_vm0, %v12665_v20, -inf }
 0x5a5   :  { %1838 = vmax.xlane.f32.xlu1 %v1837_v19  ;;  %v1834_v25 = vsel %vm1001_vm0, %v12667_v37, -inf }
 0x5a7   :  { %v12671_v23 = vpop.f32.mrb[14].mxu1 }
 0x5a8   :  { %v12673_v24 = vpop.f32.mrb[15].mxu1  ;;  %v1843_v26 = vsel %vm1001_vm0, %v12671_v23, -inf }
 0x5a9   :  { %1835 = vmax.xlane.f32.xlu1 %v1834_v25  ;;  %v1840_v13 = vsel %vm1001_vm0, %v12673_v24, -inf }
 0x5ad   :  { %1844 = vmax.xlane.f32.xlu1 %v1843_v26 }
 0x5b1   :  { %1841 = vmax.xlane.f32.xlu1 %v1840_v13 }
 0x5b3   :  { %v12683_v43 = vpop.f32.mrb[16].mxu1 }
 0x5b4   :  { %v12685_v29 = vpop.f32.mrb[17].mxu1  ;;  %v1861_v45 = vsel %vm1001_vm0, %v12683_v43, -inf }
 0x5b5   :  { %1862 = vmax.xlane.f32.xlu0 %v1861_v45  ;;  %v1858_v4 = vsel %vm1001_vm0, %v12685_v29, -inf }
 0x5b7   :  { %v12691_v22 = vpop.f32.mrb[20].mxu0  ;;  %v12693_v32 = vpop.f32.mrb[18].mxu1 }
 0x5b8   :  { %v12695_v51 = vpop.f32.mrb[21].mxu0  ;;  %v12697_v18 = vpop.f32.mrb[19].mxu1  ;;  %v1849_v33 = vsel %vm1001_vm0, %v12691_v22, -inf  ;;  %v1867_v35 = vsel %vm1001_vm0, %v12693_v32, -inf }
 0x5b9   :  { %1850 = vmax.xlane.f32.xlu1 %v1849_v33  ;;  %1859 = vmax.xlane.f32.xlu0 %v1858_v4  ;;  %v1846_v34 = vsel %vm1001_vm0, %v12695_v51, -inf  ;;  %v1864_v47 = vsel %vm1001_vm0, %v12697_v18, -inf }
 0x5bc   :  { %v1815_v9 = vpop.xlane.xlu1 %1814 }
 0x5bd   :  { %v1812_v39 = vpop.xlane.xlu0 %1811  ;;  %1847 = vmax.xlane.f32.xlu1 %v1846_v34  ;;  %1868 = vmax.xlane.f32.xlu0 %v1867_v35  ;;  %v1907_v1 = vsub.f32 %v12633_v58, %v1815_v9 }
 0x5be   :  { %v1906_v42 = vsub.f32 %v12635_v61, %v1812_v39 }
 0x5bf   :  { %v12709_v40 = vpop.f32.mrb[22].mxu0 }
 0x5c0   :  { %v12712_v7 = vpop.f32.mrb[23].mxu0  ;;  %v1855_v44 = vsel %vm1001_vm0, %v12709_v40, -inf  ;;  %v1938_v55 = vmul.f32 1.442695, %v1906_v42 }
 0x5c1   :  { %v1821_v50 = vpop.xlane.xlu0 %1820  ;;  %1856 = vmax.xlane.f32.xlu1 %v1855_v44  ;;  %1865 = vmax.xlane.f32.xlu0 %v1864_v47  ;;  %v1852_v61 = vsel %vm1001_vm0, %v12712_v7, -inf }
 0x5c2   :  { %11425 = vpow2.f32 %v1938_v55  ;;  %v1909_v58 = vsub.f32 %v12641_v6, %v1821_v50 }
 0x5c3   :  { %v12720_v52 = vpop.f32.mrb[20].mxu1 }
 0x5c4   :  { %v12722_v2 = vpop.f32.mrb[21].mxu1  ;;  %v1885_v3 = vsel %vm1001_vm0, %v12720_v52, -inf  ;;  %v1944_v34 = vmul.f32 1.442695, %v1909_v58 }
 0x5c5   :  { %v1818_v46 = vpop.xlane.xlu0 %1817  ;;  %1853 = vmax.xlane.f32.xlu1 %v1852_v61  ;;  %1886 = vmax.xlane.f32.xlu0 %v1885_v3  ;;  %v1882_v33 = vsel %vm1001_vm0, %v12722_v2, -inf }
 0x5c6   :  { %v1908_v14 = vsub.f32 %v12643_v59, %v1818_v46  ;;  %v1940_v59 = vmul.f32 1.442695, %v1907_v1 }
 0x5c8   :  { %v1942_v15 = vmul.f32 1.442695, %v1908_v14  ;;  %v12730_v5 = vpop.f32.mrb[24].mxu0  ;;  %v12732_v19 = vpop.f32.mrb[22].mxu1 }
 0x5c9   :  { %v12734_v25 = vpop.f32.mrb[25].mxu0  ;;  %v1873_v26 = vsel %vm1001_vm0, %v12730_v5, -inf  ;;  %v12738_v13 = vpop.f32.mrb[23].mxu1  ;;  %v1891_v39 = vsel %vm1001_vm0, %v12732_v19, -inf }
 0x5ca   :  { %1874 = vmax.xlane.f32.xlu0 %v1873_v26  ;;  %v1870_v45 = vsel %vm1001_vm0, %v12734_v25, -inf  ;;  %11427 = vpow2.f32 %v1942_v15  ;;  %v1888_v3 = vsel %vm1001_vm0, %v12738_v13, -inf }
 0x5cb   :  { %1871 = vmax.xlane.f32.xlu1 %v1870_v45  ;;  %11429 = vpow2.f32 %v1940_v59 }
 0x5cc   :  { %v12753_v44 = vpop.eup %11425  ;;  %11431 = vpow2.f32 %v1944_v34  ;;  %v1827_v34 = vpop.xlane.xlu0 %1826 }
 0x5cd   :  { %v2002_v47 = vsel %vm1001_vm0, %v12753_v44, 0.0 }
 0x5ce   :  { %1883 = vmax.xlane.f32.xlu0 %v1882_v33 }
 0x5cf   :  { %v12745_v4 = vpop.f32.mrb[26].mxu0 }
 0x5d0   :  { %v12747_v35 = vpop.f32.mrb[27].mxu0  ;;  %v1879_v6 = vsel %vm1001_vm0, %v12745_v4, -inf }
 0x5d1   :  { %v1876_v42 = vsel %vm1001_vm0, %v12747_v35, -inf }
 0x5d2   :  { %1892 = vmax.xlane.f32.xlu0 %v1891_v39  ;;  %1877 = vmax.xlane.f32.xlu1 %v1876_v42  ;;  %v1911_v39 = vsub.f32 %v12649_v10, %v1827_v34  ;;  %v1833_v42 = vpop.xlane.xlu0 %1832 }
 0x5d4   :  { %v12759_v50 = vpop.eup %11427 }
 0x5d5   :  { %v2008_v9 = vsel %vm1001_vm0, %v12759_v50, 0.0  ;;  %v12769_v46 = vpop.eup %11429 }
 0x5d6   :  { %1880 = vmax.xlane.f32.xlu0 %v1879_v6  ;;  %2003 = vadd.xlane.f32.xlu1 %v2002_v47  ;;  %v2005_v15 = vsel %vm1001_vm0, %v12769_v46, 0.0  ;;  %v12779_v45 = vpop.eup %11431  ;;  %v1948_v6 = vmul.f32 1.442695, %v1911_v39  ;;  %v1913_v47 = vsub.f32 %v12657_v63, %v1833_v42  ;;  %v1824_v63 = vpop.xlane.xlu1 %1823 }
 0x5d7   :  { %v2011_v59 = vsel %vm1001_vm0, %v12779_v45, 0.0 }
 0x5d8   :  { %v12761_v55 = vpop.f32.mrb[28].mxu0  ;;  %11433 = vpow2.f32 %v1948_v6 }
 0x5d9   :  { %v12763_v61 = vpop.f32.mrb[29].mxu0  ;;  %v1897_v58 = vsel %vm1001_vm0, %v12761_v55, -inf }
 0x5da   :  { %1889 = vmax.xlane.f32.xlu0 %v1888_v3  ;;  %2009 = vadd.xlane.f32.xlu1 %v2008_v9  ;;  %v1894_v26 = vsel %vm1001_vm0, %v12763_v61, -inf  ;;  %v1952_v3 = vmul.f32 1.442695, %v1913_v47 }
 0x5dc   :  { %v12771_v14 = vpop.f32.mrb[30].mxu0  ;;  %11435 = vpow2.f32 %v1952_v3 }
 0x5dd   :  { %v12773_v1 = vpop.f32.mrb[31].mxu0  ;;  %v1903_v33 = vsel %vm1001_vm0, %v12771_v14, -inf }
 0x5de   :  { %2006 = vadd.xlane.f32.xlu0 %v2005_v15  ;;  %1895 = vmax.xlane.f32.xlu1 %v1894_v26  ;;  %v1900_v9 = vsel %vm1001_vm0, %v12773_v1, -inf }
 0x5e2   :  { %2012 = vadd.xlane.f32.xlu0 %v2011_v59  ;;  %v12795_v15 = vpop.eup %11433  ;;  %v1830_v59 = vpop.xlane.xlu1 %1829 }
 0x5e3   :  { %v2017_v26 = vsel %vm1001_vm0, %v12795_v15, 0.0  ;;  %v1912_v39 = vsub.f32 %v12659_v48, %v1830_v59 }
 0x5e5   :  { %v1950_v6 = vmul.f32 1.442695, %v1912_v39 }
 0x5e6   :  { %1898 = vmax.xlane.f32.xlu0 %v1897_v58  ;;  %v1910_v58 = vsub.f32 %v12651_v11, %v1824_v63 }
 0x5e8   :  { %v1946_v34 = vmul.f32 1.442695, %v1910_v58 }
 0x5ea   :  { %1904 = vmax.xlane.f32.xlu0 %v1903_v33  ;;  %11437 = vpow2.f32 %v1946_v34 }
 0x5eb   :  { %11439 = vpow2.f32 %v1950_v6 }
 0x5ef   :  { %10894 = vrot.lane.b32.xlu1 %v12474_v41, %s12076_s5 }
 0x600   :  { %10889 = vrot.lane.b32.xlu0 %v12443_v16, %s12081_s1  ;;  %v12799_v16 = vpop.eup %11435 }
 0x601   :  { %v2023_v10 = vsel %vm1001_vm0, %v12799_v16, 0.0  ;;  %v12811_v58 = vpop.eup %11437 }
 0x602   :  { %v2014_v39 = vsel %vm1001_vm0, %v12811_v58, 0.0 }
 0x613   :  { %1901 = vmax.xlane.f32.xlu1 %v1900_v9 }
 0x61f   :  { %2018 = vadd.xlane.f32.xlu0 %v2017_v26 }
 0x623   :  { %2024 = vadd.xlane.f32.xlu0 %v2023_v10 }
 0x624   :  { %10899 = vrot.lane.b32.xlu1 %v12468_v36, %s12076_s5 }
 0x632   :  { %v1839_v33 = vpop.xlane.xlu1 %1838 }
 0x633   :  { %v1915_v47 = vsub.f32 %v12665_v20, %v1839_v33 }
 0x635   :  { %v1956_v9 = vmul.f32 1.442695, %v1915_v47 }
 0x636   :  { %v1836_v42 = vpop.xlane.xlu1 %1835 }
 0x637   :  { %v1914_v26 = vsub.f32 %v12667_v37, %v1836_v42  ;;  %11441 = vpow2.f32 %v1956_v9 }
 0x639   :  { %v1954_v10 = vmul.f32 1.442695, %v1914_v26 }
 0x63a   :  { %v1845_v3 = vpop.xlane.xlu1 %1844 }
 0x63b   :  { %v1917_v0 = vsub.f32 %v12671_v23, %v1845_v3  ;;  %11443 = vpow2.f32 %v1954_v10  ;;  %v12817_v23 = vpop.eup %11439 }
 0x63d   :  { %v1960_v59 = vmul.f32 1.442695, %v1917_v0 }
 0x63e   :  { %v1842_v53 = vpop.xlane.xlu1 %1841 }
 0x63f   :  { %v1916_v20 = vsub.f32 %v12673_v24, %v1842_v53  ;;  %v2020_v24 = vsel %vm1001_vm0, %v12817_v23, 0.0 }
 0x641   :  { %v12823_v3 = vpop.eup %11441 }
 0x642   :  { %v1863_v11 = vpop.xlane.xlu0 %1862 }
 0x643   :  { %v1923_v63 = vsub.f32 %v12683_v43, %v1863_v11  ;;  %v1958_v43 = vmul.f32 1.442695, %v1916_v20 }
 0x645   :  { %v1972_v48 = vmul.f32 1.442695, %v1923_v63  ;;  %v2029_v63 = vsel %vm1001_vm0, %v12823_v3, 0.0 }
 0x646   :  { %v1851_v33 = vpop.xlane.xlu1 %1850  ;;  %v1860_v34 = vpop.xlane.xlu0 %1859 }
 0x647   :  { %11445 = vpow2.f32 %v1972_v48  ;;  %v1922_v37 = vsub.f32 %v12685_v29, %v1860_v34  ;;  %v1919_v6 = vsub.f32 %v12691_v22, %v1851_v33 }
 0x648   :  { %2015 = vadd.xlane.f32.xlu1 %v2014_v39  ;;  %11447 = vpow2.f32 %v1960_v59 }
 0x649   :  { %v1970_v42 = vmul.f32 1.442695, %v1922_v37  ;;  %v1964_v9 = vmul.f32 1.442695, %v1919_v6 }
 0x64a   :  { %v1848_v47 = vpop.xlane.xlu1 %1847  ;;  %v1869_v0 = vpop.xlane.xlu0 %1868 }
 0x64b   :  { %v1925_v53 = vsub.f32 %v12693_v32, %v1869_v0  ;;  %11449 = vpow2.f32 %v1970_v42  ;;  %v1918_v26 = vsub.f32 %v12695_v51, %v1848_v47  ;;  %v12829_v32 = vpop.eup %11443 }
 0x64c   :  { %2021 = vadd.xlane.f32.xlu1 %v2020_v24  ;;  %11451 = vpow2.f32 %v1958_v43  ;;  %v2026_v39 = vsel %vm1001_vm0, %v12829_v32, 0.0 }
 0x64d   :  { %v1976_v29 = vmul.f32 1.442695, %v1925_v53  ;;  %v1962_v20 = vmul.f32 1.442695, %v1918_v26 }
 0x64e   :  { %v1857_v10 = vpop.xlane.xlu1 %1856  ;;  %v1866_v11 = vpop.xlane.xlu0 %1865 }
 0x64f   :  { %v1924_v22 = vsub.f32 %v12697_v18, %v1866_v11  ;;  %11453 = vpow2.f32 %v1976_v29  ;;  %v1921_v33 = vsub.f32 %v12709_v40, %v1857_v10 }
 0x650   :  { %2030 = vadd.xlane.f32.xlu1 %v2029_v63  ;;  %11455 = vpow2.f32 %v1964_v9 }
 0x651   :  { %v12831_v48 = vpop.eup %11445  ;;  %v1974_v59 = vmul.f32 1.442695, %v1924_v22  ;;  %v1968_v40 = vmul.f32 1.442695, %v1921_v33 }
 0x652   :  { %v1854_v34 = vpop.xlane.xlu1 %1853  ;;  %v1887_v51 = vpop.xlane.xlu0 %1886  ;;  %v2053_v37 = vsel %vm1001_vm0, %v12831_v48, 0.0 }
 0x653   :  { %v1931_v18 = vsub.f32 %v12720_v52, %v1887_v51  ;;  %2054 = vadd.xlane.f32.xlu0 %v2053_v37  ;;  %v12839_v42 = vpop.eup %11447  ;;  %11457 = vpow2.f32 %v1974_v59  ;;  %v1920_v47 = vsub.f32 %v12712_v7, %v1854_v34 }
 0x654   :  { %2027 = vadd.xlane.f32.xlu1 %v2026_v39  ;;  %11459 = vpow2.f32 %v1962_v20  ;;  %v2035_v52 = vsel %vm1001_vm0, %v12839_v42, 0.0 }
 0x655   :  { %v1988_v43 = vmul.f32 1.442695, %v1931_v18  ;;  %v12841_v6 = vpop.eup %11449  ;;  %v1966_v10 = vmul.f32 1.442695, %v1920_v47 }
 0x656   :  { %v2050_v53 = vsel %vm1001_vm0, %v12841_v6, 0.0  ;;  %v12848_v24 = vpop.eup %11451 }
 0x657   :  { %v1875_v0 = vpop.xlane.xlu0 %1874  ;;  %11461 = vpow2.f32 %v1988_v43  ;;  %2051 = vadd.xlane.f32.xlu0 %v2050_v53  ;;  %v2032_v59 = vsel %vm1001_vm0, %v12848_v24, 0.0 }
 0x658   :  { %v1927_v29 = vsub.f32 %v12730_v5, %v1875_v0  ;;  %v1872_v9 = vpop.xlane.xlu1 %1871  ;;  %2036 = vadd.xlane.f32.xlu1 %v2035_v52  ;;  %11463 = vpow2.f32 %v1968_v40 }
 0x659   :  { %v12851_v26 = vpop.eup %11453  ;;  %v1926_v11 = vsub.f32 %v12734_v25, %v1872_v9 }
 0x65a   :  { %v1980_v7 = vmul.f32 1.442695, %v1927_v29  ;;  %v2059_v63 = vsel %vm1001_vm0, %v12851_v26, 0.0  ;;  %v12858_v20 = vpop.eup %11455 }
 0x65b   :  { %v1884_v22 = vpop.xlane.xlu0 %1883  ;;  %2060 = vadd.xlane.f32.xlu0 %v2059_v63  ;;  %v1978_v34 = vmul.f32 1.442695, %v1926_v11  ;;  %v2041_v39 = vsel %vm1001_vm0, %v12858_v20, 0.0 }
 0x65c   :  { %11465 = vpow2.f32 %v1980_v7  ;;  %v1930_v5 = vsub.f32 %v12722_v2, %v1884_v22  ;;  %2033 = vadd.xlane.f32.xlu1 %v2032_v59 }
 0x65d   :  { %v12861_v33 = vpop.eup %11457  ;;  %11467 = vpow2.f32 %v1966_v10 }
 0x65e   :  { %v1986_v51 = vmul.f32 1.442695, %v1930_v5  ;;  %v2056_v18 = vsel %vm1001_vm0, %v12861_v33, 0.0  ;;  %v12867_v43 = vpop.eup %11459 }
 0x65f   :  { %v1893_v25 = vpop.xlane.xlu0 %1892  ;;  %v1878_v37 = vpop.xlane.xlu1 %1877  ;;  %2057 = vadd.xlane.f32.xlu0 %v2056_v18  ;;  %v2038_v10 = vsel %vm1001_vm0, %v12867_v43, 0.0 }
 0x660   :  { %11469 = vpow2.f32 %v1986_v51  ;;  %v1933_v2 = vsub.f32 %v12732_v19, %v1893_v25  ;;  %v1928_v40 = vsub.f32 %v12747_v35, %v1878_v37  ;;  %2042 = vadd.xlane.f32.xlu1 %v2041_v39 }
 0x661   :  { %v12871_v47 = vpop.eup %11461  ;;  %11471 = vpow2.f32 %v1978_v34 }
 0x662   :  { %v1992_v0 = vmul.f32 1.442695, %v1933_v2  ;;  %v1982_v53 = vmul.f32 1.442695, %v1928_v40  ;;  %v2077_v9 = vsel %vm1001_vm0, %v12871_v47, 0.0  ;;  %v12877_v7 = vpop.eup %11463 }
 0x663   :  { %v1881_v52 = vpop.xlane.xlu0 %1880  ;;  %v2004_v29 = vpop.xlane.xlu1 %2003  ;;  %2078 = vadd.xlane.f32.xlu0 %v2077_v9  ;;  %v2047_v5 = vsel %vm1001_vm0, %v12877_v7, 0.0 }
 0x664   :  { %11473 = vpow2.f32 %v1992_v0  ;;  %v1929_v19 = vsub.f32 %v12745_v4, %v1881_v52  ;;  %2039 = vadd.xlane.f32.xlu1 %v2038_v10 }
 0x665   :  { %11475 = vpow2.f32 %v1982_v53 }
 0x666   :  { %v12880_v35 = vpop.eup %11465  ;;  %v1984_v11 = vmul.f32 1.442695, %v1929_v19  ;;  %11477 = vrcp.f32 %v2004_v29 }
 0x667   :  { %v1890_v22 = vpop.xlane.xlu0 %1889  ;;  %v2010_v63 = vpop.xlane.xlu1 %2009  ;;  %v2065_v59 = vsel %vm1001_vm0, %v12880_v35, 0.0 }
 0x668   :  { %v12886_v34 = vpop.eup %11467  ;;  %11479 = vpow2.f32 %v1984_v11  ;;  %v1932_v4 = vsub.f32 %v12738_v13, %v1890_v22  ;;  %2066 = vadd.xlane.f32.xlu0 %v2065_v59  ;;  %2048 = vadd.xlane.f32.xlu1 %v2047_v5 }
 0x669   :  { %11481 = vrcp.f32 %v2010_v63  ;;  %v2044_v2 = vsel %vm1001_vm0, %v12886_v34, 0.0 }
 0x66a   :  { %v12889_v51 = vpop.eup %11469  ;;  %v1990_v25 = vmul.f32 1.442695, %v1932_v4 }
 0x66b   :  { %v2007_v37 = vpop.xlane.xlu0 %2006  ;;  %v1896_v18 = vpop.xlane.xlu1 %1895  ;;  %v2074_v39 = vsel %vm1001_vm0, %v12889_v51, 0.0 }
 0x66c   :  { %v12895_v40 = vpop.eup %11471  ;;  %11483 = vpow2.f32 %v1990_v25  ;;  %v1934_v0 = vsub.f32 %v12763_v61, %v1896_v18  ;;  %2075 = vadd.xlane.f32.xlu0 %v2074_v39  ;;  %2045 = vadd.xlane.f32.xlu1 %v2044_v2 }
 0x66d   :  { %11485 = vrcp.f32 %v2007_v37  ;;  %v2062_v10 = vsel %vm1001_vm0, %v12895_v40, 0.0 }
 0x66e   :  { %v12898_v13 = vpop.eup %11473  ;;  %v1994_v53 = vmul.f32 1.442695, %v1934_v0 }
 0x66f   :  { %v12900_v52 = vpop.eup %11475  ;;  %v2013_v29 = vpop.xlane.xlu0 %2012  ;;  %v2083_v9 = vsel %vm1001_vm0, %v12898_v13, 0.0 }
 0x670   :  { %v11478_v19 = vpop.eup %11477  ;;  %11487 = vpow2.f32 %v1994_v53  ;;  %2084 = vadd.xlane.f32.xlu0 %v2083_v9  ;;  %2063 = vadd.xlane.f32.xlu1 %v2062_v10  ;;  %v2068_v59 = vsel %vm1001_vm0, %v12900_v52, 0.0  ;;  %v10856_v9 = vunpack.i.l.bf16 %v12679_v12 }
 0x671   :  { %11489 = vrcp.f32 %v2013_v29  ;;  %v2130_v61 = vmul.f32 %v11478_v19, %v12753_v44  ;;  %v10857_v29 = vunpack.i.h.bf16 %v12679_v12 }
 0x672   :  { %v12907_v11 = vpop.eup %11479 }
 0x673   :  { %9900 = vmatprep.mubr.msk.f32.mxu1 %vm1001_vm0, %v2130_v61  ;;  %v1899_v22 = vpop.xlane.xlu0 %1898  ;;  %v2071_v63 = vsel %vm1001_vm0, %v12907_v11, 0.0  ;;  %v11482_v4 = vpop.eup %11481  ;;  %v10501_v12 = vpack.c.bf16 %v10857_v29, %v10856_v9  ;;  %v10867_v29 = vunpack.i.h.bf16 %v12689_v30  ;;  %v10866_v9 = vunpack.i.l.bf16 %v12689_v30 }
 0x674   :  { %v1935_v5 = vsub.f32 %v12761_v55, %v1899_v22  ;;  %2072 = vadd.xlane.f32.xlu0 %v2071_v63  ;;  %2069 = vadd.xlane.f32.xlu1 %v2068_v59  ;;  %v2132_v53 = vmul.f32 %v11482_v4, %v12759_v50  ;;  %v12943_v63 = vpop.permute.xlu1 %10894 }
 0x676   :  { %v12915_v25 = vpop.eup %11483  ;;  %v1996_v37 = vmul.f32 1.442695, %v1935_v5 }
 0x677   :  { %v11486_v44 = vpop.eup %11485  ;;  %v1905_v18 = vpop.xlane.xlu0 %1904  ;;  %v2080_v39 = vsel %vm1001_vm0, %v12915_v25, 0.0 }
 0x678   :  { %v2131_v2 = vmul.f32 %v11486_v44, %v12769_v46  ;;  %11491 = vpow2.f32 %v1996_v37  ;;  %v1937_v0 = vsub.f32 %v12771_v14, %v1905_v18  ;;  %2081 = vadd.xlane.f32.xlu0 %v2080_v39 }
 0x67a   :  { %v12922_v55 = vpop.eup %11487  ;;  %v2000_v10 = vmul.f32 1.442695, %v1937_v0  ;;  %9901 = vmatmul.mubr.msk.f32.vlgmr.msra.gmra.mrb[24].mxu1 %vm1001_vm0, %v2131_v2 }
 0x67b   :  { %v11490_v19 = vpop.eup %11489  ;;  %10496 = vmatpush3.bf16.msra.mxu1 %v12476_v62  ;;  %9903 = vmatprep.mubr.msk.f32.mxu1 %vm1001_vm0, %v2132_v53  ;;  %v2086_v46 = vsel %vm1001_vm0, %v12922_v55, 0.0  ;;  %v12954_v37 = vpop.permute.xlu0 %10889 }
 0x67c   :  { %11493 = vpow2.f32 %v2000_v10  ;;  %10498 = vmatprep.subr.bf16.mxu1 %v12470_v38  ;;  %2087 = vadd.xlane.f32.xlu1 %v2086_v46  ;;  %v2133_v50 = vmul.f32 %v11490_v19, %v12779_v45 }
 0x67e   :  { %9904 = vmatmul.mubr.msk.f32.gmra.mrb[26].mxu1 %vm1001_vm0, %v2133_v50 }
 0x67f   :  { %10500 = vmatpush3.bf16.msra.mxu1 %v12470_v38 }
 0x680   :  { %10502 = vmatprep.subr.bf16.mxu1 %v10501_v12 }
 0x682   :  { %v12935_v14 = vpop.eup %11491 }
 0x683   :  { %v2089_v62 = vsel %vm1001_vm0, %v12935_v14, 0.0 }
 0x684   :  { %2090 = vadd.xlane.f32.xlu0 %v2089_v62 }
 0x686   :  { %v12939_v61 = vpop.eup %11493 }
 0x687   :  { %v2095_v22 = vsel %vm1001_vm0, %v12939_v61, 0.0 }
 0x688   :  { %2096 = vadd.xlane.f32.xlu0 %v2095_v22  ;;  %v10877_v22 = vunpack.i.h.bf16 %v12703_v54 }
 0x69e   :  { %10904 = vrot.lane.b32.xlu0 %v12474_v41, %s12081_s1 }
 0x6a0   :  { %v1902_v45 = vpop.xlane.xlu1 %1901 }
 0x6a1   :  { %v1936_v38 = vsub.f32 %v12773_v1, %v1902_v45  ;;  %v10876_v45 = vunpack.i.l.bf16 %v12703_v54 }
 0x6a3   :  { %v1998_v59 = vmul.f32 1.442695, %v1936_v38  ;;  %v10505_v38 = vpack.c.bf16 %v10867_v29, %v10866_v9 }
 0x6a4   :  { %v12956_v18 = vpop.permute.xlu1 %10899 }
 0x6a5   :  { %11495 = vpow2.f32 %v1998_v59 }
 0x6ac   :  { %v2019_v44 = vpop.xlane.xlu0 %2018 }
 0x6ad   :  { %11497 = vrcp.f32 %v2019_v44 }
 0x6af   :  { %v12948_v5 = vpop.eup %11495 }
 0x6b0   :  { %v2092_v4 = vsel %vm1001_vm0, %v12948_v5, 0.0  ;;  %v2025_v39 = vpop.xlane.xlu0 %2024 }
 0x6b1   :  { %2093 = vadd.xlane.f32.xlu1 %v2092_v4  ;;  %v10509_v4 = vpack.c.bf16 %v10877_v22, %v10876_v45 }
 0x6b7   :  { %v11498_v0 = vpop.eup %11497 }
 0x6b8   :  { %v2135_v46 = vmul.f32 %v11498_v0, %v12795_v15 }
 0x6c2   :  { %10909 = vrot.lane.b32.xlu1 %v12468_v36, %s12081_s1 }
 0x6d5   :  { %v2016_v41 = vpop.xlane.xlu1 %2015 }
 0x6d6   :  { %11499 = vrcp.f32 %v2016_v41 }
 0x6d7   :  { %11501 = vrcp.f32 %v2025_v39  ;;  %v10886_v39 = vunpack.i.l.bf16 %v12718_v49 }
 0x6d9   :  { %v2022_v1 = vpop.xlane.xlu1 %2021 }
 0x6da   :  { %11503 = vrcp.f32 %v2022_v1 }
 0x6dd   :  { %v2031_v2 = vpop.xlane.xlu1 %2030 }
 0x6de   :  { %11505 = vrcp.f32 %v2031_v2 }
 0x6e0   :  { %v11500_v53 = vpop.eup %11499  ;;  %v2055_v36 = vpop.xlane.xlu0 %2054 }
 0x6e1   :  { %v2028_v10 = vpop.xlane.xlu1 %2027  ;;  %v2134_v19 = vmul.f32 %v11500_v53, %v12811_v58  ;;  %v11502_v50 = vpop.eup %11501 }
 0x6e2   :  { %11507 = vrcp.f32 %v2028_v10  ;;  %v2137_v15 = vmul.f32 %v11502_v50, %v12799_v16  ;;  %v10896_v10 = vunpack.i.l.bf16 %v12943_v63 }
 0x6e3   :  { %9914 = vmatprep.mubr.msk.f32.mxu1 %vm1001_vm0, %v2134_v19  ;;  %11509 = vrcp.f32 %v2055_v36  ;;  %v10897_v36 = vunpack.i.h.bf16 %v12943_v63  ;;  %v10891_v19 = vunpack.i.l.bf16 %v12954_v37 }
 0x6e4   :  { %v11504_v62 = vpop.eup %11503  ;;  %9915 = vmatmul.mubr.msk.f32.vlgmr.msra.gmra.mrb[28].mxu1 %vm1001_vm0, %v2135_v46  ;;  %v2052_v30 = vpop.xlane.xlu0 %2051 }
 0x6e5   :  { %10504 = vmatpush3.bf16.msra.mxu1 %v10501_v12  ;;  %v2037_v59 = vpop.xlane.xlu1 %2036  ;;  %v2136_v58 = vmul.f32 %v11504_v62, %v12817_v23  ;;  %11511 = vrcp.f32 %v2052_v30  ;;  %v10887_v12 = vunpack.i.h.bf16 %v12718_v49  ;;  %v10892_v49 = vunpack.i.h.bf16 %v12954_v37 }
 0x6e6   :  { %10506 = vmatprep.subr.bf16.mxu1 %v10505_v38  ;;  %11513 = vrcp.f32 %v2037_v59  ;;  %v10525_v22 = vpack.c.bf16 %v10897_v36, %v10896_v10 }
 0x6e7   :  { %9917 = vmatprep.mubr.msk.f32.mxu1 %vm1001_vm0, %v2136_v58  ;;  %v10513_v29 = vpack.c.bf16 %v10887_v12, %v10886_v39  ;;  %v10537_v63 = vpack.c.bf16 %v10892_v49, %v10891_v19 }
 0x6e8   :  { %9918 = vmatmul.mubr.msk.f32.gmra.mrb[30].mxu1 %vm1001_vm0, %v2137_v15  ;;  %v2061_v54 = vpop.xlane.xlu0 %2060  ;;  %v11506_v41 = vpop.eup %11505 }
 0x6e9   :  { %10508 = vmatpush3.bf16.msra.mxu1 %v10505_v38  ;;  %v2034_v44 = vpop.xlane.xlu1 %2033  ;;  %v2139_v0 = vmul.f32 %v11506_v41, %v12823_v3 }
 0x6ea   :  { %10510 = vmatprep.subr.bf16.mxu1 %v10509_v4  ;;  %11515 = vrcp.f32 %v2034_v44  ;;  %v10901_v44 = vunpack.i.l.bf16 %v12956_v18 }
 0x6eb   :  { %11517 = vrcp.f32 %v2061_v54  ;;  %v10902_v54 = vunpack.i.h.bf16 %v12956_v18 }
 0x6ec   :  { %v11508_v23 = vpop.eup %11507  ;;  %v2058_v1 = vpop.xlane.xlu0 %2057 }
 0x6ed   :  { %v2043_v16 = vpop.xlane.xlu1 %2042  ;;  %v2138_v2 = vmul.f32 %v11508_v23, %v12829_v32  ;;  %11519 = vrcp.f32 %v2058_v1  ;;  %v11510_v53 = vpop.eup %11509  ;;  %v10529_v1 = vpack.c.bf16 %v10902_v54, %v10901_v44 }
 0x6ee   :  { %v2147_v50 = vmul.f32 %v11510_v53, %v12831_v48  ;;  %11521 = vrcp.f32 %v2043_v16 }
 0x6ef   :  { %9928 = vmatprep.mubr.msk.f32.mxu1 %vm1001_vm0, %v2138_v2  ;;  %v11512_v9 = vpop.eup %11511 }
 0x6f0   :  { %9929 = vmatmul.mubr.msk.f32.vlgmr.msra.gmra.mrb[32].mxu1 %vm1001_vm0, %v2139_v0  ;;  %v2079_v32 = vpop.xlane.xlu0 %2078  ;;  %v2146_v3 = vmul.f32 %v11512_v9, %v12841_v6  ;;  %v11514_v62 = vpop.eup %11513 }
 0x6f1   :  { %10512 = vmatpush3.bf16.msra.mxu1 %v10509_v4  ;;  %v2040_v46 = vpop.xlane.xlu1 %2039  ;;  %v2141_v30 = vmul.f32 %v11514_v62, %v12839_v42 }
 0x6f2   :  { %10514 = vmatprep.subr.bf16.mxu1 %v10513_v29  ;;  %11523 = vrcp.f32 %v2040_v46  ;;  %9956 = vmatprep.mubr.msk.f32.mxu0 %vm1001_vm0, %v2146_v3 }
 0x6f3   :  { %9957 = vmatmul.mubr.msk.f32.vlgmr.msra.gmra.mrb[32].mxu0 %vm1001_vm0, %v2147_v50  ;;  %11525 = vrcp.f32 %v2079_v32 }
 0x6f4   :  { %v11516_v37 = vpop.eup %11515  ;;  %10536 = vmatpush3.bf16.msra.mxu0 %v12630_v57 }
 0x6f5   :  { %10516 = vmatpush3.bf16.msra.mxu1 %v10513_v29  ;;  %v2067_v45 = vpop.xlane.xlu0 %2066  ;;  %v2049_v38 = vpop.xlane.xlu1 %2048  ;;  %10538 = vmatprep.subr.bf16.mxu0 %v10537_v63  ;;  %v2140_v48 = vmul.f32 %v11516_v37, %v12848_v24 }
 0x6f6   :  { %10526 = vmatprep.subr.bf16.mxu1 %v10525_v22  ;;  %v11518_v6 = vpop.eup %11517  ;;  %11527 = vrcp.f32 %v2049_v38 }
 0x6f7   :  { %v11520_v59 = vpop.eup %11519  ;;  %9931 = vmatprep.mubr.msk.f32.mxu1 %vm1001_vm0, %v2140_v48  ;;  %v2149_v4 = vmul.f32 %v11518_v6, %v12851_v26 }
 0x6f8   :  { %10540 = vmatpush3.bf16.msra.mxu0 %v10537_v63  ;;  %9932 = vmatmul.mubr.msk.f32.gmra.mrb[34].mxu1 %vm1001_vm0, %v2141_v30  ;;  %v2148_v15 = vmul.f32 %v11520_v59, %v12861_v33  ;;  %v11522_v24 = vpop.eup %11521 }
 0x6f9   :  { %v2076_v58 = vpop.xlane.xlu0 %2075  ;;  %v2046_v57 = vpop.xlane.xlu1 %2045  ;;  %v2143_v33 = vmul.f32 %v11522_v24, %v12858_v20 }
 0x6fa   :  { %11529 = vrcp.f32 %v2076_v58  ;;  %9959 = vmatprep.mubr.msk.f32.mxu0 %vm1001_vm0, %v2148_v15 }
 0x6fb   :  { %11531 = vrcp.f32 %v2046_v57  ;;  %9960 = vmatmul.mubr.msk.f32.gmra.mrb[34].mxu0 %vm1001_vm0, %v2149_v4 }
 0x6fc   :  { %v11524_v42 = vpop.eup %11523  ;;  %11533 = vrcp.f32 %v2067_v45 }
 0x6fd   :  { %v2085_v41 = vpop.xlane.xlu0 %2084  ;;  %v2064_v12 = vpop.xlane.xlu1 %2063  ;;  %v2142_v39 = vmul.f32 %v11524_v42, %v12867_v43  ;;  %v14660_v42 = vmov 0  }
 0x6fe   :  { %11535 = vrcp.f32 %v2064_v12  ;;  %v11526_v16 = vpop.eup %11525 }
 0x6ff   :  { %9942 = vmatprep.mubr.msk.f32.mxu1 %vm1001_vm0, %v2142_v39  ;;  %v2155_v53 = vmul.f32 %v11526_v16, %v12871_v47 }
 0x700   :  { %9943 = vmatmul.mubr.msk.f32.vlgmr.msra.gmra.mrb[36].mxu1 %vm1001_vm0, %v2143_v33  ;;  %v11528_v2 = vpop.eup %11527 }
 0x701   :  { %v2073_v26 = vpop.xlane.xlu0 %2072  ;;  %v2070_v23 = vpop.xlane.xlu1 %2069  ;;  %10528 = vmatpush3.bf16.msra.mxu1 %v10525_v22  ;;  %v2145_v9 = vmul.f32 %v11528_v2, %v12877_v7 }
 0x702   :  { %11537 = vrcp.f32 %v2073_v26  ;;  %10530 = vmatprep.subr.bf16.mxu1 %v10529_v1 }
 0x703   :  { %11539 = vrcp.f32 %v2070_v23 }
 0x704   :  { %v11530_v18 = vpop.eup %11529  ;;  %11541 = vrcp.f32 %v2085_v41 }
 0x705   :  { %v11532_v0 = vpop.eup %11531  ;;  %v2082_v43 = vpop.xlane.xlu0 %2081  ;;  %v2154_v20 = vmul.f32 %v11530_v18, %v12889_v51  ;;  %10532 = vmatpush3.bf16.msra.mxu1 %v10529_v1  ;;  %v11186_v1 = vld [vmem:[%s14636_s6 + $0x8] sm:$0xff]   ;;  %v11187_v18 = vld [vmem:[%s14636_s6 + $0x10] sm:$0xff]  }
 0x706   :  { %11543 = vrcp.f32 %v2082_v43  ;;  %v2144_v29 = vmul.f32 %v11532_v0, %v12886_v34  ;;  %v11534_v36 = vpop.eup %11533  ;;  %v11188_v0 = vld [vmem:[%s14636_s6 + $0x18] sm:$0xff]  }
 0x707   :  { %9984 = vmatprep.mubr.msk.f32.mxu0 %vm1001_vm0, %v2154_v20  ;;  %v2151_v51 = vmul.f32 %v11534_v36, %v12880_v35 }
 0x708   :  { %9945 = vmatprep.mubr.msk.f32.mxu1 %vm1001_vm0, %v2144_v29  ;;  %9985 = vmatmul.mubr.msk.f32.vlgmr.msra.gmra.mrb[36].mxu0 %vm1001_vm0, %v2155_v53  ;;  %v11536_v10 = vpop.eup %11535 }
 0x709   :  { %9946 = vmatmul.mubr.msk.f32.gmra.mrb[38].mxu1 %vm1001_vm0, %v2145_v9  ;;  %v2088_v49 = vpop.xlane.xlu1 %2087  ;;  %v2150_v47 = vmul.f32 %v11536_v10, %v12895_v40  ;;  %v11189_v10 = vld [vmem:[%s14636_s6 + $0x20] sm:$0xff]  }
 0x70a   :  { %11545 = vrcp.f32 %v2088_v49 }
 0x70b   :  { %9970 = vmatprep.mubr.msk.f32.mxu1 %vm1001_vm0, %v2150_v47 }
 0x70c   :  { %v11538_v19 = vpop.eup %11537 }
 0x70d   :  { %v11540_v34 = vpop.eup %11539  ;;  %9971 = vmatmul.mubr.msk.f32.vlgmr.msra.gmra.mrb[40].mxu1 %vm1001_vm0, %v2151_v51  ;;  %v2153_v46 = vmul.f32 %v11538_v19, %v12907_v11  ;;  %v11190_v19 = vld [vmem:[%s14636_s6 + $0x28] sm:$0xff]  }
 0x70e   :  { %v2152_v7 = vmul.f32 %v11540_v34, %v12900_v52  ;;  %v11542_v32 = vpop.eup %11541  ;;  %v11191_v34 = vld [vmem:[%s14636_s6 + $0x30] sm:$0xff]  }
 0x70f   :  { %v2157_v35 = vmul.f32 %v11542_v32, %v12898_v13 }
 0x710   :  { %v11544_v3 = vpop.eup %11543  ;;  %9973 = vmatprep.mubr.msk.f32.mxu1 %vm1001_vm0, %v2152_v7 }
 0x711   :  { %9974 = vmatmul.mubr.msk.f32.gmra.mrb[42].mxu1 %vm1001_vm0, %v2153_v46  ;;  %v2091_v50 = vpop.xlane.xlu0 %2090  ;;  %v2156_v40 = vmul.f32 %v11544_v3, %v12915_v25 }
 0x712   :  { %11547 = vrcp.f32 %v2091_v50 }
 0x713   :  { %9987 = vmatprep.mubr.msk.f32.mxu0 %vm1001_vm0, %v2156_v40 }
 0x714   :  { %v11546_v62 = vpop.eup %11545  ;;  %9988 = vmatmul.mubr.msk.f32.gmra.mrb[38].mxu0 %vm1001_vm0, %v2157_v35  ;;  %v11192_v35 = vld [vmem:[%s14636_s6 + $0x38] sm:$0xff]  }
 0x715   :  { %v2097_v63 = vpop.xlane.xlu0 %2096  ;;  %v2158_v52 = vmul.f32 %v11546_v62, %v12922_v55 }
 0x717   :  { %9998 = vmatprep.mubr.msk.f32.mxu1 %vm1001_vm0, %v2158_v52 }
 0x719   :  { %v10905_v11 = vpop.permute.xlu0 %10904 }
 0x71a   :  { %v10907_v22 = vunpack.i.h.bf16 %v10905_v11  ;;  %v10906_v37 = vunpack.i.l.bf16 %v10905_v11 }
 0x71c   :  { %v10541_v45 = vpack.c.bf16 %v10907_v22, %v10906_v37  ;;  %v11548_v30 = vpop.eup %11547 }
 0x71d   :  { %v2159_v59 = vmul.f32 %v11548_v30, %v12935_v14 }
 0x71e   :  { %10542 = vmatprep.subr.bf16.mxu1 %v10541_v45 }
 0x71f   :  { %10544 = vmatpush3.bf16.msra.mxu1 %v10541_v45 }
 0x73e   :  { %v2094_v25 = vpop.xlane.xlu1 %2093 }
 0x73f   :  { %11549 = vrcp.f32 %v2094_v25 }
 0x740   :  { %11551 = vrcp.f32 %v2097_v63 }
 0x742   :  { %v10910_v13 = vpop.permute.xlu1 %10909 }
 0x743   :  { %v10912_v38 = vunpack.i.h.bf16 %v10910_v13  ;;  %v10911_v48 = vunpack.i.l.bf16 %v10910_v13 }
 0x745   :  { %v10545_v6 = vpack.c.bf16 %v10912_v38, %v10911_v48 }
 0x747   :  { %10546 = vmatprep.subr.bf16.mxu1 %v10545_v6 }
 0x748   :  { %10548 = vmatpush3.bf16.msra.mxu1 %v10545_v6 }
 0x749   :  { %v11550_v55 = vpop.eup %11549 }
 0x74a   :  { %v11552_v58 = vpop.eup %11551  ;;  %v2160_v57 = vmul.f32 %v11550_v55, %v12948_v5 }
 0x74b   :  { %9999 = vmatmul.mubr.msk.f32.vlgmr.msra.gmra.mrb[44].mxu1 %vm1001_vm0, %v2159_v59  ;;  %v2161_v4 = vmul.f32 %v11552_v58, %v12939_v61  ;;  %v11185_v61 = vld [vmem:[%s14636_s6] sm:$0xff]  }
 0x74c   :  { %10001 = vmatprep.mubr.msk.f32.mxu1 %vm1001_vm0, %v2160_v57  ;;  %10004 = vmatprep.subr.bf16.mxu0 %v11185_v61 }
 0x74d   :  { %v13025_v15 = vpop.f32.mrb[24].mxu1  ;;  %10005 = vmatpush3.bf16.msra.mxu0 %v11185_v61 }
 0x74e   :  { %v13028_v24 = vpop.f32.mrb[25].mxu1  ;;  %10006 = vmatprep.subr.bf16.mxu0 %v11186_v1 }
 0x74f   :  { %10002 = vmatmul.mubr.msk.f32.gmra.mrb[46].mxu1 %vm1001_vm0, %v2161_v4 }
 0x750   :  { %3570 = vmatprep.mubr.bf16.mxu1 %v14660_v42 }
 0x751   :  { %v13032_v54 = vpop.f32.mrb[26].mxu1  ;;  %10007 = vmatpush3.bf16.msra.mxu0 %v11186_v1 }
 0x752   :  { %v13034_v14 = vpop.f32.mrb[27].mxu1  ;;  %10008 = vmatprep.subr.bf16.mxu0 %v11187_v18 }
 0x755   :  { %10009 = vmatpush3.bf16.msra.mxu0 %v11187_v18 }
 0x756   :  { %10010 = vmatprep.subr.bf16.mxu0 %v11188_v0 }
 0x759   :  { %10011 = vmatpush3.bf16.msra.mxu0 %v11188_v0 }
 0x75a   :  { %10012 = vmatprep.subr.bf16.mxu0 %v11189_v10 }
 0x75d   :  { %10013 = vmatpush3.bf16.msra.mxu0 %v11189_v10 }
 0x75e   :  { %10014 = vmatprep.subr.bf16.mxu0 %v11190_v19 }
 0x761   :  { %10015 = vmatpush3.bf16.msra.mxu0 %v11190_v19 }
 0x762   :  { %10016 = vmatprep.subr.bf16.mxu0 %v11191_v34 }
 0x765   :  { %10017 = vmatpush3.bf16.msra.mxu0 %v11191_v34 }
 0x766   :  { %10018 = vmatprep.subr.bf16.mxu0 %v11192_v35 }
 0x769   :  { %10019 = vmatpush3.bf16.msra.mxu0 %v11192_v35 }
 0x7b7   :  { %v13036_v44 = vpop.f32.mrb[28].mxu1 }
 0x7b8   :  { %v13038_v5 = vpop.f32.mrb[29].mxu1 }
 0x7bb   :  { %v13040_v41 = vpop.f32.mrb[30].mxu1 }
 0x7bc   :  { %v13042_v12 = vpop.f32.mrb[31].mxu1 }
 0x7c3   :  { %v9930_v39 = vpop.f32.mrb[32].mxu1 }
 0x7c4   :  { %v2434_v33 = vpop.f32.mrb[33].mxu1 }
 0x7c5   :  { %v10913_v26 = vpack.i.bf16 %v9930_v39, %v2434_v33 }
 0x7c6   :  { %v9958_v23 = vpop.f32.mrb[32].mxu0 }
 0x7c7   :  { %10914 = vrot.lane.b32.xlu0 %v10913_v26, %s12081_s1  ;;  %v2628_v16 = vpop.f32.mrb[33].mxu0 }
 0x7c8   :  { %v10923_v2 = vpack.i.bf16 %v9958_v23, %v2628_v16 }
 0x7cb   :  { %10924 = vrot.lane.b32.xlu0 %v10923_v2, %s12076_s5  ;;  %v9933_v43 = vpop.f32.mrb[34].mxu1 }
 0x7cc   :  { %v2444_v20 = vpop.f32.mrb[35].mxu1 }
 0x7cd   :  { %v10918_v53 = vpack.i.bf16 %v9933_v43, %v2444_v20 }
 0x7ce   :  { %v9961_v29 = vpop.f32.mrb[34].mxu0 }
 0x7cf   :  { %10919 = vrot.lane.b32.xlu1 %v10918_v53, %s12081_s1  ;;  %v2638_v9 = vpop.f32.mrb[35].mxu0 }
 0x7d0   :  { %v10928_v36 = vpack.i.bf16 %v9961_v29, %v2638_v9 }
 0x7d3   :  { %v9944_v49 = vpop.f32.mrb[36].mxu1  ;;  %10929 = vrot.lane.b32.xlu1 %v10928_v36, %s12076_s5 }
 0x7d4   :  { %v2531_v47 = vpop.f32.mrb[37].mxu1 }
 0x7d5   :  { %v10943_v51 = vpack.i.bf16 %v9944_v49, %v2531_v47 }
 0x7db   :  { %v9986_v7 = vpop.f32.mrb[36].mxu0 }
 0x7dc   :  { %v9947_v32 = vpop.f32.mrb[38].mxu1  ;;  %v2822_v46 = vpop.f32.mrb[37].mxu0 }
 0x7dd   :  { %v10933_v3 = vpack.i.bf16 %v9986_v7, %v2822_v46  ;;  %v2541_v50 = vpop.f32.mrb[39].mxu1 }
 0x7de   :  { %v10948_v40 = vpack.i.bf16 %v9947_v32, %v2541_v50 }
 0x7df   :  { %10934 = vrot.lane.b32.xlu0 %v10933_v3, %s12080_s0 }
 0x7e0   :  { %v9972_v62 = vpop.f32.mrb[40].mxu1 }
 0x7e1   :  { %v2725_v63 = vpop.f32.mrb[41].mxu1 }
 0x7e2   :  { %v10953_v52 = vpack.i.bf16 %v9972_v62, %v2725_v63 }
 0x7e3   :  { %10944 = vrot.lane.b32.xlu0 %v10943_v51, %s12081_s1 }
 0x7e4   :  { %v9975_v11 = vpop.f32.mrb[42].mxu1 }
 0x7e5   :  { %v2735_v22 = vpop.f32.mrb[43].mxu1 }
 0x7e6   :  { %v10958_v37 = vpack.i.bf16 %v9975_v11, %v2735_v22 }
 0x7e7   :  { %10954 = vrot.lane.b32.xlu0 %v10953_v52, %s12076_s5  ;;  %v9989_v45 = vpop.f32.mrb[38].mxu0 }
 0x7e8   :  { %v2832_v25 = vpop.f32.mrb[39].mxu0 }
 0x7e9   :  { %v10938_v13 = vpack.i.bf16 %v9989_v45, %v2832_v25 }
 0x7eb   :  { %10939 = vrot.lane.b32.xlu1 %v10938_v13, %s12080_s0 }
 0x7ef   :  { %10949 = vrot.lane.b32.xlu1 %v10948_v40, %s12081_s1 }
 0x7f3   :  { %10959 = vrot.lane.b32.xlu1 %v10958_v37, %s12076_s5 }
 0x81e   :  { %v10000_v38 = vpop.f32.mrb[44].mxu1 }
 0x81f   :  { %v2919_v48 = vpop.f32.mrb[45].mxu1 }
 0x820   :  { %v10963_v6 = vpack.i.bf16 %v10000_v38, %v2919_v48 }
 0x822   :  { %v10003_v30 = vpop.f32.mrb[46].mxu1  ;;  %10964 = vrot.lane.b32.xlu0 %v10963_v6, %s12080_s0 }
 0x823   :  { %v2929_v55 = vpop.f32.mrb[47].mxu1 }
 0x824   :  { %v10968_v59 = vpack.i.bf16 %v10003_v30, %v2929_v55 }
 0x826   :  { %10969 = vrot.lane.b32.xlu1 %v10968_v59, %s12080_s0 }
 0x839   :  { %v10915_v58 = vpop.permute.xlu0 %10914 }
 0x83a   :  { %v10917_v4 = vunpack.i.h.bf16 %v10915_v58  ;;  %v10916_v39 = vunpack.i.l.bf16 %v10915_v58 }
 0x83c   :  { %v3035_v23 = vsel %vm1001_vm0, %v13025_v15, %v10917_v4  ;;  %v3034_v1 = vsel %vm1001_vm0, %v13028_v24, %v10916_v39 }
 0x83d   :  { %v10925_v57 = vpop.permute.xlu0 %10924 }
 0x83e   :  { %v10927_v61 = vunpack.i.h.bf16 %v10925_v57  ;;  %v10926_v33 = vunpack.i.l.bf16 %v10925_v57 }
 0x840   :  { %v3043_v0 = vsel %vm3042_vm2, %v3034_v1, %v10926_v33  ;;  %v3044_v43 = vsel %vm3042_vm2, %v3035_v23, %v10927_v61 }
 0x841   :  { %v10920_v16 = vpop.permute.xlu1 %10919 }
 0x842   :  { %v10922_v36 = vunpack.i.h.bf16 %v10920_v16  ;;  %v10921_v10 = vunpack.i.l.bf16 %v10920_v16 }
 0x844   :  { %v3037_v24 = vsel %vm1001_vm0, %v13032_v54, %v10922_v36  ;;  %v3036_v51 = vsel %vm1001_vm0, %v13034_v14, %v10921_v10 }
 0x845   :  { %v10930_v9 = vpop.permute.xlu1 %10929 }
 0x846   :  { %v10932_v15 = vunpack.i.h.bf16 %v10930_v9  ;;  %v10931_v49 = vunpack.i.l.bf16 %v10930_v9 }
 0x848   :  { %v3046_v7 = vsel %vm3042_vm2, %v3037_v24, %v10932_v15  ;;  %v3045_v32 = vsel %vm3042_vm2, %v3036_v51, %v10931_v49 }
 0x851   :  { %v10935_v26 = vpop.permute.xlu0 %10934 }
 0x852   :  { %v10937_v2 = vunpack.i.h.bf16 %v10935_v26  ;;  %v10936_v18 = vunpack.i.l.bf16 %v10935_v26 }
 0x854   :  { %v3052_v20 = vsel %vm3051_vm3, %v3043_v0, %v10936_v18  ;;  %v3053_v53 = vsel %vm3051_vm3, %v3044_v43, %v10937_v2  ;;  %v8945_v18 = vld [vmem:[#allocation5 + $0x9] ss:$0 sm:$0xff] }
 0x855   :  { %v3060_v29 = vpack.c.bf16 %v3053_v53, %v3052_v20  ;;  %v10945_v40 = vpop.permute.xlu0 %10944 }
 0x856   :  { %v10947_v63 = vunpack.i.h.bf16 %v10945_v40  ;;  %v10946_v54 = vunpack.i.l.bf16 %v10945_v40  ;;  %v11198_v40 = vld [vmem:[#allocation8 + $0xc] ss:$16 sps:$4 sm:$0xff]  }
 0x857   :  { %10020 = vmatprep.mubr.bf16.mxu0 %v3060_v29  ;;  %3611 = vmatprep.subr.bf16.mxu0 %v11198_v40 }
 0x858   :  { %v3039_v22 = vsel %vm1001_vm0, %v13036_v44, %v10947_v63  ;;  %v3038_v37 = vsel %vm1001_vm0, %v13038_v5, %v10946_v54 }
 0x859   :  { %v10955_v62 = vpop.permute.xlu0 %10954 }
 0x85a   :  { %v10957_v52 = vunpack.i.h.bf16 %v10955_v62  ;;  %v10956_v11 = vunpack.i.l.bf16 %v10955_v62  ;;  %v11202_v62 = vld [vmem:[#allocation8 + $0x28] ss:$16 sps:$4 sm:$0xff]  }
 0x85c   :  { %v3047_v55 = vsel %vm3042_vm2, %v3038_v37, %v10956_v11  ;;  %v3048_v59 = vsel %vm3042_vm2, %v3039_v22, %v10957_v52 }
 0x85d   :  { %v10940_v47 = vpop.permute.xlu1 %10939 }
 0x85e   :  { %v10942_v19 = vunpack.i.h.bf16 %v10940_v47  ;;  %v10941_v34 = vunpack.i.l.bf16 %v10940_v47 }
 0x860   :  { %v3055_v46 = vsel %vm3051_vm3, %v3046_v7, %v10942_v19  ;;  %v3054_v3 = vsel %vm3051_vm3, %v3045_v32, %v10941_v34 }
 0x861   :  { %v3061_v50 = vpack.c.bf16 %v3055_v46, %v3054_v3  ;;  %v10950_v35 = vpop.permute.xlu1 %10949  ;;  %v11195_v3 = vld [vmem:[#allocation8 + $0x4] ss:$16 sps:$4 sm:$0xff]  }
 0x862   :  { %v10952_v25 = vunpack.i.h.bf16 %v10950_v35  ;;  %v10951_v13 = vunpack.i.l.bf16 %v10950_v35  ;;  %3538 = vmatprep.subr.bf16.mxu1 %v11195_v3  ;;  %v11204_v35 = vld [vmem:[#allocation8 + $0x2c] ss:$16 sps:$4 sm:$0xff]  }
 0x863   :  { %10021 = vmatmul.mubr.bf16.vlgmr.msra.gmra.mrb[40].mxu0 %v3061_v50  ;;  %v11196_v50 = vld [vmem:[#allocation8 + $0x8] ss:$16 sps:$4 sm:$0xff]  }
 0x864   :  { %v3041_v5 = vsel %vm1001_vm0, %v13040_v41, %v10952_v25  ;;  %v3040_v39 = vsel %vm1001_vm0, %v13042_v12, %v10951_v13  ;;  %3612 = vmatpush1.bf16.msra.mxu0 %v11196_v50 }
 0x865   :  { %v10960_v14 = vpop.permute.xlu1 %10959  ;;  %3613 = vmatprep.subr.bf16.mxu0 %v11204_v35 }
 0x866   :  { %v10962_v6 = vunpack.i.h.bf16 %v10960_v14  ;;  %v10961_v30 = vunpack.i.l.bf16 %v10960_v14 }
 0x868   :  { %v3049_v26 = vsel %vm3042_vm2, %v3040_v39, %v10961_v30  ;;  %v3050_v23 = vsel %vm3042_vm2, %v3041_v5, %v10962_v6  ;;  %3614 = vmatpush1.bf16.msra.mxu0 %v11202_v62  ;;  %v11216_v5 = vld [vmem:[#allocation8 + $0x6c] ss:$16 sps:$4 sm:$0xff]   ;;  %v11211_v39 = vld [vmem:[#allocation8 + $0x60] ss:$16 sps:$4 sm:$0xff]  }
 0x894   :  { %v10965_v45 = vpop.permute.xlu0 %10964 }
 0x895   :  { %v10967_v38 = vunpack.i.h.bf16 %v10965_v45  ;;  %v10966_v48 = vunpack.i.l.bf16 %v10965_v45 }
 0x897   :  { %v3056_v58 = vsel %vm3051_vm3, %v3047_v55, %v10966_v48  ;;  %v3057_v57 = vsel %vm3051_vm3, %v3048_v59, %v10967_v38  ;;  %v11207_v59 = vld [vmem:[#allocation8 + $0x44] ss:$16 sps:$4 sm:$0xff]  }
 0x898   :  { %v10970_v4 = vpop.permute.xlu1 %10969  ;;  %v3062_v44 = vpack.c.bf16 %v3057_v57, %v3056_v58  ;;  %v11210_v58 = vld [vmem:[#allocation8 + $0x4c] ss:$16 sps:$4 sm:$0xff]   ;;  %v11205_v57 = vld [vmem:[#allocation8 + $0x40] ss:$16 sps:$4 sm:$0xff]  }
 0x899   :  { %v10972_v61 = vunpack.i.h.bf16 %v10970_v4  ;;  %v10971_v33 = vunpack.i.l.bf16 %v10970_v4  ;;  %v11208_v4 = vld [vmem:[#allocation8 + $0x48] ss:$16 sps:$4 sm:$0xff]   ;;  %3615 = vmatprep.subr.bf16.mxu0 %v11210_v58 }
 0x89a   :  { %10024 = vmatprep.mubr.bf16.mxu0 %v3062_v44  ;;  %3616 = vmatpush1.bf16.msra.mxu0 %v11208_v4  ;;  %v11213_v44 = vld [vmem:[#allocation8 + $0x64] ss:$16 sps:$4 sm:$0xff]  }
 0x89b   :  { %v3058_v1 = vsel %vm3051_vm3, %v3049_v26, %v10971_v33  ;;  %v3059_v16 = vsel %vm3051_vm3, %v3050_v23, %v10972_v61  ;;  %v11214_v61 = vld [vmem:[#allocation8 + $0x68] ss:$16 sps:$4 sm:$0xff]   ;;  %3617 = vmatprep.subr.bf16.mxu0 %v11216_v5  ;;  %v11219_v33 = vld [vmem:[#allocation8 + $0x84] ss:$16 sps:$4 sm:$0xff]   ;;  %v11222_v26 = vld [vmem:[#allocation8 + $0x8c] ss:$16 sps:$4 sm:$0xff]  }
 0x89c   :  { %v3063_v2 = vpack.c.bf16 %v3059_v16, %v3058_v1  ;;  %v11217_v23 = vld [vmem:[#allocation8 + $0x80] ss:$16 sps:$4 sm:$0xff]   ;;  %v11220_v1 = vld [vmem:[#allocation8 + $0x88] ss:$16 sps:$4 sm:$0xff]   ;;  %v11225_v16 = vld [vmem:[#allocation8 + $0xa4] ss:$16 sps:$4 sm:$0xff]  }
 0x89e   :  { %10025 = vmatmul.mubr.bf16.gmra.mrb[44].mxu0 %v3063_v2  ;;  %v11228_v2 = vld [vmem:[#allocation8 + $0xac] ss:$16 sps:$4 sm:$0xff]  }
 0x89f   :  { %3643 = vmatprep.mubr.bf16.mxu0 %v14660_v42  ;;  %3618 = vmatpush1.bf16.msra.mxu0 %v11214_v61 }
 0x8a0   :  { %3619 = vmatprep.subr.bf16.mxu0 %v11222_v26 }
 0x8a3   :  { %3620 = vmatpush1.bf16.msra.mxu0 %v11220_v1 }
 0x8a4   :  { %3621 = vmatprep.subr.bf16.mxu0 %v11228_v2 }
 0x936   :  { %v10022_v41 = vpop.f32.mrb[40].mxu0 }
 0x937   :  { %v3167_v0 = vpop.f32.mrb[41].mxu0  ;;  %v3176_v53 = vadd.f32 %v10022_v41, %v8945_v18  ;;  %v11226_v41 = vld [vmem:[#allocation8 + $0xa8] ss:$16 sps:$4 sm:$0xff]  }
 0x938   :  { %v3168_v43 = vadd.f32 %v8945_v18, %v3167_v0  ;;  %v10023_v12 = vpop.f32.mrb[42].mxu0  ;;  %3622 = vmatpush1.bf16.msra.mxu0 %v11226_v41  ;;  %v11231_v0 = vld [vmem:[#allocation8 + $0xc4] ss:$16 sps:$4 sm:$0xff]  }
 0x939   :  { %v3170_v20 = vpop.f32.mrb[43].mxu0  ;;  %v13121_v10 = vadd.f32 %v3176_v53, %v12340_v60  ;;  %v3179_v15 = vadd.f32 %v10023_v12, %v8945_v18  ;;  %v11229_v12 = vld [vmem:[#allocation8 + $0xc0] ss:$16 sps:$4 sm:$0xff]   ;;  %v11237_v53 = vld [vmem:[#allocation8 + $0xe4] ss:$16 sps:$4 sm:$0xff]  }
 0x93a   :  { %v13114_v29 = vadd.f32 %v3168_v43, %v12335_v56  ;;  %v3171_v9 = vadd.f32 %v8945_v18, %v3170_v20  ;;  %v11234_v43 = vld [vmem:[#allocation8 + $0xcc] ss:$16 sps:$4 sm:$0xff]   ;;  %v11232_v20 = vld [vmem:[#allocation8 + $0xc8] ss:$16 sps:$4 sm:$0xff]  }
 0x93b   :  { %v13126_v49 = vadd.f32 %v3179_v15, %v12350_v21  ;;  %3623 = vmatprep.subr.bf16.mxu0 %v11234_v43  ;;  %v11238_v15 = vld [vmem:[#allocation8 + $0xe8] ss:$16 sps:$4 sm:$0xff]   ;;  %v11243_v43 = vld [vmem:[#allocation10] sm:$0xff]  }
 0x93c   :  { %v13117_v36 = vadd.f32 %v3171_v9, %v12342_v8  ;;  %3208 = vadd.xlane.f32.xlu0 %v13114_v29  ;;  %3624 = vmatpush1.bf16.msra.mxu0 %v11232_v20  ;;  %v11235_v9 = vld [vmem:[#allocation8 + $0xe0] ss:$16 sps:$4 sm:$0xff]   ;;  %v11245_v20 = vld [vmem:[#allocation10 + $0x48] sm:$0xff]  }
 0x93e   :  { %3210 = vadd.xlane.f32.xlu1 %v13117_v36 }
 0x940   :  { %3212 = vadd.xlane.f32.xlu0 %v13121_v10 }
 0x944   :  { %3214 = vadd.xlane.f32.xlu0 %v13126_v49 }
 0x971   :  { %v10026_v56 = vpop.f32.mrb[44].mxu0 }
 0x972   :  { %v3183_v47 = vpop.f32.mrb[45].mxu0  ;;  %v3192_v34 = vadd.f32 %v10026_v56, %v8945_v18  ;;  %v11240_v56 = vld [vmem:[#allocation8 + $0xec] ss:$16 sps:$4 sm:$0xff]  }
 0x973   :  { %v3184_v24 = vadd.f32 %v8945_v18, %v3183_v47  ;;  %v10027_v8 = vpop.f32.mrb[46].mxu0  ;;  %3625 = vmatprep.subr.bf16.mxu0 %v11240_v56 }
 0x974   :  { %v3195_v51 = vadd.f32 %v10027_v8, %v8945_v18  ;;  %v3186_v19 = vpop.f32.mrb[47].mxu0  ;;  %v13137_v21 = vadd.f32 %v3192_v34, %v12355_v27  ;;  %v11199_v27 = vld [vmem:[#allocation8 + $0x20] ss:$16 sps:$4 sm:$0xff]   ;;  %3626 = vmatpush1.bf16.msra.mxu0 %v11238_v15  ;;  %v11247_v15 = vld [vmem:[#allocation10 + $0x8] sm:$0xff]  }
 0x975   :  { %v13130_v60 = vadd.f32 %v3184_v24, %v12348_v17  ;;  %v3187_v7 = vadd.f32 %v8945_v18, %v3186_v19  ;;  %v11193_v17 = vld [vmem:[#allocation8] ss:$16 sps:$4 sm:$0xff]  }
 0x976   :  { %v13141_v46 = vadd.f32 %v3195_v51, %v12361_v31  ;;  %3539 = vmatpush1.bf16.msra.mxu1 %v11193_v17  ;;  %v11223_v18 = vld [vmem:[#allocation8 + $0xa0] ss:$16 sps:$4 sm:$0xff]  }
 0x977   :  { %v13133_v32 = vadd.f32 %v3187_v7, %v12357_v28  ;;  %3216 = vadd.xlane.f32.xlu1 %v13130_v60  ;;  %v11201_v28 = vld [vmem:[#allocation8 + $0x24] ss:$16 sps:$4 sm:$0xff]  }
 0x978   :  { %3540 = vmatprep.subr.bf16.mxu1 %v11201_v28 }
 0x979   :  { %3218 = vadd.xlane.f32.xlu0 %v13133_v32 }
 0x97a   :  { %3541 = vmatpush1.bf16.msra.mxu1 %v11199_v27 }
 0x97b   :  { %3220 = vadd.xlane.f32.xlu1 %v13137_v21  ;;  %3542 = vmatprep.subr.bf16.mxu1 %v11207_v59 }
 0x97d   :  { %3222 = vadd.xlane.f32.xlu0 %v13141_v46 }
 0x97e   :  { %3543 = vmatpush1.bf16.msra.mxu1 %v11205_v57 }
 0x97f   :  { %3544 = vmatprep.subr.bf16.mxu1 %v11213_v44  ;;  %v13185_v44 = vld [vmem:[#allocation5 + $0xa] ss:$0 sm:$0xff] }
 0x982   :  { %3545 = vmatpush1.bf16.msra.mxu1 %v11211_v39 }
 0x983   :  { %3546 = vmatprep.subr.bf16.mxu1 %v11219_v33 }
 0x986   :  { %3547 = vmatpush1.bf16.msra.mxu1 %v11217_v23  ;;  %v13190_v23 = vld [vmem:[#allocation5 + $0xb] ss:$0 sm:$0xff] }
 0x987   :  { %3548 = vmatprep.subr.bf16.mxu1 %v11225_v16 }
 0x98a   :  { %3549 = vmatpush1.bf16.msra.mxu1 %v11223_v18 }
 0x98b   :  { %3550 = vmatprep.subr.bf16.mxu1 %v11231_v0 }
 0x98e   :  { %3551 = vmatpush1.bf16.msra.mxu1 %v11229_v12  ;;  %v11244_v12 = vld [vmem:[#allocation10 + $0x80] sm:$0xff]  }
 0x98f   :  { %3552 = vmatprep.subr.bf16.mxu1 %v11237_v53  ;;  %v11246_v53 = vld [vmem:[#allocation10 + $0xc8] sm:$0xff]  }
 0x992   :  { %3553 = vmatpush1.bf16.msra.mxu1 %v11235_v9 }
 0x9c9   :  { %v3209_v31 = vpop.xlane.xlu0 %3208 }
 0x9ca   :  { %v3224_v63 = vmul.f32 0.0078125, %v3209_v31 }
 0x9cb   :  { %v3211_v54 = vpop.xlane.xlu1 %3210 }
 0x9cc   :  { %v13146_v52 = vsub.f32 %v13114_v29, %v3224_v63  ;;  %v3225_v11 = vmul.f32 0.0078125, %v3211_v54  ;;  %v11241_v63 = vld [vmem:[#allocation10 + $0x40] sm:$0xff]  }
 0x9cd   :  { %v3213_v14 = vpop.xlane.xlu0 %3212  ;;  %v11242_v54 = vld [vmem:[#allocation10 + $0xc0] sm:$0xff]   ;;  %9401 = vmatprep.subr.bf16.mxu1 %v11241_v63 }
 0x9ce   :  { %v13149_v22 = vsub.f32 %v13117_v36, %v3225_v11  ;;  %v3226_v37 = vmul.f32 0.0078125, %v3213_v14  ;;  %v3240_v45 = vmul.f32 %v13146_v52, %v13146_v52  ;;  %9441 = vmatprep.subr.bf16.mxu0 %v11242_v54 }
 0x9d0   :  { %v13154_v25 = vsub.f32 %v13121_v10, %v3226_v37  ;;  %3248 = vadd.xlane.f32.xlu1 %v3240_v45  ;;  %v3241_v13 = vmul.f32 %v13149_v22, %v13149_v22 }
 0x9d1   :  { %v3215_v38 = vpop.xlane.xlu0 %3214 }
 0x9d2   :  { %v3227_v48 = vmul.f32 0.0078125, %v3215_v38  ;;  %3250 = vadd.xlane.f32.xlu0 %v3241_v13  ;;  %v3242_v6 = vmul.f32 %v13154_v25, %v13154_v25 }
 0x9d4   :  { %v13161_v30 = vsub.f32 %v13126_v49, %v3227_v48  ;;  %3252 = vadd.xlane.f32.xlu1 %v3242_v6 }
 0x9d6   :  { %v3243_v55 = vmul.f32 %v13161_v30, %v13161_v30 }
 0x9d8   :  { %3254 = vadd.xlane.f32.xlu0 %v3243_v55 }
 0xa04   :  { %v3217_v47 = vpop.xlane.xlu1 %3216 }
 0xa05   :  { %v3228_v24 = vmul.f32 0.0078125, %v3217_v47 }
 0xa06   :  { %v3219_v8 = vpop.xlane.xlu0 %3218 }
 0xa07   :  { %v13166_v51 = vsub.f32 %v13130_v60, %v3228_v24  ;;  %v3229_v19 = vmul.f32 0.0078125, %v3219_v8 }
 0xa08   :  { %v3221_v34 = vpop.xlane.xlu1 %3220 }
 0xa09   :  { %v13169_v7 = vsub.f32 %v13133_v32, %v3229_v19  ;;  %v3230_v17 = vmul.f32 0.0078125, %v3221_v34  ;;  %v3244_v3 = vmul.f32 %v13166_v51, %v13166_v51 }
 0xa0a   :  { %v3223_v50 = vpop.xlane.xlu0 %3222 }
 0xa0b   :  { %v13174_v40 = vsub.f32 %v13137_v21, %v3230_v17  ;;  %v3231_v28 = vmul.f32 0.0078125, %v3223_v50  ;;  %3256 = vadd.xlane.f32.xlu1 %v3244_v3  ;;  %v3245_v35 = vmul.f32 %v13169_v7, %v13169_v7 }
 0xa0d   :  { %v13179_v27 = vsub.f32 %v13141_v46, %v3231_v28  ;;  %3258 = vadd.xlane.f32.xlu0 %v3245_v35  ;;  %v3246_v62 = vmul.f32 %v13174_v40, %v13174_v40 }
 0xa0f   :  { %3260 = vadd.xlane.f32.xlu1 %v3246_v62  ;;  %v3247_v31 = vmul.f32 %v13179_v27, %v13179_v27 }
 0xa11   :  { %3262 = vadd.xlane.f32.xlu0 %v3247_v31 }
 0xa5d   :  { %v3249_v11 = vpop.xlane.xlu1 %3248 }
 0xa5e   :  { %v3264_v14 = vmul.f32 0.0078125, %v3249_v11 }
 0xa5f   :  { %v3251_v37 = vpop.xlane.xlu0 %3250 }
 0xa60   :  { %v3272_v45 = vadd.f32 1e-05, %v3264_v14  ;;  %v3265_v13 = vmul.f32 0.0078125, %v3251_v37 }
 0xa61   :  { %v3253_v38 = vpop.xlane.xlu1 %3252 }
 0xa62   :  { %11553 = vrsqrt.f32 %v3272_v45  ;;  %v3273_v48 = vadd.f32 1e-05, %v3265_v13  ;;  %v3266_v6 = vmul.f32 0.0078125, %v3253_v38 }
 0xa64   :  { %11555 = vrsqrt.f32 %v3273_v48  ;;  %v3274_v55 = vadd.f32 1e-05, %v3266_v6 }
 0xa65   :  { %v3255_v59 = vpop.xlane.xlu0 %3254 }
 0xa66   :  { %11557 = vrsqrt.f32 %v3274_v55  ;;  %v3267_v58 = vmul.f32 0.0078125, %v3255_v59 }
 0xa68   :  { %v3275_v57 = vadd.f32 1e-05, %v3267_v58 }
 0xa6a   :  { %11559 = vrsqrt.f32 %v3275_v57 }
 0xa6c   :  { %v11554_v4 = vpop.eup %11553 }
 0xa6d   :  { %v3288_v5 = vmul.f32 %v11554_v4, %v13146_v52 }
 0xa6e   :  { %v11556_v39 = vpop.eup %11555 }
 0xa6f   :  { %v3300_v61 = vmul.f32 %v13185_v44, %v3288_v5  ;;  %v3289_v33 = vmul.f32 %v11556_v39, %v13149_v22 }
 0xa70   :  { %v11558_v26 = vpop.eup %11557 }
 0xa71   :  { %v3301_v1 = vmul.f32 %v13185_v44, %v3289_v33  ;;  %v3312_v16 = vadd.f32 %v13190_v23, %v3300_v61  ;;  %v3290_v18 = vmul.f32 %v11558_v26, %v13154_v25  ;;  %v11251_v61 = vld [vmem:[#allocation10 + $0x10] sm:$0xff]   ;;  %v11254_v26 = vld [vmem:[#allocation10 + $0xd8] sm:$0xff]  }
 0xa72   :  { %v11252_v33 = vld [vmem:[#allocation10 + $0x90] sm:$0xff]  }
 0xa73   :  { %v3313_v2 = vadd.f32 %v13190_v23, %v3301_v1  ;;  %v3302_v22 = vmul.f32 %v13185_v44, %v3290_v18  ;;  %v11255_v1 = vld [vmem:[#allocation10 + $0x18] sm:$0xff]   ;;  %v11259_v18 = vld [vmem:[#allocation10 + $0x20] sm:$0xff]  }
 0xa74   :  { %v11560_v41 = vpop.eup %11559 }
 0xa75   :  { %v3320_v0 = vpack.c.bf16 %v3313_v2, %v3312_v16  ;;  %v3291_v52 = vmul.f32 %v11560_v41, %v13161_v30  ;;  %v11248_v30 = vld [vmem:[#allocation10 + $0x88] sm:$0xff]   ;;  %v3314_v56 = vadd.f32 %v13190_v23, %v3302_v22  ;;  %v11256_v16 = vld [vmem:[#allocation10 + $0x98] sm:$0xff]   ;;  %v11258_v2 = vld [vmem:[#allocation10 + $0xe0] sm:$0xff]  }
 0xa76   :  { %v11260_v41 = vld [vmem:[#allocation10 + $0xa0] sm:$0xff]   ;;  %v11267_v22 = vld [vmem:[#allocation10 + $0x30] sm:$0xff]  }
 0xa77   :  { %3571 = vmatmul.mubr.bf16.vlgmr.msra.gmra.mrb[48].mxu1 %v3320_v0  ;;  %3644 = vmatmul.mubr.bf16.vlgmr.msra.gmra.mrb[48].mxu0 %v3320_v0  ;;  %v3303_v9 = vmul.f32 %v13185_v44, %v3291_v52  ;;  %v11261_v0 = vld [vmem:[#allocation10 + $0x68] sm:$0xff]  }
 0xa78   :  { %3580 = vmatprep.mubr.bf16.mxu1 %v14660_v42  ;;  %3653 = vmatprep.mubr.bf16.mxu0 %v14660_v42  ;;  %v11262_v52 = vld [vmem:[#allocation10 + $0xe8] sm:$0xff]  }
 0xa79   :  { %v3315_v25 = vadd.f32 %v13190_v23, %v3303_v9  ;;  %9402 = vmatpush3.bf16.msra.mxu1 %v11243_v43  ;;  %9442 = vmatpush3.bf16.msra.mxu0 %v11244_v12  ;;  %v11263_v43 = vld [vmem:[#allocation10 + $0x28] sm:$0xff]   ;;  %v11268_v9 = vld [vmem:[#allocation10 + $0xb0] sm:$0xff]  }
 0xa7a   :  { %9403 = vmatprep.subr.bf16.mxu1 %v11245_v20  ;;  %9443 = vmatprep.subr.bf16.mxu0 %v11246_v53  ;;  %v11264_v12 = vld [vmem:[#allocation10 + $0xa8] sm:$0xff]   ;;  %v11265_v20 = vld [vmem:[#allocation10 + $0x70] sm:$0xff]  }
 0xa7b   :  { %v3321_v47 = vpack.c.bf16 %v3315_v25, %v3314_v56  ;;  %v11266_v53 = vld [vmem:[#allocation10 + $0xf0] sm:$0xff]   ;;  %v11269_v25 = vld [vmem:[#allocation10 + $0x78] sm:$0xff]  }
 0xa7c   :  { %v11272_v56 = vld [vmem:[#allocation10 + $0xb8] sm:$0xff]  }
 0xa7d   :  { %9404 = vmatpush3.bf16.msra.mxu1 %v11247_v15  ;;  %9444 = vmatpush3.bf16.msra.mxu0 %v11248_v30  ;;  %v11270_v15 = vld [vmem:[#allocation10 + $0xf8] sm:$0xff]  }
 0xa7e   :  { %v11271_v30 = vld [vmem:[#allocation10 + $0x38] sm:$0xff]  }
 0xa7f   :  { %3581 = vmatmul.mubr.bf16.gmra.mrb[52].mxu1 %v3321_v47  ;;  %3654 = vmatmul.mubr.bf16.gmra.mrb[52].mxu0 %v3321_v47  ;;  %v3358_v47 = vlaneseq }
 0xa80   :  { %3590 = vmatprep.mubr.bf16.mxu1 %v14660_v42  ;;  %3663 = vmatprep.mubr.bf16.mxu0 %v14660_v42 }
 0xa98   :  { %v3257_v24 = vpop.xlane.xlu1 %3256 }
 0xa99   :  { %v3268_v8 = vmul.f32 0.0078125, %v3257_v24  ;;  %v13219_v24 = vshrl.u32 %v3358_v47, 7 }
 0xa9a   :  { %v3259_v19 = vpop.xlane.xlu0 %3258 }
 0xa9b   :  { %v3276_v34 = vadd.f32 1e-05, %v3268_v8  ;;  %v3269_v17 = vmul.f32 0.0078125, %v3259_v19  ;;  %14661 = vst [vmem:[#allocation20_spill] sm:$0xff] %v13219_v24  ;;  %v13222_v8 = vsub.s32 0, %v13219_v24  ;;  %v14649_v19 = vsub.s32 2, %v13219_v24 }
 0xa9c   :  { %v3261_v3 = vpop.xlane.xlu1 %3260 }
 0xa9d   :  { %11561 = vrsqrt.f32 %v3276_v34  ;;  %v3277_v50 = vadd.f32 1e-05, %v3269_v17  ;;  %v3270_v28 = vmul.f32 0.0078125, %v3261_v3  ;;  %14662 = vst [vmem:[#allocation21_spill] sm:$0xff] %v13222_v8  ;;  %v14648_v17 = vsub.s32 1, %v13219_v24 }
 0xa9e   :  { %v3263_v35 = vpop.xlane.xlu0 %3262  ;;  %v3356_v34 = vld [vmem:[%s14634_s4] ss:$2 sm:$0xf]  ;;  %v14647_v3 = vsub.s32 3, %v13219_v24 }
 0xa9f   :  { %11563 = vrsqrt.f32 %v3277_v50  ;;  %v3278_v62 = vadd.f32 1e-05, %v3270_v28  ;;  %v3271_v31 = vmul.f32 0.0078125, %v3263_v35  ;;  %v13231_v50 = vrot.slane %v3356_v34, %v13222_v8 }
 0xaa0   :  { %v13235_v28 = vrot.slane %v3356_v34, %v14649_v19  ;;  %v13239_v35 = vrot.slane %v3356_v34, %v14648_v17 }
 0xaa1   :  { %11565 = vrsqrt.f32 %v3278_v62  ;;  %v3279_v63 = vadd.f32 1e-05, %v3271_v31  ;;  %v13243_v62 = vrot.slane %v3356_v34, %v14647_v3 }
 0xaa3   :  { %11567 = vrsqrt.f32 %v3279_v63 }
 0xaa7   :  { %v11562_v54 = vpop.eup %11561 }
 0xaa8   :  { %v3292_v11 = vmul.f32 %v11562_v54, %v13166_v51 }
 0xaa9   :  { %v11564_v14 = vpop.eup %11563 }
 0xaaa   :  { %v3293_v37 = vmul.f32 %v11564_v14, %v13169_v7  ;;  %v3304_v45 = vmul.f32 %v13185_v44, %v3292_v11 }
 0xaab   :  { %v11566_v13 = vpop.eup %11565 }
 0xaac   :  { %v3305_v38 = vmul.f32 %v13185_v44, %v3293_v37  ;;  %v3316_v6 = vadd.f32 %v13190_v23, %v3304_v45  ;;  %v3294_v59 = vmul.f32 %v11566_v13, %v13174_v40  ;;  %v11249_v40 = vld [vmem:[#allocation10 + $0x50] sm:$0xff]  }
 0xaad   :  { %v11568_v48 = vpop.eup %11567  ;;  %9405 = vmatprep.subr.bf16.mxu1 %v11249_v40 }
 0xaae   :  { %v3317_v55 = vadd.f32 %v13190_v23, %v3305_v38  ;;  %v3295_v58 = vmul.f32 %v11568_v48, %v13179_v27  ;;  %v3306_v7 = vmul.f32 %v13185_v44, %v3294_v59  ;;  %v11250_v27 = vld [vmem:[#allocation10 + $0xd0] sm:$0xff]   ;;  %9406 = vmatpush3.bf16.msra.mxu1 %v11251_v61 }
 0xaaf   :  { %9445 = vmatprep.subr.bf16.mxu0 %v11250_v27 }
 0xab0   :  { %v3322_v57 = vpack.c.bf16 %v3317_v55, %v3316_v6  ;;  %v3307_v51 = vmul.f32 %v13185_v44, %v3295_v58  ;;  %v3318_v5 = vadd.f32 %v13190_v23, %v3306_v7  ;;  %9446 = vmatpush3.bf16.msra.mxu0 %v11252_v33  ;;  %v11253_v44 = vld [vmem:[#allocation10 + $0x58] sm:$0xff]  }
 0xab1   :  { %9407 = vmatprep.subr.bf16.mxu1 %v11253_v44  ;;  %9447 = vmatprep.subr.bf16.mxu0 %v11254_v26 }
 0xab2   :  { %3591 = vmatmul.mubr.bf16.gmra.mrb[56].mxu1 %v3322_v57  ;;  %3664 = vmatmul.mubr.bf16.gmra.mrb[56].mxu0 %v3322_v57  ;;  %v3319_v4 = vadd.f32 %v13190_v23, %v3307_v51  ;;  %v11257_v23 = vld [vmem:[#allocation10 + $0x60] sm:$0xff]  }
 0xab3   :  { %3600 = vmatprep.mubr.bf16.mxu1 %v14660_v42  ;;  %3673 = vmatprep.mubr.bf16.mxu0 %v14660_v42 }
 0xab4   :  { %v3323_v39 = vpack.c.bf16 %v3319_v4, %v3318_v5  ;;  %9408 = vmatpush3.bf16.msra.mxu1 %v11255_v1  ;;  %9448 = vmatpush3.bf16.msra.mxu0 %v11256_v16 }
 0xab5   :  { %9409 = vmatprep.subr.bf16.mxu1 %v11257_v23  ;;  %9449 = vmatprep.subr.bf16.mxu0 %v11258_v2 }
 0xab8   :  { %9410 = vmatpush3.bf16.msra.mxu1 %v11259_v18  ;;  %9450 = vmatpush3.bf16.msra.mxu0 %v11260_v41 }
 0xab9   :  { %9411 = vmatprep.subr.bf16.mxu1 %v11261_v0  ;;  %9451 = vmatprep.subr.bf16.mxu0 %v11262_v52 }
 0xaba   :  { %3601 = vmatmul.mubr.bf16.gmra.mrb[60].mxu1 %v3323_v39  ;;  %3674 = vmatmul.mubr.bf16.gmra.mrb[60].mxu0 %v3323_v39 }
 0xabc   :  { %9412 = vmatpush3.bf16.msra.mxu1 %v11263_v43  ;;  %9452 = vmatpush3.bf16.msra.mxu0 %v11264_v12 }
 0xabd   :  { %9413 = vmatprep.subr.bf16.mxu1 %v11265_v20  ;;  %9453 = vmatprep.subr.bf16.mxu0 %v11266_v53 }
 0xac0   :  { %9414 = vmatpush3.bf16.msra.mxu1 %v11267_v22  ;;  %9454 = vmatpush3.bf16.msra.mxu0 %v11268_v9 }
 0xac1   :  { %9415 = vmatprep.subr.bf16.mxu1 %v11269_v25  ;;  %9455 = vmatprep.subr.bf16.mxu0 %v11270_v15 }
 0xac4   :  { %9416 = vmatpush3.bf16.msra.mxu1 %v11271_v30  ;;  %9456 = vmatpush3.bf16.msra.mxu0 %v11272_v56 }
 0xb4a   :  { %v3572_v31 = vpop.f32.mrb[48].mxu1  ;;  %v3645_v63 = vpop.f32.mrb[48].mxu0 }
 0xb4b   :  { %v3573_v54 = vadd.f32 %v3572_v31, %v13231_v50  ;;  %v3646_v11 = vadd.f32 %v3645_v63, %v13235_v28  ;;  %v3574_v14 = vpop.f32.mrb[49].mxu1  ;;  %v3647_v37 = vpop.f32.mrb[49].mxu0 }
 0xb4c   :  { %v3575_v45 = vadd.f32 %v3574_v14, %v13239_v35  ;;  %v3648_v13 = vadd.f32 %v3647_v37, %v13243_v62  ;;  %v3576_v38 = vpop.f32.mrb[50].mxu1  ;;  %v3649_v48 = vpop.f32.mrb[50].mxu0 }
 0xb4d   :  { %v3716_v6 = vmul.f32 0.70710677, %v3573_v54  ;;  %v3718_v55 = vmul.f32 0.70710677, %v3646_v11  ;;  %v3577_v57 = vadd.f32 %v3576_v38, %v13231_v50  ;;  %v13251_v51 = vadd.f32 %v3649_v48, %v13235_v28  ;;  %v3578_v7 = vpop.f32.mrb[51].mxu1  ;;  %v3651_v4 = vpop.f32.mrb[51].mxu0 }
 0xb4e   :  { %v3717_v59 = vmul.f32 0.70710677, %v3575_v45  ;;  %v3719_v58 = vmul.f32 0.70710677, %v3648_v13  ;;  %v3579_v5 = vadd.f32 %v3578_v7, %v13239_v35  ;;  %v13255_v39 = vadd.f32 %v3651_v4, %v13243_v62 }
 0xb4f   :  { %11569 = verf.f32 %v3716_v6  ;;  %v3720_v40 = vmul.f32 0.70710677, %v3577_v57  ;;  %v3722_v27 = vmul.f32 0.70710677, %v13251_v51  ;;  %v3684_v14 = vmul.f32 0.5, %v3573_v54 }
 0xb50   :  { %11571 = verf.f32 %v3718_v55  ;;  %v3721_v61 = vmul.f32 0.70710677, %v3579_v5  ;;  %v3723_v44 = vmul.f32 0.70710677, %v13255_v39  ;;  %v3686_v37 = vmul.f32 0.5, %v3646_v11 }
 0xb51   :  { %11573 = verf.f32 %v3717_v59  ;;  %v3685_v55 = vmul.f32 0.5, %v3575_v45  ;;  %v3687_v4 = vmul.f32 0.5, %v3648_v13  ;;  %v3689_v45 = vmul.f32 0.5, %v3579_v5 }
 0xb52   :  { %11575 = verf.f32 %v3719_v58  ;;  %v3582_v33 = vpop.f32.mrb[52].mxu1  ;;  %v3655_v1 = vpop.f32.mrb[52].mxu0 }
 0xb53   :  { %11577 = verf.f32 %v3720_v40  ;;  %v13260_v26 = vadd.f32 %v3582_v33, %v13231_v50  ;;  %v3584_v16 = vpop.f32.mrb[53].mxu1  ;;  %v13263_v23 = vadd.f32 %v3655_v1, %v13235_v28  ;;  %v3657_v18 = vpop.f32.mrb[53].mxu0  ;;  %v3688_v40 = vmul.f32 0.5, %v3577_v57 }
 0xb54   :  { %11579 = verf.f32 %v3722_v27  ;;  %v13266_v2 = vadd.f32 %v3584_v16, %v13239_v35  ;;  %v3586_v41 = vpop.f32.mrb[54].mxu1  ;;  %v13270_v52 = vadd.f32 %v3657_v18, %v13243_v62  ;;  %v3659_v43 = vpop.f32.mrb[54].mxu0  ;;  %v3690_v1 = vmul.f32 0.5, %v13251_v51 }
 0xb55   :  { %11581 = verf.f32 %v3721_v61  ;;  %v3724_v0 = vmul.f32 0.70710677, %v13260_v26  ;;  %v3588_v12 = vpop.f32.mrb[55].mxu1  ;;  %v3726_v20 = vmul.f32 0.70710677, %v13263_v23  ;;  %v3661_v53 = vpop.f32.mrb[55].mxu0  ;;  %v3587_v25 = vadd.f32 %v3586_v41, %v13231_v50 }
 0xb56   :  { %11583 = verf.f32 %v3723_v44  ;;  %v3725_v22 = vmul.f32 0.70710677, %v13266_v2  ;;  %v3727_v9 = vmul.f32 0.70710677, %v13270_v52  ;;  %v13277_v15 = vadd.f32 %v3659_v43, %v13235_v28 }
 0xb57   :  { %11585 = verf.f32 %v3724_v0  ;;  %v13280_v30 = vadd.f32 %v3588_v12, %v13239_v35  ;;  %v3728_v34 = vmul.f32 0.70710677, %v3587_v25  ;;  %v13283_v31 = vadd.f32 %v3661_v53, %v13243_v62 }
 0xb58   :  { %11587 = verf.f32 %v3726_v20  ;;  %v3730_v38 = vmul.f32 0.70710677, %v13277_v15  ;;  %v3691_v12 = vmul.f32 0.5, %v13255_v39 }
 0xb59   :  { %v11570_v56 = vpop.eup %11569  ;;  %11589 = verf.f32 %v3725_v22  ;;  %v3729_v59 = vmul.f32 0.70710677, %v13280_v30  ;;  %v3731_v54 = vmul.f32 0.70710677, %v13283_v31 }
 0xb5a   :  { %v11572_v47 = vpop.eup %11571  ;;  %11591 = verf.f32 %v3727_v9  ;;  %v3780_v6 = vadd.f32 1.0, %v11570_v56 }
 0xb5b   :  { %v11574_v63 = vpop.eup %11573  ;;  %11593 = verf.f32 %v3728_v34  ;;  %v3782_v7 = vadd.f32 1.0, %v11572_v47 }
 0xb5c   :  { %v11576_v48 = vpop.eup %11575  ;;  %11595 = verf.f32 %v3730_v38  ;;  %v3781_v61 = vadd.f32 1.0, %v11574_v63  ;;  %v3812_v41 = vmul.f32 %v3780_v6, %v3684_v14 }
 0xb5d   :  { %v11578_v58 = vpop.eup %11577  ;;  %11597 = verf.f32 %v3729_v59  ;;  %v3783_v44 = vadd.f32 1.0, %v11576_v48  ;;  %v3814_v13 = vmul.f32 %v3782_v7, %v3686_v37  ;;  %v3692_v37 = vmul.f32 0.5, %v13260_v26 }
 0xb5e   :  { %v11580_v27 = vpop.eup %11579  ;;  %v3784_v33 = vadd.f32 1.0, %v11578_v58  ;;  %11599 = verf.f32 %v3731_v54  ;;  %v3813_v22 = vmul.f32 %v3781_v61, %v3685_v55  ;;  %v3694_v7 = vmul.f32 0.5, %v13263_v23 }
 0xb5f   :  { %v11582_v11 = vpop.eup %11581  ;;  %v3786_v16 = vadd.f32 1.0, %v11580_v27  ;;  %v3815_v34 = vmul.f32 %v3783_v44, %v3687_v4  ;;  %v3693_v61 = vmul.f32 0.5, %v13266_v2 }
 0xb60   :  { %v11584_v18 = vpop.eup %11583  ;;  %v3816_v0 = vmul.f32 %v3784_v33, %v3688_v40  ;;  %v3785_v43 = vadd.f32 1.0, %v11582_v11  ;;  %v3696_v40 = vmul.f32 0.5, %v3587_v25  ;;  %v3698_v33 = vmul.f32 0.5, %v13277_v15 }
 0xb61   :  { %v3818_v57 = vmul.f32 %v3786_v16, %v3690_v1  ;;  %v3787_v20 = vadd.f32 1.0, %v11584_v18  ;;  %v11586_v53 = vpop.eup %11585  ;;  %v3697_v11 = vmul.f32 0.5, %v13280_v30  ;;  %v3695_v25 = vmul.f32 0.5, %v13270_v52 }
 0xb62   :  { %v3844_v9 = vpack.c.bf16 %v3816_v0, %v3812_v41  ;;  %v3817_v56 = vmul.f32 %v3785_v43, %v3689_v45  ;;  %v11588_v47 = vpop.eup %11587  ;;  %v3788_v14 = vadd.f32 1.0, %v11586_v53  ;;  %v3699_v41 = vmul.f32 0.5, %v13283_v31 }
 0xb63   :  { %v3846_v63 = vpack.c.bf16 %v3818_v57, %v3814_v13  ;;  %v3819_v51 = vmul.f32 %v3787_v20, %v3691_v12  ;;  %v11590_v38 = vpop.eup %11589  ;;  %v3790_v58 = vadd.f32 1.0, %v11588_v47 }
 0xb64   :  { %v3845_v5 = vpack.c.bf16 %v3817_v56, %v3813_v22  ;;  %v11592_v48 = vpop.eup %11591  ;;  %v3789_v55 = vadd.f32 1.0, %v11590_v38  ;;  %v3820_v26 = vmul.f32 %v3788_v14, %v3692_v37 }
 0xb65   :  { %v3847_v6 = vpack.c.bf16 %v3819_v51, %v3815_v34  ;;  %v11594_v59 = vpop.eup %11593  ;;  %v3791_v44 = vadd.f32 1.0, %v11592_v48  ;;  %v3822_v23 = vmul.f32 %v3790_v58, %v3694_v7 }
 0xb66   :  { %4148 = vmatprep.mubr.bf16.mxu1 %v3845_v5  ;;  %v11596_v39 = vpop.eup %11595  ;;  %v3792_v27 = vadd.f32 1.0, %v11594_v59  ;;  %v3821_v0 = vmul.f32 %v3789_v55, %v3693_v61 }
 0xb67   :  { %4213 = vmatprep.mubr.bf16.mxu0 %v3847_v6  ;;  %4149 = vmatmul.mubr.bf16.vlgmr.msra.gmra.mrb[64].mxu1 %v3844_v9  ;;  %v11598_v4 = vpop.eup %11597  ;;  %v3794_v54 = vadd.f32 1.0, %v11596_v39  ;;  %v3823_v57 = vmul.f32 %v3791_v44, %v3695_v25 }
 0xb68   :  { %4214 = vmatmul.mubr.bf16.vlgmr.msra.gmra.mrb[64].mxu0 %v3846_v63  ;;  %v3824_v1 = vmul.f32 %v3792_v27, %v3696_v40  ;;  %v3793_v16 = vadd.f32 1.0, %v11598_v4  ;;  %v11600_v45 = vpop.eup %11599 }
 0xb69   :  { %v3826_v18 = vmul.f32 %v3794_v54, %v3698_v33  ;;  %v3795_v2 = vadd.f32 1.0, %v11600_v45 }
 0xb6a   :  { %v3825_v43 = vmul.f32 %v3793_v16, %v3697_v11  ;;  %v3848_v13 = vpack.c.bf16 %v3824_v1, %v3820_v26 }
 0xb6b   :  { %v3850_v15 = vpack.c.bf16 %v3826_v18, %v3822_v23  ;;  %v3827_v12 = vmul.f32 %v3795_v2, %v3699_v41 }
 0xb6c   :  { %v3849_v30 = vpack.c.bf16 %v3825_v43, %v3821_v0 }
 0xb6d   :  { %v3851_v20 = vpack.c.bf16 %v3827_v12, %v3823_v57 }
 0xb6e   :  { %4156 = vmatprep.mubr.bf16.mxu1 %v3849_v30 }
 0xb6f   :  { %4157 = vmatmul.mubr.bf16.gmra.mrb[68].mxu1 %v3848_v13  ;;  %4221 = vmatprep.mubr.bf16.mxu0 %v3851_v20 }
 0xb70   :  { %4222 = vmatmul.mubr.bf16.gmra.mrb[68].mxu0 %v3850_v15 }
 0xb85   :  { %v3592_v53 = vpop.f32.mrb[56].mxu1  ;;  %v3665_v22 = vpop.f32.mrb[56].mxu0 }
 0xb86   :  { %v3593_v52 = vadd.f32 %v3592_v53, %v13231_v50  ;;  %v3666_v9 = vadd.f32 %v3665_v22, %v13235_v28  ;;  %v3594_v31 = vpop.f32.mrb[57].mxu1  ;;  %v3667_v56 = vpop.f32.mrb[57].mxu0 }
 0xb87   :  { %v3595_v47 = vadd.f32 %v3594_v31, %v13239_v35  ;;  %v3668_v34 = vadd.f32 %v3667_v56, %v13243_v62  ;;  %v3596_v63 = vpop.f32.mrb[58].mxu1  ;;  %v3669_v51 = vpop.f32.mrb[58].mxu0 }
 0xb88   :  { %v3732_v38 = vmul.f32 0.70710677, %v3593_v52  ;;  %v3734_v5 = vmul.f32 0.70710677, %v3666_v9  ;;  %v3597_v6 = vadd.f32 %v3596_v63, %v13231_v50  ;;  %v13303_v59 = vadd.f32 %v3669_v51, %v13235_v28  ;;  %v3598_v37 = vpop.f32.mrb[59].mxu1  ;;  %v3671_v58 = vpop.f32.mrb[59].mxu0 }
 0xb89   :  { %v3733_v48 = vmul.f32 0.70710677, %v3595_v47  ;;  %v3735_v14 = vmul.f32 0.70710677, %v3668_v34  ;;  %v3599_v39 = vadd.f32 %v3598_v37, %v13239_v35  ;;  %v13307_v7 = vadd.f32 %v3671_v58, %v13243_v62 }
 0xb8a   :  { %11601 = verf.f32 %v3732_v38  ;;  %v3736_v55 = vmul.f32 0.70710677, %v3597_v6  ;;  %v3738_v40 = vmul.f32 0.70710677, %v13303_v59  ;;  %v3700_v31 = vmul.f32 0.5, %v3593_v52 }
 0xb8b   :  { %11603 = verf.f32 %v3734_v5  ;;  %v3737_v27 = vmul.f32 0.70710677, %v3599_v39  ;;  %v3739_v61 = vmul.f32 0.70710677, %v13307_v7  ;;  %v3702_v56 = vmul.f32 0.5, %v3666_v9 }
 0xb8c   :  { %11605 = verf.f32 %v3733_v48  ;;  %v3701_v51 = vmul.f32 0.5, %v3595_v47  ;;  %v3703_v48 = vmul.f32 0.5, %v3668_v34  ;;  %v3705_v47 = vmul.f32 0.5, %v3599_v39 }
 0xb8d   :  { %11607 = verf.f32 %v3735_v14  ;;  %v3602_v4 = vpop.f32.mrb[60].mxu1  ;;  %v3675_v54 = vpop.f32.mrb[60].mxu0  ;;  %v3704_v14 = vmul.f32 0.5, %v3597_v6 }
 0xb8e   :  { %11609 = verf.f32 %v3736_v55  ;;  %v13312_v33 = vadd.f32 %v3602_v4, %v13231_v50  ;;  %v3604_v11 = vpop.f32.mrb[61].mxu1  ;;  %v13315_v26 = vadd.f32 %v3675_v54, %v13235_v28  ;;  %v3677_v1 = vpop.f32.mrb[61].mxu0 }
 0xb8f   :  { %11611 = verf.f32 %v3738_v40  ;;  %v13318_v44 = vadd.f32 %v3604_v11, %v13239_v35  ;;  %v3606_v16 = vpop.f32.mrb[62].mxu1  ;;  %v13322_v23 = vadd.f32 %v3677_v1, %v13243_v62  ;;  %v3679_v25 = vpop.f32.mrb[62].mxu0  ;;  %v3706_v40 = vmul.f32 0.5, %v13303_v59 }
 0xb90   :  { %11613 = verf.f32 %v3737_v27  ;;  %v3740_v45 = vmul.f32 0.70710677, %v13312_v33  ;;  %v3608_v18 = vpop.f32.mrb[63].mxu1  ;;  %v3742_v41 = vmul.f32 0.70710677, %v13315_v26  ;;  %v3681_v0 = vpop.f32.mrb[63].mxu0  ;;  %v3607_v13 = vadd.f32 %v3606_v16, %v13231_v50 }
 0xb91   :  { %11615 = verf.f32 %v3739_v61  ;;  %v3741_v43 = vmul.f32 0.70710677, %v13318_v44  ;;  %v3743_v2 = vmul.f32 0.70710677, %v13322_v23  ;;  %v13329_v15 = vadd.f32 %v3679_v25, %v13235_v28 }
 0xb92   :  { %11617 = verf.f32 %v3740_v45  ;;  %v13332_v57 = vadd.f32 %v3608_v18, %v13239_v35  ;;  %v3744_v20 = vmul.f32 0.70710677, %v3607_v13  ;;  %v13335_v53 = vadd.f32 %v3681_v0, %v13243_v62 }
 0xb93   :  { %11619 = verf.f32 %v3742_v41  ;;  %v3746_v50 = vmul.f32 0.70710677, %v13329_v15  ;;  %v3707_v1 = vmul.f32 0.5, %v13307_v7 }
 0xb94   :  { %v11602_v12 = vpop.eup %11601  ;;  %11621 = verf.f32 %v3741_v43  ;;  %v3745_v35 = vmul.f32 0.70710677, %v13332_v57  ;;  %v3747_v52 = vmul.f32 0.70710677, %v13335_v53 }
 0xb95   :  { %v11604_v30 = vpop.eup %11603  ;;  %11623 = verf.f32 %v3743_v2  ;;  %v3796_v28 = vadd.f32 1.0, %v11602_v12 }
 0xb96   :  { %v11606_v22 = vpop.eup %11605  ;;  %11625 = verf.f32 %v3744_v20  ;;  %v3798_v5 = vadd.f32 1.0, %v11604_v30 }
 0xb97   :  { %v11608_v63 = vpop.eup %11607  ;;  %11627 = verf.f32 %v3746_v50  ;;  %v3797_v62 = vadd.f32 1.0, %v11606_v22  ;;  %v3828_v61 = vmul.f32 %v3796_v28, %v3700_v31 }
 0xb98   :  { %v11610_v38 = vpop.eup %11609  ;;  %11629 = verf.f32 %v3745_v35  ;;  %v3799_v55 = vadd.f32 1.0, %v11608_v63  ;;  %v3830_v34 = vmul.f32 %v3798_v5, %v3702_v56  ;;  %v3708_v56 = vmul.f32 0.5, %v13312_v33 }
 0xb99   :  { %v11612_v37 = vpop.eup %11611  ;;  %v3800_v58 = vadd.f32 1.0, %v11610_v38  ;;  %11631 = verf.f32 %v3747_v52  ;;  %v3829_v25 = vmul.f32 %v3797_v62, %v3701_v51  ;;  %v3710_v63 = vmul.f32 0.5, %v13315_v26 }
 0xb9a   :  { %v11614_v9 = vpop.eup %11613  ;;  %v3802_v27 = vadd.f32 1.0, %v11612_v37  ;;  %v3831_v43 = vmul.f32 %v3799_v55, %v3703_v48  ;;  %v3712_v51 = vmul.f32 0.5, %v3607_v13  ;;  %v3709_v5 = vmul.f32 0.5, %v13318_v44 }
 0xb9b   :  { %v11616_v4 = vpop.eup %11615  ;;  %v3832_v54 = vmul.f32 %v3800_v58, %v3704_v14  ;;  %v3801_v11 = vadd.f32 1.0, %v11614_v9  ;;  %v3714_v48 = vmul.f32 0.5, %v13329_v15  ;;  %v3713_v37 = vmul.f32 0.5, %v13332_v57 }
 0xb9c   :  { %v3834_v6 = vmul.f32 %v3802_v27, %v3706_v40  ;;  %v3803_v16 = vadd.f32 1.0, %v11616_v4  ;;  %v11618_v45 = vpop.eup %11617  ;;  %v3711_v13 = vmul.f32 0.5, %v13322_v23  ;;  %v3715_v40 = vmul.f32 0.5, %v13335_v53 }
 0xb9d   :  { %v3833_v18 = vmul.f32 %v3801_v11, %v3705_v47  ;;  %v3852_v41 = vpack.c.bf16 %v3832_v54, %v3828_v61  ;;  %v11620_v0 = vpop.eup %11619  ;;  %v3804_v20 = vadd.f32 1.0, %v11618_v45 }
 0xb9e   :  { %v3835_v2 = vmul.f32 %v3803_v16, %v3707_v1  ;;  %v3854_v59 = vpack.c.bf16 %v3834_v6, %v3830_v34  ;;  %v11622_v12 = vpop.eup %11621  ;;  %v3806_v50 = vadd.f32 1.0, %v11620_v0 }
 0xb9f   :  { %v3853_v39 = vpack.c.bf16 %v3833_v18, %v3829_v25  ;;  %v11624_v30 = vpop.eup %11623  ;;  %v3805_v28 = vadd.f32 1.0, %v11622_v12  ;;  %v3836_v33 = vmul.f32 %v3804_v20, %v3708_v56 }
 0xba0   :  { %v3855_v22 = vpack.c.bf16 %v3835_v2, %v3831_v43  ;;  %v11626_v31 = vpop.eup %11625  ;;  %v3807_v62 = vadd.f32 1.0, %v11624_v30  ;;  %v3838_v26 = vmul.f32 %v3806_v50, %v3710_v63 }
 0xba1   :  { %4164 = vmatprep.mubr.bf16.mxu1 %v3853_v39  ;;  %v11628_v7 = vpop.eup %11627  ;;  %v3808_v35 = vadd.f32 1.0, %v11626_v31  ;;  %v3837_v27 = vmul.f32 %v3805_v28, %v3709_v5 }
 0xba2   :  { %4229 = vmatprep.mubr.bf16.mxu0 %v3855_v22  ;;  %4165 = vmatmul.mubr.bf16.gmra.mrb[72].mxu1 %v3852_v41  ;;  %v11630_v38 = vpop.eup %11629  ;;  %v3810_v14 = vadd.f32 1.0, %v11628_v7  ;;  %v3839_v61 = vmul.f32 %v3807_v62, %v3711_v13 }
 0xba3   :  { %4230 = vmatmul.mubr.bf16.gmra.mrb[72].mxu0 %v3854_v59  ;;  %v3840_v58 = vmul.f32 %v3808_v35, %v3712_v51  ;;  %v3809_v52 = vadd.f32 1.0, %v11630_v38  ;;  %v11632_v9 = vpop.eup %11631  ;;  %v13350_v59 = vld [vmem:[#allocation5 + $0xc] ss:$0 sm:$0xff] }
 0xba4   :  { %v3842_v55 = vmul.f32 %v3810_v14, %v3714_v48  ;;  %v3811_v44 = vadd.f32 1.0, %v11632_v9 }
 0xba5   :  { %v3841_v47 = vmul.f32 %v3809_v52, %v3713_v37  ;;  %v3856_v4 = vpack.c.bf16 %v3840_v58, %v3836_v33 }
 0xba6   :  { %v3858_v15 = vpack.c.bf16 %v3842_v55, %v3838_v26  ;;  %v3843_v54 = vmul.f32 %v3811_v44, %v3715_v40 }
 0xba7   :  { %v3857_v57 = vpack.c.bf16 %v3841_v47, %v3837_v27 }
 0xba8   :  { %v3859_v11 = vpack.c.bf16 %v3843_v54, %v3839_v61 }
 0xba9   :  { %4172 = vmatprep.mubr.bf16.mxu1 %v3857_v57 }
 0xbaa   :  { %4173 = vmatmul.mubr.bf16.gmra.mrb[76].mxu1 %v3856_v4  ;;  %4237 = vmatprep.mubr.bf16.mxu0 %v3859_v11 }
 0xbab   :  { %4578 = vmatprep.mubr.bf16.mxu1 %v14660_v42  ;;  %4238 = vmatmul.mubr.bf16.gmra.mrb[76].mxu0 %v3858_v15 }
 0xc3a   :  { %v9417_v34 = vpop.f32.mrb[64].mxu1 }
 0xc3b   :  { %v9457_v23 = vpop.f32.mrb[64].mxu0  ;;  %v9418_v6 = vpop.f32.mrb[65].mxu1 }
 0xc3c   :  { %v9419_v1 = vadd.f32 %v9418_v6, %v9417_v34  ;;  %v9458_v53 = vpop.f32.mrb[65].mxu0  ;;  %v9420_v16 = vpop.f32.mrb[66].mxu1 }
 0xc3d   :  { %v9459_v45 = vadd.f32 %v9458_v53, %v9457_v23  ;;  %v9460_v25 = vpop.f32.mrb[66].mxu0  ;;  %v9421_v18 = vpop.f32.mrb[67].mxu1 }
 0xc3e   :  { %v9422_v41 = vadd.f32 %v9421_v18, %v9420_v16  ;;  %v9461_v0 = vpop.f32.mrb[67].mxu0 }
 0xc3f   :  { %v4216_v43 = vadd.f32 %v9459_v45, %v9419_v1  ;;  %v9462_v2 = vadd.f32 %v9461_v0, %v9460_v25 }
 0xc41   :  { %v4246_v12 = vadd.f32 %v4216_v43, %v13114_v29  ;;  %v4219_v39 = vadd.f32 %v9462_v2, %v9422_v41 }
 0xc42   :  { %v9423_v20 = vpop.f32.mrb[68].mxu1 }
 0xc43   :  { %v4247_v30 = vadd.f32 %v4219_v39, %v13117_v36  ;;  %v13355_v22 = vadd.f32 %v13350_v59, %v4246_v12  ;;  %v9424_v31 = vpop.f32.mrb[69].mxu1  ;;  %v9463_v56 = vpop.f32.mrb[68].mxu0 }
 0xc44   :  { %v9425_v50 = vadd.f32 %v9424_v31, %v9423_v20  ;;  %v9426_v7 = vpop.f32.mrb[70].mxu1  ;;  %v9464_v28 = vpop.f32.mrb[69].mxu0  ;;  %v11273_v31 = vld [vmem:[#allocation7 + $0xc0] ss:$12 sps:$4 sm:$0xff]  }
 0xc45   :  { %4269 = vadd.xlane.f32.xlu1 %v13355_v22  ;;  %v13359_v63 = vadd.f32 %v13350_v59, %v4247_v30  ;;  %v9427_v51 = vpop.f32.mrb[71].mxu1  ;;  %v9465_v35 = vadd.f32 %v9464_v28, %v9463_v56  ;;  %v9466_v29 = vpop.f32.mrb[70].mxu0  ;;  %v11275_v56 = vld [vmem:[#allocation7 + $0xc4] ss:$12 sps:$4 sm:$0xff]  }
 0xc46   :  { %v9428_v38 = vadd.f32 %v9427_v51, %v9426_v7  ;;  %v9467_v36 = vpop.f32.mrb[71].mxu0  ;;  %4546 = vmatprep.subr.bf16.mxu1 %v11275_v56  ;;  %v11276_v7 = vld [vmem:[#allocation7 + $0xd8] ss:$12 sps:$4 sm:$0xff]  }
 0xc47   :  { %4271 = vadd.xlane.f32.xlu0 %v13359_v63  ;;  %v4224_v5 = vadd.f32 %v9465_v35, %v9425_v50  ;;  %v9468_v48 = vadd.f32 %v9467_v36, %v9466_v29  ;;  %v11278_v50 = vld [vmem:[#allocation7 + $0xdc] ss:$12 sps:$4 sm:$0xff]   ;;  %4547 = vmatpush1.bf16.msra.mxu1 %v11273_v31 }
 0xc48   :  { %4548 = vmatprep.subr.bf16.mxu1 %v11278_v50 }
 0xc49   :  { %v4248_v14 = vadd.f32 %v4224_v5, %v13121_v10  ;;  %v4227_v37 = vadd.f32 %v9468_v48, %v9428_v38 }
 0xc4b   :  { %v4249_v33 = vadd.f32 %v4227_v37, %v13126_v49  ;;  %v13365_v62 = vadd.f32 %v13350_v59, %v4248_v14  ;;  %4549 = vmatpush1.bf16.msra.mxu1 %v11276_v7 }
 0xc4d   :  { %4273 = vadd.xlane.f32.xlu1 %v13365_v62  ;;  %v13369_v58 = vadd.f32 %v13350_v59, %v4249_v33 }
 0xc4f   :  { %4275 = vadd.xlane.f32.xlu0 %v13369_v58 }
 0xc75   :  { %v9429_v52 = vpop.f32.mrb[72].mxu1 }
 0xc76   :  { %v9469_v9 = vpop.f32.mrb[72].mxu0  ;;  %v9430_v26 = vpop.f32.mrb[73].mxu1 }
 0xc77   :  { %v9431_v13 = vadd.f32 %v9430_v26, %v9429_v52  ;;  %v9470_v55 = vpop.f32.mrb[73].mxu0  ;;  %v9432_v40 = vpop.f32.mrb[74].mxu1  ;;  %v11281_v26 = vld [vmem:[#allocation7 + $0xf4] ss:$12 sps:$4 sm:$0xff]  }
 0xc78   :  { %v9471_v10 = vadd.f32 %v9470_v55, %v9469_v9  ;;  %v9472_v27 = vpop.f32.mrb[74].mxu0  ;;  %v9433_v47 = vpop.f32.mrb[75].mxu1  ;;  %v11279_v55 = vld [vmem:[#allocation7 + $0xf0] ss:$12 sps:$4 sm:$0xff]   ;;  %4550 = vmatprep.subr.bf16.mxu1 %v11281_v26 }
 0xc79   :  { %v9434_v49 = vadd.f32 %v9433_v47, %v9432_v40  ;;  %v9473_v44 = vpop.f32.mrb[75].mxu0  ;;  %4551 = vmatpush1.bf16.msra.mxu1 %v11279_v55  ;;  %v11285_v40 = vld [vmem:[#allocation7 + $0x10c] ss:$12 sps:$4 sm:$0xff]   ;;  %v11289_v47 = vld [vmem:[#allocation7 + $0x124] ss:$12 sps:$4 sm:$0xff]  }
 0xc7a   :  { %v4232_v4 = vadd.f32 %v9471_v10, %v9431_v13  ;;  %v9474_v15 = vadd.f32 %v9473_v44, %v9472_v27  ;;  %v11282_v13 = vld [vmem:[#allocation7 + $0xc8] ss:$12 sps:$4 sm:$0xff]   ;;  %v11286_v10 = vld [vmem:[#allocation7 + $0xe0] ss:$12 sps:$4 sm:$0xff]   ;;  %4552 = vmatprep.subr.bf16.mxu1 %v11285_v40 }
 0xc7b   :  { %10028 = vmatprep.subr.bf16.mxu0 %v11282_v13  ;;  %v11283_v27 = vld [vmem:[#allocation7 + $0x108] ss:$12 sps:$4 sm:$0xff]   ;;  %v11287_v44 = vld [vmem:[#allocation7 + $0x120] ss:$12 sps:$4 sm:$0xff]  }
 0xc7c   :  { %v4250_v61 = vadd.f32 %v4232_v4, %v13130_v60  ;;  %v4235_v54 = vadd.f32 %v9474_v15, %v9434_v49  ;;  %10029 = vmatpush3.bf16.msra.mxu0 %v11282_v13  ;;  %v11290_v49 = vld [vmem:[#allocation7 + $0xf8] ss:$12 sps:$4 sm:$0xff]   ;;  %v11293_v4 = vld [vmem:[#allocation7 + $0x13c] ss:$12 sps:$4 sm:$0xff]   ;;  %v9021_v55 = vld [vmem:[#allocation5 + $0xd] ss:$0 sm:$0xff] }
 0xc7d   :  { %v9435_v11 = vpop.f32.mrb[76].mxu1  ;;  %10030 = vmatprep.subr.bf16.mxu0 %v11286_v10  ;;  %4553 = vmatpush1.bf16.msra.mxu1 %v11283_v27  ;;  %v11294_v15 = vld [vmem:[#allocation7 + $0x110] ss:$12 sps:$4 sm:$0xff]  }
 0xc7e   :  { %v4251_v57 = vadd.f32 %v4235_v54, %v13133_v32  ;;  %v13375_v34 = vadd.f32 %v13350_v59, %v4250_v61  ;;  %v9436_v23 = vpop.f32.mrb[77].mxu1  ;;  %v9475_v6 = vpop.f32.mrb[76].mxu0  ;;  %4554 = vmatprep.subr.bf16.mxu1 %v11289_v47  ;;  %v11291_v61 = vld [vmem:[#allocation7 + $0x138] ss:$12 sps:$4 sm:$0xff]   ;;  %v11297_v54 = vld [vmem:[#allocation7 + $0x154] ss:$12 sps:$4 sm:$0xff]  }
 0xc7f   :  { %v9437_v1 = vadd.f32 %v9436_v23, %v9435_v11  ;;  %v9438_v53 = vpop.f32.mrb[78].mxu1  ;;  %v9476_v45 = vpop.f32.mrb[77].mxu0  ;;  %v11295_v11 = vld [vmem:[#allocation7 + $0x150] ss:$12 sps:$4 sm:$0xff]   ;;  %v11301_v23 = vld [vmem:[#allocation7 + $0x16c] ss:$12 sps:$4 sm:$0xff]  }
 0xc80   :  { %4277 = vadd.xlane.f32.xlu1 %v13375_v34  ;;  %v13379_v16 = vadd.f32 %v13350_v59, %v4251_v57  ;;  %v9439_v25 = vpop.f32.mrb[79].mxu1  ;;  %v9477_v18 = vadd.f32 %v9476_v45, %v9475_v6  ;;  %v9478_v60 = vpop.f32.mrb[78].mxu0  ;;  %10031 = vmatpush3.bf16.msra.mxu0 %v11286_v10  ;;  %v11298_v57 = vld [vmem:[#allocation7 + $0x128] ss:$12 sps:$4 sm:$0xff]   ;;  %v11302_v6 = vld [vmem:[#allocation7 + $0x140] ss:$12 sps:$4 sm:$0xff]  }
 0xc81   :  { %v9440_v41 = vadd.f32 %v9439_v25, %v9438_v53  ;;  %v9479_v32 = vpop.f32.mrb[79].mxu0  ;;  %10032 = vmatprep.subr.bf16.mxu0 %v11290_v49  ;;  %4555 = vmatpush1.bf16.msra.mxu1 %v11287_v44  ;;  %v11303_v53 = vld [vmem:[#allocation7 + $0x158] ss:$12 sps:$4 sm:$0xff]   ;;  %v11304_v45 = vld [vmem:[#allocation7 + $0x170] ss:$12 sps:$4 sm:$0xff]  }
 0xc82   :  { %14663 = vst [vmem:[#allocation22_spill] sm:$0xff] %v13379_v16  ;;  %4279 = vadd.xlane.f32.xlu0 %v13379_v16  ;;  %v4240_v0 = vadd.f32 %v9477_v18, %v9437_v1  ;;  %v9480_v43 = vadd.f32 %v9479_v32, %v9478_v60  ;;  %4556 = vmatprep.subr.bf16.mxu1 %v11293_v4  ;;  %v11299_v1 = vld [vmem:[#allocation7 + $0x168] ss:$12 sps:$4 sm:$0xff]   ;;  %v9022_v44 = vld [vmem:[#allocation5 + $0xe] ss:$0 sm:$0xff] }
 0xc84   :  { %v4252_v2 = vadd.f32 %v4240_v0, %v13137_v21  ;;  %v4243_v12 = vadd.f32 %v9480_v43, %v9440_v41  ;;  %10033 = vmatpush3.bf16.msra.mxu0 %v11290_v49 }
 0xc85   :  { %10034 = vmatprep.subr.bf16.mxu0 %v11294_v15  ;;  %4557 = vmatpush1.bf16.msra.mxu1 %v11291_v61 }
 0xc86   :  { %v4253_v39 = vadd.f32 %v4243_v12, %v13141_v46  ;;  %v13385_v30 = vadd.f32 %v13350_v59, %v4252_v2  ;;  %4558 = vmatprep.subr.bf16.mxu1 %v11297_v54 }
 0xc88   :  { %14664 = vst [vmem:[#allocation23_spill] sm:$0xff] %v13385_v30  ;;  %4281 = vadd.xlane.f32.xlu1 %v13385_v30  ;;  %v13389_v20 = vadd.f32 %v13350_v59, %v4253_v39  ;;  %10035 = vmatpush3.bf16.msra.mxu0 %v11294_v15 }
 0xc89   :  { %10036 = vmatprep.subr.bf16.mxu0 %v11298_v57  ;;  %4559 = vmatpush1.bf16.msra.mxu1 %v11295_v11 }
 0xc8a   :  { %14665 = vst [vmem:[#allocation24_spill] sm:$0xff] %v13389_v20  ;;  %4283 = vadd.xlane.f32.xlu0 %v13389_v20  ;;  %4560 = vmatprep.subr.bf16.mxu1 %v11301_v23 }
 0xc8c   :  { %10037 = vmatpush3.bf16.msra.mxu0 %v11298_v57 }
 0xc8d   :  { %10038 = vmatprep.subr.bf16.mxu0 %v11302_v6  ;;  %4561 = vmatpush1.bf16.msra.mxu1 %v11299_v1 }
 0xc90   :  { %10039 = vmatpush3.bf16.msra.mxu0 %v11302_v6 }
 0xc91   :  { %10040 = vmatprep.subr.bf16.mxu0 %v11303_v53 }
 0xc94   :  { %10041 = vmatpush3.bf16.msra.mxu0 %v11303_v53 }
 0xc95   :  { %10042 = vmatprep.subr.bf16.mxu0 %v11304_v45 }
 0xc98   :  { %10043 = vmatpush3.bf16.msra.mxu0 %v11304_v45 }
 0xcd2   :  { %v4270_v21 = vpop.xlane.xlu1 %4269 }
 0xcd3   :  { %v4285_v46 = vmul.f32 0.0078125, %v4270_v21 }
 0xcd4   :  { %v4272_v28 = vpop.xlane.xlu0 %4271 }
 0xcd5   :  { %v13393_v51 = vsub.f32 %v13355_v22, %v4285_v46  ;;  %v4286_v35 = vmul.f32 0.0078125, %v4272_v28 }
 0xcd7   :  { %v13396_v59 = vsub.f32 %v13359_v63, %v4286_v35  ;;  %v4301_v29 = vmul.f32 %v13393_v51, %v13393_v51 }
 0xcd9   :  { %4309 = vadd.xlane.f32.xlu1 %v4301_v29  ;;  %v4302_v38 = vmul.f32 %v13396_v59, %v13396_v59 }
 0xcda   :  { %v4274_v36 = vpop.xlane.xlu1 %4273 }
 0xcdb   :  { %4311 = vadd.xlane.f32.xlu0 %v4302_v38  ;;  %v4287_v5 = vmul.f32 0.0078125, %v4274_v36 }
 0xcdc   :  { %v4276_v48 = vpop.xlane.xlu0 %4275 }
 0xcdd   :  { %v13403_v14 = vsub.f32 %v13365_v62, %v4287_v5  ;;  %v4288_v37 = vmul.f32 0.0078125, %v4276_v48 }
 0xcdf   :  { %v13406_v33 = vsub.f32 %v13369_v58, %v4288_v37  ;;  %v4303_v52 = vmul.f32 %v13403_v14, %v13403_v14 }
 0xce1   :  { %4313 = vadd.xlane.f32.xlu1 %v4303_v52  ;;  %v4304_v9 = vmul.f32 %v13406_v33, %v13406_v33 }
 0xce3   :  { %4315 = vadd.xlane.f32.xlu0 %v4304_v9 }
 0xd0d   :  { %v4278_v25 = vpop.xlane.xlu1 %4277 }
 0xd0e   :  { %v4289_v18 = vmul.f32 0.0078125, %v4278_v25 }
 0xd0f   :  { %v4280_v60 = vpop.xlane.xlu0 %4279 }
 0xd10   :  { %v13413_v41 = vsub.f32 %v13375_v34, %v4289_v18  ;;  %v4290_v32 = vmul.f32 0.0078125, %v4280_v60 }
 0xd12   :  { %v13416_v0 = vsub.f32 %v13379_v16, %v4290_v32  ;;  %v4305_v43 = vmul.f32 %v13413_v41, %v13413_v41 }
 0xd14   :  { %4317 = vadd.xlane.f32.xlu1 %v4305_v43  ;;  %v4306_v2 = vmul.f32 %v13416_v0, %v13416_v0 }
 0xd15   :  { %v4282_v12 = vpop.xlane.xlu1 %4281 }
 0xd16   :  { %4319 = vadd.xlane.f32.xlu0 %v4306_v2  ;;  %v4291_v39 = vmul.f32 0.0078125, %v4282_v12 }
 0xd17   :  { %v4284_v31 = vpop.xlane.xlu0 %4283 }
 0xd18   :  { %v13423_v56 = vsub.f32 %v13385_v30, %v4291_v39  ;;  %v4292_v50 = vmul.f32 0.0078125, %v4284_v31 }
 0xd1a   :  { %v13426_v7 = vsub.f32 %v13389_v20, %v4292_v50  ;;  %v4307_v21 = vmul.f32 %v13423_v56, %v13423_v56 }
 0xd1c   :  { %4321 = vadd.xlane.f32.xlu1 %v4307_v21  ;;  %v4308_v46 = vmul.f32 %v13426_v7, %v13426_v7 }
 0xd1e   :  { %4323 = vadd.xlane.f32.xlu0 %v4308_v46 }
 0xd66   :  { %v4310_v28 = vpop.xlane.xlu1 %4309 }
 0xd67   :  { %v4325_v35 = vmul.f32 0.0078125, %v4310_v28 }
 0xd68   :  { %v4312_v29 = vpop.xlane.xlu0 %4311 }
 0xd69   :  { %v4333_v38 = vadd.f32 1e-05, %v4325_v35  ;;  %v4326_v36 = vmul.f32 0.0078125, %v4312_v29 }
 0xd6b   :  { %11633 = vrsqrt.f32 %v4333_v38  ;;  %v4334_v5 = vadd.f32 1e-05, %v4326_v36 }
 0xd6d   :  { %11635 = vrsqrt.f32 %v4334_v5 }
 0xd6e   :  { %v4314_v48 = vpop.xlane.xlu1 %4313 }
 0xd6f   :  { %v4327_v37 = vmul.f32 0.0078125, %v4314_v48 }
 0xd70   :  { %v4316_v52 = vpop.xlane.xlu0 %4315 }
 0xd71   :  { %v4335_v9 = vadd.f32 1e-05, %v4327_v37  ;;  %v4328_v26 = vmul.f32 0.0078125, %v4316_v52 }
 0xd73   :  { %11637 = vrsqrt.f32 %v4335_v9  ;;  %v4336_v40 = vadd.f32 1e-05, %v4328_v26 }
 0xd75   :  { %v11634_v13 = vpop.eup %11633  ;;  %11639 = vrsqrt.f32 %v4336_v40 }
 0xd76   :  { %v4349_v10 = vmul.f32 %v11634_v13, %v13393_v51 }
 0xd77   :  { %v11636_v27 = vpop.eup %11635 }
 0xd78   :  { %v4361_v47 = vmul.f32 %v9021_v55, %v4349_v10  ;;  %v4350_v49 = vmul.f32 %v11636_v27, %v13396_v59  ;;  %v13443_v27 = vld [vmem:[#allocation5 + $0xf] ss:$0 sm:$0xff] }
 0xd7a   :  { %v4362_v4 = vmul.f32 %v9021_v55, %v4350_v49  ;;  %v4373_v15 = vadd.f32 %v9022_v44, %v4361_v47 }
 0xd7c   :  { %v4374_v61 = vadd.f32 %v9022_v44, %v4362_v4 }
 0xd7d   :  { %v11638_v57 = vpop.eup %11637 }
 0xd7e   :  { %v4381_v54 = vpack.c.bf16 %v4374_v61, %v4373_v15  ;;  %v4351_v11 = vmul.f32 %v11638_v57, %v13403_v14  ;;  %v13446_v15 = vld [vmem:[#allocation5 + $0x10] ss:$0 sm:$0xff] }
 0xd7f   :  { %v11640_v23 = vpop.eup %11639 }
 0xd80   :  { %4579 = vmatmul.mubr.bf16.vlgmr.msra.gmra.mrb[80].mxu1 %v4381_v54  ;;  %10044 = vmatprep.mubr.bf16.mxu0 %v4381_v54  ;;  %v4352_v51 = vmul.f32 %v11640_v23, %v13406_v33  ;;  %v4363_v6 = vmul.f32 %v9021_v55, %v4351_v11 }
 0xd81   :  { %4588 = vmatprep.mubr.bf16.mxu1 %v14660_v42 }
 0xd82   :  { %v4364_v1 = vmul.f32 %v9021_v55, %v4352_v51  ;;  %v4375_v53 = vadd.f32 %v9022_v44, %v4363_v6 }
 0xd84   :  { %v4376_v45 = vadd.f32 %v9022_v44, %v4364_v1  ;;  %v13465_v1 = vld [vmem:[#allocation5 + $0x11] ss:$0 sm:$0xff] }
 0xd86   :  { %v4382_v59 = vpack.c.bf16 %v4376_v45, %v4375_v53 }
 0xd88   :  { %4589 = vmatmul.mubr.bf16.gmra.mrb[84].mxu1 %v4382_v59  ;;  %10045 = vmatmul.mubr.bf16.vlgmr.msra.gmra.mrb[80].mxu0 %v4382_v59 }
 0xd89   :  { %4598 = vmatprep.mubr.bf16.mxu1 %v14660_v42 }
 0xda1   :  { %v4318_v25 = vpop.xlane.xlu1 %4317 }
 0xda2   :  { %v4329_v18 = vmul.f32 0.0078125, %v4318_v25 }
 0xda3   :  { %v4320_v60 = vpop.xlane.xlu0 %4319 }
 0xda4   :  { %v4337_v32 = vadd.f32 1e-05, %v4329_v18  ;;  %v4330_v43 = vmul.f32 0.0078125, %v4320_v60 }
 0xda6   :  { %11641 = vrsqrt.f32 %v4337_v32  ;;  %v4338_v14 = vadd.f32 1e-05, %v4330_v43 }
 0xda8   :  { %11643 = vrsqrt.f32 %v4338_v14 }
 0xda9   :  { %v4322_v2 = vpop.xlane.xlu1 %4321 }
 0xdaa   :  { %v4331_v12 = vmul.f32 0.0078125, %v4322_v2 }
 0xdab   :  { %v4324_v33 = vpop.xlane.xlu0 %4323 }
 0xdac   :  { %v4339_v39 = vadd.f32 1e-05, %v4331_v12  ;;  %v4332_v31 = vmul.f32 0.0078125, %v4324_v33 }
 0xdae   :  { %11645 = vrsqrt.f32 %v4339_v39  ;;  %v4340_v21 = vadd.f32 1e-05, %v4332_v31 }
 0xdb0   :  { %v11642_v50 = vpop.eup %11641  ;;  %11647 = vrsqrt.f32 %v4340_v21 }
 0xdb1   :  { %v4353_v46 = vmul.f32 %v11642_v50, %v13413_v41 }
 0xdb2   :  { %v11644_v28 = vpop.eup %11643 }
 0xdb3   :  { %v4354_v35 = vmul.f32 %v11644_v28, %v13416_v0  ;;  %v4365_v29 = vmul.f32 %v9021_v55, %v4353_v46 }
 0xdb5   :  { %v4366_v38 = vmul.f32 %v9021_v55, %v4354_v35  ;;  %v4377_v36 = vadd.f32 %v9022_v44, %v4365_v29 }
 0xdb7   :  { %v4378_v5 = vadd.f32 %v9022_v44, %v4366_v38 }
 0xdb8   :  { %v11646_v37 = vpop.eup %11645 }
 0xdb9   :  { %v4383_v48 = vpack.c.bf16 %v4378_v5, %v4377_v36  ;;  %v4355_v52 = vmul.f32 %v11646_v37, %v13423_v56 }
 0xdba   :  { %v11648_v9 = vpop.eup %11647 }
 0xdbb   :  { %4599 = vmatmul.mubr.bf16.gmra.mrb[88].mxu1 %v4383_v48  ;;  %10048 = vmatprep.mubr.bf16.mxu0 %v4383_v48  ;;  %v4356_v26 = vmul.f32 %v11648_v9, %v13426_v7  ;;  %v4367_v41 = vmul.f32 %v9021_v55, %v4355_v52 }
 0xdbc   :  { %4608 = vmatprep.mubr.bf16.mxu1 %v14660_v42 }
 0xdbd   :  { %v4368_v13 = vmul.f32 %v9021_v55, %v4356_v26  ;;  %v4379_v40 = vadd.f32 %v9022_v44, %v4367_v41 }
 0xdbf   :  { %v4380_v10 = vadd.f32 %v9022_v44, %v4368_v13 }
 0xdc1   :  { %v4384_v0 = vpack.c.bf16 %v4380_v10, %v4379_v40 }
 0xdc3   :  { %4609 = vmatmul.mubr.bf16.gmra.mrb[92].mxu1 %v4384_v0  ;;  %10049 = vmatmul.mubr.bf16.gmra.mrb[84].mxu0 %v4384_v0 }
 0xe53   :  { %v4580_v47 = vpop.f32.mrb[80].mxu1 }
 0xe54   :  { %v4689_v49 = vadd.f32 %v13443_v27, %v4580_v47  ;;  %v4582_v4 = vpop.f32.mrb[81].mxu1 }
 0xe55   :  { %v4584_v56 = vpop.f32.mrb[82].mxu1  ;;  %v4710_v7 = vadd.f32 %v13446_v15, %v4582_v4 }
 0xe56   :  { %v13448_v61 = vmul.f32 0.17677669, %v4689_v49  ;;  %v4586_v54 = vpop.f32.mrb[83].mxu1  ;;  %v4690_v23 = vadd.f32 %v13443_v27, %v4584_v56 }
 0xe57   :  { %v4711_v55 = vadd.f32 %v13446_v15, %v4586_v54 }
 0xe58   :  { %4739 = vrot.lane.b32.xlu0 %v13448_v61, %s12080_s0  ;;  %10060 = vmatprep.mubr.msk.f32.mxu1 %vm1001_vm0, %v13448_v61  ;;  %v13469_v18 = vmul.f32 0.17677669, %v4690_v23 }
 0xe59   :  { %v13456_v44 = vpack.i.bf16 %v4711_v55, %v4710_v7  ;;  %v10549_v57 = vpack.c.bf16 %v4711_v55, %v4710_v7 }
 0xe5b   :  { %10974 = vrot.lane.b32.xlu1 %v13456_v44, %s12080_s0  ;;  %10551 = vmatprep.subr.msk.bf16.mxu1 %vm12430_vm1, %v10549_v57  ;;  %v4590_v51 = vpop.f32.mrb[84].mxu1  ;;  %v10046_v6 = vpop.f32.mrb[80].mxu0 }
 0xe5c   :  { %10554 = vmatpush3.bf16.xpose.msk.msra.mxu1 %vm12430_vm1, %v10549_v57  ;;  %v4592_v53 = vpop.f32.mrb[85].mxu1  ;;  %v4653_v45 = vpop.f32.mrb[81].mxu0  ;;  %v4725_v60 = vadd.f32 %v10046_v6, %v13465_v1  ;;  %v4691_v2 = vadd.f32 %v13443_v27, %v4590_v51 }
 0xe5d   :  { %v4594_v59 = vpop.f32.mrb[86].mxu1  ;;  %v10047_v25 = vpop.f32.mrb[82].mxu0  ;;  %v4712_v12 = vadd.f32 %v13446_v15, %v4592_v53  ;;  %v4723_v31 = vadd.f32 %v13465_v1, %v4653_v45 }
 0xe5e   :  { %v4726_v32 = vadd.f32 %v10047_v25, %v13465_v1  ;;  %v4596_v43 = vpop.f32.mrb[87].mxu1  ;;  %v4656_v14 = vpop.f32.mrb[83].mxu0  ;;  %v4692_v38 = vadd.f32 %v13443_v27, %v4594_v59  ;;  %v13497_v36 = vmul.f32 0.17677669, %v4691_v2 }
 0xe5f   :  { %10979 = vrot.lane.b32.xlu1 %v13456_v44, %s12076_s5  ;;  %v4713_v33 = vadd.f32 %v13446_v15, %v4596_v43  ;;  %v4724_v39 = vadd.f32 %v13465_v1, %v4656_v14 }
 0xe60   :  { %v13478_v50 = vpack.i.bf16 %v4726_v32, %v4725_v60  ;;  %v13480_v21 = vpack.c.bf16 %v4726_v32, %v4725_v60  ;;  %v13501_v5 = vmul.f32 0.17677669, %v4692_v38 }
 0xe61   :  { %v13484_v46 = vpack.i.bf16 %v4713_v33, %v4712_v12  ;;  %v10555_v28 = vpack.c.bf16 %v4713_v33, %v4712_v12  ;;  %v13486_v35 = vpack.i.bf16 %v4724_v39, %v4723_v31  ;;  %v13488_v29 = vpack.c.bf16 %v4724_v39, %v4723_v31 }
 0xe63   :  { %4741 = vrot.lane.b32.xlu1 %v13469_v18, %s12080_s0  ;;  %10984 = vrot.lane.b32.xlu0 %v13484_v46, %s12080_s0 }
 0xe64   :  { %10557 = vmatprep.subr.msk.bf16.mxu1 %vm12430_vm1, %v10555_v28 }
 0xe65   :  { %10560 = vmatpush3.bf16.xpose.msk.msra.mxu1 %vm12430_vm1, %v10555_v28 }
 0xe67   :  { %10989 = vrot.lane.b32.xlu1 %v13484_v46, %s12076_s5  ;;  %4743 = vrot.lane.b32.xlu0 %v13497_v36, %s12080_s0 }
 0xe6b   :  { %4745 = vrot.lane.b32.xlu1 %v13501_v5, %s12080_s0 }
 0xe6c   :  { %10061 = vmatmul.mubr.msk.f32.vlgmr.msra.gmra.mrb[96].mxu1 %vm1001_vm0, %v13469_v18 }
 0xe6d   :  { %10063 = vmatprep.mubr.msk.f32.mxu1 %vm1001_vm0, %v13497_v36 }
 0xe70   :  { %10064 = vmatmul.mubr.msk.f32.gmra.mrb[98].mxu1 %vm1001_vm0, %v13501_v5 }
 0xe8e   :  { %v4600_v48 = vpop.f32.mrb[88].mxu1 }
 0xe8f   :  { %v4693_v37 = vadd.f32 %v13443_v27, %v4600_v48  ;;  %v4602_v52 = vpop.f32.mrb[89].mxu1 }
 0xe90   :  { %v4604_v9 = vpop.f32.mrb[90].mxu1  ;;  %v4714_v13 = vadd.f32 %v13446_v15, %v4602_v52 }
 0xe91   :  { %v13514_v26 = vmul.f32 0.17677669, %v4693_v37  ;;  %v4606_v41 = vpop.f32.mrb[91].mxu1  ;;  %v4694_v6 = vadd.f32 %v13443_v27, %v4604_v9 }
 0xe92   :  { %v4715_v40 = vadd.f32 %v13446_v15, %v4606_v41 }
 0xe93   :  { %4747 = vrot.lane.b32.xlu0 %v13514_v26, %s12080_s0  ;;  %10074 = vmatprep.mubr.msk.f32.mxu0 %vm1001_vm0, %v13514_v26 }
 0xe94   :  { %v10993_v10 = vpack.i.bf16 %v4715_v40, %v4714_v13  ;;  %v10561_v0 = vpack.c.bf16 %v4715_v40, %v4714_v13 }
 0xe96   :  { %10994 = vrot.lane.b32.xlu1 %v10993_v10, %s12080_s0  ;;  %10563 = vmatprep.subr.msk.bf16.mxu0 %vm12430_vm1, %v10561_v0  ;;  %v4610_v47 = vpop.f32.mrb[92].mxu1  ;;  %v10050_v49 = vpop.f32.mrb[84].mxu0 }
 0xe97   :  { %11004 = vrot.lane.b32.xlu0 %v10993_v10, %s12076_s5  ;;  %10566 = vmatpush3.bf16.xpose.msk.msra.mxu0 %vm12430_vm1, %v10561_v0  ;;  %v4612_v4 = vpop.f32.mrb[93].mxu1  ;;  %v4669_v56 = vpop.f32.mrb[85].mxu0  ;;  %v4729_v55 = vadd.f32 %v10050_v49, %v13465_v1 }
 0xe98   :  { %v4614_v54 = vpop.f32.mrb[94].mxu1  ;;  %v10051_v7 = vpop.f32.mrb[86].mxu0  ;;  %v4716_v53 = vadd.f32 %v13446_v15, %v4612_v4  ;;  %v4727_v25 = vadd.f32 %v13465_v1, %v4669_v56 }
 0xe99   :  { %v4730_v57 = vadd.f32 %v10051_v7, %v13465_v1  ;;  %v4616_v23 = vpop.f32.mrb[95].mxu1  ;;  %v4672_v51 = vpop.f32.mrb[87].mxu0  ;;  %v4696_v12 = vadd.f32 %v13443_v27, %v4614_v54 }
 0xe9a   :  { %10999 = vrot.lane.b32.xlu1 %v13456_v44, %s12081_s1  ;;  %v4717_v45 = vadd.f32 %v13446_v15, %v4616_v23  ;;  %v4728_v59 = vadd.f32 %v13465_v1, %v4672_v51  ;;  %v4702_v15 = vmul.f32 0.17677669, %v4694_v6  ;;  %v4695_v1 = vadd.f32 %v13443_v27, %v4610_v47 }
 0xe9b   :  { %v13537_v60 = vpack.i.bf16 %v4730_v57, %v4729_v55  ;;  %v13539_v32 = vpack.c.bf16 %v4730_v57, %v4729_v55  ;;  %v4704_v39 = vmul.f32 0.17677669, %v4696_v12 }
 0xe9c   :  { %v11008_v44 = vpack.i.bf16 %v4717_v45, %v4716_v53  ;;  %v10567_v43 = vpack.c.bf16 %v4717_v45, %v4716_v53  ;;  %v13543_v14 = vpack.i.bf16 %v4728_v59, %v4727_v25  ;;  %v13545_v2 = vpack.c.bf16 %v4728_v59, %v4727_v25 }
 0xe9d   :  { %v4703_v33 = vmul.f32 0.17677669, %v4695_v1 }
 0xe9e   :  { %4755 = vrot.lane.b32.xlu1 %v13448_v61, %s12076_s5  ;;  %11009 = vrot.lane.b32.xlu0 %v11008_v44, %s12080_s0 }
 0xe9f   :  { %10569 = vmatprep.subr.msk.bf16.mxu0 %vm12430_vm1, %v10567_v43 }
 0xea0   :  { %10572 = vmatpush3.bf16.xpose.msk.msra.mxu0 %vm12430_vm1, %v10567_v43 }
 0xea2   :  { %4757 = vrot.lane.b32.xlu1 %v13469_v18, %s12076_s5  ;;  %4749 = vrot.lane.b32.xlu0 %v4702_v15, %s12080_s0 }
 0xea6   :  { %11014 = vrot.lane.b32.xlu1 %v13484_v46, %s12081_s1  ;;  %4759 = vrot.lane.b32.xlu0 %v13497_v36, %s12076_s5 }
 0xea7   :  { %10075 = vmatmul.mubr.msk.f32.vlgmr.msra.gmra.mrb[88].mxu0 %vm1001_vm0, %v4702_v15 }
 0xea8   :  { %10077 = vmatprep.mubr.msk.f32.mxu0 %vm1001_vm0, %v4703_v33 }
 0xeaa   :  { %4751 = vrot.lane.b32.xlu1 %v4703_v33, %s12080_s0  ;;  %4761 = vrot.lane.b32.xlu0 %v13501_v5, %s12076_s5 }
 0xeab   :  { %10078 = vmatmul.mubr.msk.f32.gmra.mrb[90].mxu0 %vm1001_vm0, %v4704_v39 }
 0xeae   :  { %4771 = vrot.lane.b32.xlu1 %v13448_v61, %s12081_s1  ;;  %11019 = vrot.lane.b32.xlu0 %v11008_v44, %s12076_s5 }
 0xeb2   :  { %4753 = vrot.lane.b32.xlu1 %v4704_v39, %s12080_s0  ;;  %11024 = vrot.lane.b32.xlu0 %v10993_v10, %s12081_s1 }
 0xeb6   :  { %4773 = vrot.lane.b32.xlu1 %v13469_v18, %s12081_s1  ;;  %4763 = vrot.lane.b32.xlu0 %v13514_v26, %s12076_s5 }
 0xeba   :  { %4775 = vrot.lane.b32.xlu1 %v13497_v36, %s12081_s1  ;;  %4765 = vrot.lane.b32.xlu0 %v4702_v15, %s12076_s5 }
 0xebe   :  { %11029 = vrot.lane.b32.xlu1 %v11008_v44, %s12081_s1  ;;  %4777 = vrot.lane.b32.xlu0 %v13501_v5, %s12081_s1 }
 0xec2   :  { %4769 = vrot.lane.b32.xlu1 %v4704_v39, %s12076_s5  ;;  %4767 = vrot.lane.b32.xlu0 %v4703_v33, %s12076_s5 }
 0xec6   :  { %4781 = vrot.lane.b32.xlu1 %v4702_v15, %s12081_s1  ;;  %4779 = vrot.lane.b32.xlu0 %v13514_v26, %s12081_s1 }
 0xeca   :  { %v4740_v27 = vpop.permute.xlu0 %4739  ;;  %4785 = vrot.lane.b32.xlu1 %v4704_v39, %s12081_s1  ;;  %4783 = vrot.lane.b32.xlu0 %v4703_v33, %s12081_s1 }
 0xecb   :  { %10088 = vmatprep.mubr.msk.f32.mxu1 %vm1001_vm0, %v4740_v27 }
 0xecd   :  { %v10975_v61 = vpop.permute.xlu1 %10974 }
 0xece   :  { %v10977_v18 = vunpack.i.h.bf16 %v10975_v61  ;;  %v10976_v31 = vunpack.i.l.bf16 %v10975_v61  ;;  %11034 = vrot.lane.b32.xlu1 %v13486_v35, %s12080_s0  ;;  %11044 = vrot.lane.b32.xlu0 %v13486_v35, %s12076_s5 }
 0xed0   :  { %v10573_v46 = vpack.c.bf16 %v10977_v18, %v10976_v31 }
 0xed1   :  { %v10980_v28 = vpop.permute.xlu1 %10979 }
 0xed2   :  { %10575 = vmatprep.subr.msk.bf16.mxu1 %vm12430_vm1, %v10573_v46  ;;  %11039 = vrot.lane.b32.xlu1 %v13478_v50, %s12080_s0  ;;  %v10982_v5 = vunpack.i.h.bf16 %v10980_v28  ;;  %v10981_v48 = vunpack.i.l.bf16 %v10980_v28 }
 0xed3   :  { %10578 = vmatpush3.bf16.xpose.msk.msra.mxu1 %vm12430_vm1, %v10573_v46  ;;  %11054 = vrot.lane.b32.xlu0 %v13543_v14, %s12080_s0 }
 0xed4   :  { %v10597_v26 = vpack.c.bf16 %v10982_v5, %v10981_v48 }
 0xed5   :  { %v10985_v38 = vpop.permute.xlu0 %10984  ;;  %v4742_v36 = vpop.permute.xlu1 %4741 }
 0xed6   :  { %11049 = vrot.lane.b32.xlu1 %v13478_v50, %s12076_s5  ;;  %v10987_v37 = vunpack.i.h.bf16 %v10985_v38  ;;  %v10986_v52 = vunpack.i.l.bf16 %v10985_v38 }
 0xed7   :  { %11059 = vrot.lane.b32.xlu0 %v13486_v35, %s12081_s1 }
 0xed8   :  { %v10579_v9 = vpack.c.bf16 %v10987_v37, %v10986_v52 }
 0xed9   :  { %v10990_v41 = vpop.permute.xlu1 %10989  ;;  %v4744_v10 = vpop.permute.xlu0 %4743 }
 0xeda   :  { %11064 = vrot.lane.b32.xlu1 %v13537_v60, %s12080_s0  ;;  %10581 = vmatprep.subr.msk.bf16.mxu1 %vm12430_vm1, %v10579_v9  ;;  %v10992_v13 = vunpack.i.h.bf16 %v10990_v41  ;;  %v10991_v40 = vunpack.i.l.bf16 %v10990_v41 }
 0xedb   :  { %10584 = vmatpush3.bf16.xpose.msk.msra.mxu1 %vm12430_vm1, %v10579_v9 }
 0xedc   :  { %10599 = vmatprep.subr.msk.bf16.mxu1 %vm12430_vm1, %v10597_v26  ;;  %v10603_v0 = vpack.c.bf16 %v10992_v13, %v10991_v40 }
 0xedd   :  { %v4746_v35 = vpop.permute.xlu1 %4745 }
 0xee2   :  { %10089 = vmatmul.mubr.msk.f32.vlgmr.msra.gmra.mrb[100].mxu1 %vm1001_vm0, %v4742_v36 }
 0xee3   :  { %10091 = vmatprep.mubr.msk.f32.mxu1 %vm1001_vm0, %v4744_v10  ;;  %10602 = vmatpush3.bf16.xpose.msk.msra.mxu1 %vm12430_vm1, %v10597_v26 }
 0xee4   :  { %10605 = vmatprep.subr.msk.bf16.mxu1 %vm12430_vm1, %v10603_v0 }
 0xee6   :  { %10092 = vmatmul.mubr.msk.f32.gmra.mrb[102].mxu1 %vm1001_vm0, %v4746_v35 }
 0xeeb   :  { %10608 = vmatpush3.bf16.xpose.msk.msra.mxu1 %vm12430_vm1, %v10603_v0 }
 0xf05   :  { %v4748_v47 = vpop.permute.xlu0 %4747 }
 0xf06   :  { %10102 = vmatprep.mubr.msk.f32.mxu0 %vm1001_vm0, %v4748_v47 }
 0xf08   :  { %v10995_v49 = vpop.permute.xlu1 %10994 }
 0xf09   :  { %v10997_v4 = vunpack.i.h.bf16 %v10995_v49  ;;  %v10996_v56 = vunpack.i.l.bf16 %v10995_v49  ;;  %v11005_v23 = vpop.permute.xlu0 %11004 }
 0xf0a   :  { %v11007_v45 = vunpack.i.h.bf16 %v11005_v23  ;;  %v11006_v59 = vunpack.i.l.bf16 %v11005_v23 }
 0xf0b   :  { %v10585_v54 = vpack.c.bf16 %v10997_v4, %v10996_v56 }
 0xf0c   :  { %v11000_v7 = vpop.permute.xlu1 %10999  ;;  %v10609_v12 = vpack.c.bf16 %v11007_v45, %v11006_v59 }
 0xf0d   :  { %v11002_v55 = vunpack.i.h.bf16 %v11000_v7  ;;  %v11001_v57 = vunpack.i.l.bf16 %v11000_v7  ;;  %10587 = vmatprep.subr.msk.bf16.mxu0 %vm12430_vm1, %v10585_v54 }
 0xf0e   :  { %10590 = vmatpush3.bf16.xpose.msk.msra.mxu0 %vm12430_vm1, %v10585_v54 }
 0xf0f   :  { %v10621_v51 = vpack.c.bf16 %v11002_v55, %v11001_v57 }
 0xf10   :  { %v4756_v6 = vpop.permute.xlu1 %4755  ;;  %v11010_v53 = vpop.permute.xlu0 %11009 }
 0xf11   :  { %10116 = vmatprep.mubr.msk.f32.mxu1 %vm1001_vm0, %v4756_v6  ;;  %10623 = vmatprep.subr.msk.bf16.mxu1 %vm12430_vm1, %v10621_v51  ;;  %v11012_v25 = vunpack.i.h.bf16 %v11010_v53  ;;  %v11011_v44 = vunpack.i.l.bf16 %v11010_v53 }
 0xf13   :  { %v10591_v15 = vpack.c.bf16 %v11012_v25, %v11011_v44 }
 0xf14   :  { %v4758_v43 = vpop.permute.xlu1 %4757  ;;  %v4750_v1 = vpop.permute.xlu0 %4749 }
 0xf15   :  { %10117 = vmatmul.mubr.msk.f32.vlgmr.msra.gmra.mrb[104].mxu1 %vm1001_vm0, %v4758_v43  ;;  %10593 = vmatprep.subr.msk.bf16.mxu0 %vm12430_vm1, %v10591_v15 }
 0xf16   :  { %10626 = vmatpush3.bf16.xpose.msk.msra.mxu1 %vm12430_vm1, %v10621_v51  ;;  %10596 = vmatpush3.bf16.xpose.msk.msra.mxu0 %vm12430_vm1, %v10591_v15 }
 0xf17   :  { %10611 = vmatprep.subr.msk.bf16.mxu0 %vm12430_vm1, %v10609_v12 }
 0xf18   :  { %v11015_v33 = vpop.permute.xlu1 %11014  ;;  %v4760_v61 = vpop.permute.xlu0 %4759 }
 0xf19   :  { %v11017_v39 = vunpack.i.h.bf16 %v11015_v33  ;;  %v11016_v27 = vunpack.i.l.bf16 %v11015_v33  ;;  %10119 = vmatprep.mubr.msk.f32.mxu1 %vm1001_vm0, %v4760_v61 }
 0xf1b   :  { %v10627_v18 = vpack.c.bf16 %v11017_v39, %v11016_v27 }
 0xf1c   :  { %v4752_v31 = vpop.permute.xlu1 %4751  ;;  %v4762_v46 = vpop.permute.xlu0 %4761 }
 0xf1d   :  { %10629 = vmatprep.subr.msk.bf16.mxu1 %vm12430_vm1, %v10627_v18  ;;  %10103 = vmatmul.mubr.msk.f32.vlgmr.msra.gmra.mrb[92].mxu0 %vm1001_vm0, %v4750_v1 }
 0xf1e   :  { %10632 = vmatpush3.bf16.xpose.msk.msra.mxu1 %vm12430_vm1, %v10627_v18  ;;  %10105 = vmatprep.mubr.msk.f32.mxu0 %vm1001_vm0, %v4752_v31 }
 0xf1f   :  { %10120 = vmatmul.mubr.msk.f32.gmra.mrb[106].mxu1 %vm1001_vm0, %v4762_v46  ;;  %10614 = vmatpush3.bf16.xpose.msk.msra.mxu0 %vm12430_vm1, %v10609_v12 }
 0xf20   :  { %v4772_v28 = vpop.permute.xlu1 %4771  ;;  %10646 = vmatprep.subr.bf16.mxu1 %v13488_v29  ;;  %v11020_v38 = vpop.permute.xlu0 %11019 }
 0xf21   :  { %10144 = vmatprep.mubr.msk.f32.mxu1 %vm1001_vm0, %v4772_v28  ;;  %v11022_v36 = vunpack.i.h.bf16 %v11020_v38  ;;  %v11021_v5 = vunpack.i.l.bf16 %v11020_v38 }
 0xf23   :  { %v10615_v37 = vpack.c.bf16 %v11022_v36, %v11021_v5 }
 0xf24   :  { %v4754_v48 = vpop.permute.xlu1 %4753  ;;  %v11025_v52 = vpop.permute.xlu0 %11024 }
 0xf25   :  { %10106 = vmatmul.mubr.msk.f32.gmra.mrb[94].mxu0 %vm1001_vm0, %v4754_v48  ;;  %v11027_v9 = vunpack.i.h.bf16 %v11025_v52  ;;  %v11026_v26 = vunpack.i.l.bf16 %v11025_v52  ;;  %10617 = vmatprep.subr.msk.bf16.mxu0 %vm12430_vm1, %v10615_v37 }
 0xf27   :  { %10620 = vmatpush3.bf16.xpose.msk.msra.mxu0 %vm12430_vm1, %v10615_v37  ;;  %v10633_v13 = vpack.c.bf16 %v11027_v9, %v11026_v26 }
 0xf28   :  { %v4774_v41 = vpop.permute.xlu1 %4773  ;;  %v4764_v40 = vpop.permute.xlu0 %4763 }
 0xf29   :  { %10145 = vmatmul.mubr.msk.f32.vlgmr.msra.gmra.mrb[108].mxu1 %vm1001_vm0, %v4774_v41  ;;  %10130 = vmatprep.mubr.msk.f32.mxu0 %vm1001_vm0, %v4764_v40 }
 0xf2a   :  { %10648 = vmatpush3.bf16.msra.mxu1 %v13488_v29  ;;  %10635 = vmatprep.subr.msk.bf16.mxu0 %vm12430_vm1, %v10633_v13 }
 0xf2b   :  { %10650 = vmatprep.subr.bf16.mxu1 %v13480_v21 }
 0xf2c   :  { %v4776_v10 = vpop.permute.xlu1 %4775  ;;  %v4766_v0 = vpop.permute.xlu0 %4765 }
 0xf2d   :  { %10147 = vmatprep.mubr.msk.f32.mxu1 %vm1001_vm0, %v4776_v10 }
 0xf2e   :  { %10652 = vmatpush3.bf16.msra.mxu1 %v13480_v21  ;;  %10131 = vmatmul.mubr.msk.f32.vlgmr.msra.gmra.mrb[96].mxu0 %vm1001_vm0, %v4766_v0 }
 0xf2f   :  { %10654 = vmatprep.subr.bf16.mxu1 %v13545_v2  ;;  %10638 = vmatpush3.bf16.xpose.msk.msra.mxu0 %vm12430_vm1, %v10633_v13 }
 0xf30   :  { %v11030_v29 = vpop.permute.xlu1 %11029  ;;  %v4778_v49 = vpop.permute.xlu0 %4777 }
 0xf31   :  { %v11032_v35 = vunpack.i.h.bf16 %v11030_v29  ;;  %v11031_v47 = vunpack.i.l.bf16 %v11030_v29  ;;  %10148 = vmatmul.mubr.msk.f32.gmra.mrb[110].mxu1 %vm1001_vm0, %v4778_v49 }
 0xf33   :  { %v10639_v4 = vpack.c.bf16 %v11032_v35, %v11031_v47 }
 0xf34   :  { %v4770_v56 = vpop.permute.xlu1 %4769  ;;  %v4768_v54 = vpop.permute.xlu0 %4767 }
 0xf35   :  { %10641 = vmatprep.subr.msk.bf16.mxu0 %vm12430_vm1, %v10639_v4  ;;  %10133 = vmatprep.mubr.msk.f32.mxu0 %vm1001_vm0, %v4768_v54 }
 0xf36   :  { %10134 = vmatmul.mubr.msk.f32.gmra.mrb[98].mxu0 %vm1001_vm0, %v4770_v56 }
 0xf37   :  { %10644 = vmatpush3.bf16.xpose.msk.msra.mxu0 %vm12430_vm1, %v10639_v4 }
 0xf38   :  { %v4782_v21 = vpop.permute.xlu1 %4781  ;;  %v4780_v7 = vpop.permute.xlu0 %4779 }
 0xf39   :  { %10158 = vmatprep.mubr.msk.f32.mxu0 %vm1001_vm0, %v4780_v7 }
 0xf3c   :  { %v4786_v55 = vpop.permute.xlu1 %4785  ;;  %v4784_v57 = vpop.permute.xlu0 %4783 }
 0xf3e   :  { %10159 = vmatmul.mubr.msk.f32.vlgmr.msra.gmra.mrb[100].mxu0 %vm1001_vm0, %v4782_v21 }
 0xf3f   :  { %v13677_v23 = vpop.f32.mrb[96].mxu1  ;;  %10161 = vmatprep.mubr.msk.f32.mxu0 %vm1001_vm0, %v4784_v57 }
 0xf40   :  { %v11035_v51 = vpop.permute.xlu1 %11034  ;;  %v13680_v6 = vpop.f32.mrb[97].mxu1  ;;  %v5734_v53 = vsel %vm1001_vm0, %v13677_v23, -inf }
 0xf41   :  { %v11037_v45 = vunpack.i.h.bf16 %v11035_v51  ;;  %v11036_v11 = vunpack.i.l.bf16 %v11035_v51  ;;  %5735 = vmax.xlane.f32.xlu0 %v5734_v53  ;;  %v11045_v59 = vpop.permute.xlu0 %11044  ;;  %v5731_v12 = vsel %vm1001_vm0, %v13680_v6, -inf }
 0xf42   :  { %10162 = vmatmul.mubr.msk.f32.gmra.mrb[102].mxu0 %vm1001_vm0, %v4786_v55  ;;  %v11047_v27 = vunpack.i.h.bf16 %v11045_v59  ;;  %v11046_v61 = vunpack.i.l.bf16 %v11045_v59 }
 0xf43   :  { %v10661_v25 = vpack.c.bf16 %v11037_v45, %v11036_v11  ;;  %v13685_v44 = vpop.f32.mrb[98].mxu1 }
 0xf44   :  { %v11040_v43 = vpop.permute.xlu1 %11039  ;;  %v13688_v15 = vpop.f32.mrb[99].mxu1  ;;  %v5740_v1 = vsel %vm1001_vm0, %v13685_v44, -inf  ;;  %v13696_v46 = vpack.c.bf16 %v11047_v27, %v11046_v61 }
 0xf45   :  { %v11042_v33 = vunpack.i.h.bf16 %v11040_v43  ;;  %v11041_v39 = vunpack.i.l.bf16 %v11040_v43  ;;  %10662 = vmatprep.subr.bf16.mxu0 %v10661_v25  ;;  %5741 = vmax.xlane.f32.xlu1 %v5740_v1  ;;  %v5737_v31 = vsel %vm1001_vm0, %v13688_v15, -inf  ;;  %v13737_v56 = vpop.permute.xlu0 %11054 }
 0xf46   :  { %5732 = vmax.xlane.f32.xlu0 %v5731_v12  ;;  %10664 = vmatpush3.bf16.msra.mxu0 %v10661_v25 }
 0xf47   :  { %v10665_v18 = vpack.c.bf16 %v11042_v33, %v11041_v39 }
 0xf48   :  { %v13755_v11 = vpop.permute.xlu1 %11049 }
 0xf49   :  { %10666 = vmatprep.subr.bf16.mxu0 %v10665_v18  ;;  %5738 = vmax.xlane.f32.xlu1 %v5737_v31  ;;  %v13741_v21 = vpop.permute.xlu0 %11059 }
 0xf4a   :  { %10668 = vmatpush3.bf16.msra.mxu0 %v10665_v18 }
 0xf4b   :  { %10678 = vmatprep.subr.bf16.mxu0 %v13696_v46 }
 0xf4c   :  { %v13767_v39 = vpop.permute.xlu1 %11064 }
 0xf7a   :  { %v13699_v28 = vpop.f32.mrb[88].mxu0 }
 0xf7b   :  { %v13701_v38 = vpop.f32.mrb[89].mxu0  ;;  %v5746_v36 = vsel %vm1001_vm0, %v13699_v28, -inf }
 0xf7c   :  { %5747 = vmax.xlane.f32.xlu1 %v5746_v36  ;;  %v5743_v37 = vsel %vm1001_vm0, %v13701_v38, -inf }
 0xf7e   :  { %v13705_v5 = vpop.f32.mrb[90].mxu0 }
 0xf7f   :  { %v13707_v48 = vpop.f32.mrb[91].mxu0  ;;  %v5752_v52 = vsel %vm1001_vm0, %v13705_v5, -inf }
 0xf80   :  { %5744 = vmax.xlane.f32.xlu1 %v5743_v37  ;;  %v5749_v9 = vsel %vm1001_vm0, %v13707_v48, -inf }
 0xf84   :  { %5753 = vmax.xlane.f32.xlu1 %v5752_v52 }
 0xf88   :  { %5750 = vmax.xlane.f32.xlu1 %v5749_v9 }
 0xfb5   :  { %v13715_v26 = vpop.f32.mrb[100].mxu1 }
 0xfb6   :  { %v13717_v41 = vpop.f32.mrb[101].mxu1  ;;  %v5758_v13 = vsel %vm1001_vm0, %v13715_v26, -inf }
 0xfb7   :  { %5759 = vmax.xlane.f32.xlu0 %v5758_v13  ;;  %v5755_v40 = vsel %vm1001_vm0, %v13717_v41, -inf }
 0xfb8   :  { %5756 = vmax.xlane.f32.xlu1 %v5755_v40 }
 0xfb9   :  { %v13723_v10 = vpop.f32.mrb[102].mxu1 }
 0xfba   :  { %v13725_v0 = vpop.f32.mrb[103].mxu1  ;;  %v5764_v29 = vsel %vm1001_vm0, %v13723_v10, -inf }
 0xfbb   :  { %5765 = vmax.xlane.f32.xlu0 %v5764_v29  ;;  %v5761_v35 = vsel %vm1001_vm0, %v13725_v0, -inf }
 0xfbf   :  { %5762 = vmax.xlane.f32.xlu0 %v5761_v35 }
 0xfce   :  { %v5736_v59 = vpop.xlane.xlu0 %5735 }
 0xfcf   :  { %v5828_v27 = vsub.f32 %v13677_v23, %v5736_v59 }
 0xfd1   :  { %v5861_v9 = vmul.f32 1.442695, %v5828_v27 }
 0xfd2   :  { %v5742_v37 = vpop.xlane.xlu1 %5741 }
 0xfd3   :  { %v5733_v18 = vpop.xlane.xlu0 %5732  ;;  %11649 = vpow2.f32 %v5861_v9 }
 0xfd4   :  { %v5827_v13 = vsub.f32 %v13680_v6, %v5733_v18 }
 0xfd6   :  { %v5859_v35 = vmul.f32 1.442695, %v5827_v13 }
 0xfd8   :  { %11651 = vpow2.f32 %v5859_v35 }
 0xfe8   :  { %v13731_v47 = vpop.f32.mrb[104].mxu1 }
 0xfe9   :  { %v13733_v49 = vpop.f32.mrb[105].mxu1  ;;  %v5782_v4 = vsel %vm1001_vm0, %v13731_v47, -inf }
 0xfea   :  { %5783 = vmax.xlane.f32.xlu0 %v5782_v4  ;;  %v5779_v54 = vsel %vm1001_vm0, %v13733_v49, -inf  ;;  %v5830_v4 = vsub.f32 %v13685_v44, %v5742_v37  ;;  %v13803_v37 = vpop.eup %11649 }
 0xfeb   :  { %v13809_v9 = vpop.eup %11651 }
 0xfee   :  { %5780 = vmax.xlane.f32.xlu0 %v5779_v54 }
 0xff0   :  { %v13743_v7 = vpop.f32.mrb[92].mxu0 }
 0xff1   :  { %v13747_v57 = vpop.f32.mrb[93].mxu0  ;;  %v5770_v53 = vsel %vm1001_vm0, %v13743_v7, -inf }
 0xff2   :  { %v13745_v55 = vpop.f32.mrb[106].mxu1  ;;  %5771 = vmax.xlane.f32.xlu1 %v5770_v53  ;;  %v5767_v25 = vsel %vm1001_vm0, %v13747_v57, -inf  ;;  %v5739_v53 = vpop.xlane.xlu1 %5738 }
 0xff3   :  { %v13749_v51 = vpop.f32.mrb[107].mxu1  ;;  %v5788_v45 = vsel %vm1001_vm0, %v13745_v55, -inf }
 0xff4   :  { %5789 = vmax.xlane.f32.xlu0 %v5788_v45  ;;  %v5785_v43 = vsel %vm1001_vm0, %v13749_v51, -inf }
 0xff6   :  { %5768 = vmax.xlane.f32.xlu1 %v5767_v25  ;;  %v5865_v25 = vmul.f32 1.442695, %v5830_v4  ;;  %v5923_v4 = vsel %vm1001_vm0, %v13809_v9, 0.0 }
 0xff8   :  { %5786 = vmax.xlane.f32.xlu0 %v5785_v43  ;;  %v13761_v1 = vpop.f32.mrb[94].mxu0  ;;  %v5829_v43 = vsub.f32 %v13688_v15, %v5739_v53  ;;  %11653 = vpow2.f32 %v5865_v25 }
 0xff9   :  { %v13763_v12 = vpop.f32.mrb[95].mxu0  ;;  %v5776_v33 = vsel %vm1001_vm0, %v13761_v1, -inf }
 0xffa   :  { %5777 = vmax.xlane.f32.xlu1 %v5776_v33  ;;  %v5773_v52 = vsel %vm1001_vm0, %v13763_v12, -inf  ;;  %v5863_v27 = vmul.f32 1.442695, %v5829_v43 }
 0xffc   :  { %v13770_v61 = vpop.f32.mrb[108].mxu1  ;;  %11655 = vpow2.f32 %v5863_v27 }
 0xffd   :  { %v13772_v31 = vpop.f32.mrb[109].mxu1  ;;  %v5806_v36 = vsel %vm1001_vm0, %v13770_v61, -inf }
 0xffe   :  { %5807 = vmax.xlane.f32.xlu0 %v5806_v36  ;;  %5774 = vmax.xlane.f32.xlu1 %v5773_v52  ;;  %v5803_v59 = vsel %vm1001_vm0, %v13772_v31, -inf  ;;  %v5926_v52 = vsel %vm1001_vm0, %v13803_v37, 0.0 }
0x1001   :  { %v13779_v40 = vpop.f32.mrb[96].mxu0 }
0x1002   :  { %v13781_v23 = vpop.f32.mrb[97].mxu0  ;;  %v5794_v29 = vsel %vm1001_vm0, %v13779_v40, -inf }
0x1003   :  { %5795 = vmax.xlane.f32.xlu0 %v5794_v29  ;;  %v5791_v54 = vsel %vm1001_vm0, %v13781_v23, -inf }
0x1004   :  { %5792 = vmax.xlane.f32.xlu1 %v5791_v54  ;;  %v13788_v45 = vpop.f32.mrb[110].mxu1  ;;  %v13819_v54 = vpop.eup %11653 }
0x1005   :  { %v13790_v6 = vpop.f32.mrb[111].mxu1  ;;  %v5812_v44 = vsel %vm1001_vm0, %v13788_v45, -inf  ;;  %v5932_v43 = vsel %vm1001_vm0, %v13819_v54, 0.0 }
0x1006   :  { %v5809_v29 = vsel %vm1001_vm0, %v13790_v6, -inf }
0x1007   :  { %5804 = vmax.xlane.f32.xlu0 %v5803_v59 }
0x1009   :  { %v13795_v33 = vpop.f32.mrb[98].mxu0 }
0x100a   :  { %v13799_v18 = vpop.f32.mrb[99].mxu0  ;;  %v5800_v15 = vsel %vm1001_vm0, %v13795_v33, -inf }
0x100b   :  { %5813 = vmax.xlane.f32.xlu0 %v5812_v44  ;;  %v5797_v36 = vsel %vm1001_vm0, %v13799_v18, -inf  ;;  %v13829_v44 = vpop.eup %11655 }
0x100c   :  { %5798 = vmax.xlane.f32.xlu1 %v5797_v36  ;;  %v5929_v36 = vsel %vm1001_vm0, %v13829_v44, 0.0 }
0x100f   :  { %5801 = vmax.xlane.f32.xlu0 %v5800_v15 }
0x1010   :  { %5927 = vadd.xlane.f32.xlu1 %v5926_v52 }
0x1011   :  { %v13811_v13 = vpop.f32.mrb[100].mxu0 }
0x1012   :  { %v13815_v35 = vpop.f32.mrb[101].mxu0  ;;  %v5818_v59 = vsel %vm1001_vm0, %v13811_v13, -inf }
0x1013   :  { %5810 = vmax.xlane.f32.xlu0 %v5809_v29  ;;  %v5815_v15 = vsel %vm1001_vm0, %v13815_v35, -inf  ;;  %v5748_v29 = vpop.xlane.xlu1 %5747 }
0x1014   :  { %5924 = vadd.xlane.f32.xlu1 %v5923_v4 }
0x1015   :  { %v13821_v53 = vpop.f32.mrb[102].mxu0 }
0x1016   :  { %v13825_v25 = vpop.f32.mrb[103].mxu0  ;;  %v5824_v27 = vsel %vm1001_vm0, %v13821_v53, -inf }
0x1017   :  { %5819 = vmax.xlane.f32.xlu0 %v5818_v59  ;;  %v5821_v52 = vsel %vm1001_vm0, %v13825_v25, -inf  ;;  %v5745_v4 = vpop.xlane.xlu1 %5744 }
0x1018   :  { %5933 = vadd.xlane.f32.xlu1 %v5932_v43 }
0x101b   :  { %5825 = vmax.xlane.f32.xlu0 %v5824_v27  ;;  %v5754_v59 = vpop.xlane.xlu1 %5753  ;;  %v5832_v27 = vsub.f32 %v13699_v28, %v5748_v29 }
0x101c   :  { %5930 = vadd.xlane.f32.xlu1 %v5929_v36  ;;  %v5834_v16 = vsub.f32 %v13705_v5, %v5754_v59 }
0x101d   :  { %v5869_v19 = vmul.f32 1.442695, %v5832_v27 }
0x101f   :  { %v5751_v43 = vpop.xlane.xlu1 %5750 }
0x1020   :  { %5816 = vmax.xlane.f32.xlu1 %v5815_v15  ;;  %v5831_v15 = vsub.f32 %v13701_v38, %v5745_v4  ;;  %v5833_v38 = vsub.f32 %v13707_v48, %v5751_v43 }
0x1024   :  { %5822 = vmax.xlane.f32.xlu1 %v5821_v52 }
0x1035   :  { %11069 = vrot.lane.b32.xlu1 %v13478_v50, %s12081_s1  ;;  %v5867_v50 = vmul.f32 1.442695, %v5831_v15 }
0x1044   :  { %v5760_v3 = vpop.xlane.xlu0 %5759 }
0x1045   :  { %v5836_v36 = vsub.f32 %v13715_v26, %v5760_v3  ;;  %v5757_v17 = vpop.xlane.xlu1 %5756  ;;  %v5873_v26 = vmul.f32 1.442695, %v5834_v16 }
0x1046   :  { %v5835_v24 = vsub.f32 %v13717_v41, %v5757_v17 }
0x1047   :  { %v5877_v8 = vmul.f32 1.442695, %v5836_v36 }
0x1048   :  { %v5875_v52 = vmul.f32 1.442695, %v5835_v24  ;;  %v5766_v20 = vpop.xlane.xlu0 %5765 }
0x1049   :  { %11657 = vpow2.f32 %v5877_v8  ;;  %v5838_v30 = vsub.f32 %v13723_v10, %v5766_v20  ;;  %v5871_v8 = vmul.f32 1.442695, %v5833_v38 }
0x104a   :  { %11659 = vpow2.f32 %v5869_v19 }
0x104b   :  { %11661 = vpow2.f32 %v5875_v52  ;;  %v5881_v28 = vmul.f32 1.442695, %v5838_v30 }
0x104c   :  { %v5763_v29 = vpop.xlane.xlu0 %5762  ;;  %11663 = vpow2.f32 %v5867_v50 }
0x104d   :  { %v5837_v3 = vsub.f32 %v13725_v0, %v5763_v29  ;;  %11665 = vpow2.f32 %v5881_v28 }
0x104e   :  { %11667 = vpow2.f32 %v5873_v26 }
0x104f   :  { %v5879_v17 = vmul.f32 1.442695, %v5837_v3 }
0x1051   :  { %11669 = vpow2.f32 %v5879_v17 }
0x1052   :  { %11671 = vpow2.f32 %v5871_v8 }
0x1053   :  { %v13849_v24 = vpop.eup %11657 }
0x1054   :  { %v13851_v19 = vpop.eup %11659  ;;  %v5950_v20 = vsel %vm1001_vm0, %v13849_v24, 0.0 }
0x1055   :  { %v13855_v30 = vpop.eup %11661  ;;  %5951 = vadd.xlane.f32.xlu0 %v5950_v20  ;;  %v5938_v48 = vsel %vm1001_vm0, %v13851_v19, 0.0 }
0x1056   :  { %v13857_v5 = vpop.eup %11663  ;;  %v5947_v16 = vsel %vm1001_vm0, %v13855_v30, 0.0 }
0x1057   :  { %v13863_v41 = vpop.eup %11665  ;;  %v5935_v4 = vsel %vm1001_vm0, %v13857_v5, 0.0 }
0x1058   :  { %v13865_v10 = vpop.eup %11667  ;;  %v5956_v0 = vsel %vm1001_vm0, %v13863_v41, 0.0 }
0x1059   :  { %5948 = vadd.xlane.f32.xlu0 %v5947_v16  ;;  %5939 = vadd.xlane.f32.xlu1 %v5938_v48  ;;  %v5944_v27 = vsel %vm1001_vm0, %v13865_v10, 0.0 }
0x105b   :  { %v13871_v59 = vpop.eup %11669 }
0x105c   :  { %v5953_v43 = vsel %vm1001_vm0, %v13871_v59, 0.0  ;;  %v13877_v36 = vpop.eup %11671 }
0x105d   :  { %5957 = vadd.xlane.f32.xlu0 %v5956_v0  ;;  %5936 = vadd.xlane.f32.xlu1 %v5935_v4  ;;  %v5941_v15 = vsel %vm1001_vm0, %v13877_v36, 0.0 }
0x1061   :  { %5954 = vadd.xlane.f32.xlu0 %v5953_v43  ;;  %5945 = vadd.xlane.f32.xlu1 %v5944_v27 }
0x1065   :  { %5942 = vadd.xlane.f32.xlu1 %v5941_v15 }
0x1077   :  { %v5784_v52 = vpop.xlane.xlu0 %5783 }
0x1078   :  { %v5844_v50 = vsub.f32 %v13731_v47, %v5784_v52 }
0x107a   :  { %v5893_v28 = vmul.f32 1.442695, %v5844_v50 }
0x107b   :  { %v5781_v29 = vpop.xlane.xlu0 %5780 }
0x107c   :  { %11673 = vpow2.f32 %v5893_v28  ;;  %v5843_v3 = vsub.f32 %v13733_v49, %v5781_v29 }
0x107e   :  { %v5891_v26 = vmul.f32 1.442695, %v5843_v3 }
0x107f   :  { %v5772_v38 = vpop.xlane.xlu1 %5771 }
0x1080   :  { %11675 = vpow2.f32 %v5891_v26  ;;  %v5840_v8 = vsub.f32 %v13743_v7, %v5772_v38 }
0x1081   :  { %v5790_v17 = vpop.xlane.xlu0 %5789 }
0x1082   :  { %v5846_v20 = vsub.f32 %v13745_v55, %v5790_v17  ;;  %v5885_v16 = vmul.f32 1.442695, %v5840_v8 }
0x1083   :  { %v5769_v0 = vpop.xlane.xlu1 %5768 }
0x1084   :  { %v5897_v48 = vmul.f32 1.442695, %v5846_v20  ;;  %11677 = vpow2.f32 %v5885_v16  ;;  %v5839_v47 = vsub.f32 %v13747_v57, %v5769_v0 }
0x1085   :  { %v5787_v4 = vpop.xlane.xlu0 %5786 }
0x1086   :  { %v13885_v43 = vpop.eup %11673  ;;  %11679 = vpow2.f32 %v5897_v48  ;;  %v5883_v27 = vmul.f32 1.442695, %v5839_v47  ;;  %v5845_v15 = vsub.f32 %v13749_v51, %v5787_v4 }
0x1087   :  { %v5974_v49 = vsel %vm1001_vm0, %v13885_v43, 0.0  ;;  %v5778_v7 = vpop.xlane.xlu1 %5777 }
0x1088   :  { %5975 = vadd.xlane.f32.xlu0 %v5974_v49  ;;  %11681 = vpow2.f32 %v5883_v27  ;;  %v5842_v55 = vsub.f32 %v13761_v1, %v5778_v7  ;;  %v5895_v29 = vmul.f32 1.442695, %v5845_v15 }
0x108a   :  { %v13891_v52 = vpop.eup %11675  ;;  %v5889_v57 = vmul.f32 1.442695, %v5842_v55 }
0x108b   :  { %v5808_v50 = vpop.xlane.xlu0 %5807  ;;  %v5971_v28 = vsel %vm1001_vm0, %v13891_v52, 0.0  ;;  %v5775_v3 = vpop.xlane.xlu1 %5774 }
0x108c   :  { %5972 = vadd.xlane.f32.xlu0 %v5971_v28  ;;  %11683 = vpow2.f32 %v5889_v57  ;;  %v5841_v26 = vsub.f32 %v13763_v12, %v5775_v3  ;;  %v5852_v17 = vsub.f32 %v13770_v61, %v5808_v50 }
0x108d   :  { %11685 = vpow2.f32 %v5895_v29 }
0x108e   :  { %v13897_v38 = vpop.eup %11677  ;;  %v5887_v51 = vmul.f32 1.442695, %v5841_v26  ;;  %v5909_v0 = vmul.f32 1.442695, %v5852_v17 }
0x108f   :  { %v5962_v20 = vsel %vm1001_vm0, %v13897_v38, 0.0 }
0x1090   :  { %v13900_v8 = vpop.eup %11679  ;;  %v5796_v1 = vpop.xlane.xlu0 %5795  ;;  %5963 = vadd.xlane.f32.xlu1 %v5962_v20  ;;  %11687 = vpow2.f32 %v5887_v51 }
0x1091   :  { %v5848_v16 = vsub.f32 %v13779_v40, %v5796_v1  ;;  %v5980_v48 = vsel %vm1001_vm0, %v13900_v8, 0.0  ;;  %v5793_v47 = vpop.xlane.xlu1 %5792 }
0x1092   :  { %5981 = vadd.xlane.f32.xlu0 %v5980_v48  ;;  %v13907_v12 = vpop.eup %11681  ;;  %v5847_v15 = vsub.f32 %v13781_v23, %v5793_v47 }
0x1093   :  { %v5901_v4 = vmul.f32 1.442695, %v5848_v16  ;;  %v5959_v49 = vsel %vm1001_vm0, %v13907_v12, 0.0 }
0x1094   :  { %v5805_v61 = vpop.xlane.xlu0 %5804  ;;  %5960 = vadd.xlane.f32.xlu1 %v5959_v49  ;;  %v5899_v3 = vmul.f32 1.442695, %v5847_v15 }
0x1095   :  { %11689 = vpow2.f32 %v5901_v4  ;;  %v5851_v27 = vsub.f32 %v13772_v31, %v5805_v61 }
0x1096   :  { %v13912_v40 = vpop.eup %11683  ;;  %11691 = vpow2.f32 %v5909_v0 }
0x1097   :  { %v5907_v7 = vmul.f32 1.442695, %v5851_v27  ;;  %v5968_v50 = vsel %vm1001_vm0, %v13912_v40, 0.0  ;;  %v13917_v28 = vpop.eup %11685 }
0x1098   :  { %v5814_v55 = vpop.xlane.xlu0 %5813  ;;  %5969 = vadd.xlane.f32.xlu0 %v5968_v50  ;;  %v5977_v51 = vsel %vm1001_vm0, %v13917_v28, 0.0 }
0x1099   :  { %v5854_v29 = vsub.f32 %v13788_v45, %v5814_v55  ;;  %v5799_v57 = vpop.xlane.xlu1 %5798  ;;  %11693 = vpow2.f32 %v5907_v7 }
0x109a   :  { %v13922_v17 = vpop.eup %11687  ;;  %11695 = vpow2.f32 %v5899_v3  ;;  %v5849_v45 = vsub.f32 %v13799_v18, %v5799_v57 }
0x109b   :  { %v5913_v31 = vmul.f32 1.442695, %v5854_v29  ;;  %v5965_v4 = vsel %vm1001_vm0, %v13922_v17, 0.0 }
0x109c   :  { %v5802_v26 = vpop.xlane.xlu0 %5801  ;;  %5978 = vadd.xlane.f32.xlu0 %v5977_v51  ;;  %v5903_v27 = vmul.f32 1.442695, %v5849_v45 }
0x109d   :  { %v5850_v23 = vsub.f32 %v13795_v33, %v5802_v26  ;;  %v5928_v1 = vpop.xlane.xlu1 %5927  ;;  %11697 = vpow2.f32 %v5913_v31 }
0x109f   :  { %v13925_v20 = vpop.eup %11689  ;;  %v5905_v16 = vmul.f32 1.442695, %v5850_v23 }
0x10a0   :  { %v5811_v48 = vpop.xlane.xlu0 %5810  ;;  %v5986_v0 = vsel %vm1001_vm0, %v13925_v20, 0.0  ;;  %v13932_v47 = vpop.eup %11691  ;;  %5966 = vadd.xlane.f32.xlu0 %v5965_v4 }
0x10a1   :  { %11699 = vpow2.f32 %v5905_v16  ;;  %v5853_v33 = vsub.f32 %v13790_v6, %v5811_v48  ;;  %5987 = vadd.xlane.f32.xlu1 %v5986_v0  ;;  %v5925_v61 = vpop.xlane.xlu1 %5924  ;;  %v5998_v15 = vsel %vm1001_vm0, %v13932_v47, 0.0 }
0x10a2   :  { %11701 = vrcp.f32 %v5928_v1 }
0x10a3   :  { %v5911_v49 = vmul.f32 1.442695, %v5853_v33  ;;  %11703 = vrcp.f32 %v5925_v61  ;;  %v13937_v7 = vpop.eup %11693 }
0x10a4   :  { %v5820_v18 = vpop.xlane.xlu0 %5819  ;;  %5999 = vadd.xlane.f32.xlu0 %v5998_v15  ;;  %v5995_v57 = vsel %vm1001_vm0, %v13937_v7, 0.0  ;;  %v13942_v3 = vpop.eup %11695 }
0x10a5   :  { %v5856_v55 = vsub.f32 %v13811_v13, %v5820_v18  ;;  %v5934_v50 = vpop.xlane.xlu1 %5933  ;;  %11705 = vpow2.f32 %v5911_v49  ;;  %v5983_v45 = vsel %vm1001_vm0, %v13942_v3, 0.0  ;;  %v11056_v18 = vunpack.i.l.bf16 %v13737_v56 }
0x10a6   :  { %11707 = vpow2.f32 %v5903_v27  ;;  %v11057_v27 = vunpack.i.h.bf16 %v13737_v56 }
0x10a7   :  { %v5917_v29 = vmul.f32 1.442695, %v5856_v55  ;;  %v13945_v26 = vpop.eup %11697 }
0x10a8   :  { %v5826_v6 = vpop.xlane.xlu0 %5825  ;;  %5996 = vadd.xlane.f32.xlu0 %v5995_v57  ;;  %v6004_v61 = vsel %vm1001_vm0, %v13945_v26, 0.0 }
0x10a9   :  { %11709 = vpow2.f32 %v5917_v29  ;;  %v5858_v31 = vsub.f32 %v13821_v53, %v5826_v6  ;;  %v5931_v51 = vpop.xlane.xlu1 %5930 }
0x10aa   :  { %11711 = vrcp.f32 %v5934_v50 }
0x10ab   :  { %v13947_v13 = vpop.eup %11699  ;;  %v5921_v23 = vmul.f32 1.442695, %v5858_v31  ;;  %11713 = vrcp.f32 %v5931_v51 }
0x10ac   :  { %v11702_v1 = vpop.eup %11701  ;;  %v5992_v16 = vsel %vm1001_vm0, %v13947_v13, 0.0  ;;  %5984 = vadd.xlane.f32.xlu0 %v5983_v45 }
0x10ad   :  { %v11704_v48 = vpop.eup %11703  ;;  %11715 = vpow2.f32 %v5921_v23  ;;  %5993 = vadd.xlane.f32.xlu1 %v5992_v16  ;;  %v5817_v53 = vpop.xlane.xlu1 %5816  ;;  %v6052_v4 = vmul.f32 %v11702_v1, %v13803_v37 }
0x10ae   :  { %v6051_v0 = vmul.f32 %v11704_v48, %v13809_v9  ;;  %v5855_v33 = vsub.f32 %v13815_v35, %v5817_v53 }
0x10af   :  { %v13959_v49 = vpop.eup %11705 }
0x10b0   :  { %10172 = vmatprep.mubr.msk.f32.mxu1 %vm1001_vm0, %v6051_v0  ;;  %v5915_v15 = vmul.f32 1.442695, %v5855_v33  ;;  %6005 = vadd.xlane.f32.xlu0 %v6004_v61  ;;  %v13964_v9 = vpop.eup %11707  ;;  %v6001_v56 = vsel %vm1001_vm0, %v13959_v49, 0.0 }
0x10b1   :  { %10173 = vmatmul.mubr.msk.f32.vlgmr.msra.gmra.mrb[112].mxu1 %vm1001_vm0, %v6052_v4  ;;  %v5823_v37 = vpop.xlane.xlu1 %5822  ;;  %v5989_v23 = vsel %vm1001_vm0, %v13964_v9, 0.0 }
0x10b2   :  { %10656 = vmatpush3.bf16.msra.mxu1 %v13545_v2  ;;  %11717 = vpow2.f32 %v5915_v15  ;;  %v5857_v55 = vsub.f32 %v13825_v25, %v5823_v37  ;;  %v13975_v2 = vpack.c.bf16 %v11057_v27, %v11056_v18  ;;  %v11052_v15 = vunpack.i.h.bf16 %v13755_v11 }
0x10b3   :  { %v13967_v35 = vpop.eup %11709  ;;  %10658 = vmatprep.subr.bf16.mxu1 %v13539_v32 }
0x10b4   :  { %v11712_v50 = vpop.eup %11711  ;;  %v6010_v29 = vsel %vm1001_vm0, %v13967_v35, 0.0  ;;  %v5919_v57 = vmul.f32 1.442695, %v5857_v55  ;;  %6002 = vadd.xlane.f32.xlu0 %v6001_v56 }
0x10b5   :  { %v11714_v6 = vpop.eup %11713  ;;  %6011 = vadd.xlane.f32.xlu1 %v6010_v29  ;;  %v6054_v25 = vmul.f32 %v11712_v50, %v13819_v54  ;;  %v14005_v45 = vpop.permute.xlu1 %11069  ;;  %v11062_v29 = vunpack.i.h.bf16 %v13741_v21 }
0x10b6   :  { %10660 = vmatpush3.bf16.msra.mxu1 %v13539_v32  ;;  %v6053_v31 = vmul.f32 %v11714_v6, %v13829_v44  ;;  %11719 = vpow2.f32 %v5919_v57  ;;  %v11061_v6 = vunpack.i.l.bf16 %v13741_v21 }
0x10b7   :  { %v13979_v51 = vpop.eup %11715  ;;  %10670 = vmatprep.subr.bf16.mxu1 %v13975_v2 }
0x10b8   :  { %10175 = vmatprep.mubr.msk.f32.mxu1 %vm1001_vm0, %v6053_v31  ;;  %v6016_v1 = vsel %vm1001_vm0, %v13979_v51, 0.0  ;;  %5990 = vadd.xlane.f32.xlu0 %v5989_v23  ;;  %v10693_v21 = vpack.c.bf16 %v11062_v29, %v11061_v6 }
0x10b9   :  { %10176 = vmatmul.mubr.msk.f32.gmra.mrb[114].mxu1 %vm1001_vm0, %v6054_v25  ;;  %6017 = vadd.xlane.f32.xlu1 %v6016_v1  ;;  %v11066_v25 = vunpack.i.l.bf16 %v13767_v39 }
0x10bc   :  { %v13989_v32 = vpop.eup %11717 }
0x10bd   :  { %v6007_v44 = vsel %vm1001_vm0, %v13989_v32, 0.0 }
0x10be   :  { %6008 = vadd.xlane.f32.xlu0 %v6007_v44 }
0x10c0   :  { %v13993_v16 = vpop.eup %11719 }
0x10c1   :  { %v6013_v54 = vsel %vm1001_vm0, %v13993_v16, 0.0 }
0x10c2   :  { %6014 = vadd.xlane.f32.xlu0 %v6013_v54 }
0x10ca   :  { %11079 = vrot.lane.b32.xlu1 %v13537_v60, %s12076_s5 }
0x10ce   :  { %11084 = vrot.lane.b32.xlu1 %v13543_v14, %s12081_s1 }
0x10d2   :  { %11089 = vrot.lane.b32.xlu1 %v13537_v60, %s12081_s1 }
0x10d8   :  { %11074 = vrot.lane.b32.xlu0 %v13543_v14, %s12076_s5  ;;  %v11051_v14 = vunpack.i.l.bf16 %v13755_v11  ;;  %v11067_v11 = vunpack.i.h.bf16 %v13767_v39 }
0x10da   :  { %v10681_v57 = vpack.c.bf16 %v11052_v15, %v11051_v14  ;;  %v10673_v44 = vpack.c.bf16 %v11067_v11, %v11066_v25 }
0x10e2   :  { %v5952_v48 = vpop.xlane.xlu0 %5951 }
0x10e3   :  { %11721 = vrcp.f32 %v5952_v48 }
0x10e6   :  { %v5949_v53 = vpop.xlane.xlu0 %5948  ;;  %v5940_v0 = vpop.xlane.xlu1 %5939 }
0x10e7   :  { %11723 = vrcp.f32 %v5949_v53 }
0x10e8   :  { %11725 = vrcp.f32 %v5940_v0 }
0x10ea   :  { %v5958_v4 = vpop.xlane.xlu0 %5957  ;;  %v5937_v33 = vpop.xlane.xlu1 %5936 }
0x10eb   :  { %11727 = vrcp.f32 %v5937_v33 }
0x10ec   :  { %11729 = vrcp.f32 %v5958_v4 }
0x10ed   :  { %v11722_v18 = vpop.eup %11721 }
0x10ee   :  { %v5955_v61 = vpop.xlane.xlu0 %5954  ;;  %v5946_v27 = vpop.xlane.xlu1 %5945  ;;  %v6060_v50 = vmul.f32 %v11722_v18, %v13849_v24 }
0x10ef   :  { %11731 = vrcp.f32 %v5955_v61  ;;  %v11072_v61 = vunpack.i.h.bf16 %v14005_v45 }
0x10f0   :  { %11733 = vrcp.f32 %v5946_v27 }
0x10f1   :  { %v11724_v60 = vpop.eup %11723 }
0x10f2   :  { %v5943_v37 = vpop.xlane.xlu1 %5942  ;;  %v6059_v55 = vmul.f32 %v11724_v60, %v13855_v30  ;;  %v11726_v56 = vpop.eup %11725 }
0x10f3   :  { %11735 = vrcp.f32 %v5943_v37  ;;  %v6056_v23 = vmul.f32 %v11726_v56, %v13851_v19 }
0x10f4   :  { %10200 = vmatprep.mubr.msk.f32.mxu0 %vm1001_vm0, %v6059_v55 }
0x10f5   :  { %10201 = vmatmul.mubr.msk.f32.vlgmr.msra.gmra.mrb[104].mxu0 %vm1001_vm0, %v6060_v50  ;;  %v11728_v31 = vpop.eup %11727 }
0x10f6   :  { %10680 = vmatpush3.bf16.msra.mxu0 %v13696_v46  ;;  %v6055_v24 = vmul.f32 %v11728_v31, %v13857_v5  ;;  %v11730_v30 = vpop.eup %11729 }
0x10f7   :  { %10682 = vmatprep.subr.bf16.mxu0 %v10681_v57  ;;  %v6062_v46 = vmul.f32 %v11730_v30, %v13863_v41 }
0x10f8   :  { %10186 = vmatprep.mubr.msk.f32.mxu1 %vm1001_vm0, %v6055_v24 }
0x10f9   :  { %v11732_v1 = vpop.eup %11731  ;;  %10187 = vmatmul.mubr.msk.f32.vlgmr.msra.gmra.mrb[116].mxu1 %vm1001_vm0, %v6056_v23 }
0x10fa   :  { %10684 = vmatpush3.bf16.msra.mxu0 %v10681_v57  ;;  %v6061_v54 = vmul.f32 %v11732_v1, %v13871_v59  ;;  %10672 = vmatpush3.bf16.msra.mxu1 %v13975_v2  ;;  %v11734_v39 = vpop.eup %11733 }
0x10fb   :  { %10694 = vmatprep.subr.bf16.mxu0 %v10693_v21  ;;  %10674 = vmatprep.subr.bf16.mxu1 %v10673_v44  ;;  %v6058_v48 = vmul.f32 %v11734_v39, %v13865_v10 }
0x10fc   :  { %10203 = vmatprep.mubr.msk.f32.mxu0 %vm1001_vm0, %v6061_v54 }
0x10fd   :  { %v11736_v19 = vpop.eup %11735  ;;  %10204 = vmatmul.mubr.msk.f32.gmra.mrb[106].mxu0 %vm1001_vm0, %v6062_v46 }
0x10fe   :  { %v6057_v5 = vmul.f32 %v11736_v19, %v13877_v36  ;;  %10676 = vmatpush3.bf16.msra.mxu1 %v10673_v44  ;;  %v11071_v36 = vunpack.i.l.bf16 %v14005_v45 }
0x1100   :  { %10189 = vmatprep.mubr.msk.f32.mxu1 %vm1001_vm0, %v6057_v5  ;;  %v10697_v60 = vpack.c.bf16 %v11072_v61, %v11071_v36 }
0x1101   :  { %10190 = vmatmul.mubr.msk.f32.gmra.mrb[118].mxu1 %vm1001_vm0, %v6058_v48 }
0x1115   :  { %v5976_v59 = vpop.xlane.xlu0 %5975 }
0x1116   :  { %11737 = vrcp.f32 %v5976_v59 }
0x1119   :  { %v5973_v2 = vpop.xlane.xlu0 %5972 }
0x111a   :  { %11739 = vrcp.f32 %v5973_v2 }
0x111d   :  { %v5964_v41 = vpop.xlane.xlu1 %5963 }
0x111e   :  { %11741 = vrcp.f32 %v5964_v41 }
0x111f   :  { %v5982_v0 = vpop.xlane.xlu0 %5981 }
0x1120   :  { %v11738_v53 = vpop.eup %11737 }
0x1121   :  { %v5961_v4 = vpop.xlane.xlu1 %5960  ;;  %v6068_v27 = vmul.f32 %v11738_v53, %v13885_v43 }
0x1122   :  { %11743 = vrcp.f32 %v5961_v4 }
0x1123   :  { %11745 = vrcp.f32 %v5982_v0 }
0x1124   :  { %v11740_v33 = vpop.eup %11739 }
0x1125   :  { %v6067_v10 = vmul.f32 %v11740_v33, %v13891_v52  ;;  %v5970_v18 = vpop.xlane.xlu0 %5969 }
0x1127   :  { %10228 = vmatprep.mubr.msk.f32.mxu0 %vm1001_vm0, %v6067_v10 }
0x1128   :  { %10229 = vmatmul.mubr.msk.f32.vlgmr.msra.gmra.mrb[108].mxu0 %vm1001_vm0, %v6068_v27  ;;  %v11742_v14 = vpop.eup %11741 }
0x1129   :  { %10696 = vmatpush3.bf16.msra.mxu0 %v10693_v21  ;;  %v5979_v15 = vpop.xlane.xlu0 %5978  ;;  %v6064_v52 = vmul.f32 %v11742_v14, %v13897_v38 }
0x112a   :  { %10698 = vmatprep.subr.bf16.mxu0 %v10697_v60  ;;  %11747 = vrcp.f32 %v5979_v15 }
0x112b   :  { %11749 = vrcp.f32 %v5970_v18 }
0x112c   :  { %v11744_v37 = vpop.eup %11743 }
0x112d   :  { %10700 = vmatpush3.bf16.msra.mxu0 %v10697_v60  ;;  %v5967_v45 = vpop.xlane.xlu0 %5966  ;;  %v6063_v55 = vmul.f32 %v11744_v37, %v13907_v12  ;;  %v11746_v50 = vpop.eup %11745 }
0x112e   :  { %11751 = vrcp.f32 %v5967_v45  ;;  %v6070_v57 = vmul.f32 %v11746_v50, %v13900_v8  ;;  %v5988_v31 = vpop.xlane.xlu1 %5987 }
0x112f   :  { %10214 = vmatprep.mubr.msk.f32.mxu1 %vm1001_vm0, %v6063_v55 }
0x1130   :  { %10215 = vmatmul.mubr.msk.f32.vlgmr.msra.gmra.mrb[120].mxu1 %vm1001_vm0, %v6064_v52 }
0x1131   :  { %v6000_v43 = vpop.xlane.xlu0 %5999 }
0x1132   :  { %11753 = vrcp.f32 %v6000_v43 }
0x1134   :  { %v11748_v56 = vpop.eup %11747 }
0x1135   :  { %v5997_v29 = vpop.xlane.xlu0 %5996  ;;  %v6069_v6 = vmul.f32 %v11748_v56, %v13917_v28  ;;  %v11750_v12 = vpop.eup %11749 }
0x1136   :  { %11755 = vrcp.f32 %v5997_v29  ;;  %v6066_v24 = vmul.f32 %v11750_v12, %v13912_v40 }
0x1137   :  { %10231 = vmatprep.mubr.msk.f32.mxu0 %vm1001_vm0, %v6069_v6 }
0x1138   :  { %10232 = vmatmul.mubr.msk.f32.gmra.mrb[110].mxu0 %vm1001_vm0, %v6070_v57  ;;  %v11752_v38 = vpop.eup %11751 }
0x1139   :  { %v5985_v11 = vpop.xlane.xlu0 %5984  ;;  %v6065_v25 = vmul.f32 %v11752_v38, %v13922_v17 }
0x113a   :  { %11757 = vrcp.f32 %v5985_v11  ;;  %v5994_v30 = vpop.xlane.xlu1 %5993 }
0x113b   :  { %10217 = vmatprep.mubr.msk.f32.mxu1 %vm1001_vm0, %v6065_v25 }
0x113c   :  { %10218 = vmatmul.mubr.msk.f32.gmra.mrb[122].mxu1 %vm1001_vm0, %v6066_v24  ;;  %v11754_v8 = vpop.eup %11753 }
0x113d   :  { %v6006_v28 = vpop.xlane.xlu0 %6005  ;;  %v6076_v54 = vmul.f32 %v11754_v8, %v13932_v47 }
0x113e   :  { %11759 = vrcp.f32 %v6006_v28 }
0x1140   :  { %v11756_v23 = vpop.eup %11755 }
0x1141   :  { %v6003_v21 = vpop.xlane.xlu0 %6002  ;;  %v6075_v44 = vmul.f32 %v11756_v23, %v13937_v7 }
0x1142   :  { %v6012_v1 = vpop.xlane.xlu1 %6011  ;;  %11761 = vrcp.f32 %v6003_v21 }
0x1143   :  { %10256 = vmatprep.mubr.msk.f32.mxu0 %vm1001_vm0, %v6075_v44  ;;  %11763 = vrcp.f32 %v5988_v31 }
0x1144   :  { %10257 = vmatmul.mubr.msk.f32.vlgmr.msra.gmra.mrb[112].mxu0 %vm1001_vm0, %v6076_v54  ;;  %v11758_v40 = vpop.eup %11757 }
0x1145   :  { %v6071_v17 = vmul.f32 %v11758_v40, %v13942_v3  ;;  %v5991_v39 = vpop.xlane.xlu0 %5990 }
0x1146   :  { %v6018_v46 = vpop.xlane.xlu1 %6017  ;;  %11765 = vrcp.f32 %v5991_v39  ;;  %v11307_v39 = vld [vmem:[%s14636_s6 + $0x50] sm:$0xff]  }
0x1147   :  { %10242 = vmatprep.mubr.msk.f32.mxu1 %vm1001_vm0, %v6071_v17  ;;  %11767 = vrcp.f32 %v5994_v30 }
0x1148   :  { %v11760_v5 = vpop.eup %11759 }
0x1149   :  { %v6078_v2 = vmul.f32 %v11760_v5, %v13945_v26  ;;  %v11308_v5 = vld [vmem:[%s14636_s6 + $0x58] sm:$0xff]  }
0x114a   :  { %v11080_v59 = vpop.permute.xlu1 %11079 }
0x114b   :  { %v6009_v19 = vpop.xlane.xlu0 %6008  ;;  %v11082_v53 = vunpack.i.h.bf16 %v11080_v59  ;;  %v11081_v0 = vunpack.i.l.bf16 %v11080_v59 }
0x114c   :  { %v11762_v48 = vpop.eup %11761  ;;  %11769 = vrcp.f32 %v6009_v19 }
0x114d   :  { %v6077_v7 = vmul.f32 %v11762_v48, %v13959_v49  ;;  %v10689_v36 = vpack.c.bf16 %v11082_v53, %v11081_v0  ;;  %11771 = vrcp.f32 %v6012_v1  ;;  %v11764_v27 = vpop.eup %11763  ;;  %v11305_v1 = vld [vmem:[%s14636_s6 + $0x40] sm:$0xff]   ;;  %v11310_v53 = vld [vmem:[%s14636_s6 + $0x68] sm:$0xff]   ;;  %v11311_v0 = vld [vmem:[%s14636_s6 + $0x70] sm:$0xff]  }
0x114e   :  { %v11085_v3 = vpop.permute.xlu1 %11084  ;;  %v6072_v37 = vmul.f32 %v11764_v27, %v13925_v20  ;;  %10276 = vmatprep.subr.bf16.mxu0 %v11305_v1 }
0x114f   :  { %v6015_v47 = vpop.xlane.xlu0 %6014  ;;  %10259 = vmatprep.mubr.msk.f32.mxu0 %vm1001_vm0, %v6077_v7  ;;  %v11087_v49 = vunpack.i.h.bf16 %v11085_v3  ;;  %v11086_v10 = vunpack.i.l.bf16 %v11085_v3  ;;  %10277 = vmatpush3.bf16.msra.mxu0 %v11305_v1 }
0x1150   :  { %10260 = vmatmul.mubr.msk.f32.gmra.mrb[114].mxu0 %vm1001_vm0, %v6078_v2  ;;  %11773 = vrcp.f32 %v6015_v47  ;;  %v11766_v18 = vpop.eup %11765  ;;  %v11309_v47 = vld [vmem:[%s14636_s6 + $0x60] sm:$0xff]  }
0x1151   :  { %v10701_v60 = vpack.c.bf16 %v11087_v49, %v11086_v10  ;;  %11775 = vrcp.f32 %v6018_v46  ;;  %v11768_v45 = vpop.eup %11767  ;;  %v6073_v55 = vmul.f32 %v11766_v18, %v13964_v9  ;;  %v11306_v46 = vld [vmem:[%s14636_s6 + $0x48] sm:$0xff]  }
0x1152   :  { %v11090_v26 = vpop.permute.xlu1 %11089  ;;  %v6074_v50 = vmul.f32 %v11768_v45, %v13947_v13  ;;  %10278 = vmatprep.subr.bf16.mxu0 %v11306_v46 }
0x1153   :  { %v11075_v41 = vpop.permute.xlu0 %11074  ;;  %v11092_v15 = vunpack.i.h.bf16 %v11090_v26  ;;  %v11091_v14 = vunpack.i.l.bf16 %v11090_v26  ;;  %10279 = vmatpush3.bf16.msra.mxu0 %v11306_v46 }
0x1154   :  { %v11077_v4 = vunpack.i.h.bf16 %v11075_v41  ;;  %v11076_v33 = vunpack.i.l.bf16 %v11075_v41  ;;  %10280 = vmatprep.subr.bf16.mxu0 %v11307_v39 }
0x1155   :  { %v10705_v43 = vpack.c.bf16 %v11092_v15, %v11091_v14 }
0x1156   :  { %v10685_v61 = vpack.c.bf16 %v11077_v4, %v11076_v33  ;;  %v11770_v52 = vpop.eup %11769 }
0x1157   :  { %v11772_v56 = vpop.eup %11771  ;;  %v6079_v29 = vmul.f32 %v11770_v52, %v13989_v32  ;;  %10281 = vmatpush3.bf16.msra.mxu0 %v11307_v39 }
0x1158   :  { %10686 = vmatprep.subr.bf16.mxu1 %v10685_v61  ;;  %v6080_v20 = vmul.f32 %v11772_v56, %v13967_v35  ;;  %10282 = vmatprep.subr.bf16.mxu0 %v11308_v5 }
0x1159   :  { %10688 = vmatpush3.bf16.msra.mxu1 %v10685_v61 }
0x115a   :  { %10690 = vmatprep.subr.bf16.mxu1 %v10689_v36  ;;  %v11774_v6 = vpop.eup %11773 }
0x115b   :  { %v11776_v9 = vpop.eup %11775  ;;  %v6081_v57 = vmul.f32 %v11774_v6, %v13993_v16  ;;  %10283 = vmatpush3.bf16.msra.mxu0 %v11308_v5 }
0x115c   :  { %v6082_v13 = vmul.f32 %v11776_v9, %v13979_v51  ;;  %10284 = vmatprep.subr.bf16.mxu0 %v11309_v47 }
0x115d   :  { %10692 = vmatpush3.bf16.msra.mxu1 %v10689_v36  ;;  %v11312_v36 = vld [vmem:[%s14636_s6 + $0x78] sm:$0xff]  }
0x115e   :  { %10702 = vmatprep.subr.bf16.mxu1 %v10701_v60 }
0x115f   :  { %10285 = vmatpush3.bf16.msra.mxu0 %v11309_v47 }
0x1160   :  { %10243 = vmatmul.mubr.msk.f32.vlgmr.msra.gmra.mrb[124].mxu1 %vm1001_vm0, %v6072_v37  ;;  %10286 = vmatprep.subr.bf16.mxu0 %v11310_v53 }
0x1161   :  { %10245 = vmatprep.mubr.msk.f32.mxu1 %vm1001_vm0, %v6073_v55  ;;  %10704 = vmatpush3.bf16.msra.mxu1 %v10701_v60 }
0x1162   :  { %10706 = vmatprep.subr.bf16.mxu1 %v10705_v43 }
0x1163   :  { %10287 = vmatpush3.bf16.msra.mxu0 %v11310_v53 }
0x1164   :  { %10246 = vmatmul.mubr.msk.f32.gmra.mrb[126].mxu1 %vm1001_vm0, %v6074_v50  ;;  %10288 = vmatprep.subr.bf16.mxu0 %v11311_v0 }
0x1165   :  { %10708 = vmatpush3.bf16.msra.mxu1 %v10705_v43  ;;  %10270 = vmatprep.mubr.msk.f32.mxu1 %vm1001_vm0, %v6079_v29 }
0x1167   :  { %10289 = vmatpush3.bf16.msra.mxu0 %v11311_v0 }
0x1168   :  { %10271 = vmatmul.mubr.msk.f32.vlgmr.msra.gmra.mrb[128].mxu1 %vm1001_vm0, %v6080_v20  ;;  %10290 = vmatprep.subr.bf16.mxu0 %v11312_v36 }
0x1169   :  { %10273 = vmatprep.mubr.msk.f32.mxu1 %vm1001_vm0, %v6081_v57 }
0x116b   :  { %10291 = vmatpush3.bf16.msra.mxu0 %v11312_v36 }
0x116c   :  { %10274 = vmatmul.mubr.msk.f32.gmra.mrb[130].mxu1 %vm1001_vm0, %v6082_v13 }
0x116d   :  { %7492 = vmatprep.mubr.bf16.mxu1 %v14660_v42 }
0x1184   :  { %v14074_v32 = vpop.f32.mrb[112].mxu1 }
0x1185   :  { %v14076_v12 = vpop.f32.mrb[113].mxu1 }
0x118c   :  { %v14078_v38 = vpop.f32.mrb[114].mxu1 }
0x118d   :  { %v14080_v35 = vpop.f32.mrb[115].mxu1 }
0x11c8   :  { %v10202_v31 = vpop.f32.mrb[104].mxu0 }
0x11c9   :  { %v6355_v16 = vpop.f32.mrb[105].mxu0 }
0x11ca   :  { %v11093_v11 = vpack.i.bf16 %v10202_v31, %v6355_v16 }
0x11cc   :  { %11094 = vrot.lane.b32.xlu1 %v11093_v11, %s12081_s1  ;;  %v14083_v25 = vpop.f32.mrb[116].mxu1 }
0x11cd   :  { %v14085_v51 = vpop.f32.mrb[117].mxu1 }
0x11d0   :  { %v10205_v24 = vpop.f32.mrb[106].mxu0 }
0x11d1   :  { %v6365_v30 = vpop.f32.mrb[107].mxu0 }
0x11d2   :  { %v11098_v28 = vpack.i.bf16 %v10205_v24, %v6365_v30 }
0x11d4   :  { %11099 = vrot.lane.b32.xlu1 %v11098_v28, %s12081_s1  ;;  %v14088_v8 = vpop.f32.mrb[118].mxu1 }
0x11d5   :  { %v14090_v23 = vpop.f32.mrb[119].mxu1 }
0x11fb   :  { %v10230_v21 = vpop.f32.mrb[108].mxu0 }
0x11fc   :  { %v6549_v44 = vpop.f32.mrb[109].mxu0 }
0x11fd   :  { %v11103_v54 = vpack.i.bf16 %v10230_v21, %v6549_v44 }
0x11ff   :  { %11104 = vrot.lane.b32.xlu0 %v11103_v54, %s12076_s5 }
0x1203   :  { %v10216_v40 = vpop.f32.mrb[120].mxu1 }
0x1204   :  { %v6452_v17 = vpop.f32.mrb[121].mxu1 }
0x1205   :  { %v11123_v19 = vpack.i.bf16 %v10216_v40, %v6452_v17 }
0x120b   :  { %v10233_v48 = vpop.f32.mrb[110].mxu0 }
0x120c   :  { %v6559_v59 = vpop.f32.mrb[111].mxu0 }
0x120d   :  { %v11108_v7 = vpack.i.bf16 %v10233_v48, %v6559_v59 }
0x120f   :  { %11109 = vrot.lane.b32.xlu1 %v11108_v7, %s12076_s5  ;;  %v10219_v2 = vpop.f32.mrb[122].mxu1 }
0x1210   :  { %v6462_v3 = vpop.f32.mrb[123].mxu1 }
0x1211   :  { %v11128_v41 = vpack.i.bf16 %v10219_v2, %v6462_v3 }
0x1217   :  { %v10258_v4 = vpop.f32.mrb[112].mxu0 }
0x1218   :  { %v6743_v33 = vpop.f32.mrb[113].mxu0 }
0x1219   :  { %v11113_v61 = vpack.i.bf16 %v10258_v4, %v6743_v33 }
0x121b   :  { %11114 = vrot.lane.b32.xlu0 %v11113_v61, %s12080_s0 }
0x121f   :  { %11124 = vrot.lane.b32.xlu0 %v11123_v19, %s12081_s1 }
0x1223   :  { %v10261_v49 = vpop.f32.mrb[114].mxu0 }
0x1224   :  { %v6753_v10 = vpop.f32.mrb[115].mxu0 }
0x1225   :  { %v11118_v26 = vpack.i.bf16 %v10261_v49, %v6753_v10 }
0x1227   :  { %11119 = vrot.lane.b32.xlu1 %v11118_v26, %s12080_s0 }
0x122b   :  { %11129 = vrot.lane.b32.xlu1 %v11128_v41, %s12081_s1 }
0x1233   :  { %v10244_v27 = vpop.f32.mrb[124].mxu1 }
0x1234   :  { %v6646_v18 = vpop.f32.mrb[125].mxu1 }
0x1235   :  { %v11133_v60 = vpack.i.bf16 %v10244_v27, %v6646_v18 }
0x1237   :  { %11134 = vrot.lane.b32.xlu0 %v11133_v60, %s12076_s5  ;;  %v10247_v15 = vpop.f32.mrb[126].mxu1 }
0x1238   :  { %v6656_v14 = vpop.f32.mrb[127].mxu1 }
0x1239   :  { %v11138_v37 = vpack.i.bf16 %v10247_v15, %v6656_v14 }
0x123b   :  { %11139 = vrot.lane.b32.xlu1 %v11138_v37, %s12076_s5  ;;  %v10272_v45 = vpop.f32.mrb[128].mxu1 }
0x123c   :  { %v6840_v55 = vpop.f32.mrb[129].mxu1 }
0x123d   :  { %v11143_v52 = vpack.i.bf16 %v10272_v45, %v6840_v55 }
0x123e   :  { %v11095_v29 = vpop.permute.xlu1 %11094 }
0x123f   :  { %11144 = vrot.lane.b32.xlu0 %v11143_v52, %s12080_s0  ;;  %v10275_v43 = vpop.f32.mrb[130].mxu1  ;;  %v11097_v20 = vunpack.i.h.bf16 %v11095_v29  ;;  %v11096_v9 = vunpack.i.l.bf16 %v11095_v29 }
0x1240   :  { %v6850_v50 = vpop.f32.mrb[131].mxu1 }
0x1241   :  { %v11148_v56 = vpack.i.bf16 %v10275_v43, %v6850_v50  ;;  %v6956_v16 = vsel %vm1001_vm0, %v14074_v32, %v11097_v20  ;;  %v6955_v11 = vsel %vm1001_vm0, %v14076_v12, %v11096_v9 }
0x1243   :  { %11149 = vrot.lane.b32.xlu1 %v11148_v56, %s12080_s0 }
0x1246   :  { %v11100_v54 = vpop.permute.xlu1 %11099 }
0x1247   :  { %v11102_v46 = vunpack.i.h.bf16 %v11100_v54  ;;  %v11101_v39 = vunpack.i.l.bf16 %v11100_v54 }
0x1249   :  { %v6958_v12 = vsel %vm1001_vm0, %v14078_v38, %v11102_v46  ;;  %v6957_v48 = vsel %vm1001_vm0, %v14080_v35, %v11101_v39 }
0x1271   :  { %v11105_v6 = vpop.permute.xlu0 %11104 }
0x1272   :  { %v11107_v57 = vunpack.i.h.bf16 %v11105_v6  ;;  %v11106_v13 = vunpack.i.l.bf16 %v11105_v6 }
0x1274   :  { %v6964_v28 = vsel %vm3042_vm2, %v6956_v16, %v11107_v57  ;;  %v6963_v1 = vsel %vm3042_vm2, %v6955_v11, %v11106_v13  ;;  %v9162_v11 = vld [vmem:[#allocation5 + $0x12] ss:$0 sm:$0xff] }
0x1281   :  { %v11110_v17 = vpop.permute.xlu1 %11109 }
0x1282   :  { %v11112_v32 = vunpack.i.h.bf16 %v11110_v17  ;;  %v11111_v19 = vunpack.i.l.bf16 %v11110_v17 }
0x1284   :  { %v6966_v47 = vsel %vm3042_vm2, %v6958_v12, %v11112_v32  ;;  %v6965_v2 = vsel %vm3042_vm2, %v6957_v48, %v11111_v19 }
0x128d   :  { %v11115_v31 = vpop.permute.xlu0 %11114 }
0x128e   :  { %v11117_v24 = vunpack.i.h.bf16 %v11115_v31  ;;  %v11116_v30 = vunpack.i.l.bf16 %v11115_v31 }
0x1290   :  { %v6971_v21 = vsel %vm3051_vm3, %v6963_v1, %v11116_v30  ;;  %v6972_v44 = vsel %vm3051_vm3, %v6964_v28, %v11117_v24 }
0x1291   :  { %v6979_v40 = vpack.c.bf16 %v6972_v44, %v6971_v21  ;;  %v11125_v0 = vpop.permute.xlu0 %11124 }
0x1292   :  { %v11127_v61 = vunpack.i.h.bf16 %v11125_v0  ;;  %v11126_v38 = vunpack.i.l.bf16 %v11125_v0  ;;  %v11318_v0 = vld [vmem:[#allocation8 + $0x10c] ss:$16 sps:$4 sm:$0xff]  }
0x1293   :  { %10292 = vmatprep.mubr.bf16.mxu0 %v6979_v40  ;;  %7533 = vmatprep.subr.bf16.mxu0 %v11318_v0  ;;  %v11349_v0 = vld [vmem:[#allocation8 + $0x1c0] ss:$16 sps:$4 sm:$0xff]  }
0x1294   :  { %v6960_v10 = vsel %vm1001_vm0, %v14083_v25, %v11127_v61  ;;  %v6959_v26 = vsel %vm1001_vm0, %v14085_v51, %v11126_v38  ;;  %v11319_v61 = vld [vmem:[#allocation8 + $0x120] ss:$16 sps:$4 sm:$0xff]   ;;  %v11322_v38 = vld [vmem:[#allocation8 + $0x128] ss:$16 sps:$4 sm:$0xff]  }
0x1299   :  { %v11120_v5 = vpop.permute.xlu1 %11119 }
0x129a   :  { %v11122_v59 = vunpack.i.h.bf16 %v11120_v5  ;;  %v11121_v7 = vunpack.i.l.bf16 %v11120_v5 }
0x129c   :  { %v6974_v3 = vsel %vm3051_vm3, %v6966_v47, %v11122_v59  ;;  %v6973_v41 = vsel %vm3051_vm3, %v6965_v2, %v11121_v7  ;;  %v14667_v59 = vld [vmem:[#allocation22_spill] sm:$0xff]  ;;  %v14669_v2 = vld [vmem:[#allocation24_spill] sm:$0xff] }
0x129d   :  { %v6980_v53 = vpack.c.bf16 %v6974_v3, %v6973_v41  ;;  %v11130_v4 = vpop.permute.xlu1 %11129  ;;  %v11315_v41 = vld [vmem:[#allocation8 + $0x104] ss:$16 sps:$4 sm:$0xff]  }
0x129e   :  { %v11132_v18 = vunpack.i.h.bf16 %v11130_v4  ;;  %v11131_v60 = vunpack.i.l.bf16 %v11130_v4  ;;  %v11321_v4 = vld [vmem:[#allocation8 + $0x124] ss:$16 sps:$4 sm:$0xff]   ;;  %7460 = vmatprep.subr.bf16.mxu1 %v11315_v41 }
0x129f   :  { %10293 = vmatmul.mubr.bf16.vlgmr.msra.gmra.mrb[116].mxu0 %v6980_v53  ;;  %v11316_v53 = vld [vmem:[#allocation8 + $0x108] ss:$16 sps:$4 sm:$0xff]   ;;  %v11351_v41 = vld [vmem:[#allocation8 + $0x1c4] ss:$16 sps:$4 sm:$0xff]  }
0x12a0   :  { %v6962_v51 = vsel %vm1001_vm0, %v14088_v8, %v11132_v18  ;;  %v6961_v29 = vsel %vm1001_vm0, %v14090_v23, %v11131_v60  ;;  %7534 = vmatpush1.bf16.msra.mxu0 %v11316_v53  ;;  %v11354_v53 = vld [vmem:[#allocation8 + $0x1cc] ss:$16 sps:$4 sm:$0xff]  }
0x12a9   :  { %v11135_v33 = vpop.permute.xlu0 %11134 }
0x12aa   :  { %v11137_v36 = vunpack.i.h.bf16 %v11135_v33  ;;  %v11136_v49 = vunpack.i.l.bf16 %v11135_v33  ;;  %v11324_v33 = vld [vmem:[#allocation8 + $0x12c] ss:$16 sps:$4 sm:$0xff]  }
0x12ab   :  { %7535 = vmatprep.subr.bf16.mxu0 %v11324_v33  ;;  %v11357_v33 = vld [vmem:[#allocation8 + $0x1e4] ss:$16 sps:$4 sm:$0xff]  }
0x12ac   :  { %v6968_v37 = vsel %vm3042_vm2, %v6960_v10, %v11137_v36  ;;  %v6967_v45 = vsel %vm3042_vm2, %v6959_v26, %v11136_v49  ;;  %7536 = vmatpush1.bf16.msra.mxu0 %v11322_v38  ;;  %v11355_v38 = vld [vmem:[#allocation8 + $0x1e0] ss:$16 sps:$4 sm:$0xff]  }
0x12ad   :  { %v11140_v35 = vpop.permute.xlu1 %11139 }
0x12ae   :  { %v11142_v55 = vunpack.i.h.bf16 %v11140_v35  ;;  %v11141_v52 = vunpack.i.l.bf16 %v11140_v35 }
0x12b0   :  { %v6970_v9 = vsel %vm3042_vm2, %v6962_v51, %v11142_v55  ;;  %v6969_v57 = vsel %vm3042_vm2, %v6961_v29, %v11141_v52  ;;  %v11325_v51 = vld [vmem:[#allocation8 + $0x140] ss:$16 sps:$4 sm:$0xff]   ;;  %v11328_v29 = vld [vmem:[#allocation8 + $0x148] ss:$16 sps:$4 sm:$0xff]  }
0x12b1   :  { %v11145_v27 = vpop.permute.xlu0 %11144 }
0x12b2   :  { %v11147_v15 = vunpack.i.h.bf16 %v11145_v27  ;;  %v11146_v14 = vunpack.i.l.bf16 %v11145_v27 }
0x12b4   :  { %v6975_v43 = vsel %vm3051_vm3, %v6967_v45, %v11146_v14  ;;  %v6976_v50 = vsel %vm3051_vm3, %v6968_v37, %v11147_v15 }
0x12b5   :  { %v11150_v56 = vpop.permute.xlu1 %11149  ;;  %v6981_v25 = vpack.c.bf16 %v6976_v50, %v6975_v43 }
0x12b6   :  { %v11152_v6 = vunpack.i.h.bf16 %v11150_v56  ;;  %v11151_v20 = vunpack.i.l.bf16 %v11150_v56  ;;  %v11327_v56 = vld [vmem:[#allocation8 + $0x144] ss:$16 sps:$4 sm:$0xff]  }
0x12b7   :  { %10296 = vmatprep.mubr.bf16.mxu0 %v6981_v25  ;;  %v11330_v25 = vld [vmem:[#allocation8 + $0x14c] ss:$16 sps:$4 sm:$0xff]  }
0x12b8   :  { %v6977_v13 = vsel %vm3051_vm3, %v6969_v57, %v11151_v20  ;;  %v6978_v31 = vsel %vm3051_vm3, %v6970_v9, %v11152_v6  ;;  %7537 = vmatprep.subr.bf16.mxu0 %v11330_v25  ;;  %v11333_v20 = vld [vmem:[#allocation8 + $0x164] ss:$16 sps:$4 sm:$0xff]   ;;  %v11336_v9 = vld [vmem:[#allocation8 + $0x16c] ss:$16 sps:$4 sm:$0xff]  }
0x12b9   :  { %v6982_v16 = vpack.c.bf16 %v6978_v31, %v6977_v13  ;;  %7538 = vmatpush1.bf16.msra.mxu0 %v11328_v29  ;;  %v11331_v13 = vld [vmem:[#allocation8 + $0x160] ss:$16 sps:$4 sm:$0xff]   ;;  %v11334_v31 = vld [vmem:[#allocation8 + $0x168] ss:$16 sps:$4 sm:$0xff]  }
0x12ba   :  { %7539 = vmatprep.subr.bf16.mxu0 %v11336_v9 }
0x12bb   :  { %10297 = vmatmul.mubr.bf16.gmra.mrb[120].mxu0 %v6982_v16 }
0x12bc   :  { %7565 = vmatprep.mubr.bf16.mxu0 %v14660_v42 }
0x12bd   :  { %7540 = vmatpush1.bf16.msra.mxu0 %v11334_v31 }
0x1372   :  { %v10294_v8 = vpop.f32.mrb[116].mxu0 }
0x1373   :  { %v7087_v24 = vpop.f32.mrb[117].mxu0  ;;  %v7096_v1 = vadd.f32 %v10294_v8, %v9162_v11 }
0x1374   :  { %v7088_v30 = vadd.f32 %v9162_v11, %v7087_v24  ;;  %v10295_v23 = vpop.f32.mrb[118].mxu0 }
0x1375   :  { %v7090_v28 = vpop.f32.mrb[119].mxu0  ;;  %v14167_v40 = vadd.f32 %v7096_v1, %v13365_v62  ;;  %v7099_v17 = vadd.f32 %v10295_v23, %v9162_v11  ;;  %v11342_v23 = vld [vmem:[#allocation8 + $0x18c] ss:$16 sps:$4 sm:$0xff]  }
0x1376   :  { %v14160_v21 = vadd.f32 %v7088_v30, %v13355_v22  ;;  %v7091_v44 = vadd.f32 %v9162_v11, %v7090_v28  ;;  %v11339_v30 = vld [vmem:[#allocation8 + $0x184] ss:$16 sps:$4 sm:$0xff]   ;;  %7541 = vmatprep.subr.bf16.mxu0 %v11342_v23 }
0x1377   :  { %v14172_v46 = vadd.f32 %v7099_v17, %v13369_v58  ;;  %v14668_v58 = vld [vmem:[#allocation23_spill] sm:$0xff] }
0x1378   :  { %v14163_v54 = vadd.f32 %v7091_v44, %v13359_v63  ;;  %7128 = vadd.xlane.f32.xlu0 %v14160_v21  ;;  %v11337_v17 = vld [vmem:[#allocation8 + $0x180] ss:$16 sps:$4 sm:$0xff]  }
0x137a   :  { %7130 = vadd.xlane.f32.xlu1 %v14163_v54 }
0x137c   :  { %7132 = vadd.xlane.f32.xlu0 %v14167_v40 }
0x1380   :  { %7134 = vadd.xlane.f32.xlu0 %v14172_v46 }
0x138e   :  { %v10298_v22 = vpop.f32.mrb[120].mxu0 }
0x138f   :  { %v7103_v39 = vpop.f32.mrb[121].mxu0  ;;  %v7112_v5 = vadd.f32 %v10298_v22, %v9162_v11  ;;  %v11340_v22 = vld [vmem:[#allocation8 + $0x188] ss:$16 sps:$4 sm:$0xff]  }
0x1390   :  { %v7104_v32 = vadd.f32 %v9162_v11, %v7103_v39  ;;  %v10299_v63 = vpop.f32.mrb[122].mxu0  ;;  %7542 = vmatpush1.bf16.msra.mxu0 %v11340_v22  ;;  %v11364_v22 = vld [vmem:[#allocation10 + $0x180] sm:$0xff]  }
0x1391   :  { %v7106_v19 = vpop.f32.mrb[123].mxu0  ;;  %v7115_v48 = vadd.f32 %v10299_v63, %v9162_v11  ;;  %v14183_v47 = vadd.f32 %v7112_v5, %v14668_v58  ;;  %v11345_v5 = vld [vmem:[#allocation8 + $0x1a4] ss:$16 sps:$4 sm:$0xff]   ;;  %v11343_v58 = vld [vmem:[#allocation8 + $0x1a0] ss:$16 sps:$4 sm:$0xff]  }
0x1392   :  { %v14176_v12 = vadd.f32 %v7104_v32, %v13375_v34  ;;  %v7107_v62 = vadd.f32 %v9162_v11, %v7106_v19  ;;  %v11313_v34 = vld [vmem:[#allocation8 + $0x100] ss:$16 sps:$4 sm:$0xff]  }
0x1393   :  { %v14187_v3 = vadd.f32 %v7115_v48, %v14669_v2  ;;  %7461 = vmatpush1.bf16.msra.mxu1 %v11313_v34  ;;  %v11346_v2 = vld [vmem:[#allocation8 + $0x1a8] ss:$16 sps:$4 sm:$0xff]  }
0x1394   :  { %v14179_v7 = vadd.f32 %v7107_v62, %v14667_v59  ;;  %7136 = vadd.xlane.f32.xlu1 %v14176_v12  ;;  %7462 = vmatprep.subr.bf16.mxu1 %v11321_v4  ;;  %v11348_v62 = vld [vmem:[#allocation8 + $0x1ac] ss:$16 sps:$4 sm:$0xff]   ;;  %v11352_v4 = vld [vmem:[#allocation8 + $0x1c8] ss:$16 sps:$4 sm:$0xff]  }
0x1395   :  { %7543 = vmatprep.subr.bf16.mxu0 %v11348_v62 }
0x1396   :  { %7138 = vadd.xlane.f32.xlu0 %v14179_v7  ;;  %7544 = vmatpush1.bf16.msra.mxu0 %v11346_v2 }
0x1397   :  { %7463 = vmatpush1.bf16.msra.mxu1 %v11319_v61  ;;  %7545 = vmatprep.subr.bf16.mxu0 %v11354_v53  ;;  %v11360_v61 = vld [vmem:[#allocation8 + $0x1ec] ss:$16 sps:$4 sm:$0xff]  }
0x1398   :  { %7140 = vadd.xlane.f32.xlu1 %v14183_v47  ;;  %7464 = vmatprep.subr.bf16.mxu1 %v11327_v56 }
0x139a   :  { %7142 = vadd.xlane.f32.xlu0 %v14187_v3  ;;  %7546 = vmatpush1.bf16.msra.mxu0 %v11352_v4 }
0x139b   :  { %7465 = vmatpush1.bf16.msra.mxu1 %v11325_v51  ;;  %7547 = vmatprep.subr.bf16.mxu0 %v11360_v61 }
0x139c   :  { %7466 = vmatprep.subr.bf16.mxu1 %v11333_v20 }
0x139f   :  { %7467 = vmatpush1.bf16.msra.mxu1 %v11331_v13 }
0x13a0   :  { %7468 = vmatprep.subr.bf16.mxu1 %v11339_v30 }
0x13a3   :  { %7469 = vmatpush1.bf16.msra.mxu1 %v11337_v17  ;;  %v11363_v17 = vld [vmem:[#allocation10 + $0x100] sm:$0xff]  }
0x13a4   :  { %7470 = vmatprep.subr.bf16.mxu1 %v11345_v5 }
0x13a7   :  { %7471 = vmatpush1.bf16.msra.mxu1 %v11343_v58 }
0x13a8   :  { %7472 = vmatprep.subr.bf16.mxu1 %v11351_v41 }
0x13ab   :  { %7473 = vmatpush1.bf16.msra.mxu1 %v11349_v0 }
0x13ac   :  { %7474 = vmatprep.subr.bf16.mxu1 %v11357_v33 }
0x13af   :  { %7475 = vmatpush1.bf16.msra.mxu1 %v11355_v38 }
0x1405   :  { %v7129_v36 = vpop.xlane.xlu0 %7128 }
0x1406   :  { %v7144_v49 = vmul.f32 0.0078125, %v7129_v36  ;;  %v11358_v36 = vld [vmem:[#allocation8 + $0x1e8] ss:$16 sps:$4 sm:$0xff]  }
0x1407   :  { %v7131_v35 = vpop.xlane.xlu1 %7130  ;;  %7548 = vmatpush1.bf16.msra.mxu0 %v11358_v36 }
0x1408   :  { %v14192_v10 = vsub.f32 %v14160_v21, %v7144_v49  ;;  %v7145_v26 = vmul.f32 0.0078125, %v7131_v35  ;;  %v11361_v49 = vld [vmem:[#allocation10 + $0x140] sm:$0xff]  }
0x1409   :  { %v7133_v27 = vpop.xlane.xlu0 %7132  ;;  %v11362_v35 = vld [vmem:[#allocation10 + $0x1c0] sm:$0xff]   ;;  %9633 = vmatprep.subr.bf16.mxu1 %v11361_v49 }
0x140a   :  { %v14195_v18 = vsub.f32 %v14163_v54, %v7145_v26  ;;  %v7146_v60 = vmul.f32 0.0078125, %v7133_v27  ;;  %v7160_v15 = vmul.f32 %v14192_v10, %v14192_v10  ;;  %9673 = vmatprep.subr.bf16.mxu0 %v11362_v35 }
0x140c   :  { %v14200_v14 = vsub.f32 %v14167_v40, %v7146_v60  ;;  %7168 = vadd.xlane.f32.xlu1 %v7160_v15  ;;  %v7161_v37 = vmul.f32 %v14195_v18, %v14195_v18 }
0x140d   :  { %v7135_v45 = vpop.xlane.xlu0 %7134 }
0x140e   :  { %v7147_v55 = vmul.f32 0.0078125, %v7135_v45  ;;  %7170 = vadd.xlane.f32.xlu0 %v7161_v37  ;;  %v7162_v52 = vmul.f32 %v14200_v14, %v14200_v14 }
0x1410   :  { %v14207_v43 = vsub.f32 %v14172_v46, %v7147_v55  ;;  %7172 = vadd.xlane.f32.xlu1 %v7162_v52 }
0x1412   :  { %v7163_v50 = vmul.f32 %v14207_v43, %v14207_v43 }
0x1414   :  { %7174 = vadd.xlane.f32.xlu0 %v7163_v50 }
0x1421   :  { %v7137_v6 = vpop.xlane.xlu1 %7136 }
0x1422   :  { %v7148_v57 = vmul.f32 0.0078125, %v7137_v6  ;;  %v14231_v6 = vld [vmem:[#allocation5 + $0x13] ss:$0 sm:$0xff] }
0x1423   :  { %v7139_v16 = vpop.xlane.xlu0 %7138 }
0x1424   :  { %v14212_v11 = vsub.f32 %v14176_v12, %v7148_v57  ;;  %v7149_v8 = vmul.f32 0.0078125, %v7139_v16  ;;  %v14236_v16 = vld [vmem:[#allocation5 + $0x14] ss:$0 sm:$0xff] }
0x1425   :  { %v7141_v24 = vpop.xlane.xlu1 %7140 }
0x1426   :  { %v14215_v28 = vsub.f32 %v14179_v7, %v7149_v8  ;;  %v7150_v1 = vmul.f32 0.0078125, %v7141_v24  ;;  %v7164_v44 = vmul.f32 %v14212_v11, %v14212_v11 }
0x1427   :  { %v7143_v39 = vpop.xlane.xlu0 %7142 }
0x1428   :  { %v14220_v32 = vsub.f32 %v14183_v47, %v7150_v1  ;;  %v7151_v63 = vmul.f32 0.0078125, %v7143_v39  ;;  %7176 = vadd.xlane.f32.xlu1 %v7164_v44  ;;  %v7165_v19 = vmul.f32 %v14215_v28, %v14215_v28  ;;  %v11365_v39 = vld [vmem:[#allocation10 + $0x148] sm:$0xff]  }
0x142a   :  { %v14225_v48 = vsub.f32 %v14187_v3, %v7151_v63  ;;  %7178 = vadd.xlane.f32.xlu0 %v7165_v19  ;;  %v7166_v59 = vmul.f32 %v14220_v32, %v14220_v32  ;;  %v11366_v63 = vld [vmem:[#allocation10 + $0x1c8] sm:$0xff]  }
0x142c   :  { %7180 = vadd.xlane.f32.xlu1 %v7166_v59  ;;  %v7167_v34 = vmul.f32 %v14225_v48, %v14225_v48  ;;  %v11368_v59 = vld [vmem:[#allocation10 + $0x188] sm:$0xff]  }
0x142e   :  { %7182 = vadd.xlane.f32.xlu0 %v7167_v34 }
0x1499   :  { %v7169_v26 = vpop.xlane.xlu1 %7168 }
0x149a   :  { %v7184_v27 = vmul.f32 0.0078125, %v7169_v26 }
0x149b   :  { %v7171_v60 = vpop.xlane.xlu0 %7170 }
0x149c   :  { %v7192_v15 = vadd.f32 1e-05, %v7184_v27  ;;  %v7185_v37 = vmul.f32 0.0078125, %v7171_v60 }
0x149d   :  { %v7173_v45 = vpop.xlane.xlu1 %7172 }
0x149e   :  { %11777 = vrsqrt.f32 %v7192_v15  ;;  %v7193_v55 = vadd.f32 1e-05, %v7185_v37  ;;  %v7186_v52 = vmul.f32 0.0078125, %v7173_v45 }
0x14a0   :  { %11779 = vrsqrt.f32 %v7193_v55  ;;  %v7194_v50 = vadd.f32 1e-05, %v7186_v52 }
0x14a1   :  { %v7175_v56 = vpop.xlane.xlu0 %7174 }
0x14a2   :  { %11781 = vrsqrt.f32 %v7194_v50  ;;  %v7187_v25 = vmul.f32 0.0078125, %v7175_v56 }
0x14a4   :  { %v7195_v51 = vadd.f32 1e-05, %v7187_v25 }
0x14a6   :  { %11783 = vrsqrt.f32 %v7195_v51 }
0x14a8   :  { %v11778_v29 = vpop.eup %11777 }
0x14a9   :  { %v7208_v20 = vmul.f32 %v11778_v29, %v14192_v10 }
0x14aa   :  { %v11780_v9 = vpop.eup %11779 }
0x14ab   :  { %v7220_v57 = vmul.f32 %v14231_v6, %v7208_v20  ;;  %v7209_v13 = vmul.f32 %v11780_v9, %v14195_v18 }
0x14ac   :  { %v11782_v31 = vpop.eup %11781 }
0x14ad   :  { %v7221_v8 = vmul.f32 %v14231_v6, %v7209_v13  ;;  %v7232_v24 = vadd.f32 %v14236_v16, %v7220_v57  ;;  %v7210_v23 = vmul.f32 %v11782_v31, %v14200_v14  ;;  %v11371_v57 = vld [vmem:[#allocation10 + $0x110] sm:$0xff]   ;;  %v11374_v31 = vld [vmem:[#allocation10 + $0x1d8] sm:$0xff]  }
0x14ae   :  { %v11372_v13 = vld [vmem:[#allocation10 + $0x190] sm:$0xff]  }
0x14af   :  { %v7233_v30 = vadd.f32 %v14236_v16, %v7221_v8  ;;  %v7222_v18 = vmul.f32 %v14231_v6, %v7210_v23  ;;  %v11375_v8 = vld [vmem:[#allocation10 + $0x118] sm:$0xff]   ;;  %v11380_v23 = vld [vmem:[#allocation10 + $0x1a0] sm:$0xff]  }
0x14b0   :  { %v11784_v1 = vpop.eup %11783 }
0x14b1   :  { %v7240_v44 = vpack.c.bf16 %v7233_v30, %v7232_v24  ;;  %v7211_v10 = vmul.f32 %v11784_v1, %v14207_v43  ;;  %v11367_v43 = vld [vmem:[#allocation10 + $0x108] sm:$0xff]   ;;  %v7234_v41 = vadd.f32 %v14236_v16, %v7222_v18  ;;  %v11376_v24 = vld [vmem:[#allocation10 + $0x198] sm:$0xff]   ;;  %v11379_v30 = vld [vmem:[#allocation10 + $0x120] sm:$0xff]  }
0x14b2   :  { %v11381_v1 = vld [vmem:[#allocation10 + $0x168] sm:$0xff]   ;;  %v11388_v18 = vld [vmem:[#allocation10 + $0x1b0] sm:$0xff]  }
0x14b3   :  { %7493 = vmatmul.mubr.bf16.vlgmr.msra.gmra.mrb[132].mxu1 %v7240_v44  ;;  %7566 = vmatmul.mubr.bf16.vlgmr.msra.gmra.mrb[124].mxu0 %v7240_v44  ;;  %v7223_v19 = vmul.f32 %v14231_v6, %v7211_v10  ;;  %v11382_v44 = vld [vmem:[#allocation10 + $0x1e8] sm:$0xff]  }
0x14b4   :  { %7502 = vmatprep.mubr.bf16.mxu1 %v14660_v42  ;;  %7575 = vmatprep.mubr.bf16.mxu0 %v14660_v42  ;;  %v11383_v10 = vld [vmem:[#allocation10 + $0x128] sm:$0xff]  }
0x14b5   :  { %v7177_v5 = vpop.xlane.xlu1 %7176  ;;  %v7235_v62 = vadd.f32 %v14236_v16, %v7223_v19  ;;  %9634 = vmatpush3.bf16.msra.mxu1 %v11363_v17  ;;  %9674 = vmatpush3.bf16.msra.mxu0 %v11364_v22  ;;  %v11384_v17 = vld [vmem:[#allocation10 + $0x1a8] sm:$0xff]   ;;  %v11385_v22 = vld [vmem:[#allocation10 + $0x170] sm:$0xff]   ;;  %v11389_v19 = vld [vmem:[#allocation10 + $0x178] sm:$0xff]  }
0x14b6   :  { %v7188_v14 = vmul.f32 0.0078125, %v7177_v5  ;;  %9635 = vmatprep.subr.bf16.mxu1 %v11365_v39  ;;  %9675 = vmatprep.subr.bf16.mxu0 %v11366_v63  ;;  %v11386_v39 = vld [vmem:[#allocation10 + $0x1f0] sm:$0xff]   ;;  %v11390_v5 = vld [vmem:[#allocation10 + $0x1f8] sm:$0xff]  }
0x14b7   :  { %v7179_v58 = vpop.xlane.xlu0 %7178  ;;  %v7241_v33 = vpack.c.bf16 %v7235_v62, %v7234_v41  ;;  %v11387_v63 = vld [vmem:[#allocation10 + $0x130] sm:$0xff]   ;;  %v11392_v62 = vld [vmem:[#allocation10 + $0x1b8] sm:$0xff]  }
0x14b8   :  { %v7196_v2 = vadd.f32 1e-05, %v7188_v14  ;;  %v7189_v34 = vmul.f32 0.0078125, %v7179_v58  ;;  %v11391_v14 = vld [vmem:[#allocation10 + $0x138] sm:$0xff]  }
0x14b9   :  { %v7181_v53 = vpop.xlane.xlu1 %7180  ;;  %9636 = vmatpush3.bf16.msra.mxu1 %v11367_v43  ;;  %9676 = vmatpush3.bf16.msra.mxu0 %v11368_v59  ;;  %v9173_v43 = vld [vmem:[%s14634_s4 + $0x1] ss:$2 sm:$0xf]  ;;  %v14670_v59 = vld [vmem:[#allocation21_spill] sm:$0xff] }
0x14ba   :  { %11785 = vrsqrt.f32 %v7196_v2  ;;  %v7197_v0 = vadd.f32 1e-05, %v7189_v34  ;;  %v7190_v4 = vmul.f32 0.0078125, %v7181_v53  ;;  %v14269_v58 = vrot.slane %v9173_v43, %v14670_v59  ;;  %v14671_v2 = vld [vmem:[#allocation20_spill] sm:$0xff] }
0x14bb   :  { %v7183_v61 = vpop.xlane.xlu0 %7182  ;;  %7503 = vmatmul.mubr.bf16.gmra.mrb[136].mxu1 %v7241_v33  ;;  %7576 = vmatmul.mubr.bf16.gmra.mrb[128].mxu0 %v7241_v33  ;;  %v14672_v34 = vsub.s32 2, %v14671_v2  ;;  %v14673_v53 = vsub.s32 1, %v14671_v2 }
0x14bc   :  { %11787 = vrsqrt.f32 %v7197_v0  ;;  %v7198_v38 = vadd.f32 1e-05, %v7190_v4  ;;  %v7191_v36 = vmul.f32 0.0078125, %v7183_v61  ;;  %7512 = vmatprep.mubr.bf16.mxu1 %v14660_v42  ;;  %7585 = vmatprep.mubr.bf16.mxu0 %v14660_v42  ;;  %v14674_v4 = vsub.s32 3, %v14671_v2 }
0x14bd   :  { %v14273_v41 = vrot.slane %v9173_v43, %v14672_v34  ;;  %v14277_v0 = vrot.slane %v9173_v43, %v14673_v53 }
0x14be   :  { %11789 = vrsqrt.f32 %v7198_v38  ;;  %v7199_v49 = vadd.f32 1e-05, %v7191_v36  ;;  %v14281_v33 = vrot.slane %v9173_v43, %v14674_v4 }
0x14c0   :  { %11791 = vrsqrt.f32 %v7199_v49 }
0x14c4   :  { %v11786_v35 = vpop.eup %11785 }
0x14c5   :  { %v7212_v26 = vmul.f32 %v11786_v35, %v14212_v11 }
0x14c6   :  { %v11788_v27 = vpop.eup %11787 }
0x14c7   :  { %v7213_v60 = vmul.f32 %v11788_v27, %v14215_v28  ;;  %v7224_v15 = vmul.f32 %v14231_v6, %v7212_v26 }
0x14c8   :  { %v11790_v37 = vpop.eup %11789 }
0x14c9   :  { %v7225_v45 = vmul.f32 %v14231_v6, %v7213_v60  ;;  %v7236_v52 = vadd.f32 %v14236_v16, %v7224_v15  ;;  %v7214_v56 = vmul.f32 %v11790_v37, %v14220_v32  ;;  %v11369_v32 = vld [vmem:[#allocation10 + $0x150] sm:$0xff]  }
0x14ca   :  { %v11792_v55 = vpop.eup %11791  ;;  %9637 = vmatprep.subr.bf16.mxu1 %v11369_v32 }
0x14cb   :  { %v7237_v50 = vadd.f32 %v14236_v16, %v7225_v45  ;;  %v7215_v25 = vmul.f32 %v11792_v55, %v14225_v48  ;;  %v7226_v28 = vmul.f32 %v14231_v6, %v7214_v56  ;;  %v11370_v48 = vld [vmem:[#allocation10 + $0x1d0] sm:$0xff]   ;;  %9638 = vmatpush3.bf16.msra.mxu1 %v11371_v57 }
0x14cc   :  { %9677 = vmatprep.subr.bf16.mxu0 %v11370_v48 }
0x14cd   :  { %v7242_v51 = vpack.c.bf16 %v7237_v50, %v7236_v52  ;;  %v7227_v11 = vmul.f32 %v14231_v6, %v7215_v25  ;;  %v7238_v20 = vadd.f32 %v14236_v16, %v7226_v28  ;;  %9678 = vmatpush3.bf16.msra.mxu0 %v11372_v13  ;;  %v11373_v6 = vld [vmem:[#allocation10 + $0x158] sm:$0xff]  }
0x14ce   :  { %9639 = vmatprep.subr.bf16.mxu1 %v11373_v6  ;;  %9679 = vmatprep.subr.bf16.mxu0 %v11374_v31 }
0x14cf   :  { %7513 = vmatmul.mubr.bf16.gmra.mrb[140].mxu1 %v7242_v51  ;;  %7586 = vmatmul.mubr.bf16.gmra.mrb[132].mxu0 %v7242_v51  ;;  %v7239_v29 = vadd.f32 %v14236_v16, %v7227_v11  ;;  %v11378_v16 = vld [vmem:[#allocation10 + $0x1e0] sm:$0xff]  }
0x14d0   :  { %7522 = vmatprep.mubr.bf16.mxu1 %v14660_v42  ;;  %7595 = vmatprep.mubr.bf16.mxu0 %v14660_v42  ;;  %v11377_v42 = vld [vmem:[#allocation10 + $0x160] sm:$0xff]  }
0x14d1   :  { %v7243_v9 = vpack.c.bf16 %v7239_v29, %v7238_v20  ;;  %9640 = vmatpush3.bf16.msra.mxu1 %v11375_v8  ;;  %9680 = vmatpush3.bf16.msra.mxu0 %v11376_v24 }
0x14d2   :  { %9641 = vmatprep.subr.bf16.mxu1 %v11377_v42  ;;  %9681 = vmatprep.subr.bf16.mxu0 %v11378_v16 }
0x14d5   :  { %9642 = vmatpush3.bf16.msra.mxu1 %v11379_v30  ;;  %9682 = vmatpush3.bf16.msra.mxu0 %v11380_v23 }
0x14d6   :  { %9643 = vmatprep.subr.bf16.mxu1 %v11381_v1  ;;  %9683 = vmatprep.subr.bf16.mxu0 %v11382_v44 }
0x14d7   :  { %7523 = vmatmul.mubr.bf16.gmra.mrb[144].mxu1 %v7243_v9  ;;  %7596 = vmatmul.mubr.bf16.gmra.mrb[136].mxu0 %v7243_v9 }
0x14d9   :  { %9644 = vmatpush3.bf16.msra.mxu1 %v11383_v10  ;;  %9684 = vmatpush3.bf16.msra.mxu0 %v11384_v17 }
0x14da   :  { %9645 = vmatprep.subr.bf16.mxu1 %v11385_v22  ;;  %9685 = vmatprep.subr.bf16.mxu0 %v11386_v39 }
0x14dd   :  { %9646 = vmatpush3.bf16.msra.mxu1 %v11387_v63  ;;  %9686 = vmatpush3.bf16.msra.mxu0 %v11388_v18 }
0x14de   :  { %9647 = vmatprep.subr.bf16.mxu1 %v11389_v19  ;;  %9687 = vmatprep.subr.bf16.mxu0 %v11390_v5 }
0x14e1   :  { %9648 = vmatpush3.bf16.msra.mxu1 %v11391_v14  ;;  %9688 = vmatpush3.bf16.msra.mxu0 %v11392_v62 }
0x1586   :  { %v7494_v61 = vpop.f32.mrb[132].mxu1  ;;  %v7567_v38 = vpop.f32.mrb[124].mxu0 }
0x1587   :  { %v7495_v36 = vadd.f32 %v7494_v61, %v14269_v58  ;;  %v7568_v49 = vadd.f32 %v7567_v38, %v14273_v41  ;;  %v7496_v35 = vpop.f32.mrb[133].mxu1  ;;  %v7569_v26 = vpop.f32.mrb[125].mxu0 }
0x1588   :  { %v7497_v27 = vadd.f32 %v7496_v35, %v14277_v0  ;;  %v7570_v60 = vadd.f32 %v7569_v26, %v14281_v33  ;;  %v7498_v15 = vpop.f32.mrb[134].mxu1  ;;  %v7571_v37 = vpop.f32.mrb[126].mxu0 }
0x1589   :  { %v7638_v45 = vmul.f32 0.70710677, %v7495_v36  ;;  %v7640_v55 = vmul.f32 0.70710677, %v7568_v49  ;;  %v7499_v56 = vadd.f32 %v7498_v15, %v14269_v58  ;;  %v14289_v25 = vadd.f32 %v7571_v37, %v14273_v41  ;;  %v7500_v51 = vpop.f32.mrb[135].mxu1  ;;  %v7573_v11 = vpop.f32.mrb[127].mxu0 }
0x158a   :  { %v7639_v52 = vmul.f32 0.70710677, %v7497_v27  ;;  %v7641_v50 = vmul.f32 0.70710677, %v7570_v60  ;;  %v7501_v28 = vadd.f32 %v7500_v51, %v14277_v0  ;;  %v14293_v29 = vadd.f32 %v7573_v11, %v14281_v33 }
0x158b   :  { %11793 = verf.f32 %v7638_v45  ;;  %v7642_v20 = vmul.f32 0.70710677, %v7499_v56  ;;  %v7644_v9 = vmul.f32 0.70710677, %v14289_v25  ;;  %v7606_v53 = vmul.f32 0.5, %v7495_v36 }
0x158c   :  { %11795 = verf.f32 %v7640_v55  ;;  %v7643_v32 = vmul.f32 0.70710677, %v7501_v28  ;;  %v7645_v57 = vmul.f32 0.70710677, %v14293_v29  ;;  %v7608_v4 = vmul.f32 0.5, %v7568_v49 }
0x158d   :  { %11797 = verf.f32 %v7639_v52  ;;  %v7607_v26 = vmul.f32 0.5, %v7497_v27  ;;  %v7609_v55 = vmul.f32 0.5, %v7570_v60  ;;  %v7610_v52 = vmul.f32 0.5, %v7499_v56 }
0x158e   :  { %11799 = verf.f32 %v7641_v50  ;;  %v7504_v48 = vpop.f32.mrb[136].mxu1  ;;  %v7577_v6 = vpop.f32.mrb[128].mxu0  ;;  %v7611_v27 = vmul.f32 0.5, %v7501_v28 }
0x158f   :  { %11801 = verf.f32 %v7642_v20  ;;  %v14298_v13 = vadd.f32 %v7504_v48, %v14269_v58  ;;  %v7506_v31 = vpop.f32.mrb[137].mxu1  ;;  %v14301_v8 = vadd.f32 %v7577_v6, %v14273_v41  ;;  %v7579_v42 = vpop.f32.mrb[129].mxu0 }
0x1590   :  { %11803 = verf.f32 %v7644_v9  ;;  %v14304_v24 = vadd.f32 %v7506_v31, %v14277_v0  ;;  %v7508_v16 = vpop.f32.mrb[138].mxu1  ;;  %v14308_v23 = vadd.f32 %v7579_v42, %v14281_v33  ;;  %v7581_v1 = vpop.f32.mrb[130].mxu0  ;;  %v7612_v9 = vmul.f32 0.5, %v14289_v25 }
0x1591   :  { %11805 = verf.f32 %v7643_v32  ;;  %v7646_v30 = vmul.f32 0.70710677, %v14298_v13  ;;  %v7510_v44 = vpop.f32.mrb[139].mxu1  ;;  %v7648_v10 = vmul.f32 0.70710677, %v14301_v8  ;;  %v7583_v17 = vpop.f32.mrb[131].mxu0  ;;  %v14314_v63 = vadd.f32 %v7508_v16, %v14269_v58 }
0x1592   :  { %11807 = verf.f32 %v7645_v57  ;;  %v7647_v22 = vmul.f32 0.70710677, %v14304_v24  ;;  %v7649_v39 = vmul.f32 0.70710677, %v14308_v23  ;;  %v14317_v18 = vadd.f32 %v7581_v1, %v14273_v41 }
0x1593   :  { %11809 = verf.f32 %v7646_v30  ;;  %v14320_v19 = vadd.f32 %v7510_v44, %v14277_v0  ;;  %v7650_v62 = vmul.f32 0.70710677, %v14314_v63  ;;  %v14324_v43 = vadd.f32 %v7583_v17, %v14281_v33 }
0x1594   :  { %11811 = verf.f32 %v7648_v10  ;;  %v7652_v61 = vmul.f32 0.70710677, %v14317_v18  ;;  %v7613_v16 = vmul.f32 0.5, %v14293_v29  ;;  %v7614_v28 = vmul.f32 0.5, %v14298_v13 }
0x1595   :  { %v11794_v5 = vpop.eup %11793  ;;  %11813 = verf.f32 %v7647_v22  ;;  %v7651_v15 = vmul.f32 0.70710677, %v14320_v19  ;;  %v7653_v36 = vmul.f32 0.70710677, %v14324_v43  ;;  %v7617_v29 = vmul.f32 0.5, %v14308_v23 }
0x1596   :  { %v11796_v14 = vpop.eup %11795  ;;  %11815 = verf.f32 %v7649_v39  ;;  %v7702_v35 = vadd.f32 1.0, %v11794_v5  ;;  %v7620_v23 = vmul.f32 0.5, %v14317_v18 }
0x1597   :  { %v11798_v34 = vpop.eup %11797  ;;  %11817 = verf.f32 %v7650_v62  ;;  %v7704_v45 = vadd.f32 1.0, %v11796_v14  ;;  %v7616_v14 = vmul.f32 0.5, %v14301_v8  ;;  %v7615_v62 = vmul.f32 0.5, %v14304_v24 }
0x1598   :  { %v11800_v38 = vpop.eup %11799  ;;  %11819 = verf.f32 %v7652_v61  ;;  %v7703_v51 = vadd.f32 1.0, %v11798_v34  ;;  %v7734_v57 = vmul.f32 %v7702_v35, %v7606_v53 }
0x1599   :  { %v11802_v37 = vpop.eup %11801  ;;  %11821 = verf.f32 %v7651_v15  ;;  %v7705_v20 = vadd.f32 1.0, %v11800_v38  ;;  %v7736_v56 = vmul.f32 %v7704_v45, %v7608_v4  ;;  %v7618_v45 = vmul.f32 0.5, %v14314_v63 }
0x159a   :  { %v11804_v50 = vpop.eup %11803  ;;  %v7706_v11 = vadd.f32 1.0, %v11802_v37  ;;  %11823 = verf.f32 %v7653_v36  ;;  %v7735_v44 = vmul.f32 %v7703_v51, %v7607_v26 }
0x159b   :  { %v11806_v49 = vpop.eup %11805  ;;  %v7708_v32 = vadd.f32 1.0, %v11804_v50  ;;  %v7737_v39 = vmul.f32 %v7705_v20, %v7609_v55 }
0x159c   :  { %v11808_v48 = vpop.eup %11807  ;;  %v7738_v6 = vmul.f32 %v7706_v11, %v7610_v52  ;;  %v7707_v31 = vadd.f32 1.0, %v11806_v49 }
0x159d   :  { %v11810_v60 = vpop.eup %11809  ;;  %v7740_v42 = vmul.f32 %v7708_v32, %v7612_v9  ;;  %v7709_v30 = vadd.f32 1.0, %v11808_v48  ;;  %v7619_v9 = vmul.f32 0.5, %v14320_v19  ;;  %v7621_v32 = vmul.f32 0.5, %v14324_v43 }
0x159e   :  { %v11812_v1 = vpop.eup %11811  ;;  %v7766_v10 = vpack.c.bf16 %v7738_v6, %v7734_v57  ;;  %v7739_v17 = vmul.f32 %v7707_v31, %v7611_v27  ;;  %v7710_v4 = vadd.f32 1.0, %v11810_v60 }
0x159f   :  { %v11814_v22 = vpop.eup %11813  ;;  %v7768_v25 = vpack.c.bf16 %v7740_v42, %v7736_v56  ;;  %v7741_v5 = vmul.f32 %v7709_v30, %v7613_v16  ;;  %v7712_v61 = vadd.f32 1.0, %v11812_v1 }
0x15a0   :  { %v7767_v34 = vpack.c.bf16 %v7739_v17, %v7735_v44  ;;  %v11816_v53 = vpop.eup %11815  ;;  %v7711_v37 = vadd.f32 1.0, %v11814_v22  ;;  %v7742_v48 = vmul.f32 %v7710_v4, %v7614_v28 }
0x15a1   :  { %v7769_v38 = vpack.c.bf16 %v7741_v5, %v7737_v39  ;;  %v11818_v15 = vpop.eup %11817  ;;  %v7744_v57 = vmul.f32 %v7712_v61, %v7616_v14  ;;  %v7713_v16 = vadd.f32 1.0, %v11816_v53 }
0x15a2   :  { %v7514_v35 = vpop.f32.mrb[140].mxu1  ;;  %v7587_v26 = vpop.f32.mrb[132].mxu0  ;;  %8071 = vmatprep.mubr.bf16.mxu1 %v7767_v34  ;;  %v7714_v50 = vadd.f32 1.0, %v11818_v15  ;;  %v7743_v42 = vmul.f32 %v7711_v37, %v7615_v62 }
0x15a3   :  { %v14337_v13 = vadd.f32 %v7514_v35, %v14269_v58  ;;  %v14340_v8 = vadd.f32 %v7587_v26, %v14273_v41  ;;  %v7516_v24 = vpop.f32.mrb[141].mxu1  ;;  %v7589_v55 = vpop.f32.mrb[133].mxu0  ;;  %8136 = vmatprep.mubr.bf16.mxu0 %v7769_v38  ;;  %8072 = vmatmul.mubr.bf16.vlgmr.msra.gmra.mrb[148].mxu1 %v7766_v10  ;;  %v7745_v34 = vmul.f32 %v7713_v16, %v7617_v29 }
0x15a4   :  { %v11820_v52 = vpop.eup %11819  ;;  %v14344_v51 = vadd.f32 %v7516_v24, %v14277_v0  ;;  %v14347_v63 = vadd.f32 %v7589_v55, %v14281_v33  ;;  %v7518_v11 = vpop.f32.mrb[142].mxu1  ;;  %8137 = vmatmul.mubr.bf16.vlgmr.msra.gmra.mrb[140].mxu0 %v7768_v25  ;;  %v7746_v30 = vmul.f32 %v7714_v50, %v7618_v45 }
0x15a5   :  { %v7591_v36 = vpop.f32.mrb[134].mxu0  ;;  %v11822_v49 = vpop.eup %11821  ;;  %v7716_v20 = vadd.f32 1.0, %v11820_v52  ;;  %v7654_v27 = vmul.f32 0.70710677, %v14337_v13  ;;  %v7656_v31 = vmul.f32 0.70710677, %v14340_v8  ;;  %v7519_v17 = vadd.f32 %v7518_v11, %v14269_v58 }
0x15a6   :  { %v7520_v18 = vpop.f32.mrb[143].mxu1  ;;  %v7715_v6 = vadd.f32 1.0, %v11822_v49  ;;  %v7593_v60 = vpop.f32.mrb[135].mxu0  ;;  %v7655_v1 = vmul.f32 0.70710677, %v14344_v51  ;;  %v14357_v22 = vadd.f32 %v7591_v36, %v14273_v41  ;;  %v7770_v26 = vpack.c.bf16 %v7746_v30, %v7742_v48 }
0x15a7   :  { %v11824_v56 = vpop.eup %11823  ;;  %v7748_v44 = vmul.f32 %v7716_v20, %v7620_v23  ;;  %v7657_v43 = vmul.f32 0.70710677, %v14347_v63  ;;  %11825 = verf.f32 %v7654_v27  ;;  %v14360_v39 = vadd.f32 %v7520_v18, %v14277_v0 }
0x15a8   :  { %v7747_v19 = vmul.f32 %v7715_v6, %v7619_v9  ;;  %v7717_v10 = vadd.f32 1.0, %v11824_v56  ;;  %11827 = verf.f32 %v7656_v31  ;;  %v14363_v5 = vadd.f32 %v7593_v60, %v14281_v33 }
0x15a9   :  { %11829 = verf.f32 %v7655_v1  ;;  %v7658_v53 = vmul.f32 0.70710677, %v7519_v17  ;;  %v7660_v4 = vmul.f32 0.70710677, %v14357_v22  ;;  %v7659_v61 = vmul.f32 0.70710677, %v14360_v39 }
0x15aa   :  { %v7749_v25 = vmul.f32 %v7717_v10, %v7621_v32  ;;  %v7771_v28 = vpack.c.bf16 %v7747_v19, %v7743_v42  ;;  %v7524_v14 = vpop.f32.mrb[144].mxu1  ;;  %v7597_v62 = vpop.f32.mrb[136].mxu0  ;;  %11831 = verf.f32 %v7657_v43  ;;  %v7661_v38 = vmul.f32 0.70710677, %v14363_v5 }
0x15ab   :  { %11833 = verf.f32 %v7658_v53  ;;  %v7772_v15 = vpack.c.bf16 %v7748_v44, %v7744_v57  ;;  %v7526_v37 = vpop.f32.mrb[145].mxu1  ;;  %v7599_v45 = vpop.f32.mrb[137].mxu0  ;;  %v14369_v24 = vadd.f32 %v7524_v14, %v14269_v58  ;;  %v14372_v29 = vadd.f32 %v7597_v62, %v14273_v41 }
0x15ac   :  { %8079 = vmatprep.mubr.bf16.mxu1 %v7771_v28  ;;  %v7773_v35 = vpack.c.bf16 %v7749_v25, %v7745_v34  ;;  %11835 = verf.f32 %v7660_v4  ;;  %v14375_v55 = vadd.f32 %v7526_v37, %v14277_v0  ;;  %v7528_v52 = vpop.f32.mrb[146].mxu1  ;;  %v7601_v50 = vpop.f32.mrb[138].mxu0  ;;  %v14378_v23 = vadd.f32 %v7599_v45, %v14281_v33 }
0x15ad   :  { %11837 = verf.f32 %v7659_v61  ;;  %8080 = vmatmul.mubr.bf16.gmra.mrb[152].mxu1 %v7770_v26  ;;  %v14381_v11 = vadd.f32 %v7528_v52, %v14269_v58  ;;  %v7530_v36 = vpop.f32.mrb[147].mxu1  ;;  %v7603_v49 = vpop.f32.mrb[139].mxu0  ;;  %v7662_v20 = vmul.f32 0.70710677, %v14369_v24  ;;  %v14385_v9 = vadd.f32 %v7601_v50, %v14273_v41 }
0x15ae   :  { %8144 = vmatprep.mubr.bf16.mxu0 %v7773_v35  ;;  %11839 = verf.f32 %v7661_v38  ;;  %v7664_v32 = vmul.f32 0.70710677, %v14372_v29  ;;  %v7663_v27 = vmul.f32 0.70710677, %v14375_v55  ;;  %v7665_v18 = vmul.f32 0.70710677, %v14378_v23 }
0x15af   :  { %8145 = vmatmul.mubr.bf16.gmra.mrb[144].mxu0 %v7772_v15  ;;  %11841 = verf.f32 %v7662_v20  ;;  %v7666_v58 = vmul.f32 0.70710677, %v14381_v11  ;;  %v7622_v6 = vmul.f32 0.5, %v14337_v13  ;;  %v7668_v31 = vmul.f32 0.70710677, %v14385_v9 }
0x15b0   :  { %11843 = verf.f32 %v7664_v32  ;;  %v7624_v41 = vmul.f32 0.5, %v14340_v8  ;;  %v7623_v56 = vmul.f32 0.5, %v14344_v51  ;;  %v14396_v42 = vadd.f32 %v7530_v36, %v14277_v0 }
0x15b1   :  { %v11826_v48 = vpop.eup %11825  ;;  %11845 = verf.f32 %v7663_v27  ;;  %v7625_v1 = vmul.f32 0.5, %v14347_v63  ;;  %v7604_v44 = vadd.f32 %v7603_v49, %v14281_v33  ;;  %v7626_v10 = vmul.f32 0.5, %v7519_v17 }
0x15b2   :  { %v11828_v57 = vpop.eup %11827  ;;  %11847 = verf.f32 %v7665_v18  ;;  %v7718_v30 = vadd.f32 1.0, %v11826_v48  ;;  %v7667_v43 = vmul.f32 0.70710677, %v14396_v42  ;;  %v7628_v28 = vmul.f32 0.5, %v14357_v22 }
0x15b3   :  { %v11830_v60 = vpop.eup %11829  ;;  %11849 = verf.f32 %v7666_v58  ;;  %v7720_v19 = vadd.f32 1.0, %v11828_v57  ;;  %v7669_v0 = vmul.f32 0.70710677, %v7604_v44  ;;  %v7627_v63 = vmul.f32 0.5, %v14360_v39 }
0x15b4   :  { %v11832_v16 = vpop.eup %11831  ;;  %11851 = verf.f32 %v7668_v31  ;;  %v7719_v25 = vadd.f32 1.0, %v11830_v60  ;;  %v7750_v33 = vmul.f32 %v7718_v30, %v7622_v6  ;;  %v7629_v35 = vmul.f32 0.5, %v14363_v5 }
0x15b5   :  { %v11834_v13 = vpop.eup %11833  ;;  %v7721_v62 = vadd.f32 1.0, %v11832_v16  ;;  %11853 = verf.f32 %v7667_v43  ;;  %v7752_v17 = vmul.f32 %v7720_v19, %v7624_v41  ;;  %v7630_v5 = vmul.f32 0.5, %v14369_v24 }
0x15b6   :  { %v11836_v8 = vpop.eup %11835  ;;  %v7722_v51 = vadd.f32 1.0, %v11834_v13  ;;  %11855 = verf.f32 %v7669_v0  ;;  %v7751_v37 = vmul.f32 %v7719_v25, %v7623_v56  ;;  %v7634_v6 = vmul.f32 0.5, %v14381_v11 }
0x15b7   :  { %v11838_v14 = vpop.eup %11837  ;;  %v7724_v34 = vadd.f32 1.0, %v11836_v8  ;;  %v7753_v50 = vmul.f32 %v7721_v62, %v7625_v1  ;;  %v7632_v60 = vmul.f32 0.5, %v14372_v29  ;;  %v7636_v56 = vmul.f32 0.5, %v14385_v9 }
0x15b8   :  { %v11840_v53 = vpop.eup %11839  ;;  %v7754_v4 = vmul.f32 %v7722_v51, %v7626_v10  ;;  %v7723_v61 = vadd.f32 1.0, %v11838_v14  ;;  %v7631_v13 = vmul.f32 0.5, %v14375_v55  ;;  %v7635_v11 = vmul.f32 0.5, %v14396_v42 }
0x15b9   :  { %v7756_v38 = vmul.f32 %v7724_v34, %v7628_v28  ;;  %v7725_v26 = vadd.f32 1.0, %v11840_v53  ;;  %v11842_v15 = vpop.eup %11841  ;;  %v7633_v51 = vmul.f32 0.5, %v14378_v23  ;;  %v7637_v29 = vmul.f32 0.5, %v7604_v44 }
0x15ba   :  { %v7755_v22 = vmul.f32 %v7723_v61, %v7627_v63  ;;  %v7774_v45 = vpack.c.bf16 %v7754_v4, %v7750_v33  ;;  %v11844_v52 = vpop.eup %11843  ;;  %v7726_v27 = vadd.f32 1.0, %v11842_v15 }
0x15bb   :  { %v7757_v36 = vmul.f32 %v7725_v26, %v7629_v35  ;;  %v7776_v49 = vpack.c.bf16 %v7756_v38, %v7752_v17  ;;  %v11846_v39 = vpop.eup %11845  ;;  %v7728_v58 = vadd.f32 1.0, %v11844_v52 }
0x15bc   :  { %v7775_v20 = vpack.c.bf16 %v7755_v22, %v7751_v37  ;;  %v11848_v32 = vpop.eup %11847  ;;  %v7727_v41 = vadd.f32 1.0, %v11846_v39  ;;  %v7758_v1 = vmul.f32 %v7726_v27, %v7630_v5 }
0x15bd   :  { %v7777_v18 = vpack.c.bf16 %v7757_v36, %v7753_v50  ;;  %v11850_v48 = vpop.eup %11849  ;;  %v7729_v19 = vadd.f32 1.0, %v11848_v32  ;;  %v7760_v24 = vmul.f32 %v7728_v58, %v7632_v60 }
0x15be   :  { %8087 = vmatprep.mubr.bf16.mxu1 %v7775_v20  ;;  %v11852_v57 = vpop.eup %11851  ;;  %v7730_v31 = vadd.f32 1.0, %v11850_v48  ;;  %v7759_v9 = vmul.f32 %v7727_v41, %v7631_v13 }
0x15bf   :  { %8152 = vmatprep.mubr.bf16.mxu0 %v7777_v18  ;;  %8088 = vmatmul.mubr.bf16.gmra.mrb[156].mxu1 %v7774_v45  ;;  %v7732_v16 = vadd.f32 1.0, %v11852_v57  ;;  %v11854_v30 = vpop.eup %11853  ;;  %v7761_v34 = vmul.f32 %v7729_v19, %v7633_v51  ;;  %v14411_v45 = vld [vmem:[#allocation5 + $0x15] ss:$0 sm:$0xff] }
0x15c0   :  { %8153 = vmatmul.mubr.bf16.gmra.mrb[148].mxu0 %v7776_v49  ;;  %v7762_v10 = vmul.f32 %v7730_v31, %v7634_v6  ;;  %v11856_v43 = vpop.eup %11855  ;;  %v7731_v25 = vadd.f32 1.0, %v11854_v30 }
0x15c1   :  { %v7764_v8 = vmul.f32 %v7732_v16, %v7636_v56  ;;  %v7733_v28 = vadd.f32 1.0, %v11856_v43 }
0x15c2   :  { %v7778_v0 = vpack.c.bf16 %v7762_v10, %v7758_v1  ;;  %v7763_v14 = vmul.f32 %v7731_v25, %v7635_v11 }
0x15c3   :  { %v7780_v62 = vpack.c.bf16 %v7764_v8, %v7760_v24  ;;  %v7765_v63 = vmul.f32 %v7733_v28, %v7637_v29 }
0x15c4   :  { %v7779_v53 = vpack.c.bf16 %v7763_v14, %v7759_v9 }
0x15c5   :  { %v7781_v55 = vpack.c.bf16 %v7765_v63, %v7761_v34 }
0x15c6   :  { %8095 = vmatprep.mubr.bf16.mxu1 %v7779_v53 }
0x15c7   :  { %8160 = vmatprep.mubr.bf16.mxu0 %v7781_v55  ;;  %8096 = vmatmul.mubr.bf16.gmra.mrb[160].mxu1 %v7778_v0 }
0x15c8   :  { %8161 = vmatmul.mubr.bf16.gmra.mrb[152].mxu0 %v7780_v62 }
0x1676   :  { %v9649_v33 = vpop.f32.mrb[148].mxu1 }
0x1677   :  { %v9689_v4 = vpop.f32.mrb[140].mxu0  ;;  %v9650_v42 = vpop.f32.mrb[149].mxu1 }
0x1678   :  { %v9651_v61 = vadd.f32 %v9650_v42, %v9649_v33  ;;  %v9690_v17 = vpop.f32.mrb[141].mxu0  ;;  %v9652_v23 = vpop.f32.mrb[150].mxu1 }
0x1679   :  { %v9691_v44 = vadd.f32 %v9690_v17, %v9689_v4  ;;  %v9692_v38 = vpop.f32.mrb[142].mxu0  ;;  %v9653_v35 = vpop.f32.mrb[151].mxu1 }
0x167a   :  { %v9654_v26 = vadd.f32 %v9653_v35, %v9652_v23  ;;  %v9693_v15 = vpop.f32.mrb[143].mxu0 }
0x167b   :  { %v8139_v37 = vadd.f32 %v9691_v44, %v9651_v61  ;;  %v9694_v22 = vadd.f32 %v9693_v15, %v9692_v38 }
0x167d   :  { %v8169_v52 = vadd.f32 %v8139_v37, %v14160_v21  ;;  %v8142_v50 = vadd.f32 %v9694_v22, %v9654_v26 }
0x167f   :  { %v8170_v36 = vadd.f32 %v8142_v50, %v14163_v54  ;;  %v14416_v49 = vadd.f32 %v14411_v45, %v8169_v52 }
0x1680   :  { %v9655_v39 = vpop.f32.mrb[152].mxu1 }
0x1681   :  { %8192 = vadd.xlane.f32.xlu1 %v14416_v49  ;;  %v14420_v20 = vadd.f32 %v14411_v45, %v8170_v36  ;;  %v9656_v27 = vpop.f32.mrb[153].mxu1 }
0x1682   :  { %v9695_v32 = vpop.f32.mrb[144].mxu0  ;;  %v9657_v18 = vadd.f32 %v9656_v27, %v9655_v39  ;;  %v9658_v58 = vpop.f32.mrb[154].mxu1 }
0x1683   :  { %v9696_v48 = vpop.f32.mrb[145].mxu0  ;;  %8194 = vadd.xlane.f32.xlu0 %v14420_v20  ;;  %v9659_v5 = vpop.f32.mrb[155].mxu1 }
0x1684   :  { %v9697_v21 = vadd.f32 %v9696_v48, %v9695_v32  ;;  %v9698_v57 = vpop.f32.mrb[146].mxu0  ;;  %v9660_v54 = vadd.f32 %v9659_v5, %v9658_v58 }
0x1685   :  { %v9699_v6 = vpop.f32.mrb[147].mxu0 }
0x1686   :  { %v8147_v31 = vadd.f32 %v9697_v21, %v9657_v18  ;;  %v9700_v60 = vadd.f32 %v9699_v6, %v9698_v57 }
0x1688   :  { %v8171_v41 = vadd.f32 %v8147_v31, %v14167_v40  ;;  %v8150_v56 = vadd.f32 %v9700_v60, %v9660_v54 }
0x168a   :  { %v8172_v16 = vadd.f32 %v8150_v56, %v14172_v46  ;;  %v8184_v30 = vadd.f32 %v14411_v45, %v8171_v41 }
0x168c   :  { %8196 = vadd.xlane.f32.xlu1 %v8184_v30  ;;  %v8185_v1 = vadd.f32 %v14411_v45, %v8172_v16 }
0x168e   :  { %8198 = vadd.xlane.f32.xlu0 %v8185_v1 }
0x1692   :  { %v9661_v13 = vpop.f32.mrb[156].mxu1 }
0x1693   :  { %v9701_v19 = vpop.f32.mrb[148].mxu0  ;;  %v9662_v10 = vpop.f32.mrb[157].mxu1 }
0x1694   :  { %v9663_v43 = vadd.f32 %v9662_v10, %v9661_v13  ;;  %v9702_v24 = vpop.f32.mrb[149].mxu0  ;;  %v9664_v8 = vpop.f32.mrb[158].mxu1 }
0x1695   :  { %v9703_v11 = vadd.f32 %v9702_v24, %v9701_v19  ;;  %v9704_v25 = vpop.f32.mrb[150].mxu0  ;;  %v9665_v51 = vpop.f32.mrb[159].mxu1 }
0x1696   :  { %v9666_v29 = vadd.f32 %v9665_v51, %v9664_v8  ;;  %v9705_v40 = vpop.f32.mrb[151].mxu0 }
0x1697   :  { %v8155_v28 = vadd.f32 %v9703_v11, %v9663_v43  ;;  %v9706_v0 = vadd.f32 %v9705_v40, %v9704_v25 }
0x1699   :  { %v8173_v46 = vadd.f32 %v8155_v28, %v14176_v12  ;;  %v8158_v9 = vadd.f32 %v9706_v0, %v9666_v29 }
0x169a   :  { %v9667_v34 = vpop.f32.mrb[160].mxu1 }
0x169b   :  { %v8174_v14 = vadd.f32 %v8158_v9, %v14179_v7  ;;  %v8186_v62 = vadd.f32 %v14411_v45, %v8173_v46  ;;  %v9707_v63 = vpop.f32.mrb[152].mxu0  ;;  %v9668_v53 = vpop.f32.mrb[161].mxu1 }
0x169c   :  { %v9669_v33 = vadd.f32 %v9668_v53, %v9667_v34  ;;  %v9708_v4 = vpop.f32.mrb[153].mxu0  ;;  %v9670_v42 = vpop.f32.mrb[162].mxu1 }
0x169d   :  { %8200 = vadd.xlane.f32.xlu1 %v8186_v62  ;;  %v8187_v55 = vadd.f32 %v14411_v45, %v8174_v14  ;;  %v9709_v61 = vadd.f32 %v9708_v4, %v9707_v63  ;;  %v9710_v17 = vpop.f32.mrb[154].mxu0  ;;  %v9671_v23 = vpop.f32.mrb[163].mxu1  ;;  %v9239_v63 = vld [vmem:[#allocation5 + $0x16] ss:$0 sm:$0xff]  ;;  %v9240_v4 = vld [vmem:[#allocation5 + $0x17] ss:$0 sm:$0xff] }
0x169e   :  { %v9672_v44 = vadd.f32 %v9671_v23, %v9670_v42  ;;  %v9711_v12 = vpop.f32.mrb[155].mxu0 }
0x169f   :  { %8202 = vadd.xlane.f32.xlu0 %v8187_v55  ;;  %v8163_v38 = vadd.f32 %v9709_v61, %v9669_v33  ;;  %v9712_v35 = vadd.f32 %v9711_v12, %v9710_v17 }
0x16a1   :  { %v8175_v7 = vadd.f32 %v8163_v38, %v14183_v47  ;;  %v8166_v26 = vadd.f32 %v9712_v35, %v9672_v44 }
0x16a3   :  { %v8176_v15 = vadd.f32 %v8166_v26, %v14187_v3  ;;  %v8188_v37 = vadd.f32 %v14411_v45, %v8175_v7 }
0x16a5   :  { %8204 = vadd.xlane.f32.xlu1 %v8188_v37  ;;  %v8189_v22 = vadd.f32 %v14411_v45, %v8176_v15 }
0x16a7   :  { %8206 = vadd.xlane.f32.xlu0 %v8189_v22 }
0x170e   :  { %v8193_v52 = vpop.xlane.xlu1 %8192 }
0x170f   :  { %v8208_v50 = vmul.f32 0.0078125, %v8193_v52 }
0x1710   :  { %v8195_v36 = vpop.xlane.xlu0 %8194 }
0x1711   :  { %v8216_v39 = vsub.f32 %v14416_v49, %v8208_v50  ;;  %v8209_v32 = vmul.f32 0.0078125, %v8195_v36 }
0x1713   :  { %v8217_v27 = vsub.f32 %v14420_v20, %v8209_v32  ;;  %v8224_v18 = vmul.f32 %v8216_v39, %v8216_v39 }
0x1715   :  { %8232 = vadd.xlane.f32.xlu1 %v8224_v18  ;;  %v8225_v47 = vmul.f32 %v8217_v27, %v8217_v27 }
0x1717   :  { %8234 = vadd.xlane.f32.xlu0 %v8225_v47 }
0x1719   :  { %v8197_v48 = vpop.xlane.xlu1 %8196 }
0x171a   :  { %v8210_v3 = vmul.f32 0.0078125, %v8197_v48 }
0x171b   :  { %v8199_v58 = vpop.xlane.xlu0 %8198 }
0x171c   :  { %v8218_v21 = vsub.f32 %v8184_v30, %v8210_v3  ;;  %v8211_v57 = vmul.f32 0.0078125, %v8199_v58 }
0x171e   :  { %v8219_v5 = vsub.f32 %v8185_v1, %v8211_v57  ;;  %v8226_v45 = vmul.f32 %v8218_v21, %v8218_v21 }
0x1720   :  { %8236 = vadd.xlane.f32.xlu1 %v8226_v45  ;;  %v8227_v54 = vmul.f32 %v8219_v5, %v8219_v5 }
0x1722   :  { %8238 = vadd.xlane.f32.xlu0 %v8227_v54 }
0x172a   :  { %v8201_v6 = vpop.xlane.xlu1 %8200 }
0x172b   :  { %v8212_v31 = vmul.f32 0.0078125, %v8201_v6 }
0x172c   :  { %v8203_v49 = vpop.xlane.xlu0 %8202 }
0x172d   :  { %v14437_v60 = vsub.f32 %v8186_v62, %v8212_v31  ;;  %v8213_v20 = vmul.f32 0.0078125, %v8203_v49 }
0x172f   :  { %v14439_v41 = vsub.f32 %v8187_v55, %v8213_v20  ;;  %v8228_v56 = vmul.f32 %v14437_v60, %v14437_v60 }
0x1731   :  { %8240 = vadd.xlane.f32.xlu1 %v8228_v56  ;;  %v8229_v16 = vmul.f32 %v14439_v41, %v14439_v41 }
0x1732   :  { %v8205_v30 = vpop.xlane.xlu1 %8204 }
0x1733   :  { %8242 = vadd.xlane.f32.xlu0 %v8229_v16  ;;  %v8214_v1 = vmul.f32 0.0078125, %v8205_v30 }
0x1734   :  { %v8207_v13 = vpop.xlane.xlu0 %8206 }
0x1735   :  { %v14445_v19 = vsub.f32 %v8188_v37, %v8214_v1  ;;  %v8215_v10 = vmul.f32 0.0078125, %v8207_v13 }
0x1737   :  { %v14447_v43 = vsub.f32 %v8189_v22, %v8215_v10  ;;  %v8230_v24 = vmul.f32 %v14445_v19, %v14445_v19 }
0x1739   :  { %8244 = vadd.xlane.f32.xlu1 %v8230_v24  ;;  %v8231_v8 = vmul.f32 %v14447_v43, %v14447_v43  ;;  %v8424_v24 = vld [vmem:[%s14639_s9] sm:$0xff] }
0x173b   :  { %8246 = vadd.xlane.f32.xlu0 %v8231_v8 }
0x17a2   :  { %v8233_v11 = vpop.xlane.xlu1 %8232 }
0x17a3   :  { %v8248_v25 = vmul.f32 0.0078125, %v8233_v11  ;;  %v12082_v11 = vmov 0.0|0.0  }
0x17a4   :  { %v8235_v51 = vpop.xlane.xlu0 %8234  ;;  %10709 = vmatprep.subr.bf16.mxu1 %v12082_v11  ;;  %10733 = vmatprep.subr.bf16.mxu0 %v12082_v11 }
0x17a5   :  { %v8256_v29 = vadd.f32 1e-05, %v8248_v25  ;;  %v8249_v40 = vmul.f32 0.0078125, %v8235_v51  ;;  %v8427_v25 = vld [vmem:[%s14639_s9 + $0x18] sm:$0xff] }
0x17a7   :  { %11857 = vrsqrt.f32 %v8256_v29  ;;  %v8257_v28 = vadd.f32 1e-05, %v8249_v40  ;;  %v8428_v29 = vld [vmem:[%s14639_s9 + $0x20] sm:$0xff]  ;;  %v8429_v40 = vld [vmem:[%s14639_s9 + $0x28] sm:$0xff] }
0x17a9   :  { %11859 = vrsqrt.f32 %v8257_v28  ;;  %v10716_v28 = vpack.c.bf16 %v8429_v40, %v8428_v29 }
0x17ad   :  { %v8237_v0 = vpop.xlane.xlu1 %8236 }
0x17ae   :  { %v8250_v46 = vmul.f32 0.0078125, %v8237_v0  ;;  %v8430_v0 = vld [vmem:[%s14639_s9 + $0x30] sm:$0xff] }
0x17af   :  { %v8239_v9 = vpop.xlane.xlu0 %8238 }
0x17b0   :  { %v8258_v14 = vadd.f32 1e-05, %v8250_v46  ;;  %v8251_v62 = vmul.f32 0.0078125, %v8239_v9  ;;  %v8431_v46 = vld [vmem:[%s14639_s9 + $0x38] sm:$0xff] }
0x17b1   :  { %v11858_v34 = vpop.eup %11857  ;;  %v10719_v9 = vpack.c.bf16 %v8431_v46, %v8430_v0 }
0x17b2   :  { %11861 = vrsqrt.f32 %v8258_v14  ;;  %v8259_v53 = vadd.f32 1e-05, %v8251_v62  ;;  %v8272_v55 = vmul.f32 %v11858_v34, %v8216_v39  ;;  %v12084_v14 = vmov 0.0   ;;  %v8432_v62 = vld [vmem:[%s14639_s9 + $0x40] sm:$0xff]  ;;  %v8433_v34 = vld [vmem:[%s14639_s9 + $0x48] sm:$0xff] }
0x17b3   :  { %v11860_v33 = vpop.eup %11859  ;;  %10332 = vmatprep.mubr.msk.f32.mxu1 %vm12083_vm4, %v12084_v14  ;;  %10367 = vmatprep.mubr.msk.f32.mxu0 %vm12083_vm4, %v12084_v14 }
0x17b4   :  { %11863 = vrsqrt.f32 %v8259_v53  ;;  %v8284_v42 = vmul.f32 %v9239_v63, %v8272_v55  ;;  %v8273_v61 = vmul.f32 %v11860_v33, %v8217_v27  ;;  %v8434_v53 = vld [vmem:[%s14639_s9 + $0x50] sm:$0xff]  ;;  %v8435_v55 = vld [vmem:[%s14639_s9 + $0x58] sm:$0xff] }
0x17b5   :  { %v10725_v33 = vpack.c.bf16 %v8435_v55, %v8434_v53 }
0x17b6   :  { %v14453_v17 = vadd.f32 %v9240_v4, %v8284_v42  ;;  %v8285_v23 = vmul.f32 %v9239_v63, %v8273_v61  ;;  %v8437_v42 = vld [vmem:[%s14639_s9 + $0x68] sm:$0xff] }
0x17b8   :  { %8304 = vadd.xlane.f32.xlu1 %v14453_v17  ;;  %v14456_v44 = vadd.f32 %v9240_v4, %v8285_v23  ;;  %v8438_v23 = vld [vmem:[%s14639_s9 + $0x70] sm:$0xff] }
0x17ba   :  { %8306 = vadd.xlane.f32.xlu0 %v14456_v44 }
0x17bc   :  { %v11862_v12 = vpop.eup %11861 }
0x17bd   :  { %v8274_v38 = vmul.f32 %v11862_v12, %v8218_v21  ;;  %v8439_v12 = vld [vmem:[%s14639_s9 + $0x78] sm:$0xff] }
0x17be   :  { %v11864_v35 = vpop.eup %11863  ;;  %v8241_v7 = vpop.xlane.xlu1 %8240 }
0x17bf   :  { %v8286_v26 = vmul.f32 %v9239_v63, %v8274_v38  ;;  %v8275_v15 = vmul.f32 %v11864_v35, %v8219_v5  ;;  %v8252_v37 = vmul.f32 0.0078125, %v8241_v7  ;;  %v10731_v38 = vpack.c.bf16 %v8439_v12, %v8438_v23 }
0x17c0   :  { %v8243_v22 = vpop.xlane.xlu0 %8242 }
0x17c1   :  { %v14459_v52 = vadd.f32 %v9240_v4, %v8286_v26  ;;  %v8287_v50 = vmul.f32 %v9239_v63, %v8275_v15  ;;  %v8260_v36 = vadd.f32 1e-05, %v8252_v37  ;;  %v8253_v39 = vmul.f32 0.0078125, %v8243_v22 }
0x17c3   :  { %8308 = vadd.xlane.f32.xlu1 %v14459_v52  ;;  %v14462_v32 = vadd.f32 %v9240_v4, %v8287_v50  ;;  %11865 = vrsqrt.f32 %v8260_v36  ;;  %v8261_v27 = vadd.f32 1e-05, %v8253_v39 }
0x17c5   :  { %8310 = vadd.xlane.f32.xlu0 %v14462_v32  ;;  %11867 = vrsqrt.f32 %v8261_v27 }
0x17c6   :  { %v8245_v18 = vpop.xlane.xlu1 %8244 }
0x17c7   :  { %v8254_v47 = vmul.f32 0.0078125, %v8245_v18 }
0x17c8   :  { %v8247_v48 = vpop.xlane.xlu0 %8246 }
0x17c9   :  { %v8262_v3 = vadd.f32 1e-05, %v8254_v47  ;;  %v8255_v58 = vmul.f32 0.0078125, %v8247_v48 }
0x17cb   :  { %11869 = vrsqrt.f32 %v8262_v3  ;;  %v8263_v57 = vadd.f32 1e-05, %v8255_v58 }
0x17cd   :  { %v11866_v21 = vpop.eup %11865  ;;  %11871 = vrsqrt.f32 %v8263_v57 }
0x17ce   :  { %v8276_v5 = vmul.f32 %v11866_v21, %v14437_v60 }
0x17cf   :  { %v11868_v45 = vpop.eup %11867 }
0x17d0   :  { %v8288_v54 = vmul.f32 %v9239_v63, %v8276_v5  ;;  %v8277_v6 = vmul.f32 %v11868_v45, %v14439_v41 }
0x17d2   :  { %v14467_v31 = vadd.f32 %v9240_v4, %v8288_v54  ;;  %v8289_v49 = vmul.f32 %v9239_v63, %v8277_v6 }
0x17d4   :  { %8312 = vadd.xlane.f32.xlu1 %v14467_v31  ;;  %v14470_v20 = vadd.f32 %v9240_v4, %v8289_v49 }
0x17d5   :  { %v11870_v56 = vpop.eup %11869 }
0x17d6   :  { %8314 = vadd.xlane.f32.xlu0 %v14470_v20  ;;  %v8278_v16 = vmul.f32 %v11870_v56, %v14445_v19  ;;  %v8425_v19 = vld [vmem:[%s14639_s9 + $0x8] sm:$0xff] }
0x17d7   :  { %v11872_v30 = vpop.eup %11871  ;;  %v10710_v8 = vpack.c.bf16 %v8425_v19, %v8424_v24 }
0x17d8   :  { %v8290_v1 = vmul.f32 %v9239_v63, %v8278_v16  ;;  %v8279_v60 = vmul.f32 %v11872_v30, %v14447_v43  ;;  %v8426_v43 = vld [vmem:[%s14639_s9 + $0x10] sm:$0xff] }
0x17d9   :  { %10711 = vmatpush3.bf16.msra.mxu1 %v10710_v8  ;;  %v10713_v51 = vpack.c.bf16 %v8427_v25, %v8426_v43 }
0x17da   :  { %v14475_v13 = vadd.f32 %v9240_v4, %v8290_v1  ;;  %v8291_v10 = vmul.f32 %v9239_v63, %v8279_v60  ;;  %10712 = vmatprep.subr.bf16.mxu1 %v12082_v11  ;;  %v10722_v63 = vpack.c.bf16 %v8433_v34, %v8432_v62 }
0x17dc   :  { %8316 = vadd.xlane.f32.xlu1 %v14475_v13  ;;  %v14478_v41 = vadd.f32 %v9240_v4, %v8291_v10  ;;  %v8436_v4 = vld [vmem:[%s14639_s9 + $0x60] sm:$0xff] }
0x17dd   :  { %10714 = vmatpush3.bf16.msra.mxu1 %v10713_v51  ;;  %v10728_v61 = vpack.c.bf16 %v8437_v42, %v8436_v4 }
0x17de   :  { %8318 = vadd.xlane.f32.xlu0 %v14478_v41  ;;  %10715 = vmatprep.subr.bf16.mxu1 %v12082_v11 }
0x17e1   :  { %10717 = vmatpush3.bf16.msra.mxu1 %v10716_v28 }
0x17e2   :  { %10718 = vmatprep.subr.bf16.mxu1 %v12082_v11 }
0x17e5   :  { %10720 = vmatpush3.bf16.msra.mxu1 %v10719_v9 }
0x17e6   :  { %10721 = vmatprep.subr.bf16.mxu1 %v12082_v11 }
0x17e9   :  { %10723 = vmatpush3.bf16.msra.mxu1 %v10722_v63 }
0x17ea   :  { %10724 = vmatprep.subr.bf16.mxu1 %v12082_v11 }
0x17ed   :  { %10726 = vmatpush3.bf16.msra.mxu1 %v10725_v33 }
0x17ee   :  { %10727 = vmatprep.subr.bf16.mxu1 %v12082_v11 }
0x17f1   :  { %10729 = vmatpush3.bf16.msra.mxu1 %v10728_v61 }
0x17f2   :  { %10730 = vmatprep.subr.bf16.mxu1 %v12082_v11 }
0x17f5   :  { %10732 = vmatpush3.bf16.msra.mxu1 %v10731_v38 }
0x17f6   :  { %10757 = vmatprep.subr.bf16.mxu1 %v12082_v11 }
0x1845   :  { %v8305_v35 = vpop.xlane.xlu1 %8304 }
0x1846   :  { %v8320_v22 = vmul.f32 0.088388346, %v8305_v35 }
0x1847   :  { %v8307_v7 = vpop.xlane.xlu0 %8306 }
0x1848   :  { %v8321_v50 = vmul.f32 0.088388346, %v8307_v7 }
0x1850   :  { %v8309_v26 = vpop.xlane.xlu1 %8308 }
0x1851   :  { %v8322_v15 = vmul.f32 0.088388346, %v8309_v26 }
0x1852   :  { %v8311_v37 = vpop.xlane.xlu0 %8310 }
0x1853   :  { %v8323_v36 = vmul.f32 0.088388346, %v8311_v37  ;;  %v8328_v39 = vmax.f32 %v8320_v22, %v8322_v15 }
0x1855   :  { %v8329_v27 = vmax.f32 %v8321_v50, %v8323_v36 }
0x1857   :  { %v8330_v18 = vmax.f32 %v8328_v39, %v8329_v27 }
0x1859   :  { %v8331_v47 = vrot.slane %v8330_v18, 4 }
0x185b   :  { %v8332_v48 = vmax.f32 %v8330_v18, %v8331_v47 }
0x185d   :  { %v8333_v3 = vrot.slane %v8332_v48, 2 }
0x185f   :  { %v8334_v58 = vmax.f32 %v8332_v48, %v8333_v3 }
0x1861   :  { %v8335_v21 = vrot.slane %v8334_v58, 1  ;;  %v8313_v30 = vpop.xlane.xlu1 %8312 }
0x1862   :  { %v8324_v8 = vmul.f32 0.088388346, %v8313_v30 }
0x1863   :  { %v8336_v57 = vmax.f32 %v8334_v58, %v8335_v21  ;;  %v8315_v60 = vpop.xlane.xlu0 %8314 }
0x1864   :  { %v8325_v43 = vmul.f32 0.088388346, %v8315_v60 }
0x1865   :  { %v8346_v5 = vsub.f32 %v8320_v22, %v8336_v57  ;;  %v8347_v45 = vsub.f32 %v8321_v50, %v8336_v57  ;;  %v8348_v54 = vsub.f32 %v8322_v15, %v8336_v57  ;;  %v8349_v6 = vsub.f32 %v8323_v36, %v8336_v57 }
0x1867   :  { %v8354_v49 = vmul.f32 1.442695, %v8346_v5  ;;  %v8356_v56 = vmul.f32 1.442695, %v8347_v45  ;;  %v8358_v16 = vmul.f32 1.442695, %v8348_v54 }
0x1868   :  { %v8360_v1 = vmul.f32 1.442695, %v8349_v6 }
0x1869   :  { %11873 = vpow2.f32 %v8354_v49  ;;  %v8317_v10 = vpop.xlane.xlu1 %8316 }
0x186a   :  { %11875 = vpow2.f32 %v8356_v56  ;;  %v8326_v24 = vmul.f32 0.088388346, %v8317_v10 }
0x186b   :  { %11877 = vpow2.f32 %v8358_v16  ;;  %v8319_v19 = vpop.xlane.xlu0 %8318 }
0x186c   :  { %11879 = vpow2.f32 %v8360_v1  ;;  %v8327_v25 = vmul.f32 0.088388346, %v8319_v19  ;;  %v8337_v51 = vmax.f32 %v8324_v8, %v8326_v24 }
0x186e   :  { %v8338_v29 = vmax.f32 %v8325_v43, %v8327_v25 }
0x1870   :  { %v8339_v28 = vmax.f32 %v8337_v51, %v8338_v29 }
0x1872   :  { %v8340_v9 = vrot.slane %v8339_v28, 4 }
0x1873   :  { %v11874_v40 = vpop.eup %11873 }
0x1874   :  { %v11876_v0 = vpop.eup %11875  ;;  %v8341_v63 = vmax.f32 %v8339_v28, %v8340_v9 }
0x1875   :  { %v8370_v46 = vadd.f32 %v11876_v0, %v11874_v40  ;;  %v11878_v62 = vpop.eup %11877 }
0x1876   :  { %v11880_v53 = vpop.eup %11879  ;;  %v8342_v33 = vrot.slane %v8341_v63, 2 }
0x1877   :  { %v8371_v34 = vadd.f32 %v11878_v62, %v8370_v46 }
0x1878   :  { %v8343_v42 = vmax.f32 %v8341_v63, %v8342_v33 }
0x1879   :  { %v8372_v55 = vadd.f32 %v11880_v53, %v8371_v34 }
0x187a   :  { %v8344_v23 = vrot.slane %v8343_v42, 1 }
0x187b   :  { %v8373_v4 = vrot.slane %v8372_v55, 4 }
0x187c   :  { %v8345_v38 = vmax.f32 %v8343_v42, %v8344_v23 }
0x187d   :  { %v8374_v61 = vadd.f32 %v8373_v4, %v8372_v55 }
0x187e   :  { %v8350_v7 = vsub.f32 %v8324_v8, %v8345_v38  ;;  %v8351_v26 = vsub.f32 %v8325_v43, %v8345_v38  ;;  %v8352_v15 = vsub.f32 %v8326_v24, %v8345_v38  ;;  %v8353_v37 = vsub.f32 %v8327_v25, %v8345_v38 }
0x187f   :  { %v8375_v12 = vrot.slane %v8374_v61, 2 }
0x1880   :  { %v8362_v22 = vmul.f32 1.442695, %v8350_v7  ;;  %v8364_v50 = vmul.f32 1.442695, %v8351_v26  ;;  %v8366_v36 = vmul.f32 1.442695, %v8352_v15 }
0x1881   :  { %v8376_v35 = vadd.f32 %v8375_v12, %v8374_v61  ;;  %v8368_v27 = vmul.f32 1.442695, %v8353_v37 }
0x1882   :  { %11881 = vpow2.f32 %v8362_v22 }
0x1883   :  { %v8377_v39 = vrot.slane %v8376_v35, 1  ;;  %11883 = vpow2.f32 %v8364_v50 }
0x1884   :  { %11885 = vpow2.f32 %v8366_v36 }
0x1885   :  { %v8378_v18 = vadd.f32 %v8377_v39, %v8376_v35  ;;  %11887 = vpow2.f32 %v8368_v27 }
0x1887   :  { %11889 = vrcp.f32 %v8378_v18 }
0x188c   :  { %v11882_v47 = vpop.eup %11881 }
0x188d   :  { %v11884_v48 = vpop.eup %11883 }
0x188e   :  { %v8379_v3 = vadd.f32 %v11884_v48, %v11882_v47  ;;  %v11886_v58 = vpop.eup %11885 }
0x188f   :  { %v11888_v57 = vpop.eup %11887 }
0x1890   :  { %v8380_v21 = vadd.f32 %v11886_v58, %v8379_v3  ;;  %v8553_v3 = vld [vmem:[%s14640_s10 + $0x10] sm:$0xff] }
0x1891   :  { %v11890_v45 = vpop.eup %11889 }
0x1892   :  { %v8381_v5 = vadd.f32 %v11888_v57, %v8380_v21  ;;  %v8390_v49 = vmul.f32 %v11890_v45, %v11874_v40  ;;  %v8391_v56 = vmul.f32 %v11890_v45, %v11876_v0  ;;  %v8392_v24 = vmul.f32 %v11890_v45, %v11878_v62 }
0x1893   :  { %v8393_v43 = vmul.f32 %v11890_v45, %v11880_v53 }
0x1894   :  { %v8382_v54 = vrot.slane %v8381_v5, 4  ;;  %v8398_v1 = vmul.f32 %v8390_v49, %v14453_v17  ;;  %v8399_v60 = vmul.f32 %v8391_v56, %v14456_v44  ;;  %v8400_v25 = vmul.f32 %v8392_v24, %v14459_v52  ;;  %v8559_v56 = vld [vmem:[%s14640_s10 + $0x40] sm:$0xff] }
0x1895   :  { %v8401_v29 = vmul.f32 %v8393_v43, %v14462_v32  ;;  %v8563_v24 = vld [vmem:[%s14640_s10 + $0x60] sm:$0xff]  ;;  %v8565_v43 = vld [vmem:[%s14640_s10 + $0x70] sm:$0xff] }
0x1896   :  { %v8383_v6 = vadd.f32 %v8382_v54, %v8381_v5  ;;  %v8406_v8 = vadd.f32 %v8399_v60, %v8398_v1  ;;  %v8556_v5 = vld [vmem:[%s14640_s10 + $0x28] sm:$0xff]  ;;  %v8557_v54 = vld [vmem:[%s14640_s10 + $0x30] sm:$0xff]  ;;  %v8562_v60 = vld [vmem:[%s14640_s10 + $0x58] sm:$0xff] }
0x1897   :  { %v8561_v1 = vld [vmem:[%s14640_s10 + $0x50] sm:$0xff] }
0x1898   :  { %v8384_v16 = vrot.slane %v8383_v6, 2  ;;  %v8407_v51 = vadd.f32 %v8406_v8, %v8400_v25  ;;  %v8566_v25 = vld [vmem:[%s14640_s10 + $0x78] sm:$0xff] }
0x189a   :  { %v8385_v30 = vadd.f32 %v8384_v16, %v8383_v6  ;;  %v8408_v28 = vadd.f32 %v8407_v51, %v8401_v29  ;;  %v8558_v6 = vld [vmem:[%s14640_s10 + $0x38] sm:$0xff]  ;;  %v8560_v16 = vld [vmem:[%s14640_s10 + $0x48] sm:$0xff]  ;;  %v10755_v51 = vpack.c.bf16 %v8566_v25, %v8565_v43 }
0x189b   :  { %v10743_v49 = vpack.c.bf16 %v8558_v6, %v8557_v54 }
0x189c   :  { %v8386_v10 = vrot.slane %v8385_v30, 1  ;;  %v8409_v34 = vrot.slane %v8408_v28, 4 }
0x189e   :  { %v8387_v19 = vadd.f32 %v8386_v10, %v8385_v30  ;;  %v8410_v55 = vadd.f32 %v8409_v34, %v8408_v28  ;;  %v10746_v30 = vpack.c.bf16 %v8560_v16, %v8559_v56  ;;  %v10749_v10 = vpack.c.bf16 %v8562_v60, %v8561_v1  ;;  %v9243_v34 = vld [vmem:[#allocation5 + $0x1a] ss:$0 sm:$0xff]  ;;  %v9247_v1 = vld [vmem:[#allocation5 + $0x1e] ss:$0 sm:$0xff] }
0x18a0   :  { %11891 = vrcp.f32 %v8387_v19  ;;  %v8411_v4 = vrot.slane %v8410_v55, 2  ;;  %v8564_v19 = vld [vmem:[%s14640_s10 + $0x68] sm:$0xff] }
0x18a1   :  { %v10752_v8 = vpack.c.bf16 %v8564_v19, %v8563_v24 }
0x18a2   :  { %v8412_v61 = vadd.f32 %v8411_v4, %v8410_v55 }
0x18a4   :  { %v8413_v38 = vrot.slane %v8412_v61, 1 }
0x18aa   :  { %v11892_v40 = vpop.eup %11891 }
0x18ab   :  { %v8394_v0 = vmul.f32 %v11892_v40, %v11882_v47  ;;  %v8395_v46 = vmul.f32 %v11892_v40, %v11884_v48  ;;  %v8396_v9 = vmul.f32 %v11892_v40, %v11886_v58  ;;  %v8397_v17 = vmul.f32 %v11892_v40, %v11888_v57  ;;  %v8551_v47 = vld [vmem:[%s14640_s10] sm:$0xff]  ;;  %v8554_v58 = vld [vmem:[%s14640_s10 + $0x18] sm:$0xff] }
0x18ac   :  { %v10737_v21 = vpack.c.bf16 %v8554_v58, %v8553_v3  ;;  %v8555_v57 = vld [vmem:[%s14640_s10 + $0x20] sm:$0xff] }
0x18ad   :  { %v8402_v44 = vmul.f32 %v8394_v0, %v14467_v31  ;;  %v8403_v62 = vmul.f32 %v8395_v46, %v14470_v20  ;;  %v8404_v63 = vmul.f32 %v8396_v9, %v14475_v13  ;;  %v8405_v52 = vmul.f32 %v8397_v17, %v14478_v41  ;;  %v9241_v13 = vld [vmem:[#allocation5 + $0x18] ss:$0 sm:$0xff]  ;;  %v9242_v46 = vld [vmem:[#allocation5 + $0x19] ss:$0 sm:$0xff]  ;;  %v9245_v3 = vld [vmem:[#allocation5 + $0x1c] ss:$0 sm:$0xff] }
0x18ae   :  { %v8414_v31 = vadd.f32 %v8413_v38, %v8412_v61  ;;  %v10740_v45 = vpack.c.bf16 %v8556_v5, %v8555_v57 }
0x18af   :  { %v8415_v53 = vadd.f32 %v8403_v62, %v8402_v44 }
0x18b1   :  { %v8416_v33 = vadd.f32 %v8415_v53, %v8404_v63 }
0x18b3   :  { %v8417_v32 = vadd.f32 %v8416_v33, %v8405_v52  ;;  %v9244_v33 = vld [vmem:[#allocation5 + $0x1b] ss:$0 sm:$0xff] }
0x18b5   :  { %v8418_v42 = vrot.slane %v8417_v32, 4 }
0x18b7   :  { %v8419_v23 = vadd.f32 %v8418_v42, %v8417_v32 }
0x18b9   :  { %v8420_v12 = vrot.slane %v8419_v23, 2 }
0x18bb   :  { %v8421_v35 = vadd.f32 %v8420_v12, %v8419_v23 }
0x18bd   :  { %v8422_v7 = vrot.slane %v8421_v35, 1 }
0x18bf   :  { %v8423_v26 = vadd.f32 %v8422_v7, %v8421_v35 }
0x18c1   :  { %v8448_v20 = vsel %vm8447_vm5, %v8423_v26, %v8414_v31  ;;  %v8674_v31 = vld [vmem:[#allocation11] sm:$0xff]  ;;  %v8675_v26 = vld [vmem:[#allocation11 + $0x8] sm:$0xff] }
0x18c2   :  { %10333 = vmatmul.mubr.f32.vlgmr.msra.gmra.mrb[164].mxu1 %v8448_v20  ;;  %v8676_v20 = vld [vmem:[#allocation11 + $0x10] sm:$0xff] }
0x18c3   :  { %10386 = vmatprep.mubr.msk.f32.mxu1 %vm12083_vm4, %v12084_v14  ;;  %v8552_v14 = vld [vmem:[%s14640_s10 + $0x8] sm:$0xff]  ;;  %s12086_s10 = smov [#allocation13]  }
0x18c4   :  { %v10734_v48 = vpack.c.bf16 %v8552_v14, %v8551_v47  ;;  %s8801_s20 = sshll.u32 %s12086_s10, 4  ;;  %s8802_s20 = int_to_ptr.vmem [resolvable:$true] %s8801_s20 }
0x18c5   :  { %s12033_s2 = scalar_lea.vmem %s8802_s20, 256  ;;  %p12038_p7 = scmp.lt.s32.totalorder %s8802_s20, %s8802_s20 }
0x18c6   :  { %10735 = vmatpush3.bf16.msra.mxu0 %v10734_v48  ;;  %p12034_p6 = scmp.ne.s32.totalorder %s8802_s20, %s12033_s2  ;;  %p12039_p8 = scmp.lt.s32.totalorder %s12033_s2, %s12033_s2 }
0x18c7   :  { %10736 = vmatprep.subr.bf16.mxu0 %v12082_v11 }
0x18c8   :  { %p12040_p9 = por %p12039_p8, %p12038_p7 }
0x18ca   :  { %10738 = vmatpush3.bf16.msra.mxu0 %v10737_v21  ;;  %v9246_v21 = vld [vmem:[#allocation5 + $0x1d] ss:$0 sm:$0xff]  ;;  %p12041_p10 = pnand %p12040_p9, %p12034_p6 }
0x18cb   :  { %10739 = vmatprep.subr.bf16.mxu0 %v12082_v11 }
0x18ce   :  { %10741 = vmatpush3.bf16.msra.mxu0 %v10740_v45 }
0x18cf   :  { %10742 = vmatprep.subr.bf16.mxu0 %v12082_v11 }
0x18d2   :  { %10744 = vmatpush3.bf16.msra.mxu0 %v10743_v49 }
0x18d3   :  { %10745 = vmatprep.subr.bf16.mxu0 %v12082_v11 }
0x18d6   :  { %10747 = vmatpush3.bf16.msra.mxu0 %v10746_v30 }
0x18d7   :  { %10748 = vmatprep.subr.bf16.mxu0 %v12082_v11 }
0x18da   :  { %10750 = vmatpush3.bf16.msra.mxu0 %v10749_v10 }
0x18db   :  { %10751 = vmatprep.subr.bf16.mxu0 %v12082_v11 }
0x18de   :  { %10753 = vmatpush3.bf16.msra.mxu0 %v10752_v8 }
0x18df   :  { %10754 = vmatprep.subr.bf16.mxu0 %v12082_v11 }
0x18e2   :  { %10756 = vmatpush3.bf16.msra.mxu0 %v10755_v51 }
0x1995   :  { %v8516_v41 = vpop.f32.mrb[164].mxu1 }
0x1996   :  { %v8517_v15 = vadd.f32 %v9241_v13, %v8516_v41  ;;  %v10334_v37 = vpop.f32.mrb[165].mxu1  ;;  %v10758_v13 = vpack.c.bf16 %v8675_v26, %v8674_v31  ;;  %v8677_v41 = vld [vmem:[#allocation11 + $0x18] sm:$0xff] }
0x1997   :  { %v8678_v37 = vld [vmem:[#allocation11 + $0x20] sm:$0xff] }
0x1998   :  { %v8523_v22 = vsel %vm8522_vm6, %v8517_v15, 0.0  ;;  %10759 = vmatpush3.bf16.msra.mxu1 %v10758_v13 }
0x1999   :  { %8524 = vadd.xlane.f32.xlu1 %v8523_v22  ;;  %10760 = vmatprep.subr.bf16.mxu1 %v12082_v11  ;;  %v8679_v22 = vld [vmem:[#allocation11 + $0x28] sm:$0xff] }
0x1a26   :  { %v8525_v50 = vpop.xlane.xlu1 %8524 }
0x1a27   :  { %v8526_v36 = vmul.f32 0.0078125, %v8525_v50  ;;  %v10764_v50 = vpack.c.bf16 %v8679_v22, %v8678_v37 }
0x1a29   :  { %v8527_v39 = vsub.f32 %v8517_v15, %v8526_v36  ;;  %v10761_v15 = vpack.c.bf16 %v8677_v41, %v8676_v20  ;;  %v8680_v36 = vld [vmem:[#allocation11 + $0x30] sm:$0xff] }
0x1a2b   :  { %v8528_v27 = vmul.f32 %v8527_v39, %v8527_v39  ;;  %10762 = vmatpush3.bf16.msra.mxu1 %v10761_v15 }
0x1a2c   :  { %10763 = vmatprep.subr.bf16.mxu1 %v12082_v11 }
0x1a2d   :  { %v8529_v18 = vsel %vm8522_vm6, %v8528_v27, 0.0 }
0x1a2e   :  { %8530 = vadd.xlane.f32.xlu0 %v8529_v18 }
0x1a2f   :  { %10765 = vmatpush3.bf16.msra.mxu1 %v10764_v50 }
0x1a30   :  { %10766 = vmatprep.subr.bf16.mxu1 %v12082_v11  ;;  %v12085_v11 = vmov 1966171168  }
0x1a31   :  { %v8763_v16 = vunpack.c.l.s4 %v12085_v11 }
0x1a33   :  { %v8764_v30 = vunpack.c.0.s8 %v8763_v16 }
0x1a35   :  { %v8767_v24 = vsub.s32 %v8764_v30, %v14671_v2 }
0x1abb   :  { %v8531_v29 = vpop.xlane.xlu0 %8530 }
0x1abc   :  { %v8532_v28 = vmul.f32 0.0078125, %v8531_v29 }
0x1abe   :  { %v8533_v40 = vadd.f32 1e-05, %v8532_v28 }
0x1ac0   :  { %11893 = vrsqrt.f32 %v8533_v40 }
0x1aca   :  { %v11894_v0 = vpop.eup %11893 }
0x1acb   :  { %v8535_v9 = vmul.f32 %v11894_v0, %v8527_v39  ;;  %v8681_v39 = vld [vmem:[#allocation11 + $0x38] sm:$0xff] }
0x1acc   :  { %v10767_v27 = vpack.c.bf16 %v8681_v39, %v8680_v36 }
0x1acd   :  { %v8540_v17 = vmul.f32 %v9242_v46, %v8535_v9 }
0x1ace   :  { %10768 = vmatpush3.bf16.msra.mxu1 %v10767_v27 }
0x1acf   :  { %v8545_v44 = vadd.f32 %v9243_v34, %v8540_v17 }
0x1ad1   :  { %v8547_v62 = vmul.f32 0.70710677, %v8545_v44  ;;  %v8546_v55 = vmul.f32 0.5, %v8545_v44 }
0x1ad3   :  { %11895 = verf.f32 %v8547_v62 }
0x1add   :  { %v11896_v63 = vpop.eup %11895 }
0x1ade   :  { %v8549_v53 = vadd.f32 1.0, %v11896_v63 }
0x1ae0   :  { %v8550_v52 = vmul.f32 %v8549_v53, %v8546_v55 }
0x1ae2   :  { %10368 = vmatmul.mubr.f32.vlgmr.msra.gmra.mrb[156].mxu0 %v8550_v52 }
0x1bb5   :  { %v8638_v4 = vpop.f32.mrb[156].mxu0 }
0x1bb6   :  { %v8639_v32 = vadd.f32 %v9244_v33, %v8638_v4  ;;  %v10369_v42 = vpop.f32.mrb[157].mxu0 }
0x1bb8   :  { %v8645_v61 = vsel %vm8644_vm7, %v8639_v32, 0.0 }
0x1bb9   :  { %8646 = vadd.xlane.f32.xlu1 %v8645_v61 }
0x1c46   :  { %v8647_v23 = vpop.xlane.xlu1 %8646 }
0x1c47   :  { %v8649_v12 = vmul.f32 0.015625, %v8647_v23 }
0x1c49   :  { %v8650_v38 = vsub.f32 %v8639_v32, %v8649_v12 }
0x1c4b   :  { %v8651_v35 = vmul.f32 %v8650_v38, %v8650_v38 }
0x1c4d   :  { %v8652_v7 = vsel %vm8644_vm7, %v8651_v35, 0.0 }
0x1c4e   :  { %8653 = vadd.xlane.f32.xlu0 %v8652_v7 }
0x1cdb   :  { %v8654_v18 = vpop.xlane.xlu0 %8653 }
0x1cdc   :  { %v8655_v47 = vmul.f32 0.015625, %v8654_v18 }
0x1cde   :  { %v8656_v14 = vadd.f32 1e-05, %v8655_v47 }
0x1ce0   :  { %11897 = vrsqrt.f32 %v8656_v14 }
0x1cea   :  { %v11898_v48 = vpop.eup %11897 }
0x1ceb   :  { %v8658_v58 = vmul.f32 %v11898_v48, %v8650_v38 }
0x1ced   :  { %v8663_v57 = vmul.f32 %v9245_v3, %v8658_v58 }
0x1cef   :  { %v8668_v5 = vadd.f32 %v9246_v21, %v8663_v57 }
0x1cf1   :  { %v8670_v45 = vmul.f32 0.70710677, %v8668_v5  ;;  %v8669_v6 = vmul.f32 0.5, %v8668_v5 }
0x1cf3   :  { %11899 = verf.f32 %v8670_v45 }
0x1cfd   :  { %v11900_v54 = vpop.eup %11899 }
0x1cfe   :  { %v8672_v49 = vadd.f32 1.0, %v11900_v54 }
0x1d00   :  { %v8673_v56 = vmul.f32 %v8672_v49, %v8669_v6 }
0x1d02   :  { %10387 = vmatmul.mubr.msk.f32.vlgmr.msra.gmra.mrb[166].mxu1 %vm3042_vm2, %v8673_v56 }
0x1dd5   :  { %v8756_v60 = vpop.f32.mrb[166].mxu1 }
0x1dd6   :  { %v8757_v10 = vadd.f32 %v9247_v1, %v8756_v60  ;;  %v10388_v19 = vpop.f32.mrb[167].mxu1 }
0x1dd8   :  { %v8760_v8 = vmax.f32 %v8757_v10, 0.0 }
0x1dda   :  { %v8768_v43 = vrot.slane %v8760_v8, %v8767_v24 }
0x1ddc   :  { %v8769_v25 = vcombine.high %v8768_v43, %v8768_v43  ;;  %v8776_v51 = vrot.slane %v8768_v43, %v8767_v24 }
0x1dde   :  { %v8783_v29 = vrot.slane %v8769_v25, %v8767_v24  ;;  %v8787_v28 = vrot.slane %v8776_v51, %v14670_v59 }
0x1de0   :  { %v8791_v40 = vrot.slane %v8783_v29, %v14670_v59  ;;  %8794 = vst [vmem:[#allocation13] sm:$0xff] %v8787_v28 }
0x1de2   :  { %8795 = vst [vmem:[#allocation13 + $0x8] sm:$0xff] %v8791_v40 }
0x1de3   :  { %12044 = shalt.err (!%p12041_p10)
}
0x1de4   :  { %s12045_s23 = scalar_lea.hbm %s14642_s12, 256 }
0x1de5   :  { %p12046_p11 = scmp.ne.s32.totalorder %s14642_s12, %s12045_s23  ;;  %p12049_p12 = scmp.lt.u32.totalorder %s12045_s23, %s14642_s12 }
0x1de7   :  { %p12051_p13 = pnand %p12049_p12, %p12046_p11 }
0x1de9   :  { %12054 = shalt.err (!%p12051_p13)
}
0x1dea   :  { %8807 = dma.vmem_to_hbm [thread:$0]  %s8802_s20, 256, %s14642_s12, [#allocation4], %s12067_s15, %s12067_s15, %s12068_s16  }
0x1deb   :  { %12063 = dma.done.wait [#allocation4], 256  }
0x1dec   :  { %12064 = vsyncadd [#allocation4], 4294967040 }
0x1ded   :  { %8811 = vsyncpa [#allocation3], 1 }
0x1dee   :  { %8812 = vsyncpa [#allocation6], 1 }
0x1def   :  { %8813 = vsyncpa [#allocation9], 1 }
0x1df0   :  { %8814 = vsyncpa [#allocation12], 1 }
0x1df1   :  { %8815 = vsyncpa [#allocation4], 1 }

</bundles_post_ra>
